<compile_context>
chip_gen: v6e
topology: v6e:2x2x1
jax: 0.10.0
libtpu: 0.0.40
codegen_flags: <defaults>
</compile_context>

<pallas_src>
import jax
import jax.numpy as jnp
from jax import lax
from jax.experimental import pallas as pl
from jax.experimental.pallas import tpu as pltpu

# MXU operand dtype for the conv matmuls.  float32 preserves the reference
# numerics; set to jnp.bfloat16 on v6e/v7x for ~2x MXU throughput (the
# accumulation stays f32 via preferred_element_type either way).
_MXU_DTYPE = jnp.float32


# ----------------------------------------------------------------------------
# Fused Pallas kernel: 7-conv backbone + divin scaling + 8-step curve loop
# ----------------------------------------------------------------------------
def _build_fused_kernel(NB, H, W):
    HW = H * W
    L = NB * HW                       # lane extent of one grid step

    def kernel(divin_ref, x_ref, masks_ref,
               w1, b1, w2, b2, w3, b3, w4, b4,
               w5a, w5b, b5, w6a, w6b, b6, w7a, w7b, b7,
               e1_ref, e_ref, r_ref):
        f32 = jnp.float32

        def im2col(x):
            # x: (cin, L) channel-major / lane-dense.  Returns the (9*cin, L)
            # shifted-tap stack: spatial shifts go through pltpu.roll (XLU,
            # essentially free next to the MXU) and zero padding is applied
            # with precomputed per-tap masks, so a full 3x3 / pad-1 conv
            # collapses into a single K = 9*cin matmul.
            parts = []
            for ky in range(3):
                for kx in range(3):
                    k = ky * 3 + kx
                    off = (ky - 1) * W + (kx - 1)     # flat spatial offset
                    if off == 0:
                        parts.append(x)               # center tap, no mask
                    else:
                        s = pltpu.roll(x, (-off) % L, axis=1)
                        parts.append(s * masks_ref[k:k + 1, :])
            return jnp.concatenate(parts, axis=0)     # sublane-aligned pieces

        def mm(w_ref, stack):
            return jnp.dot(w_ref[...].astype(_MXU_DTYPE),
                           stack.astype(_MXU_DTYPE),
                           preferred_element_type=f32)

        def relu(v):
            return jnp.maximum(v, 0.0)

        x8 = x_ref[...]                    # (8, L)  input padded to 8 chans
        x_in = x8[0:3, :]                  # (3, L)  true RGB for curve loop

        # ------------------------- backbone ---------------------------------
        s_x = im2col(x8)                                   # (72, L)
        x1 = relu(mm(w1, s_x) + b1[...])                   # (32, L)
        s1 = im2col(x1)                                    # reused by e_conv7
        x2 = relu(mm(w2, s1) + b2[...])
        s2 = im2col(x2)                                    # reused by e_conv6
        x3 = relu(mm(w3, s2) + b3[...])
        s3 = im2col(x3)                                    # reused by e_conv5
        x4 = relu(mm(w4, s3) + b4[...])
        s4 = im2col(x4)
        # concat convs as split-K accumulation (no 64-channel concat)
        x5 = relu(mm(w5a, s3) + mm(w5b, s4) + b5[...])
        s5 = im2col(x5)
        x6 = relu(mm(w6a, s2) + mm(w6b, s5) + b6[...])
        s6 = im2col(x6)
        x_r = jnp.tanh(mm(w7a, s1) + mm(w7b, s6) + b7[...])   # (24, L)

        # ----------------- curve enhancement (whole block) ------------------
        b = pl.program_id(0)
        if NB == 1:
            d_vec = divin_ref[b, 0]                          # scalar broadcast
        else:
            lane = lax.broadcasted_iota(jnp.int32, (1, L), 1)
            d_vec = jnp.zeros((1, L), f32)
            for n in range(NB):
                dn = divin_ref[b * NB + n, 0]
                d_vec = jnp.where((lane >= n * HW) & (lane < (n + 1) * HW),
                                  dn, d_vec)
        xx = x_in * d_vec                                    # x = x * divin
        e1_val = xx
        for i in range(8):
            ri = x_r[3 * i:3 * i + 3, :]
            xx = xx + ri * (xx * xx - xx)
            if i == 3:
                e1_val = xx                                  # enhance_image_1

        for n in range(NB):
            lo = n * HW
            e1_ref[n, :, :] = e1_val[:, lo:lo + HW]
            e_ref[n, :, :] = xx[:, lo:lo + HW]
            r_ref[n, :, :] = x_r[:, lo:lo + HW]              # r == cat(r1..r8)

    return kernel


def fused_enhance(divin, x8, masks, wargs, N, H, W):
    """divin (N,1) SMEM table, x8 (8, N*HW), masks (9, N*HW), wargs weights."""
    HW = H * W
    # Two grid steps when the batch splits evenly (both v7x TensorCores get
    # work); otherwise one step with the whole batch lane-packed (best for the
    # single-TC v5e/v6e — the grid is a serial loop there).
    steps = 2 if (N % 2 == 0 and N >= 2 and ((N // 2) * HW) % 128 == 0) else 1
    NB = N // steps
    L = NB * HW
    # TODO(synk): for large images add a row-strip grid axis with a 1-row halo
    # and set vmem_limit_bytes explicitly (v7x only has 64 MiB of VMEM).

    kernel = _build_fused_kernel(NB, H, W)

    in_specs = [
        pl.BlockSpec((N, 1), lambda b: (0, 0),
                     memory_space=pltpu.MemorySpace.SMEM),    # divin scalars
        pl.BlockSpec((8, L), lambda b: (0, b)),               # padded input
        pl.BlockSpec((9, L), lambda b: (0, b)),               # tap masks
    ] + [pl.BlockSpec(w.shape, lambda b: (0, 0)) for w in wargs]

    out_shape = (jax.ShapeDtypeStruct((N, 3, HW), jnp.float32),
                 jax.ShapeDtypeStruct((N, 3, HW), jnp.float32),
                 jax.ShapeDtypeStruct((N, 24, HW), jnp.float32))
    out_specs = (pl.BlockSpec((NB, 3, HW), lambda b: (b, 0, 0)),
                 pl.BlockSpec((NB, 3, HW), lambda b: (b, 0, 0)),
                 pl.BlockSpec((NB, 24, HW), lambda b: (b, 0, 0)))

    return pl.pallas_call(
        kernel,
        out_shape=out_shape,
        grid=(steps,),
        in_specs=in_specs,
        out_specs=out_specs,
        compiler_params=pltpu.CompilerParams(
            dimension_semantics=("parallel",)),
    )(divin, x8, masks, *wargs)


# ----------------------------------------------------------------------------
# Glue: weight / mask preparation (trace-time, tiny)
# ----------------------------------------------------------------------------
def prep_weights(p):
    def w_flat(w):      # (Co, Ci, 3, 3) -> (Co, 9*Ci), tap-major / cin-minor
        co, ci = w.shape[0], w.shape[1]
        return jnp.transpose(w, (0, 2, 3, 1)).reshape(co, 9 * ci).astype(jnp.float32)

    def b_col(b):
        return b.reshape(-1, 1).astype(jnp.float32)

    # conv1: zero-pad Cin 3 -> 8 so the in-kernel tap slabs are sublane-aligned.
    w1 = p["e1_w"]
    w1p = jnp.concatenate(
        [w1, jnp.zeros((w1.shape[0], 8 - w1.shape[1]) + w1.shape[2:], w1.dtype)],
        axis=1)
    args = [w_flat(w1p), b_col(p["e1_b"])]
    for name in ("e2", "e3", "e4"):
        args += [w_flat(p[f"{name}_w"]), b_col(p[f"{name}_b"])]
    for name in ("e5", "e6", "e7"):                 # concat convs: split halves
        w = p[f"{name}_w"]
        args += [w_flat(w[:, :32]), w_flat(w[:, 32:]), b_col(p[f"{name}_b"])]
    return args


def build_tap_masks(N, H, W):
    """(9, N*H*W) f32 validity masks for the 9 taps of a pad-1 3x3 conv."""
    hh = jnp.arange(H).reshape(H, 1)
    ww = jnp.arange(W).reshape(1, W)
    ms = []
    for ky in range(3):
        for kx in range(3):
            dy, dx = ky - 1, kx - 1
            valid = ((hh + dy >= 0) & (hh + dy < H) &
                     (ww + dx >= 0) & (ww + dx < W))
            ms.append(valid.astype(jnp.float32).reshape(H * W))
    m = jnp.stack(ms, axis=0)                       # (9, HW)
    return jnp.tile(m, (1, N))                      # periodic per image


# ----------------------------------------------------------------------------
# divin side branch (one scalar per image) -- XLA glue.
# TODO(synk): fold this tiny branch (3 stride-2 convs + adaptive max pools +
# FC, ~0.1% of the FLOPs) into the fused Pallas kernel; left in XLA because
# its strided/pooling lowering adds risk for essentially zero work.
# ----------------------------------------------------------------------------
def _conv2d_nhwc(x, w_oihw, b, stride):
    w_hwio = jnp.transpose(w_oihw, (2, 3, 1, 0))
    y = lax.conv_general_dilated(
        x, w_hwio, window_strides=(stride, stride), padding=((1, 1), (1, 1)),
        dimension_numbers=("NHWC", "HWIO", "NHWC"))
    return y + b.reshape(1, 1, 1, -1)


def _adaptive_max_pool(x, out_size):
    # TODO(synk): assumes the adaptive sizes divide evenly (true for the
    # reference 128->64->16->4 path and this test); PyTorch handles ragged
    # windows for non-divisible sizes.
    N, H, W, C = x.shape
    if out_size >= H:                               # output >= input: replicate
        x = jnp.repeat(x, out_size // H, axis=1)
        return jnp.repeat(x, out_size // W, axis=2)
    kh, kw = H // out_size, W // out_size
    return jnp.max(x.reshape(N, out_size, kh, out_size, kw, C), axis=(2, 4))


def _divin_branch(p, x_nhwc):
    N = x_nhwc.shape[0]
    d = _adaptive_max_pool(_conv2d_nhwc(x_nhwc, p["d1_w"], p["d1_b"], 2), 64)
    d = _adaptive_max_pool(_conv2d_nhwc(d, p["d2_w"], p["d2_b"], 2), 16)
    d = _adaptive_max_pool(_conv2d_nhwc(d, p["d3_w"], p["d3_b"], 2), 4)
    d_flat = jnp.transpose(d, (0, 3, 1, 2)).reshape(N, -1)     # NCHW flatten
    logits = d_flat @ p["fc_w"].T + p["fc_b"]
    return (jax.nn.sigmoid(logits) * 0.1 + 0.9).astype(jnp.float32)   # (N, 1)


# ----------------------------------------------------------------------------
# Deterministic parameter init (shapes follow the PyTorch module __init__)
# ----------------------------------------------------------------------------
def init_params(key):
    nf = 32
    shapes = {
        "e1": (nf, 3), "e2": (nf, nf), "e3": (nf, nf), "e4": (nf, nf),
        "e5": (nf, 2 * nf), "e6": (nf, 2 * nf), "e7": (24, 2 * nf),
        "d1": (4, 3), "d2": (8, 4), "d3": (16, 8),
    }
    p = {}
    for name, (co, ci) in shapes.items():
        key, kw, kb = jax.random.split(key, 3)
        p[f"{name}_w"] = 0.1 * jax.random.normal(kw, (co, ci, 3, 3), jnp.float32)
        p[f"{name}_b"] = 0.1 * jax.random.normal(kb, (co,), jnp.float32)
    key, kw, kb = jax.random.split(key, 3)
    p["fc_w"] = 0.1 * jax.random.normal(kw, (1, 16 * 4 * 4), jnp.float32)
    p["fc_b"] = 0.1 * jax.random.normal(kb, (1,), jnp.float32)
    return p


# ----------------------------------------------------------------------------
# Forward pass (mirrors enhance_net_nopool_ldivin.forward, return_divin=False)
# ----------------------------------------------------------------------------
@jax.jit
def forward(p, x_nchw):
    N, C, H, W = x_nchw.shape
    HW = H * W
    x_nhwc = jnp.transpose(x_nchw, (0, 2, 3, 1))

    divin = _divin_branch(p, x_nhwc)                              # (N, 1)

    # Channel-major, lane-dense input: (C, N*HW) with images packed along
    # lanes, zero-padded to 8 channels (sublane-aligned tap slabs in-kernel).
    x_cm = jnp.transpose(x_nchw, (1, 0, 2, 3)).reshape(C, N * HW)
    x8 = jnp.concatenate(
        [x_cm, jnp.zeros((8 - C, N * HW), x_cm.dtype)], axis=0).astype(jnp.float32)

    masks = build_tap_masks(N, H, W)
    wargs = prep_weights(p)

    e1, e, r = fused_enhance(divin, x8, masks, wargs, N, H, W)
    return (e1.reshape(N, 3, H, W),
            e.reshape(N, 3, H, W),
            r.reshape(N, 24, H, W))


# ----------------------------------------------------------------------------
# Pure-JAX reference (numerical self-check of the Pallas kernel)
# ----------------------------------------------------------------------------
def _ref_forward(p, x):
    def conv(x, w, b):
        y = lax.conv_general_dilated(
            x, w, (1, 1), ((1, 1), (1, 1)),
            dimension_numbers=("NCHW", "OIHW", "NCHW"))
        return y + b.reshape(1, -1, 1, 1)

    relu = jax.nn.relu
    x1 = relu(conv(x, p["e1_w"], p["e1_b"]))
    x2 = relu(conv(x1, p["e2_w"], p["e2_b"]))
    x3 = relu(conv(x2, p["e3_w"], p["e3_b"]))
    x4 = relu(conv(x3, p["e4_w"], p["e4_b"]))
    x5 = relu(conv(jnp.concatenate([x3, x4], 1), p["e5_w"], p["e5_b"]))
    x6 = relu(conv(jnp.concatenate([x2, x5], 1), p["e6_w"], p["e6_b"]))
    x_r = jnp.tanh(conv(jnp.concatenate([x1, x6], 1), p["e7_w"], p["e7_b"]))
    divin = _divin_branch(p, jnp.transpose(x, (0, 2, 3, 1))).reshape(-1, 1, 1, 1)
    xx = x * divin
    e1 = xx
    for i in range(8):
        ri = x_r[:, 3 * i:3 * i + 3]
        xx = xx + ri * (xx * xx - xx)
        if i == 3:
            e1 = xx
    return e1, xx, x_r


if __name__ == "__main__":
    key = jax.random.PRNGKey(0)
    kx, kp = jax.random.split(key)
    x = jax.random.uniform(kx, (2, 3, 16, 16), jnp.float32)       # NCHW
    params = init_params(kp)

    enhance_image_1, enhance_image, r = forward(params, x)
    jax.block_until_ready((enhance_image_1, enhance_image, r))

    assert enhance_image_1.shape == (2, 3, 16, 16)
    assert enhance_image.shape == (2, 3, 16, 16)
    assert r.shape == (2, 24, 16, 16)
    assert bool(jnp.isfinite(enhance_image_1).all())
    assert bool(jnp.isfinite(enhance_image).all())
    assert bool(jnp.isfinite(r).all())

    # Numerical self-check against a pure-JAX/XLA reference.  Tolerances allow
    # for MXU-vs-XLA-conv precision differences but catch structural bugs.
    ref_e1, ref_e, ref_r = jax.jit(_ref_forward)(params, x)
    assert bool(jnp.allclose(enhance_image_1, ref_e1, rtol=1e-1, atol=5e-2))
    assert bool(jnp.allclose(enhance_image, ref_e, rtol=1e-1, atol=5e-2))
    assert bool(jnp.allclose(r, ref_r, rtol=1e-1, atol=5e-2))

    print("KERNEL_OK")
</pallas_src>

<mosaic_0001>
module attributes {stable_mosaic.version = 11 : i64} {
  func.func @kernel(%arg0: i32, %arg1: memref<2x1xf32, #tpu.memory_space<smem>>, %arg2: memref<8x256xf32, #tpu.memory_space<vmem>>, %arg3: memref<9x256xf32, #tpu.memory_space<vmem>>, %arg4: memref<32x72xf32, #tpu.memory_space<vmem>>, %arg5: memref<32x1xf32, #tpu.memory_space<vmem>>, %arg6: memref<32x288xf32, #tpu.memory_space<vmem>>, %arg7: memref<32x1xf32, #tpu.memory_space<vmem>>, %arg8: memref<32x288xf32, #tpu.memory_space<vmem>>, %arg9: memref<32x1xf32, #tpu.memory_space<vmem>>, %arg10: memref<32x288xf32, #tpu.memory_space<vmem>>, %arg11: memref<32x1xf32, #tpu.memory_space<vmem>>, %arg12: memref<32x288xf32, #tpu.memory_space<vmem>>, %arg13: memref<32x288xf32, #tpu.memory_space<vmem>>, %arg14: memref<32x1xf32, #tpu.memory_space<vmem>>, %arg15: memref<32x288xf32, #tpu.memory_space<vmem>>, %arg16: memref<32x288xf32, #tpu.memory_space<vmem>>, %arg17: memref<32x1xf32, #tpu.memory_space<vmem>>, %arg18: memref<24x288xf32, #tpu.memory_space<vmem>>, %arg19: memref<24x288xf32, #tpu.memory_space<vmem>>, %arg20: memref<24x1xf32, #tpu.memory_space<vmem>>, %arg21: memref<1x3x256xf32, #tpu.memory_space<vmem>>, %arg22: memref<1x3x256xf32, #tpu.memory_space<vmem>>, %arg23: memref<1x24x256xf32, #tpu.memory_space<vmem>>) attributes {dimension_semantics = [#tpu.dimension_semantics<parallel>], iteration_bounds = array<i64: 2>, scalar_prefetch = 0 : i64, scratch_operands = 0 : i64, tpu.core_type = #tpu.core_type<tc>, window_params = [{transform_indices = @transform_0, window_bounds = array<i64: 2, 1>}, {transform_indices = @transform_1, window_bounds = array<i64: 8, 256>}, {transform_indices = @transform_2, window_bounds = array<i64: 9, 256>}, {pipeline_mode = #tpu.pipeline_mode<synchronous>, transform_indices = @transform_3, window_bounds = array<i64: 32, 72>}, {pipeline_mode = #tpu.pipeline_mode<synchronous>, transform_indices = @transform_4, window_bounds = array<i64: 32, 1>}, {pipeline_mode = #tpu.pipeline_mode<synchronous>, transform_indices = @transform_5, window_bounds = array<i64: 32, 288>}, {pipeline_mode = #tpu.pipeline_mode<synchronous>, transform_indices = @transform_6, window_bounds = array<i64: 32, 1>}, {pipeline_mode = #tpu.pipeline_mode<synchronous>, transform_indices = @transform_7, window_bounds = array<i64: 32, 288>}, {pipeline_mode = #tpu.pipeline_mode<synchronous>, transform_indices = @transform_8, window_bounds = array<i64: 32, 1>}, {pipeline_mode = #tpu.pipeline_mode<synchronous>, transform_indices = @transform_9, window_bounds = array<i64: 32, 288>}, {pipeline_mode = #tpu.pipeline_mode<synchronous>, transform_indices = @transform_10, window_bounds = array<i64: 32, 1>}, {pipeline_mode = #tpu.pipeline_mode<synchronous>, transform_indices = @transform_11, window_bounds = array<i64: 32, 288>}, {pipeline_mode = #tpu.pipeline_mode<synchronous>, transform_indices = @transform_12, window_bounds = array<i64: 32, 288>}, {pipeline_mode = #tpu.pipeline_mode<synchronous>, transform_indices = @transform_13, window_bounds = array<i64: 32, 1>}, {pipeline_mode = #tpu.pipeline_mode<synchronous>, transform_indices = @transform_14, window_bounds = array<i64: 32, 288>}, {pipeline_mode = #tpu.pipeline_mode<synchronous>, transform_indices = @transform_15, window_bounds = array<i64: 32, 288>}, {pipeline_mode = #tpu.pipeline_mode<synchronous>, transform_indices = @transform_16, window_bounds = array<i64: 32, 1>}, {pipeline_mode = #tpu.pipeline_mode<synchronous>, transform_indices = @transform_17, window_bounds = array<i64: 24, 288>}, {pipeline_mode = #tpu.pipeline_mode<synchronous>, transform_indices = @transform_18, window_bounds = array<i64: 24, 288>}, {pipeline_mode = #tpu.pipeline_mode<synchronous>, transform_indices = @transform_19, window_bounds = array<i64: 24, 1>}, {transform_indices = @transform_20, window_bounds = array<i64: 1, 3, 256>}, {transform_indices = @transform_21, window_bounds = array<i64: 1, 3, 256>}, {transform_indices = @transform_22, window_bounds = array<i64: 1, 24, 256>}]} {
    %c0 = arith.constant 0 : index
    %c0_0 = arith.constant 0 : index
    %0 = vector.load %arg2[%c0, %c0_0] : memref<8x256xf32, #tpu.memory_space<vmem>>, vector<8x256xf32>
    %1 = vector.extract_strided_slice %0 {offsets = [0, 0], sizes = [3, 256], strides = [1, 1]} : vector<8x256xf32> to vector<3x256xf32>
    %c17_i32 = arith.constant 17 : i32
    %2 = tpu.dynamic_rotate %0 by %c17_i32 dim 1 : vector<8x256xf32>, i32 -> vector<8x256xf32>
    %c0_1 = arith.constant 0 : index
    %c0_2 = arith.constant 0 : index
    %3 = vector.load %arg3[%c0_1, %c0_2] : memref<9x256xf32, #tpu.memory_space<vmem>>, vector<1x256xf32>
    %4 = vector.broadcast %3 : vector<1x256xf32> to vector<8x256xf32>
    %5 = arith.mulf %2, %4 : vector<8x256xf32>
    %c16_i32 = arith.constant 16 : i32
    %6 = tpu.dynamic_rotate %0 by %c16_i32 dim 1 : vector<8x256xf32>, i32 -> vector<8x256xf32>
    %c1 = arith.constant 1 : index
    %c0_3 = arith.constant 0 : index
    %7 = vector.load %arg3[%c1, %c0_3] : memref<9x256xf32, #tpu.memory_space<vmem>>, vector<1x256xf32>
    %8 = vector.broadcast %7 : vector<1x256xf32> to vector<8x256xf32>
    %9 = arith.mulf %6, %8 : vector<8x256xf32>
    %c15_i32 = arith.constant 15 : i32
    %10 = tpu.dynamic_rotate %0 by %c15_i32 dim 1 : vector<8x256xf32>, i32 -> vector<8x256xf32>
    %c2 = arith.constant 2 : index
    %c0_4 = arith.constant 0 : index
    %11 = vector.load %arg3[%c2, %c0_4] : memref<9x256xf32, #tpu.memory_space<vmem>>, vector<1x256xf32>
    %12 = vector.broadcast %11 : vector<1x256xf32> to vector<8x256xf32>
    %13 = arith.mulf %10, %12 : vector<8x256xf32>
    %c1_i32 = arith.constant 1 : i32
    %14 = tpu.dynamic_rotate %0 by %c1_i32 dim 1 : vector<8x256xf32>, i32 -> vector<8x256xf32>
    %c3 = arith.constant 3 : index
    %c0_5 = arith.constant 0 : index
    %15 = vector.load %arg3[%c3, %c0_5] : memref<9x256xf32, #tpu.memory_space<vmem>>, vector<1x256xf32>
    %16 = vector.broadcast %15 : vector<1x256xf32> to vector<8x256xf32>
    %17 = arith.mulf %14, %16 : vector<8x256xf32>
    %c255_i32 = arith.constant 255 : i32
    %18 = tpu.dynamic_rotate %0 by %c255_i32 dim 1 : vector<8x256xf32>, i32 -> vector<8x256xf32>
    %c5 = arith.constant 5 : index
    %c0_6 = arith.constant 0 : index
    %19 = vector.load %arg3[%c5, %c0_6] : memref<9x256xf32, #tpu.memory_space<vmem>>, vector<1x256xf32>
    %20 = vector.broadcast %19 : vector<1x256xf32> to vector<8x256xf32>
    %21 = arith.mulf %18, %20 : vector<8x256xf32>
    %c241_i32 = arith.constant 241 : i32
    %22 = tpu.dynamic_rotate %0 by %c241_i32 dim 1 : vector<8x256xf32>, i32 -> vector<8x256xf32>
    %c6 = arith.constant 6 : index
    %c0_7 = arith.constant 0 : index
    %23 = vector.load %arg3[%c6, %c0_7] : memref<9x256xf32, #tpu.memory_space<vmem>>, vector<1x256xf32>
    %24 = vector.broadcast %23 : vector<1x256xf32> to vector<8x256xf32>
    %25 = arith.mulf %22, %24 : vector<8x256xf32>
    %c240_i32 = arith.constant 240 : i32
    %26 = tpu.dynamic_rotate %0 by %c240_i32 dim 1 : vector<8x256xf32>, i32 -> vector<8x256xf32>
    %c7 = arith.constant 7 : index
    %c0_8 = arith.constant 0 : index
    %27 = vector.load %arg3[%c7, %c0_8] : memref<9x256xf32, #tpu.memory_space<vmem>>, vector<1x256xf32>
    %28 = vector.broadcast %27 : vector<1x256xf32> to vector<8x256xf32>
    %29 = arith.mulf %26, %28 : vector<8x256xf32>
    %c239_i32 = arith.constant 239 : i32
    %30 = tpu.dynamic_rotate %0 by %c239_i32 dim 1 : vector<8x256xf32>, i32 -> vector<8x256xf32>
    %c8 = arith.constant 8 : index
    %c0_9 = arith.constant 0 : index
    %31 = vector.load %arg3[%c8, %c0_9] : memref<9x256xf32, #tpu.memory_space<vmem>>, vector<1x256xf32>
    %32 = vector.broadcast %31 : vector<1x256xf32> to vector<8x256xf32>
    %33 = arith.mulf %30, %32 : vector<8x256xf32>
    %34 = tpu.concatenate %5, %9, %13, %17, %0, %21, %25, %29, %33 in 0 : vector<8x256xf32>, vector<8x256xf32>, vector<8x256xf32>, vector<8x256xf32>, vector<8x256xf32>, vector<8x256xf32>, vector<8x256xf32>, vector<8x256xf32>, vector<8x256xf32> -> vector<72x256xf32>
    %c0_10 = arith.constant 0 : index
    %c0_11 = arith.constant 0 : index
    %35 = vector.load %arg4[%c0_10, %c0_11] : memref<32x72xf32, #tpu.memory_space<vmem>>, vector<32x72xf32>
    %cst = arith.constant dense<0.000000e+00> : vector<32x256xf32>
    %36 = tpu.matmul %35, %34, %cst {dimension_numbers = #tpu.dot_dimension_numbers<[1], [0], [0], [1], [0, 0, 1, 1], [], []>} : vector<32x72xf32>, vector<72x256xf32>, vector<32x256xf32> -> vector<32x256xf32>
    %c0_12 = arith.constant 0 : index
    %c0_13 = arith.constant 0 : index
    %37 = vector.load %arg5[%c0_12, %c0_13] : memref<32x1xf32, #tpu.memory_space<vmem>>, vector<32x1xf32>
    %38 = vector.broadcast %37 : vector<32x1xf32> to vector<32x256xf32>
    %39 = arith.addf %36, %38 : vector<32x256xf32>
    %cst_14 = arith.constant 0.000000e+00 : f32
    %40 = vector.broadcast %cst_14 : f32 to vector<32x256xf32>
    %41 = arith.maximumf %39, %40 : vector<32x256xf32>
    %c17_i32_15 = arith.constant 17 : i32
    %42 = tpu.dynamic_rotate %41 by %c17_i32_15 dim 1 : vector<32x256xf32>, i32 -> vector<32x256xf32>
    %c0_16 = arith.constant 0 : index
    %c0_17 = arith.constant 0 : index
    %43 = vector.load %arg3[%c0_16, %c0_17] : memref<9x256xf32, #tpu.memory_space<vmem>>, vector<1x256xf32>
    %44 = vector.broadcast %43 : vector<1x256xf32> to vector<32x256xf32>
    %45 = arith.mulf %42, %44 : vector<32x256xf32>
    %c16_i32_18 = arith.constant 16 : i32
    %46 = tpu.dynamic_rotate %41 by %c16_i32_18 dim 1 : vector<32x256xf32>, i32 -> vector<32x256xf32>
    %c1_19 = arith.constant 1 : index
    %c0_20 = arith.constant 0 : index
    %47 = vector.load %arg3[%c1_19, %c0_20] : memref<9x256xf32, #tpu.memory_space<vmem>>, vector<1x256xf32>
    %48 = vector.broadcast %47 : vector<1x256xf32> to vector<32x256xf32>
    %49 = arith.mulf %46, %48 : vector<32x256xf32>
    %c15_i32_21 = arith.constant 15 : i32
    %50 = tpu.dynamic_rotate %41 by %c15_i32_21 dim 1 : vector<32x256xf32>, i32 -> vector<32x256xf32>
    %c2_22 = arith.constant 2 : index
    %c0_23 = arith.constant 0 : index
    %51 = vector.load %arg3[%c2_22, %c0_23] : memref<9x256xf32, #tpu.memory_space<vmem>>, vector<1x256xf32>
    %52 = vector.broadcast %51 : vector<1x256xf32> to vector<32x256xf32>
    %53 = arith.mulf %50, %52 : vector<32x256xf32>
    %c1_i32_24 = arith.constant 1 : i32
    %54 = tpu.dynamic_rotate %41 by %c1_i32_24 dim 1 : vector<32x256xf32>, i32 -> vector<32x256xf32>
    %c3_25 = arith.constant 3 : index
    %c0_26 = arith.constant 0 : index
    %55 = vector.load %arg3[%c3_25, %c0_26] : memref<9x256xf32, #tpu.memory_space<vmem>>, vector<1x256xf32>
    %56 = vector.broadcast %55 : vector<1x256xf32> to vector<32x256xf32>
    %57 = arith.mulf %54, %56 : vector<32x256xf32>
    %c255_i32_27 = arith.constant 255 : i32
    %58 = tpu.dynamic_rotate %41 by %c255_i32_27 dim 1 : vector<32x256xf32>, i32 -> vector<32x256xf32>
    %c5_28 = arith.constant 5 : index
    %c0_29 = arith.constant 0 : index
    %59 = vector.load %arg3[%c5_28, %c0_29] : memref<9x256xf32, #tpu.memory_space<vmem>>, vector<1x256xf32>
    %60 = vector.broadcast %59 : vector<1x256xf32> to vector<32x256xf32>
    %61 = arith.mulf %58, %60 : vector<32x256xf32>
    %c241_i32_30 = arith.constant 241 : i32
    %62 = tpu.dynamic_rotate %41 by %c241_i32_30 dim 1 : vector<32x256xf32>, i32 -> vector<32x256xf32>
    %c6_31 = arith.constant 6 : index
    %c0_32 = arith.constant 0 : index
    %63 = vector.load %arg3[%c6_31, %c0_32] : memref<9x256xf32, #tpu.memory_space<vmem>>, vector<1x256xf32>
    %64 = vector.broadcast %63 : vector<1x256xf32> to vector<32x256xf32>
    %65 = arith.mulf %62, %64 : vector<32x256xf32>
    %c240_i32_33 = arith.constant 240 : i32
    %66 = tpu.dynamic_rotate %41 by %c240_i32_33 dim 1 : vector<32x256xf32>, i32 -> vector<32x256xf32>
    %c7_34 = arith.constant 7 : index
    %c0_35 = arith.constant 0 : index
    %67 = vector.load %arg3[%c7_34, %c0_35] : memref<9x256xf32, #tpu.memory_space<vmem>>, vector<1x256xf32>
    %68 = vector.broadcast %67 : vector<1x256xf32> to vector<32x256xf32>
    %69 = arith.mulf %66, %68 : vector<32x256xf32>
    %c239_i32_36 = arith.constant 239 : i32
    %70 = tpu.dynamic_rotate %41 by %c239_i32_36 dim 1 : vector<32x256xf32>, i32 -> vector<32x256xf32>
    %c8_37 = arith.constant 8 : index
    %c0_38 = arith.constant 0 : index
    %71 = vector.load %arg3[%c8_37, %c0_38] : memref<9x256xf32, #tpu.memory_space<vmem>>, vector<1x256xf32>
    %72 = vector.broadcast %71 : vector<1x256xf32> to vector<32x256xf32>
    %73 = arith.mulf %70, %72 : vector<32x256xf32>
    %74 = tpu.concatenate %45, %49, %53, %57, %41, %61, %65, %69, %73 in 0 : vector<32x256xf32>, vector<32x256xf32>, vector<32x256xf32>, vector<32x256xf32>, vector<32x256xf32>, vector<32x256xf32>, vector<32x256xf32>, vector<32x256xf32>, vector<32x256xf32> -> vector<288x256xf32>
    %c0_39 = arith.constant 0 : index
    %c0_40 = arith.constant 0 : index
    %75 = vector.load %arg6[%c0_39, %c0_40] : memref<32x288xf32, #tpu.memory_space<vmem>>, vector<32x288xf32>
    %cst_41 = arith.constant dense<0.000000e+00> : vector<32x256xf32>
    %76 = tpu.matmul %75, %74, %cst_41 {dimension_numbers = #tpu.dot_dimension_numbers<[1], [0], [0], [1], [0, 0, 1, 1], [], []>} : vector<32x288xf32>, vector<288x256xf32>, vector<32x256xf32> -> vector<32x256xf32>
    %c0_42 = arith.constant 0 : index
    %c0_43 = arith.constant 0 : index
    %77 = vector.load %arg7[%c0_42, %c0_43] : memref<32x1xf32, #tpu.memory_space<vmem>>, vector<32x1xf32>
    %78 = vector.broadcast %77 : vector<32x1xf32> to vector<32x256xf32>
    %79 = arith.addf %76, %78 : vector<32x256xf32>
    %cst_44 = arith.constant 0.000000e+00 : f32
    %80 = vector.broadcast %cst_44 : f32 to vector<32x256xf32>
    %81 = arith.maximumf %79, %80 : vector<32x256xf32>
    %c17_i32_45 = arith.constant 17 : i32
    %82 = tpu.dynamic_rotate %81 by %c17_i32_45 dim 1 : vector<32x256xf32>, i32 -> vector<32x256xf32>
    %c0_46 = arith.constant 0 : index
    %c0_47 = arith.constant 0 : index
    %83 = vector.load %arg3[%c0_46, %c0_47] : memref<9x256xf32, #tpu.memory_space<vmem>>, vector<1x256xf32>
    %84 = vector.broadcast %83 : vector<1x256xf32> to vector<32x256xf32>
    %85 = arith.mulf %82, %84 : vector<32x256xf32>
    %c16_i32_48 = arith.constant 16 : i32
    %86 = tpu.dynamic_rotate %81 by %c16_i32_48 dim 1 : vector<32x256xf32>, i32 -> vector<32x256xf32>
    %c1_49 = arith.constant 1 : index
    %c0_50 = arith.constant 0 : index
    %87 = vector.load %arg3[%c1_49, %c0_50] : memref<9x256xf32, #tpu.memory_space<vmem>>, vector<1x256xf32>
    %88 = vector.broadcast %87 : vector<1x256xf32> to vector<32x256xf32>
    %89 = arith.mulf %86, %88 : vector<32x256xf32>
    %c15_i32_51 = arith.constant 15 : i32
    %90 = tpu.dynamic_rotate %81 by %c15_i32_51 dim 1 : vector<32x256xf32>, i32 -> vector<32x256xf32>
    %c2_52 = arith.constant 2 : index
    %c0_53 = arith.constant 0 : index
    %91 = vector.load %arg3[%c2_52, %c0_53] : memref<9x256xf32, #tpu.memory_space<vmem>>, vector<1x256xf32>
    %92 = vector.broadcast %91 : vector<1x256xf32> to vector<32x256xf32>
    %93 = arith.mulf %90, %92 : vector<32x256xf32>
    %c1_i32_54 = arith.constant 1 : i32
    %94 = tpu.dynamic_rotate %81 by %c1_i32_54 dim 1 : vector<32x256xf32>, i32 -> vector<32x256xf32>
    %c3_55 = arith.constant 3 : index
    %c0_56 = arith.constant 0 : index
    %95 = vector.load %arg3[%c3_55, %c0_56] : memref<9x256xf32, #tpu.memory_space<vmem>>, vector<1x256xf32>
    %96 = vector.broadcast %95 : vector<1x256xf32> to vector<32x256xf32>
    %97 = arith.mulf %94, %96 : vector<32x256xf32>
    %c255_i32_57 = arith.constant 255 : i32
    %98 = tpu.dynamic_rotate %81 by %c255_i32_57 dim 1 : vector<32x256xf32>, i32 -> vector<32x256xf32>
    %c5_58 = arith.constant 5 : index
    %c0_59 = arith.constant 0 : index
    %99 = vector.load %arg3[%c5_58, %c0_59] : memref<9x256xf32, #tpu.memory_space<vmem>>, vector<1x256xf32>
    %100 = vector.broadcast %99 : vector<1x256xf32> to vector<32x256xf32>
    %101 = arith.mulf %98, %100 : vector<32x256xf32>
    %c241_i32_60 = arith.constant 241 : i32
    %102 = tpu.dynamic_rotate %81 by %c241_i32_60 dim 1 : vector<32x256xf32>, i32 -> vector<32x256xf32>
    %c6_61 = arith.constant 6 : index
    %c0_62 = arith.constant 0 : index
    %103 = vector.load %arg3[%c6_61, %c0_62] : memref<9x256xf32, #tpu.memory_space<vmem>>, vector<1x256xf32>
    %104 = vector.broadcast %103 : vector<1x256xf32> to vector<32x256xf32>
    %105 = arith.mulf %102, %104 : vector<32x256xf32>
    %c240_i32_63 = arith.constant 240 : i32
    %106 = tpu.dynamic_rotate %81 by %c240_i32_63 dim 1 : vector<32x256xf32>, i32 -> vector<32x256xf32>
    %c7_64 = arith.constant 7 : index
    %c0_65 = arith.constant 0 : index
    %107 = vector.load %arg3[%c7_64, %c0_65] : memref<9x256xf32, #tpu.memory_space<vmem>>, vector<1x256xf32>
    %108 = vector.broadcast %107 : vector<1x256xf32> to vector<32x256xf32>
    %109 = arith.mulf %106, %108 : vector<32x256xf32>
    %c239_i32_66 = arith.constant 239 : i32
    %110 = tpu.dynamic_rotate %81 by %c239_i32_66 dim 1 : vector<32x256xf32>, i32 -> vector<32x256xf32>
    %c8_67 = arith.constant 8 : index
    %c0_68 = arith.constant 0 : index
    %111 = vector.load %arg3[%c8_67, %c0_68] : memref<9x256xf32, #tpu.memory_space<vmem>>, vector<1x256xf32>
    %112 = vector.broadcast %111 : vector<1x256xf32> to vector<32x256xf32>
    %113 = arith.mulf %110, %112 : vector<32x256xf32>
    %114 = tpu.concatenate %85, %89, %93, %97, %81, %101, %105, %109, %113 in 0 : vector<32x256xf32>, vector<32x256xf32>, vector<32x256xf32>, vector<32x256xf32>, vector<32x256xf32>, vector<32x256xf32>, vector<32x256xf32>, vector<32x256xf32>, vector<32x256xf32> -> vector<288x256xf32>
    %c0_69 = arith.constant 0 : index
    %c0_70 = arith.constant 0 : index
    %115 = vector.load %arg8[%c0_69, %c0_70] : memref<32x288xf32, #tpu.memory_space<vmem>>, vector<32x288xf32>
    %cst_71 = arith.constant dense<0.000000e+00> : vector<32x256xf32>
    %116 = tpu.matmul %115, %114, %cst_71 {dimension_numbers = #tpu.dot_dimension_numbers<[1], [0], [0], [1], [0, 0, 1, 1], [], []>} : vector<32x288xf32>, vector<288x256xf32>, vector<32x256xf32> -> vector<32x256xf32>
    %c0_72 = arith.constant 0 : index
    %c0_73 = arith.constant 0 : index
    %117 = vector.load %arg9[%c0_72, %c0_73] : memref<32x1xf32, #tpu.memory_space<vmem>>, vector<32x1xf32>
    %118 = vector.broadcast %117 : vector<32x1xf32> to vector<32x256xf32>
    %119 = arith.addf %116, %118 : vector<32x256xf32>
    %cst_74 = arith.constant 0.000000e+00 : f32
    %120 = vector.broadcast %cst_74 : f32 to vector<32x256xf32>
    %121 = arith.maximumf %119, %120 : vector<32x256xf32>
    %c17_i32_75 = arith.constant 17 : i32
    %122 = tpu.dynamic_rotate %121 by %c17_i32_75 dim 1 : vector<32x256xf32>, i32 -> vector<32x256xf32>
    %c0_76 = arith.constant 0 : index
    %c0_77 = arith.constant 0 : index
    %123 = vector.load %arg3[%c0_76, %c0_77] : memref<9x256xf32, #tpu.memory_space<vmem>>, vector<1x256xf32>
    %124 = vector.broadcast %123 : vector<1x256xf32> to vector<32x256xf32>
    %125 = arith.mulf %122, %124 : vector<32x256xf32>
    %c16_i32_78 = arith.constant 16 : i32
    %126 = tpu.dynamic_rotate %121 by %c16_i32_78 dim 1 : vector<32x256xf32>, i32 -> vector<32x256xf32>
    %c1_79 = arith.constant 1 : index
    %c0_80 = arith.constant 0 : index
    %127 = vector.load %arg3[%c1_79, %c0_80] : memref<9x256xf32, #tpu.memory_space<vmem>>, vector<1x256xf32>
    %128 = vector.broadcast %127 : vector<1x256xf32> to vector<32x256xf32>
    %129 = arith.mulf %126, %128 : vector<32x256xf32>
    %c15_i32_81 = arith.constant 15 : i32
    %130 = tpu.dynamic_rotate %121 by %c15_i32_81 dim 1 : vector<32x256xf32>, i32 -> vector<32x256xf32>
    %c2_82 = arith.constant 2 : index
    %c0_83 = arith.constant 0 : index
    %131 = vector.load %arg3[%c2_82, %c0_83] : memref<9x256xf32, #tpu.memory_space<vmem>>, vector<1x256xf32>
    %132 = vector.broadcast %131 : vector<1x256xf32> to vector<32x256xf32>
    %133 = arith.mulf %130, %132 : vector<32x256xf32>
    %c1_i32_84 = arith.constant 1 : i32
    %134 = tpu.dynamic_rotate %121 by %c1_i32_84 dim 1 : vector<32x256xf32>, i32 -> vector<32x256xf32>
    %c3_85 = arith.constant 3 : index
    %c0_86 = arith.constant 0 : index
    %135 = vector.load %arg3[%c3_85, %c0_86] : memref<9x256xf32, #tpu.memory_space<vmem>>, vector<1x256xf32>
    %136 = vector.broadcast %135 : vector<1x256xf32> to vector<32x256xf32>
    %137 = arith.mulf %134, %136 : vector<32x256xf32>
    %c255_i32_87 = arith.constant 255 : i32
    %138 = tpu.dynamic_rotate %121 by %c255_i32_87 dim 1 : vector<32x256xf32>, i32 -> vector<32x256xf32>
    %c5_88 = arith.constant 5 : index
    %c0_89 = arith.constant 0 : index
    %139 = vector.load %arg3[%c5_88, %c0_89] : memref<9x256xf32, #tpu.memory_space<vmem>>, vector<1x256xf32>
    %140 = vector.broadcast %139 : vector<1x256xf32> to vector<32x256xf32>
    %141 = arith.mulf %138, %140 : vector<32x256xf32>
    %c241_i32_90 = arith.constant 241 : i32
    %142 = tpu.dynamic_rotate %121 by %c241_i32_90 dim 1 : vector<32x256xf32>, i32 -> vector<32x256xf32>
    %c6_91 = arith.constant 6 : index
    %c0_92 = arith.constant 0 : index
    %143 = vector.load %arg3[%c6_91, %c0_92] : memref<9x256xf32, #tpu.memory_space<vmem>>, vector<1x256xf32>
    %144 = vector.broadcast %143 : vector<1x256xf32> to vector<32x256xf32>
    %145 = arith.mulf %142, %144 : vector<32x256xf32>
    %c240_i32_93 = arith.constant 240 : i32
    %146 = tpu.dynamic_rotate %121 by %c240_i32_93 dim 1 : vector<32x256xf32>, i32 -> vector<32x256xf32>
    %c7_94 = arith.constant 7 : index
    %c0_95 = arith.constant 0 : index
    %147 = vector.load %arg3[%c7_94, %c0_95] : memref<9x256xf32, #tpu.memory_space<vmem>>, vector<1x256xf32>
    %148 = vector.broadcast %147 : vector<1x256xf32> to vector<32x256xf32>
    %149 = arith.mulf %146, %148 : vector<32x256xf32>
    %c239_i32_96 = arith.constant 239 : i32
    %150 = tpu.dynamic_rotate %121 by %c239_i32_96 dim 1 : vector<32x256xf32>, i32 -> vector<32x256xf32>
    %c8_97 = arith.constant 8 : index
    %c0_98 = arith.constant 0 : index
    %151 = vector.load %arg3[%c8_97, %c0_98] : memref<9x256xf32, #tpu.memory_space<vmem>>, vector<1x256xf32>
    %152 = vector.broadcast %151 : vector<1x256xf32> to vector<32x256xf32>
    %153 = arith.mulf %150, %152 : vector<32x256xf32>
    %154 = tpu.concatenate %125, %129, %133, %137, %121, %141, %145, %149, %153 in 0 : vector<32x256xf32>, vector<32x256xf32>, vector<32x256xf32>, vector<32x256xf32>, vector<32x256xf32>, vector<32x256xf32>, vector<32x256xf32>, vector<32x256xf32>, vector<32x256xf32> -> vector<288x256xf32>
    %c0_99 = arith.constant 0 : index
    %c0_100 = arith.constant 0 : index
    %155 = vector.load %arg10[%c0_99, %c0_100] : memref<32x288xf32, #tpu.memory_space<vmem>>, vector<32x288xf32>
    %cst_101 = arith.constant dense<0.000000e+00> : vector<32x256xf32>
    %156 = tpu.matmul %155, %154, %cst_101 {dimension_numbers = #tpu.dot_dimension_numbers<[1], [0], [0], [1], [0, 0, 1, 1], [], []>} : vector<32x288xf32>, vector<288x256xf32>, vector<32x256xf32> -> vector<32x256xf32>
    %c0_102 = arith.constant 0 : index
    %c0_103 = arith.constant 0 : index
    %157 = vector.load %arg11[%c0_102, %c0_103] : memref<32x1xf32, #tpu.memory_space<vmem>>, vector<32x1xf32>
    %158 = vector.broadcast %157 : vector<32x1xf32> to vector<32x256xf32>
    %159 = arith.addf %156, %158 : vector<32x256xf32>
    %cst_104 = arith.constant 0.000000e+00 : f32
    %160 = vector.broadcast %cst_104 : f32 to vector<32x256xf32>
    %161 = arith.maximumf %159, %160 : vector<32x256xf32>
    %c17_i32_105 = arith.constant 17 : i32
    %162 = tpu.dynamic_rotate %161 by %c17_i32_105 dim 1 : vector<32x256xf32>, i32 -> vector<32x256xf32>
    %c0_106 = arith.constant 0 : index
    %c0_107 = arith.constant 0 : index
    %163 = vector.load %arg3[%c0_106, %c0_107] : memref<9x256xf32, #tpu.memory_space<vmem>>, vector<1x256xf32>
    %164 = vector.broadcast %163 : vector<1x256xf32> to vector<32x256xf32>
    %165 = arith.mulf %162, %164 : vector<32x256xf32>
    %c16_i32_108 = arith.constant 16 : i32
    %166 = tpu.dynamic_rotate %161 by %c16_i32_108 dim 1 : vector<32x256xf32>, i32 -> vector<32x256xf32>
    %c1_109 = arith.constant 1 : index
    %c0_110 = arith.constant 0 : index
    %167 = vector.load %arg3[%c1_109, %c0_110] : memref<9x256xf32, #tpu.memory_space<vmem>>, vector<1x256xf32>
    %168 = vector.broadcast %167 : vector<1x256xf32> to vector<32x256xf32>
    %169 = arith.mulf %166, %168 : vector<32x256xf32>
    %c15_i32_111 = arith.constant 15 : i32
    %170 = tpu.dynamic_rotate %161 by %c15_i32_111 dim 1 : vector<32x256xf32>, i32 -> vector<32x256xf32>
    %c2_112 = arith.constant 2 : index
    %c0_113 = arith.constant 0 : index
    %171 = vector.load %arg3[%c2_112, %c0_113] : memref<9x256xf32, #tpu.memory_space<vmem>>, vector<1x256xf32>
    %172 = vector.broadcast %171 : vector<1x256xf32> to vector<32x256xf32>
    %173 = arith.mulf %170, %172 : vector<32x256xf32>
    %c1_i32_114 = arith.constant 1 : i32
    %174 = tpu.dynamic_rotate %161 by %c1_i32_114 dim 1 : vector<32x256xf32>, i32 -> vector<32x256xf32>
    %c3_115 = arith.constant 3 : index
    %c0_116 = arith.constant 0 : index
    %175 = vector.load %arg3[%c3_115, %c0_116] : memref<9x256xf32, #tpu.memory_space<vmem>>, vector<1x256xf32>
    %176 = vector.broadcast %175 : vector<1x256xf32> to vector<32x256xf32>
    %177 = arith.mulf %174, %176 : vector<32x256xf32>
    %c255_i32_117 = arith.constant 255 : i32
    %178 = tpu.dynamic_rotate %161 by %c255_i32_117 dim 1 : vector<32x256xf32>, i32 -> vector<32x256xf32>
    %c5_118 = arith.constant 5 : index
    %c0_119 = arith.constant 0 : index
    %179 = vector.load %arg3[%c5_118, %c0_119] : memref<9x256xf32, #tpu.memory_space<vmem>>, vector<1x256xf32>
    %180 = vector.broadcast %179 : vector<1x256xf32> to vector<32x256xf32>
    %181 = arith.mulf %178, %180 : vector<32x256xf32>
    %c241_i32_120 = arith.constant 241 : i32
    %182 = tpu.dynamic_rotate %161 by %c241_i32_120 dim 1 : vector<32x256xf32>, i32 -> vector<32x256xf32>
    %c6_121 = arith.constant 6 : index
    %c0_122 = arith.constant 0 : index
    %183 = vector.load %arg3[%c6_121, %c0_122] : memref<9x256xf32, #tpu.memory_space<vmem>>, vector<1x256xf32>
    %184 = vector.broadcast %183 : vector<1x256xf32> to vector<32x256xf32>
    %185 = arith.mulf %182, %184 : vector<32x256xf32>
    %c240_i32_123 = arith.constant 240 : i32
    %186 = tpu.dynamic_rotate %161 by %c240_i32_123 dim 1 : vector<32x256xf32>, i32 -> vector<32x256xf32>
    %c7_124 = arith.constant 7 : index
    %c0_125 = arith.constant 0 : index
    %187 = vector.load %arg3[%c7_124, %c0_125] : memref<9x256xf32, #tpu.memory_space<vmem>>, vector<1x256xf32>
    %188 = vector.broadcast %187 : vector<1x256xf32> to vector<32x256xf32>
    %189 = arith.mulf %186, %188 : vector<32x256xf32>
    %c239_i32_126 = arith.constant 239 : i32
    %190 = tpu.dynamic_rotate %161 by %c239_i32_126 dim 1 : vector<32x256xf32>, i32 -> vector<32x256xf32>
    %c8_127 = arith.constant 8 : index
    %c0_128 = arith.constant 0 : index
    %191 = vector.load %arg3[%c8_127, %c0_128] : memref<9x256xf32, #tpu.memory_space<vmem>>, vector<1x256xf32>
    %192 = vector.broadcast %191 : vector<1x256xf32> to vector<32x256xf32>
    %193 = arith.mulf %190, %192 : vector<32x256xf32>
    %194 = tpu.concatenate %165, %169, %173, %177, %161, %181, %185, %189, %193 in 0 : vector<32x256xf32>, vector<32x256xf32>, vector<32x256xf32>, vector<32x256xf32>, vector<32x256xf32>, vector<32x256xf32>, vector<32x256xf32>, vector<32x256xf32>, vector<32x256xf32> -> vector<288x256xf32>
    %c0_129 = arith.constant 0 : index
    %c0_130 = arith.constant 0 : index
    %195 = vector.load %arg12[%c0_129, %c0_130] : memref<32x288xf32, #tpu.memory_space<vmem>>, vector<32x288xf32>
    %cst_131 = arith.constant dense<0.000000e+00> : vector<32x256xf32>
    %196 = tpu.matmul %195, %154, %cst_131 {dimension_numbers = #tpu.dot_dimension_numbers<[1], [0], [0], [1], [0, 0, 1, 1], [], []>} : vector<32x288xf32>, vector<288x256xf32>, vector<32x256xf32> -> vector<32x256xf32>
    %c0_132 = arith.constant 0 : index
    %c0_133 = arith.constant 0 : index
    %197 = vector.load %arg13[%c0_132, %c0_133] : memref<32x288xf32, #tpu.memory_space<vmem>>, vector<32x288xf32>
    %cst_134 = arith.constant dense<0.000000e+00> : vector<32x256xf32>
    %198 = tpu.matmul %197, %194, %cst_134 {dimension_numbers = #tpu.dot_dimension_numbers<[1], [0], [0], [1], [0, 0, 1, 1], [], []>} : vector<32x288xf32>, vector<288x256xf32>, vector<32x256xf32> -> vector<32x256xf32>
    %199 = arith.addf %196, %198 : vector<32x256xf32>
    %c0_135 = arith.constant 0 : index
    %c0_136 = arith.constant 0 : index
    %200 = vector.load %arg14[%c0_135, %c0_136] : memref<32x1xf32, #tpu.memory_space<vmem>>, vector<32x1xf32>
    %201 = vector.broadcast %200 : vector<32x1xf32> to vector<32x256xf32>
    %202 = arith.addf %199, %201 : vector<32x256xf32>
    %cst_137 = arith.constant 0.000000e+00 : f32
    %203 = vector.broadcast %cst_137 : f32 to vector<32x256xf32>
    %204 = arith.maximumf %202, %203 : vector<32x256xf32>
    %c17_i32_138 = arith.constant 17 : i32
    %205 = tpu.dynamic_rotate %204 by %c17_i32_138 dim 1 : vector<32x256xf32>, i32 -> vector<32x256xf32>
    %c0_139 = arith.constant 0 : index
    %c0_140 = arith.constant 0 : index
    %206 = vector.load %arg3[%c0_139, %c0_140] : memref<9x256xf32, #tpu.memory_space<vmem>>, vector<1x256xf32>
    %207 = vector.broadcast %206 : vector<1x256xf32> to vector<32x256xf32>
    %208 = arith.mulf %205, %207 : vector<32x256xf32>
    %c16_i32_141 = arith.constant 16 : i32
    %209 = tpu.dynamic_rotate %204 by %c16_i32_141 dim 1 : vector<32x256xf32>, i32 -> vector<32x256xf32>
    %c1_142 = arith.constant 1 : index
    %c0_143 = arith.constant 0 : index
    %210 = vector.load %arg3[%c1_142, %c0_143] : memref<9x256xf32, #tpu.memory_space<vmem>>, vector<1x256xf32>
    %211 = vector.broadcast %210 : vector<1x256xf32> to vector<32x256xf32>
    %212 = arith.mulf %209, %211 : vector<32x256xf32>
    %c15_i32_144 = arith.constant 15 : i32
    %213 = tpu.dynamic_rotate %204 by %c15_i32_144 dim 1 : vector<32x256xf32>, i32 -> vector<32x256xf32>
    %c2_145 = arith.constant 2 : index
    %c0_146 = arith.constant 0 : index
    %214 = vector.load %arg3[%c2_145, %c0_146] : memref<9x256xf32, #tpu.memory_space<vmem>>, vector<1x256xf32>
    %215 = vector.broadcast %214 : vector<1x256xf32> to vector<32x256xf32>
    %216 = arith.mulf %213, %215 : vector<32x256xf32>
    %c1_i32_147 = arith.constant 1 : i32
    %217 = tpu.dynamic_rotate %204 by %c1_i32_147 dim 1 : vector<32x256xf32>, i32 -> vector<32x256xf32>
    %c3_148 = arith.constant 3 : index
    %c0_149 = arith.constant 0 : index
    %218 = vector.load %arg3[%c3_148, %c0_149] : memref<9x256xf32, #tpu.memory_space<vmem>>, vector<1x256xf32>
    %219 = vector.broadcast %218 : vector<1x256xf32> to vector<32x256xf32>
    %220 = arith.mulf %217, %219 : vector<32x256xf32>
    %c255_i32_150 = arith.constant 255 : i32
    %221 = tpu.dynamic_rotate %204 by %c255_i32_150 dim 1 : vector<32x256xf32>, i32 -> vector<32x256xf32>
    %c5_151 = arith.constant 5 : index
    %c0_152 = arith.constant 0 : index
    %222 = vector.load %arg3[%c5_151, %c0_152] : memref<9x256xf32, #tpu.memory_space<vmem>>, vector<1x256xf32>
    %223 = vector.broadcast %222 : vector<1x256xf32> to vector<32x256xf32>
    %224 = arith.mulf %221, %223 : vector<32x256xf32>
    %c241_i32_153 = arith.constant 241 : i32
    %225 = tpu.dynamic_rotate %204 by %c241_i32_153 dim 1 : vector<32x256xf32>, i32 -> vector<32x256xf32>
    %c6_154 = arith.constant 6 : index
    %c0_155 = arith.constant 0 : index
    %226 = vector.load %arg3[%c6_154, %c0_155] : memref<9x256xf32, #tpu.memory_space<vmem>>, vector<1x256xf32>
    %227 = vector.broadcast %226 : vector<1x256xf32> to vector<32x256xf32>
    %228 = arith.mulf %225, %227 : vector<32x256xf32>
    %c240_i32_156 = arith.constant 240 : i32
    %229 = tpu.dynamic_rotate %204 by %c240_i32_156 dim 1 : vector<32x256xf32>, i32 -> vector<32x256xf32>
    %c7_157 = arith.constant 7 : index
    %c0_158 = arith.constant 0 : index
    %230 = vector.load %arg3[%c7_157, %c0_158] : memref<9x256xf32, #tpu.memory_space<vmem>>, vector<1x256xf32>
    %231 = vector.broadcast %230 : vector<1x256xf32> to vector<32x256xf32>
    %232 = arith.mulf %229, %231 : vector<32x256xf32>
    %c239_i32_159 = arith.constant 239 : i32
    %233 = tpu.dynamic_rotate %204 by %c239_i32_159 dim 1 : vector<32x256xf32>, i32 -> vector<32x256xf32>
    %c8_160 = arith.constant 8 : index
    %c0_161 = arith.constant 0 : index
    %234 = vector.load %arg3[%c8_160, %c0_161] : memref<9x256xf32, #tpu.memory_space<vmem>>, vector<1x256xf32>
    %235 = vector.broadcast %234 : vector<1x256xf32> to vector<32x256xf32>
    %236 = arith.mulf %233, %235 : vector<32x256xf32>
    %237 = tpu.concatenate %208, %212, %216, %220, %204, %224, %228, %232, %236 in 0 : vector<32x256xf32>, vector<32x256xf32>, vector<32x256xf32>, vector<32x256xf32>, vector<32x256xf32>, vector<32x256xf32>, vector<32x256xf32>, vector<32x256xf32>, vector<32x256xf32> -> vector<288x256xf32>
    %c0_162 = arith.constant 0 : index
    %c0_163 = arith.constant 0 : index
    %238 = vector.load %arg15[%c0_162, %c0_163] : memref<32x288xf32, #tpu.memory_space<vmem>>, vector<32x288xf32>
    %cst_164 = arith.constant dense<0.000000e+00> : vector<32x256xf32>
    %239 = tpu.matmul %238, %114, %cst_164 {dimension_numbers = #tpu.dot_dimension_numbers<[1], [0], [0], [1], [0, 0, 1, 1], [], []>} : vector<32x288xf32>, vector<288x256xf32>, vector<32x256xf32> -> vector<32x256xf32>
    %c0_165 = arith.constant 0 : index
    %c0_166 = arith.constant 0 : index
    %240 = vector.load %arg16[%c0_165, %c0_166] : memref<32x288xf32, #tpu.memory_space<vmem>>, vector<32x288xf32>
    %cst_167 = arith.constant dense<0.000000e+00> : vector<32x256xf32>
    %241 = tpu.matmul %240, %237, %cst_167 {dimension_numbers = #tpu.dot_dimension_numbers<[1], [0], [0], [1], [0, 0, 1, 1], [], []>} : vector<32x288xf32>, vector<288x256xf32>, vector<32x256xf32> -> vector<32x256xf32>
    %242 = arith.addf %239, %241 : vector<32x256xf32>
    %c0_168 = arith.constant 0 : index
    %c0_169 = arith.constant 0 : index
    %243 = vector.load %arg17[%c0_168, %c0_169] : memref<32x1xf32, #tpu.memory_space<vmem>>, vector<32x1xf32>
    %244 = vector.broadcast %243 : vector<32x1xf32> to vector<32x256xf32>
    %245 = arith.addf %242, %244 : vector<32x256xf32>
    %cst_170 = arith.constant 0.000000e+00 : f32
    %246 = vector.broadcast %cst_170 : f32 to vector<32x256xf32>
    %247 = arith.maximumf %245, %246 : vector<32x256xf32>
    %c17_i32_171 = arith.constant 17 : i32
    %248 = tpu.dynamic_rotate %247 by %c17_i32_171 dim 1 : vector<32x256xf32>, i32 -> vector<32x256xf32>
    %c0_172 = arith.constant 0 : index
    %c0_173 = arith.constant 0 : index
    %249 = vector.load %arg3[%c0_172, %c0_173] : memref<9x256xf32, #tpu.memory_space<vmem>>, vector<1x256xf32>
    %250 = vector.broadcast %249 : vector<1x256xf32> to vector<32x256xf32>
    %251 = arith.mulf %248, %250 : vector<32x256xf32>
    %c16_i32_174 = arith.constant 16 : i32
    %252 = tpu.dynamic_rotate %247 by %c16_i32_174 dim 1 : vector<32x256xf32>, i32 -> vector<32x256xf32>
    %c1_175 = arith.constant 1 : index
    %c0_176 = arith.constant 0 : index
    %253 = vector.load %arg3[%c1_175, %c0_176] : memref<9x256xf32, #tpu.memory_space<vmem>>, vector<1x256xf32>
    %254 = vector.broadcast %253 : vector<1x256xf32> to vector<32x256xf32>
    %255 = arith.mulf %252, %254 : vector<32x256xf32>
    %c15_i32_177 = arith.constant 15 : i32
    %256 = tpu.dynamic_rotate %247 by %c15_i32_177 dim 1 : vector<32x256xf32>, i32 -> vector<32x256xf32>
    %c2_178 = arith.constant 2 : index
    %c0_179 = arith.constant 0 : index
    %257 = vector.load %arg3[%c2_178, %c0_179] : memref<9x256xf32, #tpu.memory_space<vmem>>, vector<1x256xf32>
    %258 = vector.broadcast %257 : vector<1x256xf32> to vector<32x256xf32>
    %259 = arith.mulf %256, %258 : vector<32x256xf32>
    %c1_i32_180 = arith.constant 1 : i32
    %260 = tpu.dynamic_rotate %247 by %c1_i32_180 dim 1 : vector<32x256xf32>, i32 -> vector<32x256xf32>
    %c3_181 = arith.constant 3 : index
    %c0_182 = arith.constant 0 : index
    %261 = vector.load %arg3[%c3_181, %c0_182] : memref<9x256xf32, #tpu.memory_space<vmem>>, vector<1x256xf32>
    %262 = vector.broadcast %261 : vector<1x256xf32> to vector<32x256xf32>
    %263 = arith.mulf %260, %262 : vector<32x256xf32>
    %c255_i32_183 = arith.constant 255 : i32
    %264 = tpu.dynamic_rotate %247 by %c255_i32_183 dim 1 : vector<32x256xf32>, i32 -> vector<32x256xf32>
    %c5_184 = arith.constant 5 : index
    %c0_185 = arith.constant 0 : index
    %265 = vector.load %arg3[%c5_184, %c0_185] : memref<9x256xf32, #tpu.memory_space<vmem>>, vector<1x256xf32>
    %266 = vector.broadcast %265 : vector<1x256xf32> to vector<32x256xf32>
    %267 = arith.mulf %264, %266 : vector<32x256xf32>
    %c241_i32_186 = arith.constant 241 : i32
    %268 = tpu.dynamic_rotate %247 by %c241_i32_186 dim 1 : vector<32x256xf32>, i32 -> vector<32x256xf32>
    %c6_187 = arith.constant 6 : index
    %c0_188 = arith.constant 0 : index
    %269 = vector.load %arg3[%c6_187, %c0_188] : memref<9x256xf32, #tpu.memory_space<vmem>>, vector<1x256xf32>
    %270 = vector.broadcast %269 : vector<1x256xf32> to vector<32x256xf32>
    %271 = arith.mulf %268, %270 : vector<32x256xf32>
    %c240_i32_189 = arith.constant 240 : i32
    %272 = tpu.dynamic_rotate %247 by %c240_i32_189 dim 1 : vector<32x256xf32>, i32 -> vector<32x256xf32>
    %c7_190 = arith.constant 7 : index
    %c0_191 = arith.constant 0 : index
    %273 = vector.load %arg3[%c7_190, %c0_191] : memref<9x256xf32, #tpu.memory_space<vmem>>, vector<1x256xf32>
    %274 = vector.broadcast %273 : vector<1x256xf32> to vector<32x256xf32>
    %275 = arith.mulf %272, %274 : vector<32x256xf32>
    %c239_i32_192 = arith.constant 239 : i32
    %276 = tpu.dynamic_rotate %247 by %c239_i32_192 dim 1 : vector<32x256xf32>, i32 -> vector<32x256xf32>
    %c8_193 = arith.constant 8 : index
    %c0_194 = arith.constant 0 : index
    %277 = vector.load %arg3[%c8_193, %c0_194] : memref<9x256xf32, #tpu.memory_space<vmem>>, vector<1x256xf32>
    %278 = vector.broadcast %277 : vector<1x256xf32> to vector<32x256xf32>
    %279 = arith.mulf %276, %278 : vector<32x256xf32>
    %280 = tpu.concatenate %251, %255, %259, %263, %247, %267, %271, %275, %279 in 0 : vector<32x256xf32>, vector<32x256xf32>, vector<32x256xf32>, vector<32x256xf32>, vector<32x256xf32>, vector<32x256xf32>, vector<32x256xf32>, vector<32x256xf32>, vector<32x256xf32> -> vector<288x256xf32>
    %c0_195 = arith.constant 0 : index
    %c0_196 = arith.constant 0 : index
    %281 = vector.load %arg18[%c0_195, %c0_196] : memref<24x288xf32, #tpu.memory_space<vmem>>, vector<24x288xf32>
    %cst_197 = arith.constant dense<0.000000e+00> : vector<24x256xf32>
    %282 = tpu.matmul %281, %74, %cst_197 {dimension_numbers = #tpu.dot_dimension_numbers<[1], [0], [0], [1], [0, 0, 1, 1], [], []>} : vector<24x288xf32>, vector<288x256xf32>, vector<24x256xf32> -> vector<24x256xf32>
    %c0_198 = arith.constant 0 : index
    %c0_199 = arith.constant 0 : index
    %283 = vector.load %arg19[%c0_198, %c0_199] : memref<24x288xf32, #tpu.memory_space<vmem>>, vector<24x288xf32>
    %cst_200 = arith.constant dense<0.000000e+00> : vector<24x256xf32>
    %284 = tpu.matmul %283, %280, %cst_200 {dimension_numbers = #tpu.dot_dimension_numbers<[1], [0], [0], [1], [0, 0, 1, 1], [], []>} : vector<24x288xf32>, vector<288x256xf32>, vector<24x256xf32> -> vector<24x256xf32>
    %285 = arith.addf %282, %284 : vector<24x256xf32>
    %c0_201 = arith.constant 0 : index
    %c0_202 = arith.constant 0 : index
    %286 = vector.load %arg20[%c0_201, %c0_202] : memref<24x1xf32, #tpu.memory_space<vmem>>, vector<24x1xf32>
    %287 = vector.broadcast %286 : vector<24x1xf32> to vector<24x256xf32>
    %288 = arith.addf %285, %287 : vector<24x256xf32>
    %289 = math.tanh %288 : vector<24x256xf32>
    %290 = arith.index_cast %arg0 : i32 to index
    %c0_203 = arith.constant 0 : index
    %291 = memref.load %arg1[%290, %c0_203] : memref<2x1xf32, #tpu.memory_space<smem>>
    %292 = vector.broadcast %291 : f32 to vector<3x256xf32>
    %293 = arith.mulf %1, %292 : vector<3x256xf32>
    %294 = vector.extract_strided_slice %289 {offsets = [0, 0], sizes = [3, 256], strides = [1, 1]} : vector<24x256xf32> to vector<3x256xf32>
    %295 = arith.mulf %293, %293 : vector<3x256xf32>
    %296 = arith.subf %295, %293 : vector<3x256xf32>
    %297 = arith.mulf %294, %296 : vector<3x256xf32>
    %298 = arith.addf %293, %297 : vector<3x256xf32>
    %299 = vector.extract_strided_slice %289 {offsets = [3, 0], sizes = [3, 256], strides = [1, 1]} : vector<24x256xf32> to vector<3x256xf32>
    %300 = arith.mulf %298, %298 : vector<3x256xf32>
    %301 = arith.subf %300, %298 : vector<3x256xf32>
    %302 = arith.mulf %299, %301 : vector<3x256xf32>
    %303 = arith.addf %298, %302 : vector<3x256xf32>
    %304 = vector.extract_strided_slice %289 {offsets = [6, 0], sizes = [3, 256], strides = [1, 1]} : vector<24x256xf32> to vector<3x256xf32>
    %305 = arith.mulf %303, %303 : vector<3x256xf32>
    %306 = arith.subf %305, %303 : vector<3x256xf32>
    %307 = arith.mulf %304, %306 : vector<3x256xf32>
    %308 = arith.addf %303, %307 : vector<3x256xf32>
    %309 = vector.extract_strided_slice %289 {offsets = [9, 0], sizes = [3, 256], strides = [1, 1]} : vector<24x256xf32> to vector<3x256xf32>
    %310 = arith.mulf %308, %308 : vector<3x256xf32>
    %311 = arith.subf %310, %308 : vector<3x256xf32>
    %312 = arith.mulf %309, %311 : vector<3x256xf32>
    %313 = arith.addf %308, %312 : vector<3x256xf32>
    %314 = vector.extract_strided_slice %289 {offsets = [12, 0], sizes = [3, 256], strides = [1, 1]} : vector<24x256xf32> to vector<3x256xf32>
    %315 = arith.mulf %313, %313 : vector<3x256xf32>
    %316 = arith.subf %315, %313 : vector<3x256xf32>
    %317 = arith.mulf %314, %316 : vector<3x256xf32>
    %318 = arith.addf %313, %317 : vector<3x256xf32>
    %319 = vector.extract_strided_slice %289 {offsets = [15, 0], sizes = [3, 256], strides = [1, 1]} : vector<24x256xf32> to vector<3x256xf32>
    %320 = arith.mulf %318, %318 : vector<3x256xf32>
    %321 = arith.subf %320, %318 : vector<3x256xf32>
    %322 = arith.mulf %319, %321 : vector<3x256xf32>
    %323 = arith.addf %318, %322 : vector<3x256xf32>
    %324 = vector.extract_strided_slice %289 {offsets = [18, 0], sizes = [3, 256], strides = [1, 1]} : vector<24x256xf32> to vector<3x256xf32>
    %325 = arith.mulf %323, %323 : vector<3x256xf32>
    %326 = arith.subf %325, %323 : vector<3x256xf32>
    %327 = arith.mulf %324, %326 : vector<3x256xf32>
    %328 = arith.addf %323, %327 : vector<3x256xf32>
    %329 = vector.extract_strided_slice %289 {offsets = [21, 0], sizes = [3, 256], strides = [1, 1]} : vector<24x256xf32> to vector<3x256xf32>
    %330 = arith.mulf %328, %328 : vector<3x256xf32>
    %331 = arith.subf %330, %328 : vector<3x256xf32>
    %332 = arith.mulf %329, %331 : vector<3x256xf32>
    %333 = arith.addf %328, %332 : vector<3x256xf32>
    %c0_204 = arith.constant 0 : index
    %c0_205 = arith.constant 0 : index
    %c0_206 = arith.constant 0 : index
    %334 = vector.load %arg21[%c0_204, %c0_205, %c0_206] : memref<1x3x256xf32, #tpu.memory_space<vmem>>, vector<1x3x256xf32>
    %335 = vector.shape_cast %334 : vector<1x3x256xf32> to vector<3x256xf32>
    %336 = vector.shape_cast %313 : vector<3x256xf32> to vector<1x3x256xf32>
    tpu.vector_store %arg21[%c0_204, %c0_205, %c0_206], %336 {strides = array<i32>} : memref<1x3x256xf32, #tpu.memory_space<vmem>>, vector<1x3x256xf32>,
    %c0_207 = arith.constant 0 : index
    %c0_208 = arith.constant 0 : index
    %c0_209 = arith.constant 0 : index
    %337 = vector.load %arg22[%c0_207, %c0_208, %c0_209] : memref<1x3x256xf32, #tpu.memory_space<vmem>>, vector<1x3x256xf32>
    %338 = vector.shape_cast %337 : vector<1x3x256xf32> to vector<3x256xf32>
    %339 = vector.shape_cast %333 : vector<3x256xf32> to vector<1x3x256xf32>
    tpu.vector_store %arg22[%c0_207, %c0_208, %c0_209], %339 {strides = array<i32>} : memref<1x3x256xf32, #tpu.memory_space<vmem>>, vector<1x3x256xf32>,
    %c0_210 = arith.constant 0 : index
    %c0_211 = arith.constant 0 : index
    %c0_212 = arith.constant 0 : index
    %340 = vector.load %arg23[%c0_210, %c0_211, %c0_212] : memref<1x24x256xf32, #tpu.memory_space<vmem>>, vector<1x24x256xf32>
    %341 = vector.shape_cast %340 : vector<1x24x256xf32> to vector<24x256xf32>
    %342 = vector.shape_cast %289 : vector<24x256xf32> to vector<1x24x256xf32>
    tpu.vector_store %arg23[%c0_210, %c0_211, %c0_212], %342 {strides = array<i32>} : memref<1x24x256xf32, #tpu.memory_space<vmem>>, vector<1x24x256xf32>,
    return
  }
  func.func @transform_0(%arg0: i32) -> (i32, i32) {
    %c0_i32 = arith.constant 0 : i32
    %c0_i32_0 = arith.constant 0 : i32
    %c0_i32_1 = arith.constant 0 : i32
    return %c0_i32, %c0_i32_0 : i32, i32
  }
  func.func @transform_1(%arg0: i32) -> (i32, i32) {
    %c0_i32 = arith.constant 0 : i32
    %c0_i32_0 = arith.constant 0 : i32
    return %c0_i32, %arg0 : i32, i32
  }
  func.func @transform_2(%arg0: i32) -> (i32, i32) {
    %c0_i32 = arith.constant 0 : i32
    %c0_i32_0 = arith.constant 0 : i32
    return %c0_i32, %arg0 : i32, i32
  }
  func.func @transform_3(%arg0: i32) -> (i32, i32) {
    %c0_i32 = arith.constant 0 : i32
    %c0_i32_0 = arith.constant 0 : i32
    %c0_i32_1 = arith.constant 0 : i32
    return %c0_i32, %c0_i32_0 : i32, i32
  }
  func.func @transform_4(%arg0: i32) -> (i32, i32) {
    %c0_i32 = arith.constant 0 : i32
    %c0_i32_0 = arith.constant 0 : i32
    %c0_i32_1 = arith.constant 0 : i32
    return %c0_i32, %c0_i32_0 : i32, i32
  }
  func.func @transform_5(%arg0: i32) -> (i32, i32) {
    %c0_i32 = arith.constant 0 : i32
    %c0_i32_0 = arith.constant 0 : i32
    %c0_i32_1 = arith.constant 0 : i32
    return %c0_i32, %c0_i32_0 : i32, i32
  }
  func.func @transform_6(%arg0: i32) -> (i32, i32) {
    %c0_i32 = arith.constant 0 : i32
    %c0_i32_0 = arith.constant 0 : i32
    %c0_i32_1 = arith.constant 0 : i32
    return %c0_i32, %c0_i32_0 : i32, i32
  }
  func.func @transform_7(%arg0: i32) -> (i32, i32) {
    %c0_i32 = arith.constant 0 : i32
    %c0_i32_0 = arith.constant 0 : i32
    %c0_i32_1 = arith.constant 0 : i32
    return %c0_i32, %c0_i32_0 : i32, i32
  }
  func.func @transform_8(%arg0: i32) -> (i32, i32) {
    %c0_i32 = arith.constant 0 : i32
    %c0_i32_0 = arith.constant 0 : i32
    %c0_i32_1 = arith.constant 0 : i32
    return %c0_i32, %c0_i32_0 : i32, i32
  }
  func.func @transform_9(%arg0: i32) -> (i32, i32) {
    %c0_i32 = arith.constant 0 : i32
    %c0_i32_0 = arith.constant 0 : i32
    %c0_i32_1 = arith.constant 0 : i32
    return %c0_i32, %c0_i32_0 : i32, i32
  }
  func.func @transform_10(%arg0: i32) -> (i32, i32) {
    %c0_i32 = arith.constant 0 : i32
    %c0_i32_0 = arith.constant 0 : i32
    %c0_i32_1 = arith.constant 0 : i32
    return %c0_i32, %c0_i32_0 : i32, i32
  }
  func.func @transform_11(%arg0: i32) -> (i32, i32) {
    %c0_i32 = arith.constant 0 : i32
    %c0_i32_0 = arith.constant 0 : i32
    %c0_i32_1 = arith.constant 0 : i32
    return %c0_i32, %c0_i32_0 : i32, i32
  }
  func.func @transform_12(%arg0: i32) -> (i32, i32) {
    %c0_i32 = arith.constant 0 : i32
    %c0_i32_0 = arith.constant 0 : i32
    %c0_i32_1 = arith.constant 0 : i32
    return %c0_i32, %c0_i32_0 : i32, i32
  }
  func.func @transform_13(%arg0: i32) -> (i32, i32) {
    %c0_i32 = arith.constant 0 : i32
    %c0_i32_0 = arith.constant 0 : i32
    %c0_i32_1 = arith.constant 0 : i32
    return %c0_i32, %c0_i32_0 : i32, i32
  }
  func.func @transform_14(%arg0: i32) -> (i32, i32) {
    %c0_i32 = arith.constant 0 : i32
    %c0_i32_0 = arith.constant 0 : i32
    %c0_i32_1 = arith.constant 0 : i32
    return %c0_i32, %c0_i32_0 : i32, i32
  }
  func.func @transform_15(%arg0: i32) -> (i32, i32) {
    %c0_i32 = arith.constant 0 : i32
    %c0_i32_0 = arith.constant 0 : i32
    %c0_i32_1 = arith.constant 0 : i32
    return %c0_i32, %c0_i32_0 : i32, i32
  }
  func.func @transform_16(%arg0: i32) -> (i32, i32) {
    %c0_i32 = arith.constant 0 : i32
    %c0_i32_0 = arith.constant 0 : i32
    %c0_i32_1 = arith.constant 0 : i32
    return %c0_i32, %c0_i32_0 : i32, i32
  }
  func.func @transform_17(%arg0: i32) -> (i32, i32) {
    %c0_i32 = arith.constant 0 : i32
    %c0_i32_0 = arith.constant 0 : i32
    %c0_i32_1 = arith.constant 0 : i32
    return %c0_i32, %c0_i32_0 : i32, i32
  }
  func.func @transform_18(%arg0: i32) -> (i32, i32) {
    %c0_i32 = arith.constant 0 : i32
    %c0_i32_0 = arith.constant 0 : i32
    %c0_i32_1 = arith.constant 0 : i32
    return %c0_i32, %c0_i32_0 : i32, i32
  }
  func.func @transform_19(%arg0: i32) -> (i32, i32) {
    %c0_i32 = arith.constant 0 : i32
    %c0_i32_0 = arith.constant 0 : i32
    %c0_i32_1 = arith.constant 0 : i32
    return %c0_i32, %c0_i32_0 : i32, i32
  }
  func.func @transform_20(%arg0: i32) -> (i32, i32, i32) {
    %c0_i32 = arith.constant 0 : i32
    %c0_i32_0 = arith.constant 0 : i32
    %c0_i32_1 = arith.constant 0 : i32
    return %arg0, %c0_i32, %c0_i32_0 : i32, i32, i32
  }
  func.func @transform_21(%arg0: i32) -> (i32, i32, i32) {
    %c0_i32 = arith.constant 0 : i32
    %c0_i32_0 = arith.constant 0 : i32
    %c0_i32_1 = arith.constant 0 : i32
    return %arg0, %c0_i32, %c0_i32_0 : i32, i32, i32
  }
  func.func @transform_22(%arg0: i32) -> (i32, i32, i32) {
    %c0_i32 = arith.constant 0 : i32
    %c0_i32_0 = arith.constant 0 : i32
    %c0_i32_1 = arith.constant 0 : i32
    return %arg0, %c0_i32, %c0_i32_0 : i32, i32, i32
  }
}

</mosaic_0001>

<bundles_post_ra>
// kernel: forward.1
= control target key start
LH: loop header
LB: loop body
LE: loop exit
PB: predicated region body
PF: predicated region fallthrough
CT: control target
= control target key end

     0   :  { %s9517_s0 = inlined_call_operand.vmem [shape: f32[2,1], index: 0, kind: input, shape index: {}]   ;;  %s9518_s1 = inlined_call_operand.vmem [shape: f32[8,512], index: 1, kind: input, shape index: {}]   ;;  %s9519_s2 = inlined_call_operand.vmem [shape: f32[9,512], index: 2, kind: input, shape index: {}]   ;;  %s9520_s3 = inlined_call_operand.vmem [shape: f32[32,72], index: 3, kind: input, shape index: {}]   ;;  %s9521_s4 = inlined_call_operand.vmem [shape: f32[32,1], index: 4, kind: input, shape index: {}]   ;;  %s9522_s5 = inlined_call_operand.vmem [shape: f32[32,288], index: 5, kind: input, shape index: {}]   ;;  %s9523_s6 = inlined_call_operand.vmem [shape: f32[32,1], index: 6, kind: input, shape index: {}]   ;;  %s9524_s7 = inlined_call_operand.vmem [shape: f32[32,288], index: 7, kind: input, shape index: {}]   ;;  %s9525_s8 = inlined_call_operand.vmem [shape: f32[32,1], index: 8, kind: input, shape index: {}]   ;;  %s9526_s9 = inlined_call_operand.vmem [shape: f32[32,288], index: 9, kind: input, shape index: {}]   ;;  %s9527_s10 = inlined_call_operand.vmem [shape: f32[32,1], index: 10, kind: input, shape index: {}]   ;;  %s9528_s11 = inlined_call_operand.vmem [shape: f32[32,288], index: 11, kind: input, shape index: {}]   ;;  %s9529_s12 = inlined_call_operand.vmem [shape: f32[32,288], index: 12, kind: input, shape index: {}]   ;;  %s9530_s13 = inlined_call_operand.vmem [shape: f32[32,1], index: 13, kind: input, shape index: {}]   ;;  %s9531_s14 = inlined_call_operand.vmem [shape: f32[32,288], index: 14, kind: input, shape index: {}]   ;;  %s9532_s15 = inlined_call_operand.vmem [shape: f32[32,288], index: 15, kind: input, shape index: {}]   ;;  %s9533_s16 = inlined_call_operand.vmem [shape: f32[32,1], index: 16, kind: input, shape index: {}]   ;;  %s9534_s17 = inlined_call_operand.vmem [shape: f32[24,288], index: 17, kind: input, shape index: {}]   ;;  %s9535_s18 = inlined_call_operand.vmem [shape: f32[24,288], index: 18, kind: input, shape index: {}]   ;;  %s9536_s19 = inlined_call_operand.vmem [shape: f32[24,1], index: 19, kind: input, shape index: {}]   ;;  %s9537_s20 = inlined_call_operand.vmem [shape: f32[2,3,256], index: 20, kind: output, shape index: {0}]   ;;  %s9538_s21 = inlined_call_operand.vmem [shape: f32[2,3,256], index: 21, kind: output, shape index: {1}]   ;;  %s9539_s22 = inlined_call_operand.vmem [shape: f32[2,24,256], index: 22, kind: output, shape index: {2}]  }
   0x1   :  { %9825 = sst [smem:[#allocation233_spill]] %s9517_s0 }
   0x2   :  { %9826 = sst [smem:[#allocation234_spill]] %s9518_s1 }
   0x3   :  { %9827 = sst [smem:[#allocation235_spill]] %s9519_s2 }
   0x4   :  { %9828 = sst [smem:[#allocation236_spill]] %s9520_s3 }
   0x5   :  { %9829 = sst [smem:[#allocation237_spill]] %s9521_s4 }
   0x6   :  { %9830 = sst [smem:[#allocation238_spill]] %s9522_s5 }
   0x7   :  { %9831 = sst [smem:[#allocation239_spill]] %s9523_s6 }
   0x8   :  { %9832 = sst [smem:[#allocation240_spill]] %s9524_s7 }
   0x9   :  { %9833 = sst [smem:[#allocation241_spill]] %s9525_s8 }
   0xa   :  { %9834 = sst [smem:[#allocation242_spill]] %s9538_s21 }
   0xb   :  { %28 = vsyncpa [#allocation3], 0  ;;  %s5252_s3 = smov 0   ;;  %s5254_s28 = smov 0  }
   0xc   :  { %s5256_s29 = smov 0  }
   0xd LB: > { %9835 = sst [smem:[#allocation6_spill]] %s5120_s28  ;;  %s5268_s30 = sadd.s32 4294967295, %s5124_s29   ;;  %s5124_s29 = sphi %s5256_s29, %s10350_s29   ;;  %s5120_s28 = sphi %s5254_s28, %s10352_s28   ;;  %s5116_s3 = sphi %s5252_s3, %s10351_s3  }
   0xe   : > { %s5271_s4 = sadd.s32 1, %s5124_s29   ;;  %s88_s23 = sadd.s32 1, %s5120_s28 }
   0xf   : > { %9836 = sst [smem:[#allocation7_spill]] %s5271_s4  ;;  %s85_s0 = ssub.s32 %s5124_s29, %s5271_s4 }
  0x10   : > { %p86_p0 = scmp.eq.s32.totalorder %s85_s0, 0  ;;  %p95_p1 = scmp.ne.s32.totalorder %s5120_s28, %s5116_s3 }
  0x11   : > { %p96_p2 = scmp.eq.s32.totalorder %s5124_s29, 0  ;;  %p4954_p3 = scmp.ge.s32.totalorder %s5124_s29, 1 }
  0x12   : > { %s5281_s1 = scalar_select %p86_p0, %s5120_s28, %s88_s23  }
  0x13   : > { %p5283_p4 = por %p96_p2, %p95_p1  ;;  %p547_p5 = scmp.lt.s32.totalorder %s5124_s29, 3 }
  0x14   : > { %9837 = sst [smem:[#allocation8_spill]] %s5281_s1  ;;  %p5030_p6 = scmp.eq.s32.totalorder %s5268_s30, 0 }
  0x15   : > { %p5289_p7 = pnand %p4954_p3, %p547_p5  ;;  %s9840_s26 = sld [smem:[#allocation233_spill]] }
  0x17   : > { %p5026_p8 = pneg %p5289_p7 }
  0x19   : > { %p5027_p9 = pnand %p5030_p6, %p5026_p8 }
  0x1b   : > { %s560_s2 = sshll.u32 %s9840_s26, 4  ;;  %p5085_p11 = pneg %p5027_p9  ;;  %s561_s2 = int_to_ptr.vmem [resolvable:$true] %s560_s2 }
  0x1c   : > { %s5083_s27 = scalar_lea.vmem %s561_s2, 32  ;;  %p5091_p0 = scmp.lt.s32.totalorder %s561_s2, %s561_s2 }
  0x1d   : > { %p5084_p10 = scmp.ne.s32.totalorder %s561_s2, %s5083_s27  ;;  %p5092_p1 = scmp.lt.s32.totalorder %s5083_s27, %s5083_s27 }
  0x1f   : > { %p5086_p12 = pnand %p5085_p11, %p5084_p10  ;;  %p5093_p2 = por %p5092_p1, %p5091_p0 }
  0x21   : > { %p5087_p13 = pneg %p5086_p12 }
  0x23   : > { %p5094_p3 = pnand %p5093_p2, %p5087_p13 }
  0x25   : > { %5097 = shalt.err (!%p5094_p3)
}
  0x26   : > { %s5126_s0 = smov [#allocation2]   ;;  %p4956_p5 = scmp.ge.s32.totalorder %s5124_s29, 2 }
  0x27   : > { %5029 = dma.vmem_to_smem (!%p5027_p9), %s561_s2, 32, %s5126_s0, [#allocation3]  }
  0x28   : > { %618 = sbr.rel (%p4956_p5) target bundleno = 57 (0x39), region = 88 }
  0x2d   : > { %630 = sbr.rel (!%p5283_p4) target bundleno = 57 (0x39), region = 96  ;;  %s632_s23 = sand.u32 (%p5283_p4), 1, %s5120_s28  }
  0x2e   : > { %s5018_s6 = sshll.u32 (%p5283_p4), %s5124_s29, 4  ;;  %s4957_s25 = sshll.u32 (%p5283_p4), %s632_s23, 5 }
  0x2f   : > { %s9841_s4 = sld [smem:[#allocation235_spill]] (%p5283_p4)  ;;  %s634_s21 = scalar_lea.vmem (%p5283_p4), [#allocation4], %s4957_s25 }
  0x35   : > { %s637_s27 = scalar_lea.vmem %s9841_s4, %s5018_s6 }
  0x36   : > { %v650_v0 = vld [vmem:[%s637_s27] sm:$0xff]  ;;  %v652_v1 = vld [vmem:[%s637_s27 + $0x8] sm:$0xff] }
  0x37   : > { %v654_v2 = vld [vmem:[%s637_s27 + $0x20] sm:$0xff]  ;;  %651 = vst [vmem:[%s634_s21] sm:$0xff] %v650_v0  ;;  %653 = vst [vmem:[%s634_s21 + $0x8] sm:$0xff] %v652_v1  ;;  %v656_v3 = vld [vmem:[%s637_s27 + $0x28] sm:$0xff] }
  0x38   : > { %655 = vst [vmem:[%s634_s21 + $0x10] sm:$0xff] %v654_v2  ;;  %657 = vst [vmem:[%s634_s21 + $0x18] sm:$0xff] %v656_v3 }
  0x39 PF: > { %666 = sbr.rel (%p5289_p7) target bundleno = 3281 (0xcd1), region = 119 }
  0x3e   : > { %5111 = dma.done.wait (%p5030_p6), [#allocation3], 32  }
  0x3f   : > { %5113 = vsyncadd (%p5030_p6), [#allocation3], 4294967264  ;;  %s673_s29 = sand.u32 1, %s5116_s3  }
  0x40   : > { %s4962_s4 = sshll.u32 %s673_s29, 5 }
  0x41   : > { %s5315_s1 = scalar_lea.vmem [#allocation4], %s4962_s4 }
  0x42   : > { %679 = sfence }
  0x43   : > { %s4963_s5 = sshll.u32 %s5268_s30, 1  ;;  %s9842_s0 = sld [smem:[#allocation234_spill]]  ;;  %v9564_v6 = vmov 0.0   ;;  %v5136_v9 = vmov 0   ;;  %v778_v12 = vlaneseq  ;;  %vm979_vm8 = vcmask 588800  }
  0x44   : > { %p751_p4 = scmp.lt.s32.totalorder %s4963_s5, 3  ;;  %s9552_s6 = smov 112   ;;  %1056 = vmatprep.mubr.f32.mxu0 %v9564_v6  ;;  %5067 = vset.pattern.permute.xlu0 %v5136_v9  ;;  %v4976_v17 = vld [vmem:[%s5315_s1 + $0x10] ss:$8 sm:$0x3]  ;;  %vm1381_vm9 = vcmask 261120  }
  0x45   : > { %s9546_s3 = smov 111   ;;  %s9550_s25 = smov 113   ;;  %5068 = vset.pattern.permute.xlu1 %v5136_v9  ;;  %v786_v13 = vshrl.u32 %v778_v12, 7  ;;  %v5374_v14 = vand.u32 127, %v778_v12  ;;  %vm4665_vm10 = vcmask 1041408   ;;  %vm4734_vm11 = vcmask 1040384  }
  0x46   : > { %s10354_s5 = smov (!%p751_p4, %s4963_s5), 3  ;;  %s9548_s26 = smov 127   ;;  %v4975_v20 = vld [vmem:[%s5315_s1 + $0x7] ss:$8 sm:$0x3] }
  0x47   : > { %s4964_s21 = sshll.u32 %s10354_s5, 3  ;;  %s9560_s27 = smov 1   ;;  %v5376_v15 = vsub.s32 1, %v786_v13  ;;  %v5378_v16 = vsub.s32 0, %v786_v13  ;;  %vm911_vm0 = vcmp.lt.s32.totalorder %v5374_v14, 112  ;;  %vm933_vm1 = vcmp.lt.s32.totalorder %v5374_v14, 111 }
  0x48   : > { %s9558_s29 = smov 15   ;;  %s9556_s4 = smov 16   ;;  %v4974_v21 = vld [vmem:[%s5315_s1 + $0x6] ss:$8 sm:$0x3]  ;;  %vm889_vm2 = vcmp.lt.s32.totalorder %v5374_v14, 113 }
  0x49   : > { %s5321_s23 = scalar_lea.vmem %s9842_s0, %s4964_s21  ;;  %s9554_s5 = smov 17   ;;  %v5386_v22 = vrot.slane %v4976_v17, %v5376_v15  ;;  %v5389_v23 = vrot.slane %v4976_v17, %v5378_v16  ;;  %v5393_v26 = vrot.slane %v4975_v20, %v5376_v15  ;;  %v5396_v27 = vrot.slane %v4974_v21, %v5376_v15  ;;  %v4973_v36 = vld [vmem:[%s5315_s1 + $0x5] ss:$8 sm:$0x3] }
  0x4a   : > { %v5324_v4 = vld [vmem:[%s5321_s23] sm:$0xff]  ;;  %v5331_v5 = vld [vmem:[%s5321_s23 + $0x8] sm:$0xff]  ;;  %s9843_s24 = sld [smem:[#allocation237_spill]]  ;;  %v5405_v31 = vrot.slane %v4975_v20, %v5378_v16  ;;  %v5412_v35 = vrot.slane %v4974_v21, %v5378_v16  ;;  %vm867_vm3 = vcmp.lt.s32.totalorder %v5374_v14, 127  ;;  %v5425_v45 = vrot.slane %v4973_v36, %v5376_v15  ;;  %s9864_s21 = smov 111  }
  0x4b   : > { %907 = vrot.lane.b32.xlu1 %v5324_v4, %s9552_s6  ;;  %929 = vrot.lane.b32.xlu0 %v5324_v4, %s9546_s3  ;;  %9844 = vst [vmem:[#allocation9_spill] sm:$0xff] %v5393_v26  ;;  %9845 = vst [vmem:[#allocation10_spill] sm:$0xff] %v5396_v27  ;;  %v5428_v46 = vrot.slane %v4973_v36, %v5378_v16  ;;  %v4972_v47 = vld [vmem:[%s5315_s1 + $0x3] ss:$8 sm:$0x3]  ;;  %vm845_vm4 = vcmp.lt.s32.totalorder %v5374_v14, 1 }
  0x4c   : > { %9846 = vst [vmem:[#allocation11_spill] sm:$0xff] %v5405_v31  ;;  %9847 = vst [vmem:[#allocation12_spill] sm:$0xff] %v5412_v35  ;;  %v5439_v54 = vrot.slane %v4972_v47, %v5376_v15  ;;  %v5442_v55 = vrot.slane %v4972_v47, %v5378_v16  ;;  %v4971_v56 = vld [vmem:[%s5315_s1 + $0x2] ss:$8 sm:$0x3]  ;;  %vm823_vm5 = vcmp.lt.s32.totalorder %v5374_v14, 15 }
  0x4d   : > { %9848 = vst [vmem:[#allocation13_spill] sm:$0xff] %v5425_v45  ;;  %9849 = vst [vmem:[#allocation14_spill] sm:$0xff] %v5428_v46  ;;  %v5454_v63 = vrot.slane %v4971_v56, %v5376_v15  ;;  %v5457_v0 = vrot.slane %v4971_v56, %v5378_v16  ;;  %v4970_v1 = vld [vmem:[%s5315_s1 + $0x1] ss:$8 sm:$0x3]  ;;  %vm801_vm6 = vcmp.lt.s32.totalorder %v5374_v14, 16 }
  0x4e   : > { %vm780_vm7 = vcmp.lt.s32.totalorder %v5374_v14, 17  ;;  %s9946_s7 = sld [smem:[#allocation240_spill]]  ;;  %p757_p6 = scmp.lt.s32.totalorder %s5268_s30, 1 }
  0x4f   : > { %909 = vrot.lane.b32.xlu1 %v5331_v5, %s9552_s6  ;;  %931 = vrot.lane.b32.xlu0 %v5331_v5, %s9546_s3  ;;  %s9850_s3 = sld [smem:[#allocation236_spill]]  ;;  %s9854_s6 = smov 17  }
  0x50   : > { %v958_v7 = vld [vmem:[%s9843_s24 + $0x18] sm:$0xff]  ;;  %v957_v8 = vld [vmem:[%s9843_s24 + $0x10] sm:$0xff]  ;;  %v955_v10 = vld [vmem:[%s9843_s24] sm:$0xff]  ;;  %s9947_s8 = sld [smem:[#allocation241_spill]] }
  0x51   : > { %v956_v11 = vld [vmem:[%s9843_s24 + $0x8] sm:$0xff]  ;;  %s9939_s24 = smov 16  }
  0x53   : > { %887 = vrot.lane.b32.xlu1 %v5331_v5, %s9550_s25  ;;  %885 = vrot.lane.b32.xlu0 %v5324_v4, %s9550_s25 }
  0x55   : > { %s9851_s25 = smov %s9850_s3 }
  0x56   : > { %v954_v36 = vld [vmem:[%s9851_s25 + $0x18] sm:$0xff] }
  0x57   : > { %865 = vrot.lane.b32.xlu1 %v5331_v5, %s9548_s26  ;;  %863 = vrot.lane.b32.xlu0 %v5324_v4, %s9548_s26  ;;  %s9862_s26 = smov 113  }
  0x5b   : > { %843 = vrot.lane.b32.xlu1 %v5331_v5, %s9560_s27  ;;  %841 = vrot.lane.b32.xlu0 %v5324_v4, %s9560_s27 }
  0x5f   : > { %821 = vrot.lane.b32.xlu1 %v5331_v5, %s9558_s29  ;;  %819 = vrot.lane.b32.xlu0 %v5324_v4, %s9558_s29 }
  0x63   : > { %799 = vrot.lane.b32.xlu1 %v5331_v5, %s9556_s4  ;;  %797 = vrot.lane.b32.xlu0 %v5324_v4, %s9556_s4 }
  0x67   : > { %776 = vrot.lane.b32.xlu1 %v5331_v5, %s9554_s5  ;;  %774 = vrot.lane.b32.xlu0 %v5324_v4, %s9554_s5  ;;  %s9863_s5 = smov 127  }
  0x6b   : > { %976 = vperm.xlu0 %5067, %v958_v7   ;;  %971 = vperm.xlu1 %5068, %v957_v8  }
  0x6f   : > { %961 = vperm.xlu0 %5067, %v955_v10   ;;  %966 = vperm.xlu1 %5068, %v956_v11   ;;  %v5469_v10 = vrot.slane %v4970_v1, %v5376_v15  ;;  %v783_v11 = vld [vmem:[%s5315_s1] ss:$8 sm:$0x3]  ;;  %s9865_s1 = sld [smem:[#allocation238_spill]] }
  0x70   : > { %v5483_v21 = vrot.slane %v783_v11, %v5376_v15  ;;  %v951_v15 = vld [vmem:[%s9850_s3] sm:$0xff]  ;;  %s9855_s3 = smov 112  }
  0xbd   : > { %v908_v18 = vpop.permute.xlu1 %907  ;;  %v930_v19 = vpop.permute.xlu0 %929 }
  0xc1   : > { %v910_v24 = vpop.permute.xlu1 %909  ;;  %v932_v25 = vpop.permute.xlu0 %931 }
  0xc2   : > { %v913_v28 = vsel %vm911_vm0, %v910_v24, %v908_v18  ;;  %v935_v29 = vsel %vm933_vm1, %v932_v25, %v930_v19  ;;  %v934_v30 = vsel %vm933_vm1, %v930_v19, %v932_v25  ;;  %v912_v32 = vsel %vm911_vm0, %v908_v18, %v910_v24 }
  0xc3   : > { %v950_v33 = vmul.f32 %v5386_v22, %v935_v29  ;;  %v949_v34 = vmul.f32 %v5389_v23, %v934_v30  ;;  %v928_v39 = vmul.f32 %v5393_v26, %v913_v28  ;;  %v927_v42 = vmul.f32 %v5405_v31, %v912_v32 }
  0xc4   : > { %v5486_v24 = vrot.slane %v783_v11, %v5378_v16  ;;  %v1346_v11 = vld [vmem:[%s9865_s1 + $0x8] sm:$0xff] }
  0xc5   : > { %v888_v37 = vpop.permute.xlu1 %887  ;;  %1006 = vmatprep.subr.mxu0 %v950_v33  ;;  %v886_v38 = vpop.permute.xlu0 %885  ;;  %1458 = vmatprep.mubr.f32.mxu1 %v1346_v11 }
  0xc6   : > { %v890_v40 = vsel %vm889_vm2, %v886_v38, %v888_v37  ;;  %v891_v41 = vsel %vm889_vm2, %v888_v37, %v886_v38  ;;  %1007 = vmatpush1.msra.mxu0 %v949_v34  ;;  %v953_v34 = vld [vmem:[%s9851_s25 + $0x10] sm:$0xff] }
  0xc7   : > { %1008 = vmatprep.subr.mxu0 %v928_v39  ;;  %v906_v43 = vmul.f32 %v5396_v27, %v891_v41  ;;  %v905_v44 = vmul.f32 %v5412_v35, %v890_v40 }
  0xc8   : > { %1009 = vmatpush1.msra.mxu0 %v927_v42 }
  0xc9   : > { %v866_v48 = vpop.permute.xlu1 %865  ;;  %1010 = vmatprep.subr.mxu0 %v906_v43  ;;  %v864_v49 = vpop.permute.xlu0 %863 }
  0xca   : > { %v868_v50 = vsel %vm867_vm3, %v864_v49, %v866_v48  ;;  %v869_v51 = vsel %vm867_vm3, %v866_v48, %v864_v49  ;;  %1011 = vmatpush1.msra.mxu0 %v905_v44 }
  0xcb   : > { %v884_v52 = vmul.f32 %v5425_v45, %v869_v51  ;;  %v883_v53 = vmul.f32 %v5428_v46, %v868_v50 }
  0xcd   : > { %v844_v57 = vpop.permute.xlu1 %843  ;;  %1012 = vmatprep.subr.mxu0 %v884_v52  ;;  %v842_v58 = vpop.permute.xlu0 %841 }
  0xce   : > { %v846_v59 = vsel %vm845_vm4, %v842_v58, %v844_v57  ;;  %v847_v60 = vsel %vm845_vm4, %v844_v57, %v842_v58  ;;  %1013 = vmatpush1.msra.mxu0 %v883_v53 }
  0xcf   : > { %1014 = vmatprep.subr.mxu0 %v5331_v5  ;;  %v862_v61 = vmul.f32 %v5439_v54, %v846_v59  ;;  %v861_v62 = vmul.f32 %v5442_v55, %v847_v60 }
  0xd0   : > { %1015 = vmatpush1.msra.mxu0 %v5324_v4  ;;  %v5472_v4 = vrot.slane %v4970_v1, %v5378_v16  ;;  %v952_v16 = vld [vmem:[%s9851_s25 + $0x8] sm:$0xff] }
  0xd1   : > { %v822_v2 = vpop.permute.xlu1 %821  ;;  %1016 = vmatprep.subr.mxu0 %v862_v61  ;;  %v820_v3 = vpop.permute.xlu0 %819 }
  0xd2   : > { %v824_v5 = vsel %vm823_vm5, %v820_v3, %v822_v2  ;;  %v825_v7 = vsel %vm823_vm5, %v822_v2, %v820_v3  ;;  %1017 = vmatpush1.msra.mxu0 %v861_v62 }
  0xd3   : > { %v840_v8 = vmul.f32 %v5454_v63, %v824_v5  ;;  %v839_v9 = vmul.f32 %v5457_v0, %v825_v7 }
  0xd5   : > { %v800_v12 = vpop.permute.xlu1 %799  ;;  %1018 = vmatprep.subr.mxu0 %v840_v8  ;;  %v798_v13 = vpop.permute.xlu0 %797 }
  0xd6   : > { %v802_v17 = vsel %vm801_vm6, %v798_v13, %v800_v12  ;;  %v803_v18 = vsel %vm801_vm6, %v800_v12, %v798_v13  ;;  %1019 = vmatpush1.msra.mxu0 %v839_v9 }
  0xd7   : > { %v818_v19 = vmul.f32 %v5469_v10, %v802_v17  ;;  %v817_v20 = vmul.f32 %v5472_v4, %v803_v18 }
  0xd9   : > { %v777_v25 = vpop.permute.xlu1 %776  ;;  %1020 = vmatprep.subr.mxu0 %v818_v19  ;;  %v775_v28 = vpop.permute.xlu0 %774 }
  0xda   : > { %v781_v29 = vsel %vm780_vm7, %v775_v28, %v777_v25  ;;  %v782_v30 = vsel %vm780_vm7, %v777_v25, %v775_v28  ;;  %1021 = vmatpush1.msra.mxu0 %v817_v20 }
  0xdb   : > { %v796_v32 = vmul.f32 %v5483_v21, %v781_v29  ;;  %v795_v33 = vmul.f32 %v5486_v24, %v782_v30 }
  0xdd   : > { %1022 = vmatprep.subr.mxu0 %v796_v32 }
  0xde   : > { %1023 = vmatpush1.msra.mxu0 %v795_v33 }
  0xdf   : > { %4977 = vmatmul.mubr.msk.f32.vlgmr.msra.gmra.mxu0 %vm979_vm8, %v951_v15 }
  0xe0   : > { %1062 = vmatprep.mubr.f32.mxu0 %v9564_v6 }
  0xe3   : > { %4978 = vmatmul.mubr.msk.f32.gmra.mxu0 %vm979_vm8, %v952_v16 }
  0xe4   : > { %1068 = vmatprep.mubr.f32.mxu0 %v9564_v6 }
  0xe6   : > { %v977_v37 = vpop.permute.xlu0 %976  ;;  %v972_v47 = vpop.permute.xlu1 %971 }
  0xe7   : > { %4979 = vmatmul.mubr.msk.f32.gmra.mxu0 %vm979_vm8, %v953_v34 }
  0xe8   : > { %1074 = vmatprep.mubr.f32.mxu0 %v9564_v6 }
  0xea   : > { %v962_v38 = vpop.permute.xlu0 %961  ;;  %v967_v49 = vpop.permute.xlu1 %966 }
  0xeb   : > { %4980 = vmatmul.mubr.msk.f32.gmra.mxu0 %vm979_vm8, %v954_v36 }
  0xec   : > { %1547 = vmatprep.mubr.f32.mxu0 %v9564_v6 }
 0x19f   : > { %v1058_v39 = vpop.f32.mrf.mxu0 }
 0x1a0   : > { %v1059_v40 = vadd.f32 %v1058_v39, %v962_v38 }
 0x1a1   : > { %v1060_v41 = vpop.f32.mrf.mxu0 }
 0x1a2   : > { %v5510_v42 = vmax.f32 %v1059_v40, 0.0  ;;  %v1061_v43 = vadd.f32 %v1060_v41, %v962_v38 }
 0x1a3   : > { %v1064_v48 = vpop.f32.mrf.mxu0 }
 0x1a4   : > { %9852 = vst [vmem:[#allocation15_spill] sm:$0xff] %v5510_v42  ;;  %v5512_v44 = vmax.f32 %v1061_v43, 0.0  ;;  %1185 = vrot.lane.b32.xlu1 %v5510_v42, %s9560_s27  ;;  %v1065_v50 = vadd.f32 %v1064_v48, %v967_v49 }
 0x1a5   : > { %v1066_v51 = vpop.f32.mrf.mxu0 }
 0x1a6   : > { %9853 = vst [vmem:[#allocation16_spill] sm:$0xff] %v5512_v44  ;;  %1193 = vrot.lane.b32.xlu0 %v5512_v44, %s9560_s27  ;;  %v1067_v52 = vadd.f32 %v1066_v51, %v967_v49  ;;  %v5532_v53 = vmax.f32 %v1065_v50, 0.0 }
 0x1a7   : > { %v1070_v57 = vpop.f32.mrf.mxu0 }
 0x1a8   : > { %1153 = vrot.lane.b32.xlu1 %v5510_v42, %s9558_s29  ;;  %9856 = vst [vmem:[#allocation17_spill] sm:$0xff] %v5532_v53  ;;  %v5536_v56 = vmax.f32 %v1067_v52, 0.0  ;;  %v1071_v58 = vadd.f32 %v1070_v57, %v972_v47 }
 0x1a9   : > { %v1072_v59 = vpop.f32.mrf.mxu0 }
 0x1aa   : > { %1161 = vrot.lane.b32.xlu0 %v5512_v44, %s9558_s29  ;;  %9857 = vst [vmem:[#allocation18_spill] sm:$0xff] %v5536_v56  ;;  %v1073_v60 = vadd.f32 %v1072_v59, %v972_v47  ;;  %v5556_v61 = vmax.f32 %v1071_v58, 0.0 }
 0x1ab   : > { %v1076_v1 = vpop.f32.mrf.mxu0 }
 0x1ac   : > { %1121 = vrot.lane.b32.xlu1 %v5510_v42, %s9556_s4  ;;  %9858 = vst [vmem:[#allocation19_spill] sm:$0xff] %v5556_v61  ;;  %v5560_v62 = vmax.f32 %v1073_v60, 0.0  ;;  %v1077_v3 = vadd.f32 %v1076_v1, %v977_v37 }
 0x1ad   : > { %v1078_v2 = vpop.f32.mrf.mxu0 }
 0x1ae   : > { %1129 = vrot.lane.b32.xlu0 %v5512_v44, %s9556_s4  ;;  %9859 = vst [vmem:[#allocation20_spill] sm:$0xff] %v5560_v62  ;;  %v1079_v5 = vadd.f32 %v1078_v2, %v977_v37  ;;  %v5580_v7 = vmax.f32 %v1077_v3, 0.0 }
 0x1b0   : > { %1089 = vrot.lane.b32.xlu1 %v5510_v42, %s9854_s6  ;;  %9860 = vst [vmem:[#allocation21_spill] sm:$0xff] %v5580_v7  ;;  %v5584_v8 = vmax.f32 %v1079_v5, 0.0 }
 0x1b2   : > { %1097 = vrot.lane.b32.xlu0 %v5512_v44, %s9854_s6  ;;  %9861 = vst [vmem:[#allocation22_spill] sm:$0xff] %v5584_v8 }
 0x1b4   : > { %1281 = vrot.lane.b32.xlu1 %v5510_v42, %s9855_s3 }
 0x1b6   : > { %1289 = vrot.lane.b32.xlu0 %v5512_v44, %s9855_s3 }
 0x1b8   : > { %1187 = vrot.lane.b32.xlu1 %v5532_v53, %s9560_s27 }
 0x1ba   : > { %1195 = vrot.lane.b32.xlu0 %v5536_v56, %s9560_s27 }
 0x1bc   : > { %1155 = vrot.lane.b32.xlu1 %v5532_v53, %s9558_s29 }
 0x1be   : > { %1163 = vrot.lane.b32.xlu0 %v5536_v56, %s9558_s29 }
 0x1c0   : > { %1123 = vrot.lane.b32.xlu1 %v5532_v53, %s9556_s4 }
 0x1c2   : > { %1131 = vrot.lane.b32.xlu0 %v5536_v56, %s9556_s4 }
 0x1c4   : > { %1091 = vrot.lane.b32.xlu1 %v5532_v53, %s9854_s6 }
 0x1c6   : > { %1099 = vrot.lane.b32.xlu0 %v5536_v56, %s9854_s6 }
 0x1c8   : > { %1283 = vrot.lane.b32.xlu1 %v5532_v53, %s9855_s3 }
 0x1ca   : > { %1291 = vrot.lane.b32.xlu0 %v5536_v56, %s9855_s3 }
 0x1cc   : > { %1189 = vrot.lane.b32.xlu1 %v5556_v61, %s9560_s27 }
 0x1ce   : > { %1197 = vrot.lane.b32.xlu0 %v5560_v62, %s9560_s27 }
 0x1d0   : > { %1157 = vrot.lane.b32.xlu1 %v5556_v61, %s9558_s29 }
 0x1d2   : > { %1165 = vrot.lane.b32.xlu0 %v5560_v62, %s9558_s29 }
 0x1d4   : > { %1125 = vrot.lane.b32.xlu1 %v5556_v61, %s9556_s4 }
 0x1d6   : > { %1133 = vrot.lane.b32.xlu0 %v5560_v62, %s9556_s4 }
 0x1d8   : > { %1093 = vrot.lane.b32.xlu1 %v5556_v61, %s9854_s6 }
 0x1da   : > { %1101 = vrot.lane.b32.xlu0 %v5560_v62, %s9854_s6 }
 0x1dc   : > { %1285 = vrot.lane.b32.xlu1 %v5556_v61, %s9855_s3 }
 0x1de   : > { %1293 = vrot.lane.b32.xlu0 %v5560_v62, %s9855_s3 }
 0x1e0   : > { %1191 = vrot.lane.b32.xlu1 %v5580_v7, %s9560_s27 }
 0x1e2   : > { %1199 = vrot.lane.b32.xlu0 %v5584_v8, %s9560_s27  ;;  %s9937_s27 = smov 1  }
 0x1e4   : > { %1253 = vrot.lane.b32.xlu1 %v5556_v61, %s9862_s26 }
 0x1e6   : > { %1261 = vrot.lane.b32.xlu0 %v5560_v62, %s9862_s26 }
 0x1e8   : > { %1159 = vrot.lane.b32.xlu1 %v5580_v7, %s9558_s29 }
 0x1ea   : > { %1167 = vrot.lane.b32.xlu0 %v5584_v8, %s9558_s29  ;;  %s9938_s29 = smov 15  }
 0x1ec   : > { %1127 = vrot.lane.b32.xlu1 %v5580_v7, %s9556_s4 }
 0x1ee   : > { %1259 = vrot.lane.b32.xlu0 %v5536_v56, %s9862_s26 }
 0x1f0   : > { %1095 = vrot.lane.b32.xlu1 %v5580_v7, %s9854_s6 }
 0x1f2   : > { %1135 = vrot.lane.b32.xlu0 %v5584_v8, %s9556_s4  ;;  %s9866_s4 = sld [smem:[#allocation239_spill]] }
 0x1f4   : > { %1287 = vrot.lane.b32.xlu1 %v5580_v7, %s9855_s3 }
 0x1f6   : > { %1257 = vrot.lane.b32.xlu0 %v5512_v44, %s9862_s26 }
 0x1f8   : > { %1255 = vrot.lane.b32.xlu1 %v5580_v7, %s9862_s26  ;;  %v1360_v20 = vld [vmem:[%s9866_s4 + $0x18] sm:$0xff]  ;;  %v1359_v28 = vld [vmem:[%s9866_s4 + $0x10] sm:$0xff]  ;;  %v1358_v30 = vld [vmem:[%s9866_s4 + $0x8] sm:$0xff] }
 0x1f9   : > { %v1357_v33 = vld [vmem:[%s9866_s4] sm:$0xff] }
 0x1fa   : > { %1103 = vrot.lane.b32.xlu0 %v5584_v8, %s9854_s6 }
 0x1fc   : > { %1251 = vrot.lane.b32.xlu1 %v5532_v53, %s9862_s26 }
 0x1fe   : > { %1229 = vrot.lane.b32.xlu0 %v5560_v62, %s9863_s5 }
 0x200   : > { %1249 = vrot.lane.b32.xlu1 %v5510_v42, %s9862_s26 }
 0x202   : > { %1295 = vrot.lane.b32.xlu0 %v5584_v8, %s9855_s3 }
 0x204   : > { %1223 = vrot.lane.b32.xlu1 %v5580_v7, %s9863_s5 }
 0x206   : > { %1227 = vrot.lane.b32.xlu0 %v5536_v56, %s9863_s5 }
 0x208   : > { %1221 = vrot.lane.b32.xlu1 %v5556_v61, %s9863_s5 }
 0x20a   : > { %1263 = vrot.lane.b32.xlu0 %v5584_v8, %s9862_s26 }
 0x20c   : > { %1219 = vrot.lane.b32.xlu1 %v5532_v53, %s9863_s5 }
 0x20e   : > { %1225 = vrot.lane.b32.xlu0 %v5512_v44, %s9863_s5 }
 0x210   : > { %1217 = vrot.lane.b32.xlu1 %v5510_v42, %s9863_s5 }
 0x212   : > { %1231 = vrot.lane.b32.xlu0 %v5584_v8, %s9863_s5 }
 0x214   : > { %1319 = vrot.lane.b32.xlu1 %v5580_v7, %s9864_s21 }
 0x216   : > { %1325 = vrot.lane.b32.xlu0 %v5560_v62, %s9864_s21  ;;  %v5642_v9 = vpop.permute.xlu1 %1185 }
 0x218   : > { %v1194_v12 = vpop.permute.xlu0 %1193  ;;  %1317 = vrot.lane.b32.xlu1 %v5556_v61, %s9864_s21 }
 0x21a   : > { %1327 = vrot.lane.b32.xlu0 %v5584_v8, %s9864_s21  ;;  %v5651_v13 = vpop.permute.xlu1 %1153 }
 0x21c   : > { %v5653_v17 = vpop.permute.xlu0 %1161  ;;  %1315 = vrot.lane.b32.xlu1 %v5532_v53, %s9864_s21 }
 0x21e   : > { %1323 = vrot.lane.b32.xlu0 %v5536_v56, %s9864_s21  ;;  %v5659_v18 = vpop.permute.xlu1 %1121 }
 0x220   : > { %v5661_v19 = vpop.permute.xlu0 %1129  ;;  %1313 = vrot.lane.b32.xlu1 %v5510_v42, %s9864_s21 }
 0x222   : > { %1321 = vrot.lane.b32.xlu0 %v5512_v44, %s9864_s21  ;;  %v5670_v25 = vpop.permute.xlu1 %1089 }
 0x224   : > { %v5675_v29 = vpop.permute.xlu0 %1097  ;;  %1378 = vperm.xlu1 %5068, %v1360_v20  }
 0x226   : > { %1373 = vperm.xlu0 %5067, %v1359_v28   ;;  %v5680_v32 = vpop.permute.xlu1 %1281 }
 0x228   : > { %v5685_v15 = vpop.permute.xlu0 %1289  ;;  %1368 = vperm.xlu1 %5068, %v1358_v30  }
 0x22a   : > { %1363 = vperm.xlu0 %5067, %v1357_v33   ;;  %v1188_v16 = vpop.permute.xlu1 %1187 }
 0x22c   : > { %v1196_v34 = vpop.permute.xlu0 %1195 }
 0x22d   : > { %v1202_v42 = vsel %vm845_vm4, %v1188_v16, %v1196_v34  ;;  %v1206_v44 = vsel %vm845_vm4, %v1196_v34, %v1188_v16  ;;  %v1205_v16 = vsel %vm845_vm4, %v1194_v12, %v5642_v9 }
 0x22e   : > { %v1156_v36 = vpop.permute.xlu1 %1155 }
 0x230   : > { %v1164_v37 = vpop.permute.xlu0 %1163 }
 0x232   : > { %v5687_v38 = vpop.permute.xlu1 %1123 }
 0x234   : > { %v5689_v39 = vpop.permute.xlu0 %1131 }
 0x236   : > { %v5691_v40 = vpop.permute.xlu1 %1091 }
 0x238   : > { %v5693_v41 = vpop.permute.xlu0 %1099 }
 0x23a   : > { %v5695_v43 = vpop.permute.xlu1 %1283 }
 0x23c   : > { %v5697_v47 = vpop.permute.xlu0 %1291 }
 0x23e   : > { %v1190_v48 = vpop.permute.xlu1 %1189 }
 0x240   : > { %v1198_v49 = vpop.permute.xlu0 %1197 }
 0x241   : > { %v1203_v5 = vsel %vm845_vm4, %v1190_v48, %v1198_v49  ;;  %v1207_v28 = vsel %vm845_vm4, %v1198_v49, %v1190_v48  ;;  %v1201_v49 = vsel %vm845_vm4, %v5642_v9, %v1194_v12 }
 0x242   : > { %v1158_v50 = vpop.permute.xlu1 %1157  ;;  %v5735_v48 = vmul.f32 %v1203_v5, %v5439_v54  ;;  %v5753_v5 = vmul.f32 %v1206_v44, %v5442_v55  ;;  %v5767_v44 = vmul.f32 %v1205_v16, %v5442_v55  ;;  %v1174_v16 = vsel %vm823_vm5, %v1164_v37, %v1156_v36 }
 0x244   : > { %v1166_v51 = vpop.permute.xlu0 %1165  ;;  %9869 = vst [vmem:[#allocation25_spill] sm:$0xff] %v5735_v48  ;;  %9872 = vst [vmem:[#allocation28_spill] sm:$0xff] %v5753_v5 }
 0x245   : > { %v1171_v9 = vsel %vm823_vm5, %v1158_v50, %v1166_v51  ;;  %9874 = vst [vmem:[#allocation30_spill] sm:$0xff] %v5767_v44 }
 0x246   : > { %v5699_v52 = vpop.permute.xlu1 %1125 }
 0x248   : > { %v5701_v57 = vpop.permute.xlu0 %1133 }
 0x24a   : > { %v5703_v58 = vpop.permute.xlu1 %1093 }
 0x24c   : > { %v5705_v59 = vpop.permute.xlu0 %1101 }
 0x24e   : > { %v5707_v60 = vpop.permute.xlu1 %1285 }
 0x250   : > { %v5709_v1 = vpop.permute.xlu0 %1293 }
 0x252   : > { %v1192_v2 = vpop.permute.xlu1 %1191 }
 0x254   : > { %v1200_v3 = vpop.permute.xlu0 %1199 }
 0x255   : > { %v1204_v11 = vsel %vm845_vm4, %v1192_v2, %v1200_v3  ;;  %v1208_v20 = vsel %vm845_vm4, %v1200_v3, %v1192_v2  ;;  %v5742_v2 = vmul.f32 %v1207_v28, %v5442_v55  ;;  %v5749_v3 = vmul.f32 %v1202_v42, %v5439_v54 }
 0x256   : > { %v5719_v30 = vpop.permute.xlu1 %1253  ;;  %v5722_v33 = vmul.f32 %v1204_v11, %v5439_v54  ;;  %v5725_v6 = vmul.f32 %v1208_v20, %v5442_v55  ;;  %v5757_v20 = vmul.f32 %v1201_v49, %v5439_v54  ;;  %v1175_v28 = vsel %vm823_vm5, %v1166_v51, %v1158_v50 }
 0x257   : > { %9870 = vst [vmem:[#allocation26_spill] sm:$0xff] %v5742_v2  ;;  %9871 = vst [vmem:[#allocation27_spill] sm:$0xff] %v5749_v3  ;;  %v5787_v50 = vmul.f32 %v1171_v9, %v5454_v63  ;;  %v1169_v51 = vsel %vm823_vm5, %v5651_v13, %v5653_v17 }
 0x258   : > { %9867 = vst [vmem:[#allocation23_spill] sm:$0xff] %v5722_v33  ;;  %9868 = vst [vmem:[#allocation24_spill] sm:$0xff] %v5725_v6  ;;  %v5731_v53 = vpop.permute.xlu0 %1261  ;;  %1394 = vmatprep.subr.mxu1 %v5722_v33 }
 0x259   : > { %1395 = vmatpush1.msra.mxu1 %v5725_v6  ;;  %9873 = vst [vmem:[#allocation29_spill] sm:$0xff] %v5757_v20  ;;  %9877 = vst [vmem:[#allocation33_spill] sm:$0xff] %v5787_v50 }
 0x25a   : > { %1396 = vmatprep.subr.mxu1 %v5735_v48  ;;  %v1160_v34 = vpop.permute.xlu1 %1159 }
 0x25b   : > { %1397 = vmatpush1.msra.mxu1 %v5742_v2 }
 0x25c   : > { %v1168_v11 = vpop.permute.xlu0 %1167  ;;  %1398 = vmatprep.subr.mxu1 %v5749_v3 }
 0x25d   : > { %v1172_v12 = vsel %vm823_vm5, %v1160_v34, %v1168_v11  ;;  %v1176_v42 = vsel %vm823_vm5, %v1168_v11, %v1160_v34  ;;  %1399 = vmatpush1.msra.mxu1 %v5753_v5  ;;  %v1170_v34 = vsel %vm823_vm5, %v1156_v36, %v1164_v37  ;;  %v1173_v36 = vsel %vm823_vm5, %v5653_v17, %v5651_v13 }
 0x25e   : > { %1400 = vmatprep.subr.mxu1 %v5757_v20  ;;  %v1128_v49 = vpop.permute.xlu1 %1127  ;;  %v5773_v3 = vmul.f32 %v1172_v12, %v5454_v63  ;;  %v5776_v2 = vmul.f32 %v1176_v42, %v5457_v0  ;;  %v5795_v12 = vmul.f32 %v1175_v28, %v5457_v0  ;;  %v5803_v9 = vmul.f32 %v1170_v34, %v5454_v63 }
 0x25f   : > { %1401 = vmatpush1.msra.mxu1 %v5767_v44  ;;  %v5807_v42 = vmul.f32 %v1174_v16, %v5457_v0  ;;  %v5811_v28 = vmul.f32 %v1169_v51, %v5454_v63  ;;  %v1139_v13 = vsel %vm801_vm6, %v5699_v52, %v5701_v57  ;;  %v5823_v16 = vmul.f32 %v1173_v36, %v5457_v0 }
 0x260   : > { %9875 = vst [vmem:[#allocation31_spill] sm:$0xff] %v5773_v3  ;;  %9876 = vst [vmem:[#allocation32_spill] sm:$0xff] %v5776_v2  ;;  %v5783_v11 = vpop.permute.xlu0 %1259  ;;  %1402 = vmatprep.subr.mxu1 %v5773_v3  ;;  %v1143_v51 = vsel %vm801_vm6, %v5701_v57, %v5699_v52  ;;  %v1142_v52 = vsel %vm801_vm6, %v5689_v39, %v5687_v38  ;;  %v1137_v36 = vsel %vm801_vm6, %v5659_v18, %v5661_v19 }
 0x261   : > { %1403 = vmatpush1.msra.mxu1 %v5776_v2  ;;  %9878 = vst [vmem:[#allocation34_spill] sm:$0xff] %v5795_v12  ;;  %9879 = vst [vmem:[#allocation35_spill] sm:$0xff] %v5803_v9 }
 0x262   : > { %1404 = vmatprep.subr.mxu1 %v5787_v50  ;;  %v1096_v37 = vpop.permute.xlu1 %1095  ;;  %9880 = vst [vmem:[#allocation36_spill] sm:$0xff] %v5807_v42  ;;  %9881 = vst [vmem:[#allocation37_spill] sm:$0xff] %v5811_v28 }
 0x263   : > { %1405 = vmatpush1.msra.mxu1 %v5795_v12  ;;  %9882 = vst [vmem:[#allocation38_spill] sm:$0xff] %v5823_v16 }
 0x264   : > { %v1136_v2 = vpop.permute.xlu0 %1135  ;;  %1406 = vmatprep.subr.mxu1 %v5803_v9 }
 0x265   : > { %v1140_v17 = vsel %vm801_vm6, %v1128_v49, %v1136_v2  ;;  %v1144_v34 = vsel %vm801_vm6, %v1136_v2, %v1128_v49  ;;  %1407 = vmatpush1.msra.mxu1 %v5807_v42  ;;  %v1138_v2 = vsel %vm801_vm6, %v5687_v38, %v5689_v39  ;;  %v5849_v49 = vmul.f32 %v1139_v13, %v5469_v10 }
 0x266   : > { %1408 = vmatprep.subr.mxu1 %v5811_v28  ;;  %v1288_v9 = vpop.permute.xlu1 %1287  ;;  %v5831_v12 = vmul.f32 %v1140_v17, %v5469_v10  ;;  %v5834_v50 = vmul.f32 %v1144_v34, %v5472_v4  ;;  %v5857_v17 = vmul.f32 %v1143_v51, %v5472_v4  ;;  %v1141_v38 = vsel %vm801_vm6, %v5661_v19, %v5659_v18 }
 0x267   : > { %1409 = vmatpush1.msra.mxu1 %v5823_v16  ;;  %9885 = vst [vmem:[#allocation41_spill] sm:$0xff] %v5849_v49  ;;  %v5867_v13 = vmul.f32 %v1138_v2, %v5469_v10  ;;  %v5871_v34 = vmul.f32 %v1142_v52, %v5472_v4  ;;  %v5875_v51 = vmul.f32 %v1137_v36, %v5469_v10 }
 0x268   : > { %9883 = vst [vmem:[#allocation39_spill] sm:$0xff] %v5831_v12  ;;  %9884 = vst [vmem:[#allocation40_spill] sm:$0xff] %v5834_v50  ;;  %v5845_v57 = vpop.permute.xlu0 %1257  ;;  %1410 = vmatprep.subr.mxu1 %v5831_v12  ;;  %v1107_v18 = vsel %vm780_vm7, %v5703_v58, %v5705_v59  ;;  %v5887_v52 = vmul.f32 %v1141_v38, %v5472_v4  ;;  %v1111_v36 = vsel %vm780_vm7, %v5705_v59, %v5703_v58 }
 0x269   : > { %1411 = vmatpush1.msra.mxu1 %v5834_v50  ;;  %9886 = vst [vmem:[#allocation42_spill] sm:$0xff] %v5857_v17  ;;  %9887 = vst [vmem:[#allocation43_spill] sm:$0xff] %v5867_v13  ;;  %v1110_v58 = vsel %vm780_vm7, %v5693_v41, %v5691_v40  ;;  %v1105_v38 = vsel %vm780_vm7, %v5670_v25, %v5675_v29 }
 0x26a   : > { %1412 = vmatprep.subr.mxu1 %v5849_v49  ;;  %v5864_v39 = vpop.permute.xlu1 %1255  ;;  %9888 = vst [vmem:[#allocation44_spill] sm:$0xff] %v5871_v34  ;;  %9889 = vst [vmem:[#allocation45_spill] sm:$0xff] %v5875_v51 }
 0x26b   : > { %1413 = vmatpush1.msra.mxu1 %v5857_v17  ;;  %9890 = vst [vmem:[#allocation46_spill] sm:$0xff] %v5887_v52 }
 0x26c   : > { %v1104_v50 = vpop.permute.xlu0 %1103  ;;  %1414 = vmatprep.subr.mxu1 %v5867_v13 }
 0x26d   : > { %v1108_v19 = vsel %vm780_vm7, %v1096_v37, %v1104_v50  ;;  %v1112_v2 = vsel %vm780_vm7, %v1104_v50, %v1096_v37  ;;  %1415 = vmatpush1.msra.mxu1 %v5871_v34  ;;  %v1106_v50 = vsel %vm780_vm7, %v5691_v40, %v5693_v41  ;;  %v5913_v37 = vmul.f32 %v1107_v18, %v5483_v21 }
 0x26e   : > { %1416 = vmatprep.subr.mxu1 %v5875_v51  ;;  %v1252_v13 = vpop.permute.xlu1 %1251  ;;  %v5895_v17 = vmul.f32 %v1108_v19, %v5483_v21  ;;  %v5898_v49 = vmul.f32 %v1112_v2, %v5486_v24  ;;  %v5921_v19 = vmul.f32 %v1111_v36, %v5486_v24  ;;  %v1109_v40 = vsel %vm780_vm7, %v5675_v29, %v5670_v25 }
 0x26f   : > { %1417 = vmatpush1.msra.mxu1 %v5887_v52  ;;  %9893 = vst [vmem:[#allocation49_spill] sm:$0xff] %v5913_v37  ;;  %v5929_v18 = vmul.f32 %v1106_v50, %v5483_v21  ;;  %v5933_v2 = vmul.f32 %v1110_v58, %v5486_v24  ;;  %v5937_v36 = vmul.f32 %v1105_v38, %v5483_v21 }
 0x270   : > { %9891 = vst [vmem:[#allocation47_spill] sm:$0xff] %v5895_v17  ;;  %9892 = vst [vmem:[#allocation48_spill] sm:$0xff] %v5898_v49  ;;  %v5909_v59 = vpop.permute.xlu0 %1229  ;;  %1418 = vmatprep.subr.mxu1 %v5895_v17  ;;  %v1303_v25 = vsel %vm911_vm0, %v5709_v1, %v5707_v60  ;;  %v5949_v58 = vmul.f32 %v1109_v40, %v5486_v24  ;;  %v1299_v38 = vsel %vm911_vm0, %v5707_v60, %v5709_v1 }
 0x271   : > { %1419 = vmatpush1.msra.mxu1 %v5898_v49  ;;  %9894 = vst [vmem:[#allocation50_spill] sm:$0xff] %v5921_v19  ;;  %9895 = vst [vmem:[#allocation51_spill] sm:$0xff] %v5929_v18  ;;  %v1298_v60 = vsel %vm911_vm0, %v5695_v43, %v5697_v47  ;;  %v1301_v40 = vsel %vm911_vm0, %v5685_v15, %v5680_v32 }
 0x272   : > { %1420 = vmatprep.subr.mxu1 %v5913_v37  ;;  %v1250_v41 = vpop.permute.xlu1 %1249  ;;  %9896 = vst [vmem:[#allocation52_spill] sm:$0xff] %v5933_v2  ;;  %9897 = vst [vmem:[#allocation53_spill] sm:$0xff] %v5937_v36 }
 0x273   : > { %1421 = vmatpush1.msra.mxu1 %v5921_v19  ;;  %9898 = vst [vmem:[#allocation54_spill] sm:$0xff] %v5949_v58 }
 0x274   : > { %v1296_v49 = vpop.permute.xlu0 %1295  ;;  %1422 = vmatprep.subr.mxu1 %v5929_v18 }
 0x275   : > { %v1300_v29 = vsel %vm911_vm0, %v1288_v9, %v1296_v49  ;;  %v1304_v50 = vsel %vm911_vm0, %v1296_v49, %v1288_v9  ;;  %1423 = vmatpush1.msra.mxu1 %v5933_v2  ;;  %v1302_v9 = vsel %vm911_vm0, %v5697_v47, %v5695_v43  ;;  %v5973_v49 = vmul.f32 %v1303_v25, %v5393_v26 }
 0x276   : > { %1424 = vmatprep.subr.mxu1 %v5937_v36  ;;  %v1224_v18 = vpop.permute.xlu1 %1223  ;;  %v5957_v19 = vmul.f32 %v1304_v50, %v5393_v26  ;;  %v5960_v37 = vmul.f32 %v1300_v29, %v5405_v31  ;;  %v5981_v29 = vmul.f32 %v1299_v38, %v5405_v31  ;;  %v1297_v43 = vsel %vm911_vm0, %v5680_v32, %v5685_v15 }
 0x277   : > { %1425 = vmatpush1.msra.mxu1 %v5949_v58  ;;  %9901 = vst [vmem:[#allocation57_spill] sm:$0xff] %v5973_v49  ;;  %v5989_v25 = vmul.f32 %v1302_v9, %v5393_v26  ;;  %v5993_v50 = vmul.f32 %v1298_v60, %v5405_v31  ;;  %v5997_v38 = vmul.f32 %v1301_v40, %v5393_v26 }
 0x278   : > { %9899 = vst [vmem:[#allocation55_spill] sm:$0xff] %v5957_v19  ;;  %9900 = vst [vmem:[#allocation56_spill] sm:$0xff] %v5960_v37  ;;  %v1228_v1 = vpop.permute.xlu0 %1227  ;;  %1426 = vmatprep.subr.mxu1 %v5957_v19  ;;  %v1271_v32 = vsel %vm889_vm2, %v5731_v53, %v5719_v30  ;;  %v6011_v60 = vmul.f32 %v1297_v43, %v5405_v31  ;;  %v1267_v40 = vsel %vm889_vm2, %v5719_v30, %v5731_v53 }
 0x279   : > { %1427 = vmatpush2.msra.mxu1 %v5960_v37  ;;  %9902 = vst [vmem:[#allocation58_spill] sm:$0xff] %v5981_v29  ;;  %9903 = vst [vmem:[#allocation59_spill] sm:$0xff] %v5989_v25  ;;  %v6033_v30 = vmul.f32 %v1271_v32, %v5396_v27  ;;  %v1269_v43 = vsel %vm889_vm2, %v5845_v57, %v1250_v41 }
 0x27a   : > { %1428 = vmatprep.subr.mxu1 %v5973_v49  ;;  %v1222_v47 = vpop.permute.xlu1 %1221  ;;  %9904 = vst [vmem:[#allocation60_spill] sm:$0xff] %v5993_v50  ;;  %9905 = vst [vmem:[#allocation61_spill] sm:$0xff] %v5997_v38 }
 0x27b   : > { %1429 = vmatpush2.msra.mxu1 %v5981_v29  ;;  %9906 = vst [vmem:[#allocation62_spill] sm:$0xff] %v6011_v60  ;;  %9909 = vst [vmem:[#allocation65_spill] sm:$0xff] %v6033_v30 }
 0x27c   : > { %v1264_v37 = vpop.permute.xlu0 %1263  ;;  %1430 = vmatprep.subr.mxu1 %v5989_v25 }
 0x27d   : > { %v1268_v15 = vsel %vm889_vm2, %v5864_v39, %v1264_v37  ;;  %v1272_v9 = vsel %vm889_vm2, %v1264_v37, %v5864_v39  ;;  %1431 = vmatpush2.msra.mxu1 %v5993_v50  ;;  %v1270_v39 = vsel %vm889_vm2, %v5783_v11, %v1252_v13  ;;  %v1266_v37 = vsel %vm889_vm2, %v1252_v13, %v5783_v11 }
 0x27e   : > { %1432 = vmatprep.subr.mxu1 %v5997_v38  ;;  %v1220_v25 = vpop.permute.xlu1 %1219  ;;  %v6019_v29 = vmul.f32 %v1272_v9, %v5396_v27  ;;  %v6022_v49 = vmul.f32 %v1268_v15, %v5412_v35  ;;  %v6040_v15 = vmul.f32 %v1267_v40, %v5412_v35  ;;  %v1265_v9 = vsel %vm889_vm2, %v1250_v41, %v5845_v57 }
 0x27f   : > { %1433 = vmatpush2.msra.mxu1 %v6011_v60  ;;  %v6047_v13 = vmul.f32 %v1270_v39, %v5396_v27  ;;  %v6051_v32 = vmul.f32 %v1266_v37, %v5412_v35  ;;  %v6055_v40 = vmul.f32 %v1269_v43, %v5396_v27  ;;  %v1239_v57 = vsel %vm867_vm3, %v5909_v59, %v1222_v47 }
 0x280   : > { %9907 = vst [vmem:[#allocation63_spill] sm:$0xff] %v6019_v29  ;;  %9908 = vst [vmem:[#allocation64_spill] sm:$0xff] %v6022_v49  ;;  %v1226_v53 = vpop.permute.xlu0 %1225  ;;  %1434 = vmatprep.subr.mxu1 %v6019_v29  ;;  %v6066_v37 = vmul.f32 %v1265_v9, %v5412_v35  ;;  %v1235_v43 = vsel %vm867_vm3, %v1222_v47, %v5909_v59  ;;  %v6085_v59 = vmul.f32 %v1239_v57, %v5425_v45 }
 0x281   : > { %1435 = vmatpush2.msra.mxu1 %v6022_v49  ;;  %9910 = vst [vmem:[#allocation66_spill] sm:$0xff] %v6040_v15  ;;  %9911 = vst [vmem:[#allocation67_spill] sm:$0xff] %v6047_v13 }
 0x282   : > { %1436 = vmatprep.subr.mxu1 %v6033_v30  ;;  %v1218_v11 = vpop.permute.xlu1 %1217  ;;  %9912 = vst [vmem:[#allocation68_spill] sm:$0xff] %v6051_v32  ;;  %9913 = vst [vmem:[#allocation69_spill] sm:$0xff] %v6055_v40 }
 0x283   : > { %1437 = vmatpush2.msra.mxu1 %v6040_v15  ;;  %9914 = vst [vmem:[#allocation70_spill] sm:$0xff] %v6066_v37  ;;  %9917 = vst [vmem:[#allocation73_spill] sm:$0xff] %v6085_v59  ;;  %v1237_v47 = vsel %vm867_vm3, %v1226_v53, %v1218_v11 }
 0x284   : > { %v1232_v29 = vpop.permute.xlu0 %1231  ;;  %1438 = vmatprep.subr.mxu1 %v6047_v13 }
 0x285   : > { %v1236_v41 = vsel %vm867_vm3, %v1224_v18, %v1232_v29  ;;  %v1240_v39 = vsel %vm867_vm3, %v1232_v29, %v1224_v18  ;;  %1439 = vmatpush2.msra.mxu1 %v6051_v32  ;;  %v1238_v18 = vsel %vm867_vm3, %v1228_v1, %v1220_v25  ;;  %v1234_v29 = vsel %vm867_vm3, %v1220_v25, %v1228_v1 }
 0x286   : > { %1440 = vmatprep.subr.mxu1 %v6055_v40  ;;  %v1320_v13 = vpop.permute.xlu1 %1319  ;;  %v6073_v15 = vmul.f32 %v1240_v39, %v5425_v45  ;;  %v6076_v30 = vmul.f32 %v1236_v41, %v5428_v46  ;;  %v6091_v41 = vmul.f32 %v1235_v43, %v5428_v46  ;;  %v1233_v39 = vsel %vm867_vm3, %v1218_v11, %v1226_v53 }
 0x287   : > { %1441 = vmatpush2.msra.mxu1 %v6066_v37  ;;  %v6097_v25 = vmul.f32 %v1238_v18, %v5425_v45  ;;  %v6101_v57 = vmul.f32 %v1234_v29, %v5428_v46  ;;  %v6105_v43 = vmul.f32 %v1237_v47, %v5425_v45  ;;  %v6115_v29 = vmul.f32 %v1233_v39, %v5428_v46  ;;  %v1848_v37 = vld [vmem:[%s9947_s8] sm:$0xff] }
 0x288   : > { %9915 = vst [vmem:[#allocation71_spill] sm:$0xff] %v6073_v15  ;;  %9916 = vst [vmem:[#allocation72_spill] sm:$0xff] %v6076_v30  ;;  %v1326_v9 = vpop.permute.xlu0 %1325  ;;  %1442 = vmatprep.subr.mxu1 %v6073_v15  ;;  %v10313_v14 = vld [vmem:[#allocation67_spill] sm:$0xff] }
 0x289   : > { %1443 = vmatpush2.msra.mxu1 %v6076_v30  ;;  %9918 = vst [vmem:[#allocation74_spill] sm:$0xff] %v6091_v41  ;;  %9919 = vst [vmem:[#allocation75_spill] sm:$0xff] %v6097_v25 }
 0x28a   : > { %1444 = vmatprep.subr.mxu1 %v6085_v59  ;;  %v1318_v1 = vpop.permute.xlu1 %1317  ;;  %9920 = vst [vmem:[#allocation76_spill] sm:$0xff] %v6101_v57  ;;  %9921 = vst [vmem:[#allocation77_spill] sm:$0xff] %v6105_v43 }
 0x28b   : > { %1445 = vmatpush2.msra.mxu1 %v6091_v41  ;;  %v1335_v53 = vsel %vm933_vm1, %v1326_v9, %v1318_v1  ;;  %9922 = vst [vmem:[#allocation78_spill] sm:$0xff] %v6115_v29 }
 0x28c   : > { %v1328_v15 = vpop.permute.xlu0 %1327  ;;  %1446 = vmatprep.subr.mxu1 %v6097_v25  ;;  %v1331_v25 = vsel %vm933_vm1, %v1318_v1, %v1326_v9 }
 0x28d   : > { %v1332_v11 = vsel %vm933_vm1, %v1320_v13, %v1328_v15  ;;  %v1336_v18 = vsel %vm933_vm1, %v1328_v15, %v1320_v13  ;;  %1447 = vmatpush2.msra.mxu1 %v6101_v57  ;;  %v6130_v13 = vmul.f32 %v1335_v53, %v5386_v22  ;;  %v6133_v9 = vmul.f32 %v1331_v25, %v5389_v23  ;;  %v1849_v57 = vld [vmem:[%s9947_s8 + $0x8] sm:$0xff] }
 0x28e   : > { %v6120_v47 = vmul.f32 %v1332_v11, %v5389_v23  ;;  %1448 = vmatprep.subr.mxu1 %v6105_v43  ;;  %v1316_v41 = vpop.permute.xlu1 %1315  ;;  %v6124_v59 = vmul.f32 %v1336_v18, %v5386_v22 }
 0x28f   : > { %1449 = vmatpush2.msra.mxu1 %v6115_v29  ;;  %9925 = vst [vmem:[#allocation81_spill] sm:$0xff] %v6130_v13  ;;  %9926 = vst [vmem:[#allocation82_spill] sm:$0xff] %v6133_v9 }
 0x290   : > { %9923 = vst [vmem:[#allocation79_spill] sm:$0xff] %v6120_v47  ;;  %9924 = vst [vmem:[#allocation80_spill] sm:$0xff] %v6124_v59  ;;  %v1324_v15 = vpop.permute.xlu0 %1323  ;;  %1450 = vmatprep.subr.mxu1 %v5584_v8  ;;  %1507 = vmatprep.subr.mxu0 %v6124_v59  ;;  %v1850_v59 = vld [vmem:[%s9947_s8 + $0x10] sm:$0xff] }
 0x291   : > { %v1330_v39 = vsel %vm933_vm1, %v1316_v41, %v1324_v15  ;;  %v1334_v1 = vsel %vm933_vm1, %v1324_v15, %v1316_v41  ;;  %1451 = vmatpush2.msra.mxu1 %v5580_v7  ;;  %1508 = vmatpush1.msra.mxu0 %v6120_v47 }
 0x292   : > { %v6142_v11 = vmul.f32 %v1330_v39, %v5389_v23  ;;  %1452 = vmatprep.subr.mxu1 %v5560_v62  ;;  %1509 = vmatprep.subr.mxu0 %v6130_v13  ;;  %v6147_v25 = vmul.f32 %v1334_v1, %v5386_v22  ;;  %v1314_v53 = vpop.permute.xlu1 %1313  ;;  %v9929_v39 = vld [vmem:[#allocation17_spill] sm:$0xff] }
 0x293   : > { %1453 = vmatpush2.msra.mxu1 %v5556_v61  ;;  %1510 = vmatpush1.msra.mxu0 %v6133_v9  ;;  %v1345_v1 = vld [vmem:[%s9865_s1] sm:$0xff] }
 0x294   : > { %9927 = vst [vmem:[#allocation83_spill] sm:$0xff] %v6142_v11  ;;  %9928 = vst [vmem:[#allocation84_spill] sm:$0xff] %v6147_v25  ;;  %v1322_v41 = vpop.permute.xlu0 %1321  ;;  %1454 = vmatprep.subr.mxu1 %v5536_v56  ;;  %1511 = vmatprep.subr.mxu0 %v6147_v25  ;;  %v9931_v56 = vld [vmem:[#allocation16_spill] sm:$0xff] }
 0x295   : > { %v1329_v18 = vsel %vm933_vm1, %v1314_v53, %v1322_v41  ;;  %v1333_v15 = vsel %vm933_vm1, %v1322_v41, %v1314_v53  ;;  %1455 = vmatpush2.msra.mxu1 %v9929_v39  ;;  %1512 = vmatpush1.msra.mxu0 %v6142_v11  ;;  %v1349_v53 = vld [vmem:[%s9865_s1 + $0x20] sm:$0xff]  ;;  %v9933_v41 = vld [vmem:[#allocation15_spill] sm:$0xff] }
 0x296   : > { %v6163_v61 = vmul.f32 %v1329_v18, %v5389_v23  ;;  %1456 = vmatprep.subr.mxu1 %v9931_v56  ;;  %v6167_v25 = vmul.f32 %v1333_v15, %v5386_v22  ;;  %v1347_v39 = vld [vmem:[%s9865_s1 + $0x10] sm:$0xff]  ;;  %v1348_v18 = vld [vmem:[%s9865_s1 + $0x18] sm:$0xff]  ;;  %v1353_v56 = vld [vmem:[%s9865_s1 + $0x40] sm:$0xff] }
 0x297   : > { %1457 = vmatpush2.msra.mxu1 %v9933_v41  ;;  %v1352_v15 = vld [vmem:[%s9865_s1 + $0x38] sm:$0xff]  ;;  %v9934_v41 = vmov 0.0  }
 0x298   : > { %9930 = vst [vmem:[#allocation85_spill] sm:$0xff] %v6163_v61  ;;  %9932 = vst [vmem:[#allocation86_spill] sm:$0xff] %v6167_v25  ;;  %1459 = vmatmul.mubr.f32.vlgmr.msra.gmra.mxu1 %v1345_v1  ;;  %1513 = vmatprep.subr.mxu0 %v6167_v25  ;;  %v1350_v1 = vld [vmem:[%s9865_s1 + $0x28] sm:$0xff] }
 0x299   : > { %1514 = vmatpush1.msra.mxu0 %v6163_v61  ;;  %1464 = vmatprep.mubr.f32.mxu1 %v1349_v53  ;;  %v1351_v53 = vld [vmem:[%s9865_s1 + $0x30] sm:$0xff] }
 0x29a   : > { %4981 = vmatmul.mubr.msk.f32.vlgmr.msra.gmra.mxu0 %vm1381_vm9, %v1347_v39  ;;  %v1355_v39 = vld [vmem:[%s9865_s1 + $0x50] sm:$0xff] }
 0x29b   : > { %1553 = vmatprep.mubr.f32.mxu0 %v9934_v41 }
 0x29c   : > { %1465 = vmatmul.mubr.f32.gmra.mxu1 %v1348_v18  ;;  %v1354_v18 = vld [vmem:[%s9865_s1 + $0x48] sm:$0xff] }
 0x29d   : > { %1470 = vmatprep.mubr.f32.mxu1 %v1352_v15  ;;  %v1356_v15 = vld [vmem:[%s9865_s1 + $0x58] sm:$0xff]  ;;  %s5015_s1 = sshll.u32 %s5268_s30, 7  ;;  %s10356_s30 = smov (!%p757_p6, %s5268_s30), 1 }
 0x29e   : > { %4982 = vmatmul.mubr.msk.f32.gmra.mxu0 %vm1381_vm9, %v1350_v1  ;;  %s5021_s4 = smul.u32 48, %s10356_s30  ;;  %s5019_s2 = sshll.u32 %s10356_s30, 3 }
 0x29f   : > { %1559 = vmatprep.mubr.f32.mxu0 %v9934_v41  ;;  %v1379_v13 = vpop.permute.xlu1 %1378 }
 0x2a0   : > { %1471 = vmatmul.mubr.f32.gmra.mxu1 %v1351_v53 }
 0x2a1   : > { %1476 = vmatprep.mubr.f32.mxu1 %v1355_v39  ;;  %v1374_v1 = vpop.permute.xlu0 %1373 }
 0x2a2   : > { %4983 = vmatmul.mubr.msk.f32.gmra.mxu0 %vm1381_vm9, %v1353_v56 }
 0x2a3   : > { %1565 = vmatprep.mubr.f32.mxu0 %v9934_v41 }
 0x2a4   : > { %1477 = vmatmul.mubr.f32.gmra.mxu1 %v1354_v18 }
 0x2a5   : > { %v1364_v61 = vpop.permute.xlu0 %1363 }
 0x2a6   : > { %4984 = vmatmul.mubr.msk.f32.gmra.mxu0 %vm1381_vm9, %v1356_v15  ;;  %v1369_v15 = vpop.permute.xlu1 %1368 }
 0x358   : > { %v1460_v25 = vpop.f32.mrf.mxu1 }
 0x359   : > { %v1461_v53 = vadd.f32 %v1460_v25, %v1364_v61 }
 0x35a   : > { %v1462_v39 = vpop.f32.mrf.mxu1  ;;  %v1549_v11 = vpop.f32.mrf.mxu0 }
 0x35b   : > { %v1463_v62 = vadd.f32 %v1462_v39, %v1364_v61  ;;  %v1550_v9 = vadd.f32 %v1549_v11, %v1461_v53 }
 0x35c   : > { %v1551_v7 = vpop.f32.mrf.mxu0  ;;  %v1466_v18 = vpop.f32.mrf.mxu1 }
 0x35d   : > { %v6209_v56 = vmax.f32 %v1550_v9, 0.0  ;;  %v1552_v8 = vadd.f32 %v1551_v7, %v1463_v62  ;;  %v1467_v25 = vadd.f32 %v1466_v18, %v1369_v15 }
 0x35e   : > { %v1468_v61 = vpop.f32.mrf.mxu1  ;;  %v1555_v11 = vpop.f32.mrf.mxu0 }
 0x35f   : > { %9935 = vst [vmem:[#allocation87_spill] sm:$0xff] %v6209_v56  ;;  %v6211_v47 = vmax.f32 %v1552_v8, 0.0  ;;  %1676 = vrot.lane.b32.xlu1 %v6209_v56, %s9937_s27  ;;  %v1469_v62 = vadd.f32 %v1468_v61, %v1369_v15  ;;  %v1556_v8 = vadd.f32 %v1555_v11, %v1467_v25 }
 0x360   : > { %v1557_v7 = vpop.f32.mrf.mxu0  ;;  %v1472_v18 = vpop.f32.mrf.mxu1 }
 0x361   : > { %9936 = vst [vmem:[#allocation88_spill] sm:$0xff] %v6211_v47  ;;  %1684 = vrot.lane.b32.xlu0 %v6211_v47, %s9937_s27  ;;  %v1558_v9 = vadd.f32 %v1557_v7, %v1469_v62  ;;  %v6227_v53 = vmax.f32 %v1556_v8, 0.0  ;;  %v1473_v11 = vadd.f32 %v1472_v18, %v1374_v1 }
 0x362   : > { %v1474_v15 = vpop.f32.mrf.mxu1  ;;  %v1561_v61 = vpop.f32.mrf.mxu0 }
 0x363   : > { %1644 = vrot.lane.b32.xlu1 %v6209_v56, %s9938_s29  ;;  %9940 = vst [vmem:[#allocation89_spill] sm:$0xff] %v6227_v53  ;;  %v6231_v39 = vmax.f32 %v1558_v9, 0.0  ;;  %v1475_v25 = vadd.f32 %v1474_v15, %v1374_v1  ;;  %v1562_v7 = vadd.f32 %v1561_v61, %v1473_v11 }
 0x364   : > { %v1563_v62 = vpop.f32.mrf.mxu0  ;;  %v1478_v1 = vpop.f32.mrf.mxu1 }
 0x365   : > { %1652 = vrot.lane.b32.xlu0 %v6211_v47, %s9938_s29  ;;  %9941 = vst [vmem:[#allocation90_spill] sm:$0xff] %v6231_v39  ;;  %v1564_v8 = vadd.f32 %v1563_v62, %v1475_v25  ;;  %v6247_v9 = vmax.f32 %v1562_v7, 0.0  ;;  %v1479_v11 = vadd.f32 %v1478_v1, %v1379_v13 }
 0x366   : > { %v1480_v15 = vpop.f32.mrf.mxu1  ;;  %v1567_v61 = vpop.f32.mrf.mxu0 }
 0x367   : > { %1612 = vrot.lane.b32.xlu1 %v6209_v56, %s9939_s24  ;;  %9942 = vst [vmem:[#allocation91_spill] sm:$0xff] %v6247_v9  ;;  %v6251_v18 = vmax.f32 %v1564_v8, 0.0  ;;  %v1481_v25 = vadd.f32 %v1480_v15, %v1379_v13  ;;  %v1568_v7 = vadd.f32 %v1567_v61, %v1479_v11  ;;  %v1837_v13 = vld [vmem:[%s9946_s7 + $0x8] sm:$0xff] }
 0x368   : > { %v1569_v62 = vpop.f32.mrf.mxu0  ;;  %1948 = vmatprep.mubr.f32.mxu0 %v1837_v13 }
 0x369   : > { %1620 = vrot.lane.b32.xlu0 %v6211_v47, %s9939_s24  ;;  %9943 = vst [vmem:[#allocation92_spill] sm:$0xff] %v6251_v18  ;;  %v1570_v8 = vadd.f32 %v1569_v62, %v1481_v25  ;;  %v6271_v29 = vmax.f32 %v1568_v7, 0.0 }
 0x36b   : > { %1580 = vrot.lane.b32.xlu1 %v6209_v56, %s9854_s6  ;;  %9944 = vst [vmem:[#allocation93_spill] sm:$0xff] %v6271_v29  ;;  %v6275_v1 = vmax.f32 %v1570_v8, 0.0  ;;  %v1851_v8 = vld [vmem:[%s9947_s8 + $0x18] sm:$0xff]  ;;  %s9455_s8 = sld [smem:[#allocation2 + %s5015_s1]] }
 0x36d   : > { %1588 = vrot.lane.b32.xlu0 %v6211_v47, %s9854_s6  ;;  %9945 = vst [vmem:[#allocation94_spill] sm:$0xff] %v6275_v1 }
 0x36f   : > { %1678 = vrot.lane.b32.xlu1 %v6227_v53, %s9937_s27 }
 0x371   : > { %1686 = vrot.lane.b32.xlu0 %v6231_v39, %s9937_s27 }
 0x373   : > { %1646 = vrot.lane.b32.xlu1 %v6227_v53, %s9938_s29 }
 0x375   : > { %1654 = vrot.lane.b32.xlu0 %v6231_v39, %s9938_s29 }
 0x377   : > { %1614 = vrot.lane.b32.xlu1 %v6227_v53, %s9939_s24 }
 0x379   : > { %1622 = vrot.lane.b32.xlu0 %v6231_v39, %s9939_s24 }
 0x37b   : > { %1582 = vrot.lane.b32.xlu1 %v6227_v53, %s9854_s6 }
 0x37d   : > { %1590 = vrot.lane.b32.xlu0 %v6231_v39, %s9854_s6 }
 0x37f   : > { %1680 = vrot.lane.b32.xlu1 %v6247_v9, %s9937_s27 }
 0x381   : > { %1688 = vrot.lane.b32.xlu0 %v6251_v18, %s9937_s27 }
 0x383   : > { %1648 = vrot.lane.b32.xlu1 %v6247_v9, %s9938_s29 }
 0x385   : > { %1656 = vrot.lane.b32.xlu0 %v6251_v18, %s9938_s29 }
 0x387   : > { %1616 = vrot.lane.b32.xlu1 %v6247_v9, %s9939_s24 }
 0x389   : > { %1624 = vrot.lane.b32.xlu0 %v6251_v18, %s9939_s24 }
 0x38b   : > { %1584 = vrot.lane.b32.xlu1 %v6247_v9, %s9854_s6 }
 0x38d   : > { %1592 = vrot.lane.b32.xlu0 %v6251_v18, %s9854_s6 }
 0x38f   : > { %1776 = vrot.lane.b32.xlu1 %v6247_v9, %s9855_s3 }
 0x391   : > { %1784 = vrot.lane.b32.xlu0 %v6251_v18, %s9855_s3 }
 0x393   : > { %1682 = vrot.lane.b32.xlu1 %v6271_v29, %s9937_s27 }
 0x395   : > { %1690 = vrot.lane.b32.xlu0 %v6275_v1, %s9937_s27 }
 0x397   : > { %1774 = vrot.lane.b32.xlu1 %v6227_v53, %s9855_s3 }
 0x399   : > { %1782 = vrot.lane.b32.xlu0 %v6231_v39, %s9855_s3 }
 0x39b   : > { %1650 = vrot.lane.b32.xlu1 %v6271_v29, %s9938_s29 }
 0x39d   : > { %1658 = vrot.lane.b32.xlu0 %v6275_v1, %s9938_s29 }
 0x39f   : > { %1618 = vrot.lane.b32.xlu1 %v6271_v29, %s9939_s24 }
 0x3a1   : > { %1780 = vrot.lane.b32.xlu0 %v6211_v47, %s9855_s3 }
 0x3a3   : > { %1586 = vrot.lane.b32.xlu1 %v6271_v29, %s9854_s6 }
 0x3a5   : > { %1626 = vrot.lane.b32.xlu0 %v6275_v1, %s9939_s24 }
 0x3a7   : > { %1778 = vrot.lane.b32.xlu1 %v6271_v29, %s9855_s3 }
 0x3a9   : > { %1752 = vrot.lane.b32.xlu0 %v6251_v18, %s9862_s26 }
 0x3ab   : > { %1772 = vrot.lane.b32.xlu1 %v6209_v56, %s9855_s3 }
 0x3ad   : > { %1594 = vrot.lane.b32.xlu0 %v6275_v1, %s9854_s6 }
 0x3af   : > { %1746 = vrot.lane.b32.xlu1 %v6271_v29, %s9862_s26 }
 0x3b1   : > { %1750 = vrot.lane.b32.xlu0 %v6231_v39, %s9862_s26 }
 0x3b3   : > { %1744 = vrot.lane.b32.xlu1 %v6247_v9, %s9862_s26 }
 0x3b5   : > { %1786 = vrot.lane.b32.xlu0 %v6275_v1, %s9855_s3 }
 0x3b7   : > { %1742 = vrot.lane.b32.xlu1 %v6227_v53, %s9862_s26 }
 0x3b9   : > { %1748 = vrot.lane.b32.xlu0 %v6211_v47, %s9862_s26 }
 0x3bb   : > { %1740 = vrot.lane.b32.xlu1 %v6209_v56, %s9862_s26 }
 0x3bd   : > { %1754 = vrot.lane.b32.xlu0 %v6275_v1, %s9862_s26 }
 0x3bf   : > { %1714 = vrot.lane.b32.xlu1 %v6271_v29, %s9863_s5 }
 0x3c1   : > { %1720 = vrot.lane.b32.xlu0 %v6251_v18, %s9863_s5 }
 0x3c3   : > { %1712 = vrot.lane.b32.xlu1 %v6247_v9, %s9863_s5 }
 0x3c5   : > { %1722 = vrot.lane.b32.xlu0 %v6275_v1, %s9863_s5 }
 0x3c7   : > { %1710 = vrot.lane.b32.xlu1 %v6227_v53, %s9863_s5 }
 0x3c9   : > { %1718 = vrot.lane.b32.xlu0 %v6231_v39, %s9863_s5 }
 0x3cb   : > { %1708 = vrot.lane.b32.xlu1 %v6209_v56, %s9863_s5 }
 0x3cd   : > { %1716 = vrot.lane.b32.xlu0 %v6211_v47, %s9863_s5 }
 0x3cf   : > { %1810 = vrot.lane.b32.xlu1 %v6271_v29, %s9864_s21 }
 0x3d1   : > { %1816 = vrot.lane.b32.xlu0 %v6251_v18, %s9864_s21  ;;  %v1677_v15 = vpop.permute.xlu1 %1676 }
 0x3d3   : > { %v1685_v61 = vpop.permute.xlu0 %1684  ;;  %1808 = vrot.lane.b32.xlu1 %v6247_v9, %s9864_s21 }
 0x3d5   : > { %1818 = vrot.lane.b32.xlu0 %v6275_v1, %s9864_s21  ;;  %v6348_v11 = vpop.permute.xlu1 %1644 }
 0x3d7   : > { %v6350_v25 = vpop.permute.xlu0 %1652  ;;  %1806 = vrot.lane.b32.xlu1 %v6227_v53, %s9864_s21 }
 0x3d9   : > { %1814 = vrot.lane.b32.xlu0 %v6231_v39, %s9864_s21  ;;  %v6356_v62 = vpop.permute.xlu1 %1612 }
 0x3db   : > { %v6358_v7 = vpop.permute.xlu0 %1620  ;;  %1804 = vrot.lane.b32.xlu1 %v6209_v56, %s9864_s21 }
 0x3dd   : > { %1812 = vrot.lane.b32.xlu0 %v6211_v47, %s9864_s21  ;;  %v6367_v13 = vpop.permute.xlu1 %1580 }
 0x3df   : > { %v6372_v43 = vpop.permute.xlu0 %1588  ;;  %1869 = vperm.xlu1 %5068, %v1851_v8  }
 0x3e1   : > { %1864 = vperm.xlu0 %5067, %v1850_v59   ;;  %v1679_v30 = vpop.permute.xlu1 %1678 }
 0x3e3   : > { %v1687_v40 = vpop.permute.xlu0 %1686  ;;  %1859 = vperm.xlu1 %5068, %v1849_v57  }
 0x3e4   : > { %v1693_v48 = vsel %vm845_vm4, %v1679_v30, %v1687_v40  ;;  %v1697_v6 = vsel %vm845_vm4, %v1687_v40, %v1679_v30 }
 0x3e5   : > { %1854 = vperm.xlu0 %5067, %v1848_v37   ;;  %v1647_v32 = vpop.permute.xlu1 %1646  ;;  %v6436_v30 = vmul.f32 %v1693_v48, %v5439_v54 }
 0x3e7   : > { %v1655_v49 = vpop.permute.xlu0 %1654  ;;  %9952 = vst [vmem:[#allocation99_spill] sm:$0xff] %v6436_v30 }
 0x3e9   : > { %v6380_v60 = vpop.permute.xlu1 %1614 }
 0x3eb   : > { %v6382_v38 = vpop.permute.xlu0 %1622 }
 0x3ed   : > { %v6384_v8 = vpop.permute.xlu1 %1582 }
 0x3ef   : > { %v6386_v50 = vpop.permute.xlu0 %1590 }
 0x3f1   : > { %v1681_v19 = vpop.permute.xlu1 %1680 }
 0x3f3   : > { %v1689_v59 = vpop.permute.xlu0 %1688 }
 0x3f4   : > { %v1694_v16 = vsel %vm845_vm4, %v1681_v19, %v1689_v59  ;;  %v1698_v3 = vsel %vm845_vm4, %v1689_v59, %v1681_v19 }
 0x3f5   : > { %v1649_v58 = vpop.permute.xlu1 %1648 }
 0x3f7   : > { %v1657_v36 = vpop.permute.xlu0 %1656 }
 0x3f9   : > { %v6388_v2 = vpop.permute.xlu1 %1616 }
 0x3fb   : > { %v6390_v17 = vpop.permute.xlu0 %1624 }
 0x3fd   : > { %v6392_v57 = vpop.permute.xlu1 %1584 }
 0x3ff   : > { %v6394_v37 = vpop.permute.xlu0 %1592 }
 0x401   : > { %v6396_v52 = vpop.permute.xlu1 %1776 }
 0x403   : > { %v6398_v51 = vpop.permute.xlu0 %1784 }
 0x405   : > { %v1683_v34 = vpop.permute.xlu1 %1682 }
 0x407   : > { %v1691_v12 = vpop.permute.xlu0 %1690 }
 0x408   : > { %v1695_v28 = vsel %vm845_vm4, %v1683_v34, %v1691_v12  ;;  %v1699_v42 = vsel %vm845_vm4, %v1691_v12, %v1683_v34  ;;  %v6424_v12 = vmul.f32 %v1694_v16, %v5439_v54  ;;  %v6429_v34 = vmul.f32 %v1698_v3, %v5442_v55 }
 0x409   : > { %v6409_v44 = vmul.f32 %v1699_v42, %v5442_v55  ;;  %v6411_v20 = vpop.permute.xlu1 %1774  ;;  %v6414_v5 = vmul.f32 %v1695_v28, %v5439_v54  ;;  %v1692_v42 = vsel %vm845_vm4, %v1677_v15, %v1685_v61  ;;  %v1696_v28 = vsel %vm845_vm4, %v1685_v61, %v1677_v15 }
 0x40a   : > { %9950 = vst [vmem:[#allocation97_spill] sm:$0xff] %v6424_v12  ;;  %9951 = vst [vmem:[#allocation98_spill] sm:$0xff] %v6429_v34  ;;  %v6439_v16 = vmul.f32 %v1697_v6, %v5442_v55  ;;  %v6444_v3 = vmul.f32 %v1692_v42, %v5439_v54  ;;  %v6447_v59 = vmul.f32 %v1696_v28, %v5442_v55 }
 0x40b   : > { %9948 = vst [vmem:[#allocation95_spill] sm:$0xff] %v6409_v44  ;;  %9949 = vst [vmem:[#allocation96_spill] sm:$0xff] %v6414_v5  ;;  %v6420_v33 = vpop.permute.xlu0 %1782  ;;  %1884 = vmatprep.subr.mxu0 %v6414_v5  ;;  %v1662_v15 = vsel %vm823_vm5, %v1649_v58, %v1657_v36  ;;  %v1666_v61 = vsel %vm823_vm5, %v1657_v36, %v1649_v58  ;;  %v1660_v58 = vsel %vm823_vm5, %v6348_v11, %v6350_v25 }
 0x40c   : > { %1885 = vmatpush1.msra.mxu0 %v6409_v44  ;;  %9953 = vst [vmem:[#allocation100_spill] sm:$0xff] %v6439_v16  ;;  %9954 = vst [vmem:[#allocation101_spill] sm:$0xff] %v6444_v3  ;;  %v6474_v36 = vmul.f32 %v1662_v15, %v5454_v63 }
 0x40d   : > { %1886 = vmatprep.subr.mxu0 %v6424_v12  ;;  %v1651_v19 = vpop.permute.xlu1 %1650  ;;  %9955 = vst [vmem:[#allocation102_spill] sm:$0xff] %v6447_v59 }
 0x40e   : > { %1887 = vmatpush1.msra.mxu0 %v6429_v34  ;;  %v1661_v34 = vsel %vm823_vm5, %v1647_v32, %v1655_v49  ;;  %9958 = vst [vmem:[#allocation105_spill] sm:$0xff] %v6474_v36 }
 0x40f   : > { %v1659_v40 = vpop.permute.xlu0 %1658  ;;  %1888 = vmatprep.subr.mxu0 %v6436_v30  ;;  %v6490_v15 = vmul.f32 %v1661_v34, %v5454_v63 }
 0x410   : > { %v1663_v48 = vsel %vm823_vm5, %v1651_v19, %v1659_v40  ;;  %v1667_v6 = vsel %vm823_vm5, %v1659_v40, %v1651_v19  ;;  %1889 = vmatpush1.msra.mxu0 %v6439_v16  ;;  %v1665_v19 = vsel %vm823_vm5, %v1655_v49, %v1647_v32  ;;  %v1664_v49 = vsel %vm823_vm5, %v6350_v25, %v6348_v11 }
 0x411   : > { %v6459_v42 = vmul.f32 %v1667_v6, %v5457_v0  ;;  %1890 = vmatprep.subr.mxu0 %v6444_v3  ;;  %v1619_v28 = vpop.permute.xlu1 %1618  ;;  %v6463_v30 = vmul.f32 %v1663_v48, %v5454_v63  ;;  %v6481_v48 = vmul.f32 %v1666_v61, %v5457_v0  ;;  %9960 = vst [vmem:[#allocation107_spill] sm:$0xff] %v6490_v15 }
 0x412   : > { %1891 = vmatpush1.msra.mxu0 %v6447_v59  ;;  %v6493_v6 = vmul.f32 %v1665_v19, %v5457_v0  ;;  %v1630_v11 = vsel %vm801_vm6, %v6388_v2, %v6390_v17  ;;  %v1634_v19 = vsel %vm801_vm6, %v6390_v17, %v6388_v2  ;;  %v1633_v17 = vsel %vm801_vm6, %v6382_v38, %v6380_v60 }
 0x413   : > { %9956 = vst [vmem:[#allocation103_spill] sm:$0xff] %v6459_v42  ;;  %9957 = vst [vmem:[#allocation104_spill] sm:$0xff] %v6463_v30  ;;  %v6470_v40 = vpop.permute.xlu0 %1780  ;;  %1892 = vmatprep.subr.mxu0 %v6463_v30  ;;  %v6501_v30 = vmul.f32 %v1664_v49, %v5457_v0 }
 0x414   : > { %9959 = vst [vmem:[#allocation106_spill] sm:$0xff] %v6481_v48  ;;  %1893 = vmatpush1.msra.mxu0 %v6459_v42  ;;  %9961 = vst [vmem:[#allocation108_spill] sm:$0xff] %v6493_v6  ;;  %v6498_v42 = vmul.f32 %v1660_v58, %v5454_v63 }
 0x415   : > { %1894 = vmatprep.subr.mxu0 %v6474_v36  ;;  %v1587_v32 = vpop.permute.xlu1 %1586  ;;  %9963 = vst [vmem:[#allocation110_spill] sm:$0xff] %v6501_v30 }
 0x416   : > { %1895 = vmatpush1.msra.mxu0 %v6481_v48  ;;  %9962 = vst [vmem:[#allocation109_spill] sm:$0xff] %v6498_v42 }
 0x417   : > { %v1627_v61 = vpop.permute.xlu0 %1626  ;;  %1896 = vmatprep.subr.mxu0 %v6490_v15 }
 0x418   : > { %v1631_v25 = vsel %vm801_vm6, %v1619_v28, %v1627_v61  ;;  %v1635_v34 = vsel %vm801_vm6, %v1627_v61, %v1619_v28  ;;  %1897 = vmatpush1.msra.mxu0 %v6493_v6  ;;  %v1629_v28 = vsel %vm801_vm6, %v6380_v60, %v6382_v38  ;;  %v6536_v61 = vmul.f32 %v1630_v11, %v5469_v10 }
 0x419   : > { %v6517_v58 = vmul.f32 %v1635_v34, %v5472_v4  ;;  %1898 = vmatprep.subr.mxu0 %v6498_v42  ;;  %v1779_v49 = vpop.permute.xlu1 %1778  ;;  %v6521_v15 = vmul.f32 %v1631_v25, %v5469_v10  ;;  %v1628_v25 = vsel %vm801_vm6, %v6356_v62, %v6358_v7  ;;  %v6543_v34 = vmul.f32 %v1634_v19, %v5472_v4 }
 0x41a   : > { %1899 = vmatpush1.msra.mxu0 %v6501_v30  ;;  %9966 = vst [vmem:[#allocation113_spill] sm:$0xff] %v6536_v61  ;;  %v1632_v38 = vsel %vm801_vm6, %v6358_v7, %v6356_v62  ;;  %v6552_v11 = vmul.f32 %v1629_v28, %v5469_v10  ;;  %v1598_v62 = vsel %vm780_vm7, %v6392_v57, %v6394_v37 }
 0x41b   : > { %9964 = vst [vmem:[#allocation111_spill] sm:$0xff] %v6517_v58  ;;  %9965 = vst [vmem:[#allocation112_spill] sm:$0xff] %v6521_v15  ;;  %v6532_v2 = vpop.permute.xlu0 %1752  ;;  %1900 = vmatprep.subr.mxu0 %v6521_v15  ;;  %v6555_v15 = vmul.f32 %v1633_v17, %v5472_v4  ;;  %v6563_v30 = vmul.f32 %v1632_v38, %v5472_v4  ;;  %v1602_v17 = vsel %vm780_vm7, %v6394_v37, %v6392_v57 }
 0x41c   : > { %9967 = vst [vmem:[#allocation114_spill] sm:$0xff] %v6543_v34  ;;  %1901 = vmatpush1.msra.mxu0 %v6517_v58  ;;  %9968 = vst [vmem:[#allocation115_spill] sm:$0xff] %v6552_v11  ;;  %v6560_v58 = vmul.f32 %v1628_v25, %v5469_v10  ;;  %v1601_v57 = vsel %vm780_vm7, %v6386_v50, %v6384_v8 }
 0x41d   : > { %1902 = vmatprep.subr.mxu0 %v6536_v61  ;;  %v1773_v60 = vpop.permute.xlu1 %1772  ;;  %9969 = vst [vmem:[#allocation116_spill] sm:$0xff] %v6555_v15  ;;  %9971 = vst [vmem:[#allocation118_spill] sm:$0xff] %v6563_v30 }
 0x41e   : > { %1903 = vmatpush1.msra.mxu0 %v6543_v34  ;;  %9970 = vst [vmem:[#allocation117_spill] sm:$0xff] %v6560_v58 }
 0x41f   : > { %v1595_v19 = vpop.permute.xlu0 %1594  ;;  %1904 = vmatprep.subr.mxu0 %v6552_v11 }
 0x420   : > { %v1599_v7 = vsel %vm780_vm7, %v1587_v32, %v1595_v19  ;;  %v1603_v28 = vsel %vm780_vm7, %v1595_v19, %v1587_v32  ;;  %1905 = vmatpush1.msra.mxu0 %v6555_v15  ;;  %v1597_v32 = vsel %vm780_vm7, %v6384_v8, %v6386_v50  ;;  %v6596_v19 = vmul.f32 %v1598_v62, %v5483_v21 }
 0x421   : > { %v6579_v25 = vmul.f32 %v1603_v28, %v5486_v24  ;;  %1906 = vmatprep.subr.mxu0 %v6560_v58  ;;  %v1747_v38 = vpop.permute.xlu1 %1746  ;;  %v6583_v11 = vmul.f32 %v1599_v7, %v5483_v21  ;;  %v1596_v7 = vsel %vm780_vm7, %v6367_v13, %v6372_v43  ;;  %v6603_v28 = vmul.f32 %v1602_v17, %v5486_v24 }
 0x422   : > { %1907 = vmatpush1.msra.mxu0 %v6563_v30  ;;  %9974 = vst [vmem:[#allocation121_spill] sm:$0xff] %v6596_v19  ;;  %v1600_v50 = vsel %vm780_vm7, %v6372_v43, %v6367_v13  ;;  %v6612_v62 = vmul.f32 %v1597_v32, %v5483_v21  ;;  %v1794_v43 = vsel %vm911_vm0, %v6398_v51, %v6396_v52 }
 0x423   : > { %9972 = vst [vmem:[#allocation119_spill] sm:$0xff] %v6579_v25  ;;  %9973 = vst [vmem:[#allocation120_spill] sm:$0xff] %v6583_v11  ;;  %v1751_v37 = vpop.permute.xlu0 %1750  ;;  %1908 = vmatprep.subr.mxu0 %v6583_v11  ;;  %v6615_v11 = vmul.f32 %v1601_v57, %v5486_v24  ;;  %v6623_v30 = vmul.f32 %v1600_v50, %v5486_v24  ;;  %v1790_v57 = vsel %vm911_vm0, %v6396_v52, %v6398_v51 }
 0x424   : > { %9975 = vst [vmem:[#allocation122_spill] sm:$0xff] %v6603_v28  ;;  %1909 = vmatpush1.msra.mxu0 %v6579_v25  ;;  %9976 = vst [vmem:[#allocation123_spill] sm:$0xff] %v6612_v62  ;;  %v6620_v25 = vmul.f32 %v1596_v7, %v5483_v21  ;;  %v1789_v51 = vsel %vm911_vm0, %v6411_v20, %v6420_v33 }
 0x425   : > { %1910 = vmatprep.subr.mxu0 %v6596_v19  ;;  %v1745_v8 = vpop.permute.xlu1 %1744  ;;  %9977 = vst [vmem:[#allocation124_spill] sm:$0xff] %v6615_v11  ;;  %9979 = vst [vmem:[#allocation126_spill] sm:$0xff] %v6623_v30 }
 0x426   : > { %1911 = vmatpush1.msra.mxu0 %v6603_v28  ;;  %9978 = vst [vmem:[#allocation125_spill] sm:$0xff] %v6620_v25 }
 0x427   : > { %v1787_v17 = vpop.permute.xlu0 %1786  ;;  %1912 = vmatprep.subr.mxu0 %v6612_v62 }
 0x428   : > { %v1791_v13 = vsel %vm911_vm0, %v1779_v49, %v1787_v17  ;;  %v1795_v32 = vsel %vm911_vm0, %v1787_v17, %v1779_v49  ;;  %1913 = vmatpush1.msra.mxu0 %v6615_v11  ;;  %v1793_v49 = vsel %vm911_vm0, %v6420_v33, %v6411_v20  ;;  %v6656_v17 = vmul.f32 %v1794_v43, %v5393_v26 }
 0x429   : > { %v6639_v7 = vmul.f32 %v1791_v13, %v5405_v31  ;;  %1914 = vmatprep.subr.mxu0 %v6620_v25  ;;  %v1743_v50 = vpop.permute.xlu1 %1742  ;;  %v6643_v62 = vmul.f32 %v1795_v32, %v5393_v26  ;;  %v6659_v13 = vmul.f32 %v1790_v57, %v5405_v31  ;;  %v1792_v32 = vsel %vm911_vm0, %v6470_v40, %v1773_v60 }
 0x42a   : > { %1915 = vmatpush1.msra.mxu0 %v6623_v30  ;;  %9982 = vst [vmem:[#allocation129_spill] sm:$0xff] %v6656_v17  ;;  %v1788_v30 = vsel %vm911_vm0, %v1773_v60, %v6470_v40  ;;  %v6670_v20 = vmul.f32 %v1793_v49, %v5393_v26  ;;  %v6673_v43 = vmul.f32 %v1789_v51, %v5405_v31 }
 0x42b   : > { %9980 = vst [vmem:[#allocation127_spill] sm:$0xff] %v6639_v7  ;;  %9981 = vst [vmem:[#allocation128_spill] sm:$0xff] %v6643_v62  ;;  %v1749_v52 = vpop.permute.xlu0 %1748  ;;  %1916 = vmatprep.subr.mxu0 %v6643_v62  ;;  %v6681_v62 = vmul.f32 %v1788_v30, %v5405_v31  ;;  %v1762_v40 = vsel %vm889_vm2, %v6532_v2, %v1745_v8  ;;  %v1758_v51 = vsel %vm889_vm2, %v1745_v8, %v6532_v2 }
 0x42c   : > { %9983 = vst [vmem:[#allocation130_spill] sm:$0xff] %v6659_v13  ;;  %1917 = vmatpush2.msra.mxu0 %v6639_v7  ;;  %9984 = vst [vmem:[#allocation131_spill] sm:$0xff] %v6670_v20  ;;  %v6678_v7 = vmul.f32 %v1792_v32, %v5393_v26  ;;  %v6708_v2 = vmul.f32 %v1762_v40, %v5396_v27  ;;  %v6711_v8 = vmul.f32 %v1758_v51, %v5412_v35 }
 0x42d   : > { %1918 = vmatprep.subr.mxu0 %v6656_v17  ;;  %v1741_v33 = vpop.permute.xlu1 %1740  ;;  %9985 = vst [vmem:[#allocation132_spill] sm:$0xff] %v6673_v43  ;;  %9987 = vst [vmem:[#allocation134_spill] sm:$0xff] %v6681_v62 }
 0x42e   : > { %1919 = vmatpush2.msra.mxu0 %v6659_v13  ;;  %9986 = vst [vmem:[#allocation133_spill] sm:$0xff] %v6678_v7  ;;  %v1761_v13 = vsel %vm889_vm2, %v1751_v37, %v1743_v50  ;;  %9990 = vst [vmem:[#allocation137_spill] sm:$0xff] %v6708_v2 }
 0x42f   : > { %v1755_v57 = vpop.permute.xlu0 %1754  ;;  %1920 = vmatprep.subr.mxu0 %v6670_v20  ;;  %9991 = vst [vmem:[#allocation138_spill] sm:$0xff] %v6711_v8 }
 0x430   : > { %v1759_v60 = vsel %vm889_vm2, %v1747_v38, %v1755_v57  ;;  %v1763_v49 = vsel %vm889_vm2, %v1755_v57, %v1747_v38  ;;  %1921 = vmatpush2.msra.mxu0 %v6673_v43  ;;  %v1757_v38 = vsel %vm889_vm2, %v1743_v50, %v1751_v37  ;;  %v6720_v50 = vmul.f32 %v1761_v13, %v5396_v27 }
 0x431   : > { %v6695_v32 = vmul.f32 %v1759_v60, %v5412_v35  ;;  %1922 = vmatprep.subr.mxu0 %v6678_v7  ;;  %v1715_v30 = vpop.permute.xlu1 %1714  ;;  %v6699_v20 = vmul.f32 %v1763_v49, %v5396_v27  ;;  %v1760_v60 = vsel %vm889_vm2, %v1749_v52, %v1741_v33  ;;  %v1756_v49 = vsel %vm889_vm2, %v1741_v33, %v1749_v52 }
 0x432   : > { %1923 = vmatpush2.msra.mxu0 %v6681_v62  ;;  %9992 = vst [vmem:[#allocation139_spill] sm:$0xff] %v6720_v50  ;;  %v6723_v40 = vmul.f32 %v1757_v38, %v5412_v35 }
 0x433   : > { %9988 = vst [vmem:[#allocation135_spill] sm:$0xff] %v6695_v32  ;;  %9989 = vst [vmem:[#allocation136_spill] sm:$0xff] %v6699_v20  ;;  %v1721_v57 = vpop.permute.xlu0 %1720  ;;  %1924 = vmatprep.subr.mxu0 %v6699_v20  ;;  %v6728_v20 = vmul.f32 %v1760_v60, %v5396_v27 }
 0x434   : > { %1925 = vmatpush2.msra.mxu0 %v6695_v32  ;;  %9993 = vst [vmem:[#allocation140_spill] sm:$0xff] %v6723_v40  ;;  %v6731_v32 = vmul.f32 %v1756_v49, %v5412_v35 }
 0x435   : > { %1926 = vmatprep.subr.mxu0 %v6708_v2  ;;  %v1713_v37 = vpop.permute.xlu1 %1712  ;;  %9994 = vst [vmem:[#allocation141_spill] sm:$0xff] %v6728_v20 }
 0x436   : > { %1927 = vmatpush2.msra.mxu0 %v6711_v8  ;;  %9995 = vst [vmem:[#allocation142_spill] sm:$0xff] %v6731_v32  ;;  %v1730_v52 = vsel %vm867_vm3, %v1721_v57, %v1713_v37  ;;  %v1726_v38 = vsel %vm867_vm3, %v1713_v37, %v1721_v57 }
 0x437   : > { %v1723_v51 = vpop.permute.xlu0 %1722  ;;  %1928 = vmatprep.subr.mxu0 %v6720_v50 }
 0x438   : > { %v1727_v13 = vsel %vm867_vm3, %v1715_v30, %v1723_v51  ;;  %v1731_v33 = vsel %vm867_vm3, %v1723_v51, %v1715_v30  ;;  %1929 = vmatpush2.msra.mxu0 %v6723_v40  ;;  %v6752_v30 = vmul.f32 %v1730_v52, %v5425_v45  ;;  %v6755_v51 = vmul.f32 %v1726_v38, %v5428_v46 }
 0x439   : > { %v6743_v60 = vmul.f32 %v1727_v13, %v5428_v46  ;;  %1930 = vmatprep.subr.mxu0 %v6728_v20  ;;  %v1711_v49 = vpop.permute.xlu1 %1710  ;;  %v6747_v50 = vmul.f32 %v1731_v33, %v5425_v45 }
 0x43a   : > { %1931 = vmatpush2.msra.mxu0 %v6731_v32  ;;  %9998 = vst [vmem:[#allocation145_spill] sm:$0xff] %v6752_v30  ;;  %9999 = vst [vmem:[#allocation146_spill] sm:$0xff] %v6755_v51  ;;  %v2338_v32 = vld [vmem:[%s9527_s10] sm:$0xff] }
 0x43b   : > { %9996 = vst [vmem:[#allocation143_spill] sm:$0xff] %v6743_v60  ;;  %9997 = vst [vmem:[#allocation144_spill] sm:$0xff] %v6747_v50  ;;  %v1719_v8 = vpop.permute.xlu0 %1718  ;;  %1932 = vmatprep.subr.mxu0 %v6747_v50 }
 0x43c   : > { %v1725_v57 = vsel %vm867_vm3, %v1711_v49, %v1719_v8  ;;  %v1729_v37 = vsel %vm867_vm3, %v1719_v8, %v1711_v49  ;;  %1933 = vmatpush2.msra.mxu0 %v6743_v60 }
 0x43d   : > { %v6763_v13 = vmul.f32 %v1725_v57, %v5428_v46  ;;  %1934 = vmatprep.subr.mxu0 %v6752_v30  ;;  %v1709_v33 = vpop.permute.xlu1 %1708  ;;  %v6767_v52 = vmul.f32 %v1729_v37, %v5425_v45 }
 0x43e   : > { %1935 = vmatpush2.msra.mxu0 %v6755_v51 }
 0x43f   : > { %10000 = vst [vmem:[#allocation147_spill] sm:$0xff] %v6763_v13  ;;  %10001 = vst [vmem:[#allocation148_spill] sm:$0xff] %v6767_v52  ;;  %v1717_v38 = vpop.permute.xlu0 %1716  ;;  %1936 = vmatprep.subr.mxu0 %v6767_v52 }
 0x440   : > { %v1724_v50 = vsel %vm867_vm3, %v1709_v33, %v1717_v38  ;;  %v1728_v8 = vsel %vm867_vm3, %v1717_v38, %v1709_v33  ;;  %1937 = vmatpush2.msra.mxu0 %v6763_v13 }
 0x441   : > { %v6777_v49 = vmul.f32 %v1724_v50, %v5428_v46  ;;  %v1811_v57 = vpop.permute.xlu1 %1810  ;;  %v6780_v37 = vmul.f32 %v1728_v8, %v5425_v45 }
 0x443   : > { %10002 = vst [vmem:[#allocation149_spill] sm:$0xff] %v6777_v49  ;;  %10003 = vst [vmem:[#allocation150_spill] sm:$0xff] %v6780_v37  ;;  %v1817_v30 = vpop.permute.xlu0 %1816  ;;  %1938 = vmatprep.subr.mxu0 %v6780_v37 }
 0x444   : > { %1939 = vmatpush2.msra.mxu0 %v6777_v49 }
 0x445   : > { %1940 = vmatprep.subr.mxu0 %v6275_v1  ;;  %v1809_v52 = vpop.permute.xlu1 %1808 }
 0x446   : > { %1941 = vmatpush2.msra.mxu0 %v6271_v29  ;;  %v1826_v1 = vsel %vm933_vm1, %v1817_v30, %v1809_v52  ;;  %v1822_v29 = vsel %vm933_vm1, %v1809_v52, %v1817_v30 }
 0x447   : > { %v1819_v33 = vpop.permute.xlu0 %1818  ;;  %1942 = vmatprep.subr.mxu0 %v6251_v18  ;;  %v1836_v18 = vld [vmem:[%s9946_s7] sm:$0xff]  ;;  %v6818_v52 = vmul.f32 %v1826_v1, %v5386_v22  ;;  %v1843_v1 = vld [vmem:[%s9946_s7 + $0x38] sm:$0xff] }
 0x448   : > { %v1827_v50 = vsel %vm933_vm1, %v1819_v33, %v1811_v57  ;;  %1943 = vmatpush2.msra.mxu0 %v6247_v9  ;;  %v1823_v38 = vsel %vm933_vm1, %v1811_v57, %v1819_v33  ;;  %v1840_v33 = vld [vmem:[%s9946_s7 + $0x20] sm:$0xff] }
 0x449   : > { %1944 = vmatprep.subr.mxu0 %v6231_v39  ;;  %v1807_v8 = vpop.permute.xlu1 %1806  ;;  %v6803_v57 = vmul.f32 %v1827_v50, %v5386_v22  ;;  %v6809_v39 = vmul.f32 %v1823_v38, %v5389_v23  ;;  %10006 = vst [vmem:[#allocation153_spill] sm:$0xff] %v6818_v52  ;;  %v6821_v50 = vmul.f32 %v1822_v29, %v5389_v23  ;;  %v1839_v38 = vld [vmem:[%s9946_s7 + $0x18] sm:$0xff] }
 0x44a   : > { %1945 = vmatpush2.msra.mxu0 %v6227_v53 }
 0x44b   : > { %v1815_v49 = vpop.permute.xlu0 %1814  ;;  %1946 = vmatprep.subr.mxu0 %v6211_v47  ;;  %10004 = vst [vmem:[#allocation151_spill] sm:$0xff] %v6803_v57  ;;  %10005 = vst [vmem:[#allocation152_spill] sm:$0xff] %v6809_v39 }
 0x44c   : > { %v1825_v53 = vsel %vm933_vm1, %v1815_v49, %v1807_v8  ;;  %1947 = vmatpush2.msra.mxu0 %v6209_v56  ;;  %v1821_v30 = vsel %vm933_vm1, %v1807_v8, %v1815_v49  ;;  %10007 = vst [vmem:[#allocation154_spill] sm:$0xff] %v6821_v50 }
 0x44d   : > { %1949 = vmatmul.mubr.f32.vlgmr.msra.gmra.mxu0 %v1836_v18  ;;  %1997 = vmatprep.subr.mxu0 %v6803_v57  ;;  %v1805_v56 = vpop.permute.xlu1 %1804  ;;  %v6829_v18 = vmul.f32 %v1825_v53, %v5386_v22  ;;  %v6835_v29 = vmul.f32 %v1821_v30, %v5389_v23  ;;  %v1842_v30 = vld [vmem:[%s9946_s7 + $0x30] sm:$0xff] }
 0x44e   : > { %1998 = vmatpush1.msra.mxu0 %v6809_v39  ;;  %1954 = vmatprep.mubr.f32.mxu0 %v1840_v33 }
 0x44f   : > { %v1813_v47 = vpop.permute.xlu0 %1812  ;;  %1999 = vmatprep.subr.mxu0 %v6818_v52  ;;  %10008 = vst [vmem:[#allocation155_spill] sm:$0xff] %v6829_v18  ;;  %10009 = vst [vmem:[#allocation156_spill] sm:$0xff] %v6835_v29 }
 0x450   : > { %v1820_v49 = vsel %vm933_vm1, %v1805_v56, %v1813_v47  ;;  %v1824_v8 = vsel %vm933_vm1, %v1813_v47, %v1805_v56  ;;  %2000 = vmatpush1.msra.mxu0 %v6821_v50  ;;  %v1846_v47 = vld [vmem:[%s9946_s7 + $0x50] sm:$0xff]  ;;  %v1845_v56 = vld [vmem:[%s9946_s7 + $0x48] sm:$0xff] }
 0x451   : > { %v6843_v33 = vmul.f32 %v1820_v49, %v5389_v23  ;;  %1955 = vmatmul.mubr.f32.gmra.mxu0 %v1839_v38  ;;  %2001 = vmatprep.subr.mxu0 %v6829_v18  ;;  %v6847_v53 = vmul.f32 %v1824_v8, %v5386_v22  ;;  %v1838_v38 = vld [vmem:[%s9946_s7 + $0x10] sm:$0xff]  ;;  %v1844_v49 = vld [vmem:[%s9946_s7 + $0x40] sm:$0xff]  ;;  %v1847_v8 = vld [vmem:[%s9946_s7 + $0x58] sm:$0xff] }
 0x452   : > { %2002 = vmatpush1.msra.mxu0 %v6835_v29  ;;  %1960 = vmatprep.mubr.f32.mxu0 %v1843_v1  ;;  %v1841_v1 = vld [vmem:[%s9946_s7 + $0x28] sm:$0xff]  ;;  %s771_s7 = scalar_lea.vmem %s9539_s22, %s5021_s4 }
 0x453   : > { %10010 = vst [vmem:[#allocation157_spill] sm:$0xff] %v6843_v33  ;;  %10011 = vst [vmem:[#allocation158_spill] sm:$0xff] %v6847_v53  ;;  %2003 = vmatprep.subr.mxu0 %v6847_v53 }
 0x454   : > { %2004 = vmatpush1.msra.mxu0 %v6843_v33 }
 0x455   : > { %1961 = vmatmul.mubr.f32.gmra.mxu0 %v1842_v30 }
 0x456   : > { %1966 = vmatprep.mubr.f32.mxu0 %v1846_v47 }
 0x459   : > { %1967 = vmatmul.mubr.f32.gmra.mxu0 %v1845_v56 }
 0x45a   : > { %2037 = vmatprep.mubr.f32.mxu0 %v9934_v41  ;;  %v1870_v51 = vpop.permute.xlu1 %1869 }
 0x45d   : > { %4985 = vmatmul.mubr.msk.f32.vlgmr.msra.gmra.mxu0 %vm1381_vm9, %v1838_v38 }
 0x45e   : > { %2043 = vmatprep.mubr.f32.mxu0 %v9934_v41 }
 0x461   : > { %4986 = vmatmul.mubr.msk.f32.gmra.mxu0 %vm1381_vm9, %v1841_v1  ;;  %v1865_v1 = vpop.permute.xlu0 %1864 }
 0x462   : > { %2049 = vmatprep.mubr.f32.mxu0 %v9934_v41 }
 0x465   : > { %4987 = vmatmul.mubr.msk.f32.gmra.mxu0 %vm1381_vm9, %v1844_v49  ;;  %v1855_v9 = vpop.permute.xlu0 %1854 }
 0x466   : > { %2055 = vmatprep.mubr.f32.mxu0 %v9934_v41 }
 0x469   : > { %4988 = vmatmul.mubr.msk.f32.gmra.mxu0 %vm1381_vm9, %v1847_v8 }
 0x46a   : > { %2527 = vmatprep.mubr.f32.mxu0 %v9934_v41 }
 0x50d   : > { %v1950_v30 = vpop.f32.mrf.mxu0 }
 0x50e   : > { %v1951_v18 = vadd.f32 %v1950_v30, %v1855_v9 }
 0x50f   : > { %v1952_v47 = vpop.f32.mrf.mxu0 }
 0x510   : > { %v1953_v52 = vadd.f32 %v1952_v47, %v1855_v9  ;;  %v1860_v9 = vpop.permute.xlu1 %1859 }
 0x511   : > { %v1956_v56 = vpop.f32.mrf.mxu0 }
 0x513   : > { %v1958_v38 = vpop.f32.mrf.mxu0 }
 0x515   : > { %v1962_v33 = vpop.f32.mrf.mxu0 }
 0x517   : > { %v1964_v53 = vpop.f32.mrf.mxu0 }
 0x519   : > { %v1968_v29 = vpop.f32.mrf.mxu0 }
 0x51b   : > { %v1970_v49 = vpop.f32.mrf.mxu0 }
 0x51d   : > { %v2039_v50 = vpop.f32.mrf.mxu0 }
 0x51e   : > { %v2040_v39 = vadd.f32 %v2039_v50, %v1951_v18  ;;  %v1959_v50 = vadd.f32 %v1958_v38, %v1860_v9  ;;  %v1963_v38 = vadd.f32 %v1962_v33, %v1865_v1 }
 0x51f   : > { %v2041_v57 = vpop.f32.mrf.mxu0 }
 0x520   : > { %v6882_v37 = vmax.f32 %v2040_v39, 0.0  ;;  %v2042_v8 = vadd.f32 %v2041_v57, %v1953_v52  ;;  %v1957_v57 = vadd.f32 %v1956_v56, %v1860_v9  ;;  %v1965_v9 = vadd.f32 %v1964_v53, %v1865_v1 }
 0x521   : > { %v2045_v39 = vpop.f32.mrf.mxu0  ;;  %v1969_v53 = vadd.f32 %v1968_v29, %v1870_v51  ;;  %v2327_v29 = vld [vmem:[%s9526_s9 + $0x8] sm:$0xff] }
 0x522   : > { %10012 = vst [vmem:[#allocation159_spill] sm:$0xff] %v6882_v37  ;;  %v6884_v13 = vmax.f32 %v2042_v8, 0.0  ;;  %2166 = vrot.lane.b32.xlu1 %v6882_v37, %s9937_s27  ;;  %v2046_v18 = vadd.f32 %v2045_v39, %v1957_v57  ;;  %2438 = vmatprep.mubr.f32.mxu1 %v2327_v29  ;;  %v2339_v29 = vld [vmem:[%s9527_s10 + $0x8] sm:$0xff] }
 0x523   : > { %v2047_v52 = vpop.f32.mrf.mxu0 }
 0x524   : > { %10013 = vst [vmem:[#allocation160_spill] sm:$0xff] %v6884_v13  ;;  %2174 = vrot.lane.b32.xlu0 %v6884_v13, %s9937_s27  ;;  %v2048_v30 = vadd.f32 %v2047_v52, %v1959_v50  ;;  %v6904_v47 = vmax.f32 %v2046_v18, 0.0 }
 0x525   : > { %v2051_v56 = vpop.f32.mrf.mxu0 }
 0x526   : > { %2134 = vrot.lane.b32.xlu1 %v6882_v37, %s9938_s29  ;;  %10014 = vst [vmem:[#allocation161_spill] sm:$0xff] %v6904_v47  ;;  %v6908_v8 = vmax.f32 %v2048_v30, 0.0  ;;  %v2052_v57 = vadd.f32 %v2051_v56, %v1963_v38  ;;  %v1971_v30 = vadd.f32 %v1970_v49, %v1870_v51 }
 0x527   : > { %v2053_v39 = vpop.f32.mrf.mxu0 }
 0x528   : > { %2142 = vrot.lane.b32.xlu0 %v6884_v13, %s9938_s29  ;;  %10015 = vst [vmem:[#allocation162_spill] sm:$0xff] %v6908_v8  ;;  %v2054_v52 = vadd.f32 %v2053_v39, %v1965_v9  ;;  %v6928_v50 = vmax.f32 %v2052_v57, 0.0 }
 0x529   : > { %v2057_v33 = vpop.f32.mrf.mxu0 }
 0x52a   : > { %2102 = vrot.lane.b32.xlu1 %v6882_v37, %s9939_s24  ;;  %10016 = vst [vmem:[#allocation163_spill] sm:$0xff] %v6928_v50  ;;  %v6932_v18 = vmax.f32 %v2054_v52, 0.0  ;;  %v2058_v56 = vadd.f32 %v2057_v33, %v1969_v53 }
 0x52b   : > { %v2059_v1 = vpop.f32.mrf.mxu0 }
 0x52c   : > { %2110 = vrot.lane.b32.xlu0 %v6884_v13, %s9939_s24  ;;  %10017 = vst [vmem:[#allocation164_spill] sm:$0xff] %v6932_v18  ;;  %v2060_v38 = vadd.f32 %v2059_v1, %v1971_v30  ;;  %v6952_v39 = vmax.f32 %v2058_v56, 0.0  ;;  %v2341_v1 = vld [vmem:[%s9527_s10 + $0x18] sm:$0xff]  ;;  %v2340_v56 = vld [vmem:[%s9527_s10 + $0x10] sm:$0xff] }
 0x52e   : > { %2070 = vrot.lane.b32.xlu1 %v6882_v37, %s9854_s6  ;;  %10018 = vst [vmem:[#allocation165_spill] sm:$0xff] %v6952_v39  ;;  %v6956_v9 = vmax.f32 %v2060_v38, 0.0 }
 0x530   : > { %2078 = vrot.lane.b32.xlu0 %v6884_v13, %s9854_s6  ;;  %10019 = vst [vmem:[#allocation166_spill] sm:$0xff] %v6956_v9 }
 0x532   : > { %2262 = vrot.lane.b32.xlu1 %v6882_v37, %s9855_s3 }
 0x534   : > { %2270 = vrot.lane.b32.xlu0 %v6884_v13, %s9855_s3 }
 0x536   : > { %2168 = vrot.lane.b32.xlu1 %v6904_v47, %s9937_s27 }
 0x538   : > { %2176 = vrot.lane.b32.xlu0 %v6908_v8, %s9937_s27 }
 0x53a   : > { %2136 = vrot.lane.b32.xlu1 %v6904_v47, %s9938_s29 }
 0x53c   : > { %2144 = vrot.lane.b32.xlu0 %v6908_v8, %s9938_s29 }
 0x53e   : > { %2104 = vrot.lane.b32.xlu1 %v6904_v47, %s9939_s24 }
 0x540   : > { %2112 = vrot.lane.b32.xlu0 %v6908_v8, %s9939_s24 }
 0x542   : > { %2072 = vrot.lane.b32.xlu1 %v6904_v47, %s9854_s6 }
 0x544   : > { %2080 = vrot.lane.b32.xlu0 %v6908_v8, %s9854_s6 }
 0x546   : > { %2264 = vrot.lane.b32.xlu1 %v6904_v47, %s9855_s3 }
 0x548   : > { %2272 = vrot.lane.b32.xlu0 %v6908_v8, %s9855_s3 }
 0x54a   : > { %2170 = vrot.lane.b32.xlu1 %v6928_v50, %s9937_s27 }
 0x54c   : > { %2178 = vrot.lane.b32.xlu0 %v6932_v18, %s9937_s27 }
 0x54e   : > { %2138 = vrot.lane.b32.xlu1 %v6928_v50, %s9938_s29 }
 0x550   : > { %2146 = vrot.lane.b32.xlu0 %v6932_v18, %s9938_s29 }
 0x552   : > { %2106 = vrot.lane.b32.xlu1 %v6928_v50, %s9939_s24 }
 0x554   : > { %2114 = vrot.lane.b32.xlu0 %v6932_v18, %s9939_s24 }
 0x556   : > { %2074 = vrot.lane.b32.xlu1 %v6928_v50, %s9854_s6 }
 0x558   : > { %2082 = vrot.lane.b32.xlu0 %v6932_v18, %s9854_s6 }
 0x55a   : > { %2266 = vrot.lane.b32.xlu1 %v6928_v50, %s9855_s3 }
 0x55c   : > { %2274 = vrot.lane.b32.xlu0 %v6932_v18, %s9855_s3 }
 0x55e   : > { %2172 = vrot.lane.b32.xlu1 %v6952_v39, %s9937_s27 }
 0x560   : > { %2180 = vrot.lane.b32.xlu0 %v6956_v9, %s9937_s27 }
 0x562   : > { %2234 = vrot.lane.b32.xlu1 %v6928_v50, %s9862_s26 }
 0x564   : > { %2242 = vrot.lane.b32.xlu0 %v6932_v18, %s9862_s26 }
 0x566   : > { %2140 = vrot.lane.b32.xlu1 %v6952_v39, %s9938_s29 }
 0x568   : > { %2148 = vrot.lane.b32.xlu0 %v6956_v9, %s9938_s29 }
 0x56a   : > { %2108 = vrot.lane.b32.xlu1 %v6952_v39, %s9939_s24 }
 0x56c   : > { %2240 = vrot.lane.b32.xlu0 %v6908_v8, %s9862_s26 }
 0x56e   : > { %2076 = vrot.lane.b32.xlu1 %v6952_v39, %s9854_s6 }
 0x570   : > { %2116 = vrot.lane.b32.xlu0 %v6956_v9, %s9939_s24 }
 0x572   : > { %2268 = vrot.lane.b32.xlu1 %v6952_v39, %s9855_s3 }
 0x574   : > { %2238 = vrot.lane.b32.xlu0 %v6884_v13, %s9862_s26 }
 0x576   : > { %2236 = vrot.lane.b32.xlu1 %v6952_v39, %s9862_s26 }
 0x578   : > { %2084 = vrot.lane.b32.xlu0 %v6956_v9, %s9854_s6 }
 0x57a   : > { %2232 = vrot.lane.b32.xlu1 %v6904_v47, %s9862_s26 }
 0x57c   : > { %2210 = vrot.lane.b32.xlu0 %v6932_v18, %s9863_s5 }
 0x57e   : > { %2230 = vrot.lane.b32.xlu1 %v6882_v37, %s9862_s26 }
 0x580   : > { %2276 = vrot.lane.b32.xlu0 %v6956_v9, %s9855_s3 }
 0x582   : > { %2204 = vrot.lane.b32.xlu1 %v6952_v39, %s9863_s5 }
 0x584   : > { %2208 = vrot.lane.b32.xlu0 %v6908_v8, %s9863_s5 }
 0x586   : > { %2202 = vrot.lane.b32.xlu1 %v6928_v50, %s9863_s5 }
 0x588   : > { %2244 = vrot.lane.b32.xlu0 %v6956_v9, %s9862_s26 }
 0x58a   : > { %2200 = vrot.lane.b32.xlu1 %v6904_v47, %s9863_s5 }
 0x58c   : > { %2206 = vrot.lane.b32.xlu0 %v6884_v13, %s9863_s5 }
 0x58e   : > { %2198 = vrot.lane.b32.xlu1 %v6882_v37, %s9863_s5 }
 0x590   : > { %2212 = vrot.lane.b32.xlu0 %v6956_v9, %s9863_s5 }
 0x592   : > { %2300 = vrot.lane.b32.xlu1 %v6952_v39, %s9864_s21 }
 0x594   : > { %2306 = vrot.lane.b32.xlu0 %v6932_v18, %s9864_s21  ;;  %v7014_v51 = vpop.permute.xlu1 %2166 }
 0x596   : > { %v2175_v49 = vpop.permute.xlu0 %2174  ;;  %2298 = vrot.lane.b32.xlu1 %v6928_v50, %s9864_s21 }
 0x598   : > { %2308 = vrot.lane.b32.xlu0 %v6956_v9, %s9864_s21  ;;  %v7023_v57 = vpop.permute.xlu1 %2134 }
 0x59a   : > { %v7025_v52 = vpop.permute.xlu0 %2142  ;;  %2296 = vrot.lane.b32.xlu1 %v6904_v47, %s9864_s21 }
 0x59c   : > { %2304 = vrot.lane.b32.xlu0 %v6908_v8, %s9864_s21  ;;  %v7031_v33 = vpop.permute.xlu1 %2102 }
 0x59e   : > { %v7033_v53 = vpop.permute.xlu0 %2110  ;;  %2294 = vrot.lane.b32.xlu1 %v6882_v37, %s9864_s21 }
 0x5a0   : > { %2302 = vrot.lane.b32.xlu0 %v6884_v13, %s9864_s21  ;;  %v7042_v30 = vpop.permute.xlu1 %2070 }
 0x5a2   : > { %v7047_v38 = vpop.permute.xlu0 %2078  ;;  %2359 = vperm.xlu1 %5068, %v2341_v1  }
 0x5a4   : > { %2354 = vperm.xlu0 %5067, %v2340_v56   ;;  %v7052_v60 = vpop.permute.xlu1 %2262 }
 0x5a6   : > { %v7057_v20 = vpop.permute.xlu0 %2270  ;;  %2349 = vperm.xlu1 %5068, %v2339_v29  }
 0x5a8   : > { %2344 = vperm.xlu0 %5067, %v2338_v32   ;;  %v2169_v40 = vpop.permute.xlu1 %2168 }
 0x5aa   : > { %v2177_v2 = vpop.permute.xlu0 %2176 }
 0x5ab   : > { %v2183_v37 = vsel %vm845_vm4, %v2169_v40, %v2177_v2  ;;  %v2187_v13 = vsel %vm845_vm4, %v2177_v2, %v2169_v40 }
 0x5ac   : > { %v2137_v62 = vpop.permute.xlu1 %2136 }
 0x5ae   : > { %v2145_v7 = vpop.permute.xlu0 %2144 }
 0x5b0   : > { %v7059_v1 = vpop.permute.xlu1 %2104 }
 0x5b2   : > { %v7061_v43 = vpop.permute.xlu0 %2112 }
 0x5b4   : > { %v7063_v17 = vpop.permute.xlu1 %2072 }
 0x5b6   : > { %v7065_v56 = vpop.permute.xlu0 %2080 }
 0x5b8   : > { %v7067_v25 = vpop.permute.xlu1 %2264 }
 0x5ba   : > { %v7069_v11 = vpop.permute.xlu0 %2272 }
 0x5bc   : > { %v2171_v28 = vpop.permute.xlu1 %2170 }
 0x5be   : > { %v2179_v19 = vpop.permute.xlu0 %2178 }
 0x5bf   : > { %v2184_v59 = vsel %vm845_vm4, %v2171_v28, %v2179_v19  ;;  %v2188_v12 = vsel %vm845_vm4, %v2179_v19, %v2171_v28  ;;  %v7121_v28 = vmul.f32 %v2183_v37, %v5439_v54 }
 0x5c0   : > { %v2139_v29 = vpop.permute.xlu1 %2138 }
 0x5c1   : > { %10021 = vst [vmem:[#allocation168_spill] sm:$0xff] %v7121_v28 }
 0x5c2   : > { %v2147_v32 = vpop.permute.xlu0 %2146 }
 0x5c4   : > { %v7071_v58 = vpop.permute.xlu1 %2106 }
 0x5c6   : > { %v7073_v15 = vpop.permute.xlu0 %2114 }
 0x5c8   : > { %v7075_v34 = vpop.permute.xlu1 %2074 }
 0x5ca   : > { %v7077_v61 = vpop.permute.xlu0 %2082 }
 0x5cc   : > { %v7079_v42 = vpop.permute.xlu1 %2266 }
 0x5ce   : > { %v7081_v6 = vpop.permute.xlu0 %2274 }
 0x5d0   : > { %v2173_v48 = vpop.permute.xlu1 %2172 }
 0x5d2   : > { %v2181_v36 = vpop.permute.xlu0 %2180 }
 0x5d3   : > { %v2185_v3 = vsel %vm845_vm4, %v2173_v48, %v2181_v36  ;;  %v2189_v16 = vsel %vm845_vm4, %v2181_v36, %v2173_v48  ;;  %v7107_v36 = vmul.f32 %v2184_v59, %v5439_v54  ;;  %v2186_v48 = vsel %vm845_vm4, %v2175_v49, %v7014_v51 }
 0x5d4   : > { %v7092_v44 = vmul.f32 %v2189_v16, %v5442_v55  ;;  %v7094_v5 = vpop.permute.xlu1 %2234  ;;  %v7097_v41 = vmul.f32 %v2185_v3, %v5439_v54  ;;  %v2182_v16 = vsel %vm845_vm4, %v7014_v51, %v2175_v49  ;;  %v7113_v3 = vmul.f32 %v2188_v12, %v5442_v55 }
 0x5d5   : > { %v7124_v59 = vmul.f32 %v2187_v13, %v5442_v55  ;;  %v7129_v12 = vmul.f32 %v2182_v16, %v5439_v54  ;;  %v7132_v40 = vmul.f32 %v2186_v48, %v5442_v55  ;;  %v2152_v51 = vsel %vm823_vm5, %v2139_v29, %v2147_v32 }
 0x5d6   : > { %v7103_v47 = vpop.permute.xlu0 %2242  ;;  %2374 = vmatprep.subr.mxu1 %v7097_v41  ;;  %10020 = vst [vmem:[#allocation167_spill] sm:$0xff] %v7113_v3  ;;  %v2156_v49 = vsel %vm823_vm5, %v2147_v32, %v2139_v29  ;;  %v7159_v29 = vmul.f32 %v2152_v51, %v5454_v63  ;;  %v2150_v32 = vsel %vm823_vm5, %v7023_v57, %v7025_v52 }
 0x5d7   : > { %2375 = vmatpush1.msra.mxu1 %v7092_v44 }
 0x5d8   : > { %2376 = vmatprep.subr.mxu1 %v7107_v36  ;;  %v2141_v19 = vpop.permute.xlu1 %2140 }
 0x5d9   : > { %2377 = vmatpush1.msra.mxu1 %v7113_v3  ;;  %v2151_v3 = vsel %vm823_vm5, %v2137_v62, %v2145_v7 }
 0x5da   : > { %v2149_v2 = vpop.permute.xlu0 %2148  ;;  %2378 = vmatprep.subr.mxu1 %v7121_v28  ;;  %v7175_v51 = vmul.f32 %v2151_v3, %v5454_v63 }
 0x5db   : > { %v2153_v37 = vsel %vm823_vm5, %v2141_v19, %v2149_v2  ;;  %v2157_v13 = vsel %vm823_vm5, %v2149_v2, %v2141_v19  ;;  %2379 = vmatpush1.msra.mxu1 %v7124_v59  ;;  %v2155_v19 = vsel %vm823_vm5, %v2145_v7, %v2137_v62  ;;  %v2154_v62 = vsel %vm823_vm5, %v7025_v52, %v7023_v57 }
 0x5dc   : > { %v7144_v16 = vmul.f32 %v2157_v13, %v5457_v0  ;;  %2380 = vmatprep.subr.mxu1 %v7129_v12  ;;  %v2109_v48 = vpop.permute.xlu1 %2108  ;;  %v7148_v28 = vmul.f32 %v2153_v37, %v5454_v63  ;;  %v7166_v37 = vmul.f32 %v2156_v49, %v5457_v0  ;;  %10024 = vst [vmem:[#allocation171_spill] sm:$0xff] %v7175_v51 }
 0x5dd   : > { %2381 = vmatpush1.msra.mxu1 %v7132_v40  ;;  %v7178_v13 = vmul.f32 %v2155_v19, %v5457_v0  ;;  %v2120_v57 = vsel %vm801_vm6, %v7071_v58, %v7073_v15  ;;  %v2124_v19 = vsel %vm801_vm6, %v7073_v15, %v7071_v58  ;;  %v2123_v15 = vsel %vm801_vm6, %v7061_v43, %v7059_v1 }
 0x5de   : > { %10022 = vst [vmem:[#allocation169_spill] sm:$0xff] %v7144_v16  ;;  %10023 = vst [vmem:[#allocation170_spill] sm:$0xff] %v7148_v28  ;;  %v7155_v2 = vpop.permute.xlu0 %2240  ;;  %2382 = vmatprep.subr.mxu1 %v7148_v28  ;;  %v7186_v28 = vmul.f32 %v2154_v62, %v5457_v0 }
 0x5df   : > { %2383 = vmatpush1.msra.mxu1 %v7144_v16  ;;  %v7183_v16 = vmul.f32 %v2150_v32, %v5454_v63 }
 0x5e0   : > { %2384 = vmatprep.subr.mxu1 %v7159_v29  ;;  %v2077_v7 = vpop.permute.xlu1 %2076  ;;  %10025 = vst [vmem:[#allocation172_spill] sm:$0xff] %v7186_v28 }
 0x5e1   : > { %2385 = vmatpush1.msra.mxu1 %v7166_v37 }
 0x5e2   : > { %v2117_v49 = vpop.permute.xlu0 %2116  ;;  %2386 = vmatprep.subr.mxu1 %v7175_v51 }
 0x5e3   : > { %v2121_v52 = vsel %vm801_vm6, %v2109_v48, %v2117_v49  ;;  %v2125_v3 = vsel %vm801_vm6, %v2117_v49, %v2109_v48  ;;  %2387 = vmatpush1.msra.mxu1 %v7178_v13  ;;  %v2119_v48 = vsel %vm801_vm6, %v7059_v1, %v7061_v43  ;;  %v7221_v49 = vmul.f32 %v2120_v57, %v5469_v10 }
 0x5e4   : > { %v7202_v32 = vmul.f32 %v2125_v3, %v5472_v4  ;;  %2388 = vmatprep.subr.mxu1 %v7183_v16  ;;  %v2269_v62 = vpop.permute.xlu1 %2268  ;;  %v7206_v51 = vmul.f32 %v2121_v52, %v5469_v10  ;;  %v2118_v52 = vsel %vm801_vm6, %v7031_v33, %v7033_v53  ;;  %v7228_v3 = vmul.f32 %v2124_v19, %v5472_v4 }
 0x5e5   : > { %2389 = vmatpush1.msra.mxu1 %v7186_v28  ;;  %10028 = vst [vmem:[#allocation175_spill] sm:$0xff] %v7221_v49  ;;  %v2122_v43 = vsel %vm801_vm6, %v7033_v53, %v7031_v33  ;;  %v7239_v57 = vmul.f32 %v2119_v48, %v5469_v10  ;;  %v2088_v53 = vsel %vm780_vm7, %v7075_v34, %v7077_v61 }
 0x5e6   : > { %10026 = vst [vmem:[#allocation173_spill] sm:$0xff] %v7202_v32  ;;  %10027 = vst [vmem:[#allocation174_spill] sm:$0xff] %v7206_v51  ;;  %v7217_v58 = vpop.permute.xlu0 %2238  ;;  %2390 = vmatprep.subr.mxu1 %v7206_v51  ;;  %v7242_v51 = vmul.f32 %v2123_v15, %v5472_v4  ;;  %v7250_v33 = vmul.f32 %v2122_v43, %v5472_v4 }
 0x5e7   : > { %10029 = vst [vmem:[#allocation176_spill] sm:$0xff] %v7228_v3  ;;  %2391 = vmatpush1.msra.mxu1 %v7202_v32  ;;  %10030 = vst [vmem:[#allocation177_spill] sm:$0xff] %v7239_v57  ;;  %v7247_v32 = vmul.f32 %v2118_v52, %v5469_v10  ;;  %v2092_v52 = vsel %vm780_vm7, %v7077_v61, %v7075_v34  ;;  %v2091_v61 = vsel %vm780_vm7, %v7065_v56, %v7063_v17 }
 0x5e8   : > { %2392 = vmatprep.subr.mxu1 %v7221_v49  ;;  %v7236_v1 = vpop.permute.xlu1 %2236  ;;  %10031 = vst [vmem:[#allocation178_spill] sm:$0xff] %v7242_v51  ;;  %10033 = vst [vmem:[#allocation180_spill] sm:$0xff] %v7250_v33 }
 0x5e9   : > { %2393 = vmatpush1.msra.mxu1 %v7228_v3  ;;  %10032 = vst [vmem:[#allocation179_spill] sm:$0xff] %v7247_v32 }
 0x5ea   : > { %v2085_v19 = vpop.permute.xlu0 %2084  ;;  %2394 = vmatprep.subr.mxu1 %v7239_v57 }
 0x5eb   : > { %v2089_v48 = vsel %vm780_vm7, %v2077_v7, %v2085_v19  ;;  %v2093_v15 = vsel %vm780_vm7, %v2085_v19, %v2077_v7  ;;  %2395 = vmatpush1.msra.mxu1 %v7242_v51  ;;  %v2087_v7 = vsel %vm780_vm7, %v7063_v17, %v7065_v56  ;;  %v7285_v19 = vmul.f32 %v2088_v53, %v5483_v21 }
 0x5ec   : > { %v7266_v43 = vmul.f32 %v2093_v15, %v5486_v24  ;;  %2396 = vmatprep.subr.mxu1 %v7247_v32  ;;  %v2233_v57 = vpop.permute.xlu1 %2232  ;;  %v7270_v3 = vmul.f32 %v2089_v48, %v5483_v21  ;;  %v2086_v48 = vsel %vm780_vm7, %v7042_v30, %v7047_v38  ;;  %v7292_v15 = vmul.f32 %v2092_v52, %v5486_v24 }
 0x5ed   : > { %2397 = vmatpush1.msra.mxu1 %v7250_v33  ;;  %10036 = vst [vmem:[#allocation183_spill] sm:$0xff] %v7285_v19  ;;  %v2090_v17 = vsel %vm780_vm7, %v7047_v38, %v7042_v30  ;;  %v7301_v53 = vmul.f32 %v2087_v7, %v5483_v21  ;;  %v2284_v30 = vsel %vm911_vm0, %v7081_v6, %v7079_v42 }
 0x5ee   : > { %10034 = vst [vmem:[#allocation181_spill] sm:$0xff] %v7266_v43  ;;  %10035 = vst [vmem:[#allocation182_spill] sm:$0xff] %v7270_v3  ;;  %v7281_v34 = vpop.permute.xlu0 %2210  ;;  %2398 = vmatprep.subr.mxu1 %v7270_v3  ;;  %v7304_v3 = vmul.f32 %v2091_v61, %v5486_v24  ;;  %v7312_v33 = vmul.f32 %v2090_v17, %v5486_v24  ;;  %v2280_v61 = vsel %vm911_vm0, %v7079_v42, %v7081_v6 }
 0x5ef   : > { %10037 = vst [vmem:[#allocation184_spill] sm:$0xff] %v7292_v15  ;;  %2399 = vmatpush1.msra.mxu1 %v7266_v43  ;;  %10038 = vst [vmem:[#allocation185_spill] sm:$0xff] %v7301_v53  ;;  %v7309_v43 = vmul.f32 %v2086_v48, %v5483_v21  ;;  %v2279_v42 = vsel %vm911_vm0, %v7067_v25, %v7069_v11 }
 0x5f0   : > { %2400 = vmatprep.subr.mxu1 %v7285_v19  ;;  %v2231_v56 = vpop.permute.xlu1 %2230  ;;  %10039 = vst [vmem:[#allocation186_spill] sm:$0xff] %v7304_v3  ;;  %10041 = vst [vmem:[#allocation188_spill] sm:$0xff] %v7312_v33 }
 0x5f1   : > { %2401 = vmatpush1.msra.mxu1 %v7292_v15  ;;  %10040 = vst [vmem:[#allocation187_spill] sm:$0xff] %v7309_v43 }
 0x5f2   : > { %v2277_v52 = vpop.permute.xlu0 %2276  ;;  %2402 = vmatprep.subr.mxu1 %v7301_v53 }
 0x5f3   : > { %v2281_v38 = vsel %vm911_vm0, %v2269_v62, %v2277_v52  ;;  %v2285_v7 = vsel %vm911_vm0, %v2277_v52, %v2269_v62  ;;  %2403 = vmatpush1.msra.mxu1 %v7304_v3  ;;  %v2283_v62 = vsel %vm911_vm0, %v7069_v11, %v7067_v25  ;;  %v7345_v52 = vmul.f32 %v2284_v30, %v5393_v26 }
 0x5f4   : > { %v7328_v48 = vmul.f32 %v2281_v38, %v5405_v31  ;;  %2404 = vmatprep.subr.mxu1 %v7309_v43  ;;  %v2205_v17 = vpop.permute.xlu1 %2204  ;;  %v7332_v53 = vmul.f32 %v2285_v7, %v5393_v26  ;;  %v2282_v38 = vsel %vm911_vm0, %v7057_v20, %v7052_v60  ;;  %v7352_v7 = vmul.f32 %v2280_v61, %v5405_v31 }
 0x5f5   : > { %2405 = vmatpush1.msra.mxu1 %v7312_v33  ;;  %10044 = vst [vmem:[#allocation191_spill] sm:$0xff] %v7345_v52  ;;  %v2278_v11 = vsel %vm911_vm0, %v7052_v60, %v7057_v20  ;;  %v7361_v30 = vmul.f32 %v2283_v62, %v5393_v26  ;;  %v2252_v20 = vsel %vm889_vm2, %v7103_v47, %v7094_v5 }
 0x5f6   : > { %10042 = vst [vmem:[#allocation189_spill] sm:$0xff] %v7328_v48  ;;  %10043 = vst [vmem:[#allocation190_spill] sm:$0xff] %v7332_v53  ;;  %v2209_v6 = vpop.permute.xlu0 %2208  ;;  %2406 = vmatprep.subr.mxu1 %v7332_v53  ;;  %v7364_v53 = vmul.f32 %v2279_v42, %v5405_v31  ;;  %v7372_v33 = vmul.f32 %v2278_v11, %v5405_v31  ;;  %v2248_v42 = vsel %vm889_vm2, %v7094_v5, %v7103_v47 }
 0x5f7   : > { %10045 = vst [vmem:[#allocation192_spill] sm:$0xff] %v7352_v7  ;;  %2407 = vmatpush2.msra.mxu1 %v7328_v48  ;;  %10046 = vst [vmem:[#allocation193_spill] sm:$0xff] %v7361_v30  ;;  %v7369_v48 = vmul.f32 %v2282_v38, %v5393_v26  ;;  %v7405_v47 = vmul.f32 %v2252_v20, %v5396_v27 }
 0x5f8   : > { %2408 = vmatprep.subr.mxu1 %v7345_v52  ;;  %v2203_v25 = vpop.permute.xlu1 %2202  ;;  %10047 = vst [vmem:[#allocation194_spill] sm:$0xff] %v7364_v53  ;;  %10049 = vst [vmem:[#allocation196_spill] sm:$0xff] %v7372_v33 }
 0x5f9   : > { %2409 = vmatpush2.msra.mxu1 %v7352_v7  ;;  %10048 = vst [vmem:[#allocation195_spill] sm:$0xff] %v7369_v48  ;;  %10052 = vst [vmem:[#allocation199_spill] sm:$0xff] %v7405_v47 }
 0x5fa   : > { %v2245_v61 = vpop.permute.xlu0 %2244  ;;  %2410 = vmatprep.subr.mxu1 %v7361_v30 }
 0x5fb   : > { %v2249_v60 = vsel %vm889_vm2, %v7236_v1, %v2245_v61  ;;  %v2253_v62 = vsel %vm889_vm2, %v2245_v61, %v7236_v1  ;;  %2411 = vmatpush2.msra.mxu1 %v7364_v53  ;;  %v2251_v1 = vsel %vm889_vm2, %v7155_v2, %v2233_v57  ;;  %v2247_v61 = vsel %vm889_vm2, %v2233_v57, %v7155_v2 }
 0x5fc   : > { %v7390_v38 = vmul.f32 %v2249_v60, %v5412_v35  ;;  %2412 = vmatprep.subr.mxu1 %v7369_v48  ;;  %v2201_v11 = vpop.permute.xlu1 %2200  ;;  %v7394_v30 = vmul.f32 %v2253_v62, %v5396_v27  ;;  %v7408_v60 = vmul.f32 %v2248_v42, %v5412_v35  ;;  %v2250_v62 = vsel %vm889_vm2, %v7217_v58, %v2231_v56 }
 0x5fd   : > { %2413 = vmatpush2.msra.mxu1 %v7372_v33  ;;  %v2246_v33 = vsel %vm889_vm2, %v2231_v56, %v7217_v58  ;;  %v7419_v57 = vmul.f32 %v2251_v1, %v5396_v27  ;;  %v7422_v20 = vmul.f32 %v2247_v61, %v5412_v35  ;;  %v2220_v58 = vsel %vm867_vm3, %v7281_v34, %v2203_v25 }
 0x5fe   : > { %10050 = vst [vmem:[#allocation197_spill] sm:$0xff] %v7390_v38  ;;  %10051 = vst [vmem:[#allocation198_spill] sm:$0xff] %v7394_v30  ;;  %v2207_v5 = vpop.permute.xlu0 %2206  ;;  %2414 = vmatprep.subr.mxu1 %v7394_v30  ;;  %v7430_v30 = vmul.f32 %v2246_v33, %v5412_v35  ;;  %v2216_v61 = vsel %vm867_vm3, %v2203_v25, %v7281_v34  ;;  %v7457_v34 = vmul.f32 %v2220_v58, %v5425_v45 }
 0x5ff   : > { %10053 = vst [vmem:[#allocation200_spill] sm:$0xff] %v7408_v60  ;;  %2415 = vmatpush2.msra.mxu1 %v7390_v38  ;;  %10054 = vst [vmem:[#allocation201_spill] sm:$0xff] %v7419_v57  ;;  %v7427_v38 = vmul.f32 %v2250_v62, %v5396_v27  ;;  %v7460_v25 = vmul.f32 %v2216_v61, %v5428_v46 }
 0x600   : > { %2416 = vmatprep.subr.mxu1 %v7405_v47  ;;  %v2199_v2 = vpop.permute.xlu1 %2198  ;;  %10055 = vst [vmem:[#allocation202_spill] sm:$0xff] %v7422_v20  ;;  %10057 = vst [vmem:[#allocation204_spill] sm:$0xff] %v7430_v30 }
 0x601   : > { %2417 = vmatpush2.msra.mxu1 %v7408_v60  ;;  %10056 = vst [vmem:[#allocation203_spill] sm:$0xff] %v7427_v38  ;;  %v2219_v60 = vsel %vm867_vm3, %v2209_v6, %v2201_v11  ;;  %10060 = vst [vmem:[#allocation207_spill] sm:$0xff] %v7457_v34 }
 0x602   : > { %v2213_v42 = vpop.permute.xlu0 %2212  ;;  %2418 = vmatprep.subr.mxu1 %v7419_v57  ;;  %10061 = vst [vmem:[#allocation208_spill] sm:$0xff] %v7460_v25 }
 0x603   : > { %v2217_v56 = vsel %vm867_vm3, %v2205_v17, %v2213_v42  ;;  %v2221_v1 = vsel %vm867_vm3, %v2213_v42, %v2205_v17  ;;  %2419 = vmatpush2.msra.mxu1 %v7422_v20  ;;  %v2215_v17 = vsel %vm867_vm3, %v2201_v11, %v2209_v6  ;;  %v7469_v11 = vmul.f32 %v2219_v60, %v5425_v45 }
 0x604   : > { %v7444_v62 = vmul.f32 %v2217_v56, %v5428_v46  ;;  %2420 = vmatprep.subr.mxu1 %v7427_v38  ;;  %v2301_v33 = vpop.permute.xlu1 %2300  ;;  %v7448_v57 = vmul.f32 %v2221_v1, %v5425_v45  ;;  %v2218_v56 = vsel %vm867_vm3, %v2207_v5, %v2199_v2  ;;  %v2214_v1 = vsel %vm867_vm3, %v2199_v2, %v2207_v5 }
 0x605   : > { %2421 = vmatpush2.msra.mxu1 %v7430_v30  ;;  %10062 = vst [vmem:[#allocation209_spill] sm:$0xff] %v7469_v11  ;;  %v7472_v58 = vmul.f32 %v2215_v17, %v5428_v46 }
 0x606   : > { %10058 = vst [vmem:[#allocation205_spill] sm:$0xff] %v7444_v62  ;;  %10059 = vst [vmem:[#allocation206_spill] sm:$0xff] %v7448_v57  ;;  %v2307_v42 = vpop.permute.xlu0 %2306  ;;  %2422 = vmatprep.subr.mxu1 %v7448_v57  ;;  %v7477_v57 = vmul.f32 %v2218_v56, %v5425_v45 }
 0x607   : > { %2423 = vmatpush2.msra.mxu1 %v7444_v62  ;;  %10063 = vst [vmem:[#allocation210_spill] sm:$0xff] %v7472_v58  ;;  %v7480_v62 = vmul.f32 %v2214_v1, %v5428_v46 }
 0x608   : > { %2424 = vmatprep.subr.mxu1 %v7457_v34  ;;  %v2299_v6 = vpop.permute.xlu1 %2298  ;;  %10064 = vst [vmem:[#allocation211_spill] sm:$0xff] %v7477_v57 }
 0x609   : > { %2425 = vmatpush2.msra.mxu1 %v7460_v25  ;;  %10065 = vst [vmem:[#allocation212_spill] sm:$0xff] %v7480_v62  ;;  %v2316_v5 = vsel %vm933_vm1, %v2307_v42, %v2299_v6  ;;  %v2312_v17 = vsel %vm933_vm1, %v2299_v6, %v2307_v42 }
 0x60a   : > { %v2309_v61 = vpop.permute.xlu0 %2308  ;;  %2426 = vmatprep.subr.mxu1 %v7469_v11  ;;  %v7505_v42 = vmul.f32 %v2312_v17, %v5389_v23 }
 0x60b   : > { %v2313_v60 = vsel %vm933_vm1, %v2301_v33, %v2309_v61  ;;  %v2317_v2 = vsel %vm933_vm1, %v2309_v61, %v2301_v33  ;;  %2427 = vmatpush2.msra.mxu1 %v7472_v58  ;;  %v7502_v33 = vmul.f32 %v2316_v5, %v5386_v22 }
 0x60c   : > { %v7492_v56 = vmul.f32 %v2313_v60, %v5389_v23  ;;  %2428 = vmatprep.subr.mxu1 %v7477_v57  ;;  %v2297_v1 = vpop.permute.xlu1 %2296  ;;  %v7496_v11 = vmul.f32 %v2317_v2, %v5386_v22  ;;  %10069 = vst [vmem:[#allocation216_spill] sm:$0xff] %v7505_v42  ;;  %v3222_v57 = vld [vmem:[%s9530_s13 + $0x10] sm:$0xff] }
 0x60d   : > { %2429 = vmatpush2.msra.mxu1 %v7480_v62  ;;  %10068 = vst [vmem:[#allocation215_spill] sm:$0xff] %v7502_v33 }
 0x60e   : > { %10066 = vst [vmem:[#allocation213_spill] sm:$0xff] %v7492_v56  ;;  %10067 = vst [vmem:[#allocation214_spill] sm:$0xff] %v7496_v11  ;;  %v2305_v25 = vpop.permute.xlu0 %2304  ;;  %2430 = vmatprep.subr.mxu1 %v6956_v9  ;;  %2487 = vmatprep.subr.mxu0 %v7496_v11 }
 0x60f   : > { %v2311_v6 = vsel %vm933_vm1, %v2297_v1, %v2305_v25  ;;  %v2315_v61 = vsel %vm933_vm1, %v2305_v25, %v2297_v1  ;;  %2431 = vmatpush2.msra.mxu1 %v6952_v39  ;;  %2488 = vmatpush1.msra.mxu0 %v7492_v56 }
 0x610   : > { %v7514_v60 = vmul.f32 %v2311_v6, %v5389_v23  ;;  %2432 = vmatprep.subr.mxu1 %v6932_v18  ;;  %2489 = vmatprep.subr.mxu0 %v7502_v33  ;;  %v7519_v5 = vmul.f32 %v2315_v61, %v5386_v22  ;;  %v2295_v2 = vpop.permute.xlu1 %2294  ;;  %v10072_v6 = vld [vmem:[#allocation161_spill] sm:$0xff] }
 0x611   : > { %2433 = vmatpush2.msra.mxu1 %v6928_v50  ;;  %2490 = vmatpush1.msra.mxu0 %v7505_v42  ;;  %v2326_v61 = vld [vmem:[%s9526_s9] sm:$0xff] }
 0x612   : > { %10070 = vst [vmem:[#allocation217_spill] sm:$0xff] %v7514_v60  ;;  %10071 = vst [vmem:[#allocation218_spill] sm:$0xff] %v7519_v5  ;;  %v2303_v25 = vpop.permute.xlu0 %2302  ;;  %2434 = vmatprep.subr.mxu1 %v6908_v8  ;;  %2491 = vmatprep.subr.mxu0 %v7519_v5  ;;  %v10074_v8 = vld [vmem:[#allocation160_spill] sm:$0xff] }
 0x613   : > { %v2310_v17 = vsel %vm933_vm1, %v2295_v2, %v2303_v25  ;;  %v2314_v1 = vsel %vm933_vm1, %v2303_v25, %v2295_v2  ;;  %2435 = vmatpush2.msra.mxu1 %v10072_v6  ;;  %2492 = vmatpush1.msra.mxu0 %v7514_v60  ;;  %v2330_v2 = vld [vmem:[%s9526_s9 + $0x20] sm:$0xff]  ;;  %v10076_v25 = vld [vmem:[#allocation159_spill] sm:$0xff] }
 0x614   : > { %v7535_v50 = vmul.f32 %v2310_v17, %v5389_v23  ;;  %2436 = vmatprep.subr.mxu1 %v10074_v8  ;;  %v7539_v5 = vmul.f32 %v2314_v1, %v5386_v22  ;;  %v2328_v6 = vld [vmem:[%s9526_s9 + $0x10] sm:$0xff]  ;;  %v2329_v17 = vld [vmem:[%s9526_s9 + $0x18] sm:$0xff]  ;;  %v2334_v8 = vld [vmem:[%s9526_s9 + $0x40] sm:$0xff] }
 0x615   : > { %2437 = vmatpush2.msra.mxu1 %v10076_v25  ;;  %v2333_v1 = vld [vmem:[%s9526_s9 + $0x38] sm:$0xff]  ;;  %v10077_v25 = vmov 0.0  }
 0x616   : > { %10073 = vst [vmem:[#allocation219_spill] sm:$0xff] %v7535_v50  ;;  %10075 = vst [vmem:[#allocation220_spill] sm:$0xff] %v7539_v5  ;;  %2439 = vmatmul.mubr.f32.vlgmr.msra.gmra.mxu1 %v2326_v61  ;;  %2493 = vmatprep.subr.mxu0 %v7539_v5  ;;  %v2331_v61 = vld [vmem:[%s9526_s9 + $0x28] sm:$0xff] }
 0x617   : > { %2494 = vmatpush1.msra.mxu0 %v7535_v50  ;;  %2444 = vmatprep.mubr.f32.mxu1 %v2330_v2  ;;  %v2332_v2 = vld [vmem:[%s9526_s9 + $0x30] sm:$0xff] }
 0x618   : > { %4989 = vmatmul.mubr.msk.f32.vlgmr.msra.gmra.mxu0 %vm1381_vm9, %v2328_v6  ;;  %v2336_v6 = vld [vmem:[%s9526_s9 + $0x50] sm:$0xff] }
 0x619   : > { %2533 = vmatprep.mubr.f32.mxu0 %v10077_v25 }
 0x61a   : > { %2445 = vmatmul.mubr.f32.gmra.mxu1 %v2329_v17  ;;  %v2335_v17 = vld [vmem:[%s9526_s9 + $0x48] sm:$0xff] }
 0x61b   : > { %2450 = vmatprep.mubr.f32.mxu1 %v2333_v1  ;;  %v2337_v1 = vld [vmem:[%s9526_s9 + $0x58] sm:$0xff] }
 0x61c   : > { %4990 = vmatmul.mubr.msk.f32.gmra.mxu0 %vm1381_vm9, %v2331_v61 }
 0x61d   : > { %2539 = vmatprep.mubr.f32.mxu0 %v10077_v25 }
 0x61e   : > { %2451 = vmatmul.mubr.f32.gmra.mxu1 %v2332_v2 }
 0x61f   : > { %2456 = vmatprep.mubr.f32.mxu1 %v2336_v6  ;;  %v2355_v61 = vpop.permute.xlu0 %2354 }
 0x620   : > { %4991 = vmatmul.mubr.msk.f32.gmra.mxu0 %vm1381_vm9, %v2334_v8 }
 0x621   : > { %2545 = vmatprep.mubr.f32.mxu0 %v10077_v25 }
 0x622   : > { %2457 = vmatmul.mubr.f32.gmra.mxu1 %v2335_v17  ;;  %v2360_v17 = vpop.permute.xlu1 %2359 }
 0x623   : > { %3005 = vmatprep.mubr.f32.mxu1 %v10077_v25  ;;  %v2345_v2 = vpop.permute.xlu0 %2344 }
 0x624   : > { %4992 = vmatmul.mubr.msk.f32.gmra.mxu0 %vm1381_vm9, %v2337_v1 }
 0x6d6   : > { %v2440_v6 = vpop.f32.mrf.mxu1 }
 0x6d7   : > { %v2441_v50 = vadd.f32 %v2440_v6, %v2345_v2 }
 0x6d8   : > { %v2442_v5 = vpop.f32.mrf.mxu1  ;;  %v2529_v60 = vpop.f32.mrf.mxu0 }
 0x6d9   : > { %v2443_v18 = vadd.f32 %v2442_v5, %v2345_v2  ;;  %v2530_v42 = vadd.f32 %v2529_v60, %v2441_v50  ;;  %v2350_v50 = vpop.permute.xlu1 %2349 }
 0x6da   : > { %v2531_v8 = vpop.f32.mrf.mxu0  ;;  %v2446_v1 = vpop.f32.mrf.mxu1 }
 0x6db   : > { %v7582_v39 = vmax.f32 %v2530_v42, 0.0  ;;  %v2532_v33 = vadd.f32 %v2531_v8, %v2443_v18  ;;  %v2447_v42 = vadd.f32 %v2446_v1, %v2350_v50 }
 0x6dc   : > { %v2448_v18 = vpop.f32.mrf.mxu1 }
 0x6dd   : > { %10078 = vst [vmem:[#allocation221_spill] sm:$0xff] %v7582_v39  ;;  %v7584_v9 = vmax.f32 %v2532_v33, 0.0  ;;  %2656 = vrot.lane.b32.xlu1 %v7582_v39, %s9937_s27  ;;  %v2535_v33 = vpop.f32.mrf.mxu0  ;;  %v2449_v60 = vadd.f32 %v2448_v18, %v2350_v50 }
 0x6de   : > { %v2536_v2 = vadd.f32 %v2535_v33, %v2447_v42  ;;  %v2452_v50 = vpop.f32.mrf.mxu1 }
 0x6df   : > { %10079 = vst [vmem:[#allocation222_spill] sm:$0xff] %v7584_v9  ;;  %2664 = vrot.lane.b32.xlu0 %v7584_v9, %s9937_s27  ;;  %v2537_v5 = vpop.f32.mrf.mxu0  ;;  %v2453_v42 = vadd.f32 %v2452_v50, %v2355_v61 }
 0x6e0   : > { %v2538_v6 = vadd.f32 %v2537_v5, %v2449_v60  ;;  %v7604_v8 = vmax.f32 %v2536_v2, 0.0  ;;  %v2454_v18 = vpop.f32.mrf.mxu1 }
 0x6e1   : > { %2784 = vrot.lane.b32.xlu1 %v7582_v39, %s9864_s21  ;;  %v2541_v33 = vpop.f32.mrf.mxu0  ;;  %v2455_v60 = vadd.f32 %v2454_v18, %v2355_v61 }
 0x6e2   : > { %10080 = vst [vmem:[#allocation223_spill] sm:$0xff] %v7604_v8  ;;  %v7608_v1 = vmax.f32 %v2538_v6, 0.0  ;;  %v2542_v2 = vadd.f32 %v2541_v33, %v2453_v42  ;;  %v2458_v61 = vpop.f32.mrf.mxu1 }
 0x6e3   : > { %2792 = vrot.lane.b32.xlu0 %v7584_v9, %s9864_s21  ;;  %v2543_v5 = vpop.f32.mrf.mxu0  ;;  %v2459_v42 = vadd.f32 %v2458_v61, %v2360_v17 }
 0x6e4   : > { %10081 = vst [vmem:[#allocation224_spill] sm:$0xff] %v7608_v1  ;;  %v2544_v6 = vadd.f32 %v2543_v5, %v2455_v60  ;;  %v7632_v56 = vmax.f32 %v2542_v2, 0.0  ;;  %v2460_v18 = vpop.f32.mrf.mxu1 }
 0x6e5   : > { %2624 = vrot.lane.b32.xlu1 %v7582_v39, %s9938_s29  ;;  %v2547_v33 = vpop.f32.mrf.mxu0  ;;  %v2461_v60 = vadd.f32 %v2460_v18, %v2360_v17 }
 0x6e6   : > { %10082 = vst [vmem:[#allocation225_spill] sm:$0xff] %v7632_v56  ;;  %v7636_v50 = vmax.f32 %v2544_v6, 0.0  ;;  %v2548_v2 = vadd.f32 %v2547_v33, %v2459_v42 }
 0x6e7   : > { %2632 = vrot.lane.b32.xlu0 %v7584_v9, %s9938_s29  ;;  %v2549_v5 = vpop.f32.mrf.mxu0 }
 0x6e8   : > { %10083 = vst [vmem:[#allocation226_spill] sm:$0xff] %v7636_v50  ;;  %v2550_v6 = vadd.f32 %v2549_v5, %v2461_v60  ;;  %v7660_v62 = vmax.f32 %v2548_v2, 0.0  ;;  %v3223_v2 = vld [vmem:[%s9530_s13 + $0x18] sm:$0xff] }
 0x6e9   : > { %2592 = vrot.lane.b32.xlu1 %v7582_v39, %s9939_s24 }
 0x6ea   : > { %10084 = vst [vmem:[#allocation227_spill] sm:$0xff] %v7660_v62  ;;  %v7664_v61 = vmax.f32 %v2550_v6, 0.0  ;;  %v2829_v6 = vld [vmem:[%s9529_s12 + $0x8] sm:$0xff] }
 0x6eb   : > { %2600 = vrot.lane.b32.xlu0 %v7584_v9, %s9939_s24  ;;  %2916 = vmatprep.mubr.f32.mxu0 %v2829_v6 }
 0x6ec   : > { %10085 = vst [vmem:[#allocation228_spill] sm:$0xff] %v7664_v61 }
 0x6ed   : > { %2560 = vrot.lane.b32.xlu1 %v7582_v39, %s9854_s6 }
 0x6ef   : > { %2568 = vrot.lane.b32.xlu0 %v7584_v9, %s9854_s6 }
 0x6f1   : > { %2658 = vrot.lane.b32.xlu1 %v7604_v8, %s9937_s27 }
 0x6f3   : > { %2666 = vrot.lane.b32.xlu0 %v7608_v1, %s9937_s27 }
 0x6f5   : > { %2786 = vrot.lane.b32.xlu1 %v7604_v8, %s9864_s21 }
 0x6f7   : > { %2794 = vrot.lane.b32.xlu0 %v7608_v1, %s9864_s21 }
 0x6f9   : > { %2626 = vrot.lane.b32.xlu1 %v7604_v8, %s9938_s29 }
 0x6fb   : > { %2634 = vrot.lane.b32.xlu0 %v7608_v1, %s9938_s29 }
 0x6fd   : > { %2594 = vrot.lane.b32.xlu1 %v7604_v8, %s9939_s24 }
 0x6ff   : > { %2602 = vrot.lane.b32.xlu0 %v7608_v1, %s9939_s24 }
 0x701   : > { %2562 = vrot.lane.b32.xlu1 %v7604_v8, %s9854_s6 }
 0x703   : > { %2570 = vrot.lane.b32.xlu0 %v7608_v1, %s9854_s6 }
 0x705   : > { %2754 = vrot.lane.b32.xlu1 %v7604_v8, %s9855_s3 }
 0x707   : > { %2762 = vrot.lane.b32.xlu0 %v7608_v1, %s9855_s3 }
 0x709   : > { %2660 = vrot.lane.b32.xlu1 %v7632_v56, %s9937_s27 }
 0x70b   : > { %2668 = vrot.lane.b32.xlu0 %v7636_v50, %s9937_s27 }
 0x70d   : > { %2788 = vrot.lane.b32.xlu1 %v7632_v56, %s9864_s21 }
 0x70f   : > { %2796 = vrot.lane.b32.xlu0 %v7636_v50, %s9864_s21 }
 0x711   : > { %2628 = vrot.lane.b32.xlu1 %v7632_v56, %s9938_s29 }
 0x713   : > { %2636 = vrot.lane.b32.xlu0 %v7636_v50, %s9938_s29 }
 0x715   : > { %2596 = vrot.lane.b32.xlu1 %v7632_v56, %s9939_s24 }
 0x717   : > { %2604 = vrot.lane.b32.xlu0 %v7636_v50, %s9939_s24 }
 0x719   : > { %2564 = vrot.lane.b32.xlu1 %v7632_v56, %s9854_s6 }
 0x71b   : > { %2572 = vrot.lane.b32.xlu0 %v7636_v50, %s9854_s6 }
 0x71d   : > { %2756 = vrot.lane.b32.xlu1 %v7632_v56, %s9855_s3 }
 0x71f   : > { %2764 = vrot.lane.b32.xlu0 %v7636_v50, %s9855_s3 }
 0x721   : > { %2662 = vrot.lane.b32.xlu1 %v7660_v62, %s9937_s27 }
 0x723   : > { %2670 = vrot.lane.b32.xlu0 %v7664_v61, %s9937_s27 }
 0x725   : > { %2790 = vrot.lane.b32.xlu1 %v7660_v62, %s9864_s21 }
 0x727   : > { %2798 = vrot.lane.b32.xlu0 %v7664_v61, %s9864_s21 }
 0x729   : > { %2630 = vrot.lane.b32.xlu1 %v7660_v62, %s9938_s29 }
 0x72b   : > { %2638 = vrot.lane.b32.xlu0 %v7664_v61, %s9938_s29 }
 0x72d   : > { %2752 = vrot.lane.b32.xlu1 %v7582_v39, %s9855_s3 }
 0x72f   : > { %2760 = vrot.lane.b32.xlu0 %v7584_v9, %s9855_s3 }
 0x731   : > { %2598 = vrot.lane.b32.xlu1 %v7660_v62, %s9939_s24 }
 0x733   : > { %2606 = vrot.lane.b32.xlu0 %v7664_v61, %s9939_s24 }
 0x735   : > { %2566 = vrot.lane.b32.xlu1 %v7660_v62, %s9854_s6 }
 0x737   : > { %2732 = vrot.lane.b32.xlu0 %v7636_v50, %s9862_s26 }
 0x739   : > { %2758 = vrot.lane.b32.xlu1 %v7660_v62, %s9855_s3 }
 0x73b   : > { %2574 = vrot.lane.b32.xlu0 %v7664_v61, %s9854_s6 }
 0x73d   : > { %2726 = vrot.lane.b32.xlu1 %v7660_v62, %s9862_s26 }
 0x73f   : > { %2730 = vrot.lane.b32.xlu0 %v7608_v1, %s9862_s26 }
 0x741   : > { %2724 = vrot.lane.b32.xlu1 %v7632_v56, %s9862_s26 }
 0x743   : > { %2766 = vrot.lane.b32.xlu0 %v7664_v61, %s9855_s3 }
 0x745   : > { %2722 = vrot.lane.b32.xlu1 %v7604_v8, %s9862_s26 }
 0x747   : > { %2728 = vrot.lane.b32.xlu0 %v7584_v9, %s9862_s26 }
 0x749   : > { %2720 = vrot.lane.b32.xlu1 %v7582_v39, %s9862_s26 }
 0x74b   : > { %2734 = vrot.lane.b32.xlu0 %v7664_v61, %s9862_s26 }
 0x74d   : > { %2694 = vrot.lane.b32.xlu1 %v7660_v62, %s9863_s5 }
 0x74f   : > { %2700 = vrot.lane.b32.xlu0 %v7636_v50, %s9863_s5  ;;  %v2657_v17 = vpop.permute.xlu1 %2656 }
 0x751   : > { %v2665_v18 = vpop.permute.xlu0 %2664  ;;  %2692 = vrot.lane.b32.xlu1 %v7632_v56, %s9863_s5 }
 0x752   : > { %v2676_v27 = vsel %vm845_vm4, %v2665_v18, %v2657_v17 }
 0x753   : > { %2702 = vrot.lane.b32.xlu0 %v7664_v61, %s9863_s5  ;;  %v7718_v33 = vpop.permute.xlu1 %2784 }
 0x755   : > { %v7720_v42 = vpop.permute.xlu0 %2792  ;;  %2690 = vrot.lane.b32.xlu1 %v7604_v8, %s9863_s5 }
 0x757   : > { %2698 = vrot.lane.b32.xlu0 %v7608_v1, %s9863_s5  ;;  %v7726_v60 = vpop.permute.xlu1 %2624 }
 0x759   : > { %v7728_v5 = vpop.permute.xlu0 %2632  ;;  %2688 = vrot.lane.b32.xlu1 %v7582_v39, %s9863_s5  ;;  %v3221_v39 = vld [vmem:[%s9530_s13 + $0x8] sm:$0xff] }
 0x75b   : > { %2696 = vrot.lane.b32.xlu0 %v7584_v9, %s9863_s5  ;;  %v7740_v11 = vpop.permute.xlu1 %2592  ;;  %v3220_v9 = vld [vmem:[%s9530_s13] sm:$0xff] }
 0x75d   : > { %v7745_v58 = vpop.permute.xlu0 %2600  ;;  %3241 = vperm.xlu1 %5068, %v3223_v2  }
 0x75f   : > { %3236 = vperm.xlu0 %5067, %v3222_v57   ;;  %v7750_v8 = vpop.permute.xlu1 %2560 }
 0x761   : > { %v7755_v34 = vpop.permute.xlu0 %2568  ;;  %3231 = vperm.xlu1 %5068, %v3221_v39  }
 0x763   : > { %3226 = vperm.xlu0 %5067, %v3220_v9   ;;  %v2659_v6 = vpop.permute.xlu1 %2658 }
 0x765   : > { %v2667_v1 = vpop.permute.xlu0 %2666 }
 0x766   : > { %v2673_v28 = vsel %vm845_vm4, %v2659_v6, %v2667_v1 }
 0x767   : > { %v2787_v56 = vpop.permute.xlu1 %2786 }
 0x769   : > { %v2795_v50 = vpop.permute.xlu0 %2794 }
 0x76b   : > { %v7757_v2 = vpop.permute.xlu1 %2626 }
 0x76d   : > { %v7759_v30 = vpop.permute.xlu0 %2634 }
 0x76f   : > { %v7761_v62 = vpop.permute.xlu1 %2594 }
 0x771   : > { %v7763_v57 = vpop.permute.xlu0 %2602 }
 0x773   : > { %v7765_v38 = vpop.permute.xlu1 %2562 }
 0x775   : > { %v7767_v61 = vpop.permute.xlu0 %2570 }
 0x777   : > { %v7769_v20 = vpop.permute.xlu1 %2754 }
 0x778   : > { %10086 = vst [vmem:[#allocation229_spill] sm:$0xff] %v7769_v20 }
 0x779   : > { %v7771_v39 = vpop.permute.xlu0 %2762 }
 0x77a   : > { %10087 = vst [vmem:[#allocation230_spill] sm:$0xff] %v7771_v39 }
 0x77b   : > { %v2661_v9 = vpop.permute.xlu1 %2660 }
 0x77d   : > { %v2669_v47 = vpop.permute.xlu0 %2668 }
 0x77e   : > { %v2674_v32 = vsel %vm845_vm4, %v2661_v9, %v2669_v47  ;;  %v2678_v51 = vsel %vm845_vm4, %v2669_v47, %v2661_v9  ;;  %v2677_v47 = vsel %vm845_vm4, %v2667_v1, %v2659_v6  ;;  %v2805_v9 = vsel %vm933_vm1, %v2795_v50, %v2787_v56 }
 0x77f   : > { %v2789_v25 = vpop.permute.xlu1 %2788 }
 0x781   : > { %v2797_v48 = vpop.permute.xlu0 %2796 }
 0x783   : > { %v2629_v53 = vpop.permute.xlu1 %2628 }
 0x785   : > { %v2637_v7 = vpop.permute.xlu0 %2636 }
 0x787   : > { %v7773_v52 = vpop.permute.xlu1 %2596 }
 0x789   : > { %v7775_v45 = vpop.permute.xlu0 %2604 }
 0x78b   : > { %v7777_v46 = vpop.permute.xlu1 %2564 }
 0x78d   : > { %v7779_v43 = vpop.permute.xlu0 %2572 }
 0x78f   : > { %v7781_v3 = vpop.permute.xlu1 %2756 }
 0x790   : > { %10088 = vst [vmem:[#allocation231_spill] sm:$0xff] %v7781_v3  ;;  %v2680_v3 = vmul.f32 %v2676_v27, %v5442_v55  ;;  %v2806_v27 = vsel %vm933_vm1, %v2797_v48, %v2789_v25 }
 0x791   : > { %v7783_v15 = vpop.permute.xlu0 %2764 }
 0x792   : > { %10089 = vst [vmem:[#allocation232_spill] sm:$0xff] %v7783_v15  ;;  %v2672_v15 = vsel %vm845_vm4, %v2657_v17, %v2665_v18  ;;  %v2802_v17 = vsel %vm933_vm1, %v2789_v25, %v2797_v48  ;;  %v2800_v48 = vsel %vm933_vm1, %v7718_v33, %v7720_v42  ;;  %v2801_v25 = vsel %vm933_vm1, %v2787_v56, %v2795_v50 }
 0x793   : > { %v2663_v19 = vpop.permute.xlu1 %2662  ;;  %v2646_v56 = vsel %vm823_vm5, %v2637_v7, %v2629_v53 }
 0x795   : > { %v2671_v35 = vpop.permute.xlu0 %2670 }
 0x796   : > { %v2675_v49 = vsel %vm845_vm4, %v2663_v19, %v2671_v35  ;;  %v2679_v39 = vsel %vm845_vm4, %v2671_v35, %v2663_v19  ;;  %v2684_v35 = vmul.f32 %v2678_v51, %v5442_v55 }
 0x797   : > { %v2686_v20 = vmul.f32 %v2679_v39, %v5442_v55  ;;  %v2791_v26 = vpop.permute.xlu1 %2790  ;;  %v2687_v31 = vmul.f32 %v2675_v49, %v5439_v54  ;;  %v2685_v49 = vmul.f32 %v2674_v32, %v5439_v54  ;;  %v2681_v39 = vmul.f32 %v2672_v15, %v5439_v54 }
 0x798   : > { %v2813_v15 = vmul.f32 %v2806_v27, %v5386_v22  ;;  %v2641_v27 = vsel %vm823_vm5, %v7757_v2, %v7759_v30 }
 0x799   : > { %v2799_v19 = vpop.permute.xlu0 %2798  ;;  %2852 = vmatprep.subr.mxu0 %v2687_v31  ;;  %v2683_v31 = vmul.f32 %v2673_v28, %v5439_v54  ;;  %v2812_v28 = vmul.f32 %v2802_v17, %v5389_v23  ;;  %v2810_v17 = vmul.f32 %v2801_v25, %v5389_v23 }
 0x79a   : > { %v2803_v18 = vsel %vm933_vm1, %v2791_v26, %v2799_v19  ;;  %v2807_v1 = vsel %vm933_vm1, %v2799_v19, %v2791_v26  ;;  %2853 = vmatpush1.msra.mxu0 %v2686_v20  ;;  %v2804_v26 = vsel %vm933_vm1, %v7720_v42, %v7718_v33  ;;  %v2682_v20 = vmul.f32 %v2677_v47, %v5442_v55 }
 0x79b   : > { %v2814_v6 = vmul.f32 %v2803_v18, %v5389_v23  ;;  %2854 = vmatprep.subr.mxu0 %v2685_v49  ;;  %v2631_v51 = vpop.permute.xlu1 %2630  ;;  %v2815_v32 = vmul.f32 %v2807_v1, %v5386_v22  ;;  %v2811_v49 = vmul.f32 %v2805_v9, %v5386_v22  ;;  %v2642_v18 = vsel %vm823_vm5, %v2629_v53, %v2637_v7 }
 0x79c   : > { %2855 = vmatpush1.msra.mxu0 %v2684_v35  ;;  %v2808_v35 = vmul.f32 %v2800_v48, %v5389_v23  ;;  %v2645_v53 = vsel %vm823_vm5, %v7759_v30, %v7757_v2  ;;  %v2653_v1 = vmul.f32 %v2642_v18, %v5454_v63  ;;  %v2652_v30 = vmul.f32 %v2646_v56, %v5457_v0 }
 0x79d   : > { %v2639_v19 = vpop.permute.xlu0 %2638  ;;  %2856 = vmatprep.subr.mxu0 %v2683_v31  ;;  %2965 = vmatprep.subr.mxu1 %v2815_v32  ;;  %v2651_v31 = vmul.f32 %v2641_v27, %v5454_v63  ;;  %v2830_v32 = vld [vmem:[%s9529_s12 + $0x10] sm:$0xff] }
 0x79e   : > { %v2643_v33 = vsel %vm823_vm5, %v2631_v51, %v2639_v19  ;;  %v2647_v42 = vsel %vm823_vm5, %v2639_v19, %v2631_v51  ;;  %2857 = vmatpush1.msra.mxu0 %v2682_v20  ;;  %2966 = vmatpush1.msra.mxu1 %v2814_v6  ;;  %v2809_v6 = vmul.f32 %v2804_v26, %v5386_v22 }
 0x79f   : > { %v2654_v50 = vmul.f32 %v2647_v42, %v5457_v0  ;;  %2858 = vmatprep.subr.mxu0 %v2681_v39  ;;  %2967 = vmatprep.subr.mxu1 %v2813_v15  ;;  %v7843_v47 = vpop.permute.xlu1 %2752  ;;  %v2655_v9 = vmul.f32 %v2643_v33, %v5454_v63  ;;  %v2640_v51 = vsel %vm823_vm5, %v7726_v60, %v7728_v5 }
 0x7a0   : > { %2859 = vmatpush1.msra.mxu0 %v2680_v3  ;;  %2968 = vmatpush1.msra.mxu1 %v2812_v28  ;;  %v2644_v3 = vsel %vm823_vm5, %v7728_v5, %v7726_v60  ;;  %v2650_v39 = vmul.f32 %v2645_v53, %v5457_v0  ;;  %v2649_v5 = vmul.f32 %v2640_v51, %v5454_v63  ;;  %v10093_v53 = vld [vmem:[#allocation169_spill] sm:$0xff] }
 0x7a1   : > { %v7856_v7 = vpop.permute.xlu0 %2760  ;;  %2860 = vmatprep.subr.mxu0 %v2655_v9  ;;  %2969 = vmatprep.subr.mxu1 %v2811_v49  ;;  %v2648_v48 = vmul.f32 %v2644_v3, %v5457_v0  ;;  %v2610_v26 = vsel %vm801_vm6, %v7773_v52, %v7775_v45  ;;  %v2609_v49 = vsel %vm801_vm6, %v7761_v62, %v7763_v57 }
 0x7a2   : > { %2861 = vmatpush1.msra.mxu0 %v2654_v50  ;;  %2970 = vmatpush1.msra.mxu1 %v2810_v17  ;;  %v2621_v18 = vmul.f32 %v2610_v26, %v5469_v10  ;;  %v2608_v33 = vsel %vm801_vm6, %v7740_v11, %v7745_v58  ;;  %v2619_v56 = vmul.f32 %v2609_v49, %v5469_v10  ;;  %v10092_v17 = vld [vmem:[#allocation170_spill] sm:$0xff] }
 0x7a3   : > { %2862 = vmatprep.subr.mxu0 %v2653_v1  ;;  %2971 = vmatprep.subr.mxu1 %v2809_v6  ;;  %v2599_v2 = vpop.permute.xlu1 %2598  ;;  %v2577_v51 = vsel %vm780_vm7, %v7765_v38, %v7767_v61  ;;  %v10098_v26 = vld [vmem:[#allocation174_spill] sm:$0xff] }
 0x7a4   : > { %2863 = vmatpush1.msra.mxu0 %v2652_v30  ;;  %2972 = vmatpush1.msra.mxu1 %v2808_v35  ;;  %v2576_v30 = vsel %vm780_vm7, %v7750_v8, %v7755_v34 }
 0x7a5   : > { %v2607_v60 = vpop.permute.xlu0 %2606  ;;  %2864 = vmatprep.subr.mxu0 %v2651_v31  ;;  %3042 = vmatprep.subr.mxu1 %v7097_v41  ;;  %v2614_v41 = vsel %vm801_vm6, %v7775_v45, %v7773_v52  ;;  %v2613_v45 = vsel %vm801_vm6, %v7763_v57, %v7761_v62  ;;  %v10090_v52 = vld [vmem:[#allocation167_spill] sm:$0xff]  ;;  %v10091_v62 = vld [vmem:[#allocation168_spill] sm:$0xff] }
 0x7a6   : > { %v2611_v20 = vsel %vm801_vm6, %v2599_v2, %v2607_v60  ;;  %v2615_v25 = vsel %vm801_vm6, %v2607_v60, %v2599_v2  ;;  %2865 = vmatpush1.msra.mxu0 %v2650_v39  ;;  %4993 = vmatmul.mubr.msk.f32.vlgmr.msra.gmra.mxu1 %vm1381_vm9, %v2830_v32  ;;  %v2620_v42 = vmul.f32 %v2614_v41, %v5472_v4  ;;  %v10095_v39 = vld [vmem:[#allocation172_spill] sm:$0xff] }
 0x7a7   : > { %v2622_v28 = vmul.f32 %v2615_v25, %v5472_v4  ;;  %3043 = vmatpush1.msra.mxu1 %v7092_v44  ;;  %2866 = vmatprep.subr.mxu0 %v2649_v5  ;;  %v2567_v19 = vpop.permute.xlu1 %2566  ;;  %v2623_v15 = vmul.f32 %v2611_v20, %v5469_v10  ;;  %v2618_v50 = vmul.f32 %v2613_v45, %v5472_v4  ;;  %v10097_v60 = vld [vmem:[#allocation232_spill] sm:$0xff]  ;;  %v10099_v25 = vld [vmem:[#allocation11_spill] sm:$0xff]  ;;  %v10102_v45 = vld [vmem:[#allocation229_spill] sm:$0xff] }
 0x7a8   : > { %3044 = vmatprep.subr.mxu1 %v7107_v36  ;;  %2867 = vmatpush1.msra.mxu0 %v2648_v48  ;;  %v2612_v36 = vsel %vm801_vm6, %v7745_v58, %v7740_v11  ;;  %v2617_v58 = vmul.f32 %v2608_v33, %v5469_v10  ;;  %v10096_v48 = vld [vmem:[#allocation231_spill] sm:$0xff] }
 0x7a9   : > { %3045 = vmatpush1.msra.mxu1 %v10090_v52  ;;  %v7903_v44 = vpop.permute.xlu0 %2732  ;;  %2868 = vmatprep.subr.mxu0 %v2623_v15  ;;  %v2616_v9 = vmul.f32 %v2612_v36, %v5472_v4  ;;  %v2770_v20 = vsel %vm911_vm0, %v10096_v48, %v10097_v60  ;;  %v10101_v15 = vld [vmem:[#allocation9_spill] sm:$0xff]  ;;  %v10103_v52 = vld [vmem:[#allocation230_spill] sm:$0xff]  ;;  %v10104_v33 = vld [vmem:[#allocation175_spill] sm:$0xff] }
 0x7aa   : > { %3046 = vmatprep.subr.mxu1 %v10091_v62  ;;  %2869 = vmatpush1.msra.mxu0 %v2622_v28  ;;  %v10100_v28 = vld [vmem:[#allocation173_spill] sm:$0xff]  ;;  %v2769_v36 = vsel %vm911_vm0, %v10102_v45, %v10103_v52 }
 0x7ab   : > { %3047 = vmatpush1.msra.mxu1 %v7124_v59  ;;  %2870 = vmatprep.subr.mxu0 %v2621_v18  ;;  %v2759_v57 = vpop.permute.xlu1 %2758  ;;  %v2578_v59 = vsel %vm780_vm7, %v7777_v46, %v7779_v43  ;;  %v2773_v18 = vsel %vm911_vm0, %v10103_v52, %v10102_v45 }
 0x7ac   : > { %3048 = vmatprep.subr.mxu1 %v7129_v12  ;;  %2871 = vmatpush1.msra.mxu0 %v2620_v42  ;;  %v2589_v3 = vmul.f32 %v2578_v59, %v5483_v21  ;;  %v10105_v42 = vld [vmem:[#allocation176_spill] sm:$0xff] }
 0x7ad   : > { %3049 = vmatpush1.msra.mxu1 %v7132_v40  ;;  %v2575_v11 = vpop.permute.xlu0 %2574  ;;  %2872 = vmatprep.subr.mxu0 %v2619_v56  ;;  %v2582_v40 = vsel %vm780_vm7, %v7779_v43, %v7777_v46  ;;  %v2581_v46 = vsel %vm780_vm7, %v7767_v61, %v7765_v38  ;;  %v10094_v38 = vld [vmem:[#allocation171_spill] sm:$0xff]  ;;  %v2587_v61 = vmul.f32 %v2577_v51, %v5483_v21 }
 0x7ae   : > { %v2579_v35 = vsel %vm780_vm7, %v2567_v19, %v2575_v11  ;;  %v2583_v12 = vsel %vm780_vm7, %v2575_v11, %v2567_v19  ;;  %3050 = vmatprep.subr.mxu1 %v10092_v17  ;;  %2873 = vmatpush1.msra.mxu0 %v2618_v50  ;;  %v2588_v2 = vmul.f32 %v2582_v40, %v5486_v24  ;;  %v10106_v11 = vld [vmem:[#allocation177_spill] sm:$0xff]  ;;  %v10108_v17 = vld [vmem:[#allocation179_spill] sm:$0xff] }
 0x7af   : > { %v2590_v27 = vmul.f32 %v2583_v12, %v5486_v24  ;;  %3051 = vmatpush1.msra.mxu1 %v10093_v53  ;;  %2874 = vmatprep.subr.mxu0 %v2617_v58  ;;  %v7938_v1 = vpop.permute.xlu1 %2726  ;;  %v2591_v6 = vmul.f32 %v2579_v35, %v5483_v21  ;;  %v2586_v31 = vmul.f32 %v2581_v46, %v5486_v24  ;;  %v10107_v58 = vld [vmem:[#allocation178_spill] sm:$0xff] }
 0x7b0   : > { %3052 = vmatprep.subr.mxu1 %v7159_v29  ;;  %2875 = vmatpush1.msra.mxu0 %v2616_v9  ;;  %v2580_v29 = vsel %vm780_vm7, %v7755_v34, %v7750_v8  ;;  %v2585_v8 = vmul.f32 %v2576_v30, %v5483_v21  ;;  %v2780_v56 = vmul.f32 %v2770_v20, %v10099_v25  ;;  %v10110_v46 = vld [vmem:[#allocation182_spill] sm:$0xff]  ;;  %v10111_v30 = vld [vmem:[#allocation12_spill] sm:$0xff]  ;;  %v10118_v20 = vld [vmem:[#allocation187_spill] sm:$0xff] }
 0x7b1   : > { %3053 = vmatpush1.msra.mxu1 %v7166_v37  ;;  %v7951_v43 = vpop.permute.xlu0 %2730  ;;  %2876 = vmatprep.subr.mxu0 %v2591_v6  ;;  %v2584_v32 = vmul.f32 %v2580_v29, %v5486_v24  ;;  %v2768_v50 = vsel %vm911_vm0, %v7843_v47, %v7856_v7  ;;  %v2772_v9 = vsel %vm911_vm0, %v7856_v7, %v7843_v47 }
 0x7b2   : > { %3054 = vmatprep.subr.mxu1 %v10094_v38  ;;  %2877 = vmatpush1.msra.mxu0 %v2590_v27  ;;  %v2779_v35 = vmul.f32 %v2773_v18, %v10101_v15  ;;  %v2778_v12 = vmul.f32 %v2769_v36, %v10099_v25  ;;  %v2776_v40 = vmul.f32 %v2768_v50, %v10099_v25  ;;  %v10109_v27 = vld [vmem:[#allocation180_spill] sm:$0xff]  ;;  %v10123_v50 = vld [vmem:[#allocation13_spill] sm:$0xff] }
 0x7b3   : > { %3055 = vmatpush1.msra.mxu1 %v7178_v13  ;;  %2878 = vmatprep.subr.mxu0 %v2589_v3  ;;  %v2725_v37 = vpop.permute.xlu1 %2724  ;;  %v2774_v13 = vsel %vm911_vm0, %v10097_v60, %v10096_v48  ;;  %v2777_v47 = vmul.f32 %v2772_v9, %v10101_v15 }
 0x7b4   : > { %3056 = vmatprep.subr.mxu1 %v7183_v16  ;;  %2879 = vmatpush1.msra.mxu0 %v2588_v2  ;;  %v2742_v7 = vsel %vm889_vm2, %v7903_v44, %v2725_v37  ;;  %v2738_v3 = vsel %vm889_vm2, %v2725_v37, %v7903_v44  ;;  %v10112_v2 = vld [vmem:[#allocation181_spill] sm:$0xff]  ;;  %v10115_v44 = vld [vmem:[#allocation184_spill] sm:$0xff] }
 0x7b5   : > { %3057 = vmatpush1.msra.mxu1 %v10095_v39  ;;  %v2767_v34 = vpop.permute.xlu0 %2766  ;;  %2880 = vmatprep.subr.mxu0 %v2587_v61  ;;  %v10113_v61 = vld [vmem:[#allocation10_spill] sm:$0xff] }
 0x7b6   : > { %v2771_v5 = vsel %vm911_vm0, %v2759_v57, %v2767_v34  ;;  %v2775_v16 = vsel %vm911_vm0, %v2767_v34, %v2759_v57  ;;  %3058 = vmatprep.subr.mxu1 %v10098_v26  ;;  %2881 = vmatpush1.msra.mxu0 %v2586_v31  ;;  %v2781_v57 = vmul.f32 %v2774_v13, %v10101_v15  ;;  %v10116_v13 = vld [vmem:[#allocation185_spill] sm:$0xff] }
 0x7b7   : > { %v2782_v41 = vmul.f32 %v2771_v5, %v10099_v25  ;;  %3059 = vmatpush1.msra.mxu1 %v10100_v28  ;;  %2882 = vmatprep.subr.mxu0 %v2585_v8  ;;  %v2723_v19 = vpop.permute.xlu1 %2722  ;;  %v2783_v49 = vmul.f32 %v2775_v16, %v10101_v15  ;;  %v2749_v34 = vmul.f32 %v2742_v7, %v10113_v61  ;;  %v10117_v5 = vld [vmem:[#allocation186_spill] sm:$0xff]  ;;  %v10119_v28 = vld [vmem:[#allocation188_spill] sm:$0xff] }
 0x7b8   : > { %3060 = vmatprep.subr.mxu1 %v10104_v33  ;;  %2883 = vmatpush1.msra.mxu0 %v2584_v32  ;;  %v2741_v32 = vsel %vm889_vm2, %v7951_v43, %v2723_v19  ;;  %v2737_v39 = vsel %vm889_vm2, %v2723_v19, %v7951_v43  ;;  %v2748_v8 = vmul.f32 %v2738_v3, %v10111_v30  ;;  %v10120_v33 = vld [vmem:[#allocation190_spill] sm:$0xff] }
 0x7b9   : > { %3061 = vmatpush1.msra.mxu1 %v10105_v42  ;;  %v2729_v62 = vpop.permute.xlu0 %2728  ;;  %2884 = vmatprep.subr.mxu0 %v2783_v49  ;;  %v2747_v16 = vmul.f32 %v2741_v32, %v10113_v61  ;;  %v2746_v26 = vmul.f32 %v2737_v39, %v10111_v30  ;;  %v10121_v42 = vld [vmem:[#allocation14_spill] sm:$0xff] }
 0x7ba   : > { %3062 = vmatprep.subr.mxu1 %v10106_v11  ;;  %2885 = vmatpush2.msra.mxu0 %v2782_v41  ;;  %v10124_v11 = vld [vmem:[#allocation191_spill] sm:$0xff] }
 0x7bb   : > { %3063 = vmatpush1.msra.mxu1 %v10107_v58  ;;  %2886 = vmatprep.subr.mxu0 %v2781_v57  ;;  %v2721_v59 = vpop.permute.xlu1 %2720  ;;  %v10122_v57 = vld [vmem:[#allocation189_spill] sm:$0xff]  ;;  %v10125_v58 = vld [vmem:[#allocation192_spill] sm:$0xff] }
 0x7bc   : > { %3064 = vmatprep.subr.mxu1 %v10108_v17  ;;  %2887 = vmatpush2.msra.mxu0 %v2780_v56  ;;  %v2736_v48 = vsel %vm889_vm2, %v2721_v59, %v2729_v62  ;;  %v2740_v60 = vsel %vm889_vm2, %v2729_v62, %v2721_v59 }
 0x7bd   : > { %3065 = vmatpush1.msra.mxu1 %v10109_v27  ;;  %v2735_v53 = vpop.permute.xlu0 %2734  ;;  %2888 = vmatprep.subr.mxu0 %v2779_v35  ;;  %v2744_v41 = vmul.f32 %v2736_v48, %v10111_v30  ;;  %v2745_v49 = vmul.f32 %v2740_v60, %v10113_v61  ;;  %v10126_v27 = vld [vmem:[#allocation193_spill] sm:$0xff]  ;;  %v10136_v48 = vld [vmem:[#allocation202_spill] sm:$0xff]  ;;  %v10137_v60 = vld [vmem:[#allocation228_spill] sm:$0xff] }
 0x7be   : > { %v2739_v6 = vsel %vm889_vm2, %v7938_v1, %v2735_v53  ;;  %v2743_v51 = vsel %vm889_vm2, %v2735_v53, %v7938_v1  ;;  %3066 = vmatprep.subr.mxu1 %v10110_v46  ;;  %2889 = vmatpush2.msra.mxu0 %v2778_v12  ;;  %v10114_v1 = vld [vmem:[#allocation183_spill] sm:$0xff]  ;;  %v10129_v46 = vld [vmem:[#allocation196_spill] sm:$0xff] }
 0x7bf   : > { %v2750_v29 = vmul.f32 %v2739_v6, %v10111_v30  ;;  %3067 = vmatpush1.msra.mxu1 %v10112_v2  ;;  %2890 = vmatprep.subr.mxu0 %v2777_v47  ;;  %v2695_v38 = vpop.permute.xlu1 %2694  ;;  %v2751_v31 = vmul.f32 %v2743_v51, %v10113_v61  ;;  %v10127_v47 = vld [vmem:[#allocation194_spill] sm:$0xff]  ;;  %v10128_v6 = vld [vmem:[#allocation195_spill] sm:$0xff] }
 0x7c0   : > { %3068 = vmatprep.subr.mxu1 %v10114_v1  ;;  %2891 = vmatpush2.msra.mxu0 %v2776_v40  ;;  %v10131_v1 = vld [vmem:[#allocation197_spill] sm:$0xff] }
 0x7c1   : > { %3069 = vmatpush1.msra.mxu1 %v10115_v44  ;;  %v2701_v37 = vpop.permute.xlu0 %2700  ;;  %2892 = vmatprep.subr.mxu0 %v2751_v31  ;;  %v10130_v31 = vld [vmem:[#allocation198_spill] sm:$0xff]  ;;  %v10132_v44 = vmov 0.0  }
 0x7c2   : > { %3070 = vmatprep.subr.mxu1 %v10116_v13  ;;  %2893 = vmatpush2.msra.mxu0 %v2750_v29  ;;  %v2833_v29 = vld [vmem:[%s9529_s12 + $0x28] sm:$0xff]  ;;  %v10138_v13 = vld [vmem:[#allocation203_spill] sm:$0xff] }
 0x7c3   : > { %3071 = vmatpush1.msra.mxu1 %v10117_v5  ;;  %2894 = vmatprep.subr.mxu0 %v2749_v34  ;;  %v2693_v43 = vpop.permute.xlu1 %2692  ;;  %v10134_v34 = vld [vmem:[#allocation200_spill] sm:$0xff]  ;;  %v10139_v5 = vld [vmem:[#allocation227_spill] sm:$0xff] }
 0x7c4   : > { %3072 = vmatprep.subr.mxu1 %v10118_v20  ;;  %2895 = vmatpush2.msra.mxu0 %v2748_v8  ;;  %v2710_v45 = vsel %vm867_vm3, %v2701_v37, %v2693_v43  ;;  %v2706_v36 = vsel %vm867_vm3, %v2693_v43, %v2701_v37  ;;  %v10133_v37 = vld [vmem:[#allocation199_spill] sm:$0xff]  ;;  %v10135_v8 = vld [vmem:[#allocation201_spill] sm:$0xff]  ;;  %v10140_v43 = vld [vmem:[#allocation204_spill] sm:$0xff] }
 0x7c5   : > { %3073 = vmatpush1.msra.mxu1 %v10119_v28  ;;  %v2703_v19 = vpop.permute.xlu0 %2702  ;;  %2896 = vmatprep.subr.mxu0 %v2747_v16  ;;  %v2717_v35 = vmul.f32 %v2710_v45, %v10123_v50  ;;  %v2716_v12 = vmul.f32 %v2706_v36, %v10121_v42  ;;  %v10141_v16 = vld [vmem:[#allocation226_spill] sm:$0xff]  ;;  %v10143_v20 = vld [vmem:[#allocation225_spill] sm:$0xff]  ;;  %v10145_v28 = vld [vmem:[#allocation224_spill] sm:$0xff] }
 0x7c6   : > { %v2707_v52 = vsel %vm867_vm3, %v2695_v38, %v2703_v19  ;;  %v2711_v18 = vsel %vm867_vm3, %v2703_v19, %v2695_v38  ;;  %3074 = vmatprep.subr.mxu1 %v10120_v33  ;;  %2897 = vmatpush2.msra.mxu0 %v2746_v26  ;;  %v10142_v26 = vld [vmem:[#allocation206_spill] sm:$0xff]  ;;  %v10146_v19 = vld [vmem:[#allocation207_spill] sm:$0xff]  ;;  %v2828_v45 = vld [vmem:[%s9529_s12] sm:$0xff] }
 0x7c7   : > { %v2718_v62 = vmul.f32 %v2707_v52, %v10121_v42  ;;  %3075 = vmatpush2.msra.mxu1 %v10122_v57  ;;  %2898 = vmatprep.subr.mxu0 %v2745_v49  ;;  %v2691_v56 = vpop.permute.xlu1 %2690  ;;  %v2719_v9 = vmul.f32 %v2711_v18, %v10123_v50  ;;  %v10147_v49 = vld [vmem:[#allocation223_spill] sm:$0xff]  ;;  %v10148_v52 = vld [vmem:[#allocation208_spill] sm:$0xff]  ;;  %v10149_v18 = vld [vmem:[#allocation222_spill] sm:$0xff] }
 0x7c8   : > { %3076 = vmatprep.subr.mxu1 %v10124_v11  ;;  %2899 = vmatpush2.msra.mxu0 %v2744_v41  ;;  %v10144_v41 = vld [vmem:[#allocation205_spill] sm:$0xff]  ;;  %v10155_v11 = vld [vmem:[#allocation212_spill] sm:$0xff] }
 0x7c9   : > { %3077 = vmatpush2.msra.mxu1 %v10125_v58  ;;  %v2699_v59 = vpop.permute.xlu0 %2698  ;;  %2900 = vmatprep.subr.mxu0 %v2719_v9  ;;  %v10150_v33 = vld [vmem:[#allocation209_spill] sm:$0xff]  ;;  %v10154_v9 = vld [vmem:[#allocation214_spill] sm:$0xff] }
 0x7ca   : > { %v2705_v17 = vsel %vm867_vm3, %v2691_v56, %v2699_v59  ;;  %v2709_v40 = vsel %vm867_vm3, %v2699_v59, %v2691_v56  ;;  %3078 = vmatprep.subr.mxu1 %v10126_v27  ;;  %2901 = vmatpush2.msra.mxu0 %v2718_v62  ;;  %v10151_v36 = vld [vmem:[#allocation221_spill] sm:$0xff]  ;;  %v10152_v62 = vld [vmem:[#allocation210_spill] sm:$0xff]  ;;  %v10153_v56 = vld [vmem:[#allocation211_spill] sm:$0xff] }
 0x7cb   : > { %v2714_v53 = vmul.f32 %v2705_v17, %v10121_v42  ;;  %3079 = vmatpush2.msra.mxu1 %v10127_v47  ;;  %2902 = vmatprep.subr.mxu0 %v2717_v35  ;;  %v2715_v7 = vmul.f32 %v2709_v40, %v10123_v50  ;;  %v2689_v51 = vpop.permute.xlu1 %2688  ;;  %v2836_v57 = vld [vmem:[%s9529_s12 + $0x40] sm:$0xff]  ;;  %v10157_v35 = vld [vmem:[#allocation166_spill] sm:$0xff]  ;;  %v2831_v17 = vld [vmem:[%s9529_s12 + $0x18] sm:$0xff] }
 0x7cc   : > { %3080 = vmatprep.subr.mxu1 %v10128_v6  ;;  %2903 = vmatpush2.msra.mxu0 %v2716_v12  ;;  %v2832_v58 = vld [vmem:[%s9529_s12 + $0x20] sm:$0xff]  ;;  %v10158_v12 = vld [vmem:[#allocation215_spill] sm:$0xff]  ;;  %v10160_v27 = vld [vmem:[#allocation216_spill] sm:$0xff] }
 0x7cd   : > { %3081 = vmatpush2.msra.mxu1 %v10129_v46  ;;  %v2697_v3 = vpop.permute.xlu0 %2696  ;;  %2904 = vmatprep.subr.mxu0 %v2715_v7  ;;  %v10156_v59 = vld [vmem:[#allocation213_spill] sm:$0xff]  ;;  %v2839_v47 = vld [vmem:[%s9529_s12 + $0x58] sm:$0xff]  ;;  %v10162_v7 = vld [vmem:[#allocation218_spill] sm:$0xff] }
 0x7ce   : > { %v2704_v2 = vsel %vm867_vm3, %v2689_v51, %v2697_v3  ;;  %v2708_v38 = vsel %vm867_vm3, %v2697_v3, %v2689_v51  ;;  %3082 = vmatprep.subr.mxu1 %v10130_v31  ;;  %2905 = vmatpush2.msra.mxu0 %v2714_v53  ;;  %v10159_v40 = vld [vmem:[#allocation165_spill] sm:$0xff]  ;;  %v10161_v53 = vld [vmem:[#allocation164_spill] sm:$0xff]  ;;  %v10163_v6 = vld [vmem:[#allocation163_spill] sm:$0xff] }
 0x7cf   : > { %v2712_v32 = vmul.f32 %v2704_v2, %v10121_v42  ;;  %3083 = vmatpush2.msra.mxu1 %v10131_v1  ;;  %v2713_v39 = vmul.f32 %v2708_v38, %v10123_v50  ;;  %3011 = vmatprep.mubr.f32.mxu1 %v10132_v44  ;;  %v2835_v51 = vld [vmem:[%s9529_s12 + $0x38] sm:$0xff]  ;;  %v10164_v46 = vld [vmem:[#allocation217_spill] sm:$0xff]  ;;  %v10165_v3 = vld [vmem:[#allocation162_spill] sm:$0xff] }
 0x7d0   : > { %3084 = vmatprep.subr.mxu1 %v10133_v37  ;;  %4994 = vmatmul.mubr.msk.f32.gmra.mxu1 %vm1381_vm9, %v2833_v29  ;;  %v10166_v29 = vld [vmem:[#allocation220_spill] sm:$0xff]  ;;  %v2834_v2 = vld [vmem:[%s9529_s12 + $0x30] sm:$0xff]  ;;  %v10167_v38 = vld [vmem:[#allocation161_spill] sm:$0xff] }
 0x7d1   : > { %3085 = vmatpush2.msra.mxu1 %v10134_v34  ;;  %2906 = vmatprep.subr.mxu0 %v2713_v39  ;;  %v2817_v31 = vld [vmem:[%s9528_s11 + $0x8] sm:$0xff]  ;;  %v10168_v1 = vld [vmem:[#allocation219_spill] sm:$0xff]  ;;  %v10169_v39 = vld [vmem:[#allocation160_spill] sm:$0xff] }
 0x7d2   : > { %3086 = vmatprep.subr.mxu1 %v10135_v8  ;;  %2907 = vmatpush2.msra.mxu0 %v2712_v32  ;;  %v2838_v32 = vld [vmem:[%s9529_s12 + $0x50] sm:$0xff]  ;;  %v2816_v37 = vld [vmem:[%s9528_s11] sm:$0xff] }
 0x7d3   : > { %3087 = vmatpush2.msra.mxu1 %v10136_v48  ;;  %2908 = vmatprep.subr.mxu0 %v10137_v60  ;;  %v10170_v34 = vld [vmem:[#allocation159_spill] sm:$0xff]  ;;  %v2820_v8 = vld [vmem:[%s9528_s11 + $0x20] sm:$0xff]  ;;  %v2837_v48 = vld [vmem:[%s9529_s12 + $0x48] sm:$0xff] }
 0x7d4   : > { %3088 = vmatprep.subr.mxu1 %v10138_v13  ;;  %2909 = vmatpush2.msra.mxu0 %v10139_v5  ;;  %v2819_v60 = vld [vmem:[%s9528_s11 + $0x18] sm:$0xff]  ;;  %v2818_v5 = vld [vmem:[%s9528_s11 + $0x10] sm:$0xff] }
 0x7d5   : > { %3089 = vmatpush2.msra.mxu1 %v10140_v43  ;;  %2910 = vmatprep.subr.mxu0 %v10141_v16  ;;  %v2823_v13 = vld [vmem:[%s9528_s11 + $0x38] sm:$0xff]  ;;  %v2822_v43 = vld [vmem:[%s9528_s11 + $0x30] sm:$0xff] }
 0x7d6   : > { %3090 = vmatprep.subr.mxu1 %v10142_v26  ;;  %2911 = vmatpush2.msra.mxu0 %v10143_v20  ;;  %v2826_v16 = vld [vmem:[%s9528_s11 + $0x50] sm:$0xff]  ;;  %v2821_v26 = vld [vmem:[%s9528_s11 + $0x28] sm:$0xff] }
 0x7d7   : > { %3091 = vmatpush2.msra.mxu1 %v10144_v41  ;;  %2912 = vmatprep.subr.mxu0 %v10145_v28  ;;  %v2825_v20 = vld [vmem:[%s9528_s11 + $0x48] sm:$0xff]  ;;  %v2824_v41 = vld [vmem:[%s9528_s11 + $0x40] sm:$0xff]  ;;  %v2827_v28 = vld [vmem:[%s9528_s11 + $0x58] sm:$0xff] }
 0x7d8   : > { %3092 = vmatprep.subr.mxu1 %v10146_v19  ;;  %2913 = vmatpush2.msra.mxu0 %v10147_v49 }
 0x7d9   : > { %3093 = vmatpush2.msra.mxu1 %v10148_v52  ;;  %2914 = vmatprep.subr.mxu0 %v10149_v18 }
 0x7da   : > { %3094 = vmatprep.subr.mxu1 %v10150_v33  ;;  %2915 = vmatpush2.msra.mxu0 %v10151_v36 }
 0x7db   : > { %3095 = vmatpush2.msra.mxu1 %v10152_v62  ;;  %2917 = vmatmul.mubr.f32.vlgmr.msra.gmra.mxu0 %v2828_v45 }
 0x7dc   : > { %3096 = vmatprep.subr.mxu1 %v10153_v56  ;;  %3155 = vmatprep.subr.mxu0 %v10154_v9 }
 0x7dd   : > { %3017 = vmatprep.mubr.f32.mxu1 %v10132_v44  ;;  %3097 = vmatpush2.msra.mxu1 %v10155_v11 }
 0x7de   : > { %3156 = vmatpush1.msra.mxu0 %v10156_v59  ;;  %4995 = vmatmul.mubr.msk.f32.gmra.mxu1 %vm1381_vm9, %v2836_v57 }
 0x7df   : > { %3098 = vmatprep.subr.mxu1 %v10157_v35  ;;  %3157 = vmatprep.subr.mxu0 %v10158_v12  ;;  %v8208_v12 = vpop.permute.xlu0 %3236 }
 0x7e0   : > { %2922 = vmatprep.mubr.f32.mxu0 %v2832_v58  ;;  %3099 = vmatpush2.msra.mxu1 %v10159_v40 }
 0x7e1   : > { %3158 = vmatpush1.msra.mxu0 %v10160_v27  ;;  %3100 = vmatprep.subr.mxu1 %v10161_v53 }
 0x7e2   : > { %2923 = vmatmul.mubr.f32.gmra.mxu0 %v2831_v17  ;;  %3159 = vmatprep.subr.mxu0 %v10162_v7 }
 0x7e3   : > { %3023 = vmatprep.mubr.f32.mxu1 %v10132_v44  ;;  %3101 = vmatpush2.msra.mxu1 %v10163_v6 }
 0x7e4   : > { %3160 = vmatpush1.msra.mxu0 %v10164_v46  ;;  %4996 = vmatmul.mubr.msk.f32.gmra.mxu1 %vm1381_vm9, %v2839_v47 }
 0x7e5   : > { %3102 = vmatprep.subr.mxu1 %v10165_v3  ;;  %3161 = vmatprep.subr.mxu0 %v10166_v29 }
 0x7e6   : > { %2928 = vmatprep.mubr.f32.mxu0 %v2835_v51  ;;  %3103 = vmatpush2.msra.mxu1 %v10167_v38 }
 0x7e7   : > { %3162 = vmatpush1.msra.mxu0 %v10168_v1  ;;  %3104 = vmatprep.subr.mxu1 %v10169_v39 }
 0x7e8   : > { %2929 = vmatmul.mubr.f32.gmra.mxu0 %v2834_v2  ;;  %3105 = vmatpush2.msra.mxu1 %v10170_v34  ;;  %v3227_v2 = vpop.permute.xlu0 %3226 }
 0x7e9   : > { %3106 = vmatprep.mubr.f32.mxu1 %v2817_v31  ;;  %2934 = vmatprep.mubr.f32.mxu0 %v2838_v32 }
 0x7ea   : > { %3107 = vmatmul.mubr.f32.vlgmr.msra.gmra.mxu1 %v2816_v37 }
 0x7eb   : > { %3112 = vmatprep.mubr.f32.mxu1 %v2820_v8 }
 0x7ec   : > { %2935 = vmatmul.mubr.f32.gmra.mxu0 %v2837_v48 }
 0x7ed   : > { %3195 = vmatprep.mubr.f32.mxu0 %v10132_v44 }
 0x7ee   : > { %3113 = vmatmul.mubr.f32.gmra.mxu1 %v2819_v60  ;;  %v8226_v60 = vpop.permute.xlu1 %3241 }
 0x7ef   : > { %3118 = vmatprep.mubr.f32.mxu1 %v2823_v13 }
 0x7f0   : > { %4997 = vmatmul.mubr.msk.f32.vlgmr.msra.gmra.mxu0 %vm1381_vm9, %v2818_v5 }
 0x7f1   : > { %3201 = vmatprep.mubr.f32.mxu0 %v10132_v44 }
 0x7f2   : > { %3119 = vmatmul.mubr.f32.gmra.mxu1 %v2822_v43 }
 0x7f3   : > { %3124 = vmatprep.mubr.f32.mxu1 %v2826_v16 }
 0x7f4   : > { %4998 = vmatmul.mubr.msk.f32.gmra.mxu0 %vm1381_vm9, %v2821_v26 }
 0x7f5   : > { %3207 = vmatprep.mubr.f32.mxu0 %v10132_v44 }
 0x7f6   : > { %3125 = vmatmul.mubr.f32.gmra.mxu1 %v2825_v20 }
 0x7f7   : > { %3705 = vmatprep.mubr.f32.mxu1 %v10132_v44 }
 0x7f8   : > { %4999 = vmatmul.mubr.msk.f32.gmra.mxu0 %vm1381_vm9, %v2824_v41 }
 0x7f9   : > { %3213 = vmatprep.mubr.f32.mxu0 %v10132_v44 }
 0x7fc   : > { %5000 = vmatmul.mubr.msk.f32.gmra.mxu0 %vm1381_vm9, %v2827_v28  ;;  %v3232_v28 = vpop.permute.xlu1 %3231 }
 0x866   : > { %v3007_v19 = vpop.f32.mrf.mxu1 }
 0x868   : > { %v3009_v49 = vpop.f32.mrf.mxu1 }
 0x890   : > { %v3013_v45 = vpop.f32.mrf.mxu1 }
 0x892   : > { %v3015_v52 = vpop.f32.mrf.mxu1 }
 0x89b   : > { %v2918_v18 = vpop.f32.mrf.mxu0 }
 0x89c   : > { %v3008_v40 = vadd.f32 %v3007_v19, %v2918_v18 }
 0x89d   : > { %v2920_v33 = vpop.f32.mrf.mxu0 }
 0x89e   : > { %v3019_v36 = vpop.f32.mrf.mxu1  ;;  %v3010_v7 = vadd.f32 %v3009_v49, %v2920_v33 }
 0x8a0   : > { %v8206_v62 = vpop.f32.mrf.mxu1 }
 0x8a2   : > { %v2924_v57 = vpop.f32.mrf.mxu0 }
 0x8a3   : > { %v3014_v48 = vadd.f32 %v3013_v45, %v2924_v57 }
 0x8a4   : > { %v2926_v56 = vpop.f32.mrf.mxu0  ;;  %v3025_v9 = vpop.f32.mrf.mxu1 }
 0x8a5   : > { %v3016_v5 = vadd.f32 %v3015_v52, %v2926_v56 }
 0x8a6   : > { %v3027_v11 = vpop.f32.mrf.mxu1 }
 0x8a8   : > { %v2930_v58 = vpop.f32.mrf.mxu0 }
 0x8a9   : > { %v3020_v57 = vadd.f32 %v3019_v36, %v2930_v58 }
 0x8aa   : > { %v2932_v59 = vpop.f32.mrf.mxu0  ;;  %v3108_v35 = vpop.f32.mrf.mxu1 }
 0x8ab   : > { %v3109_v6 = vadd.f32 %v3108_v35, %v3008_v40 }
 0x8ac   : > { %v2936_v17 = vpop.f32.mrf.mxu0  ;;  %v3110_v53 = vpop.f32.mrf.mxu1 }
 0x8ad   : > { %v8210_v27 = vadd.f32 %v3025_v9, %v2936_v17  ;;  %v3111_v3 = vadd.f32 %v3110_v53, %v3010_v7  ;;  %v3022_v9 = vadd.f32 %v8206_v62, %v2932_v59 }
 0x8ae   : > { %v2938_v47 = vpop.f32.mrf.mxu0  ;;  %v3114_v34 = vpop.f32.mrf.mxu1 }
 0x8af   : > { %v8212_v51 = vadd.f32 %v3027_v11, %v2938_v47  ;;  %v3115_v43 = vadd.f32 %v3114_v34, %v3014_v48 }
 0x8b0   : > { %v3197_v46 = vpop.f32.mrf.mxu0  ;;  %v3116_v13 = vpop.f32.mrf.mxu1 }
 0x8b1   : > { %v3198_v29 = vadd.f32 %v3197_v46, %v3109_v6  ;;  %v3117_v26 = vadd.f32 %v3116_v13, %v3016_v5  ;;  %v3923_v13 = vld [vmem:[%s9533_s16 + $0x18] sm:$0xff]  ;;  %v3529_v5 = vld [vmem:[%s9532_s15 + $0x8] sm:$0xff] }
 0x8b2   : > { %v3199_v38 = vpop.f32.mrf.mxu0  ;;  %v3120_v18 = vpop.f32.mrf.mxu1  ;;  %3616 = vmatprep.mubr.f32.mxu0 %v3529_v5 }
 0x8b3   : > { %v3244_v31 = vadd.f32 %v3227_v2, %v3198_v29  ;;  %v3200_v32 = vadd.f32 %v3199_v38, %v3111_v3  ;;  %v3121_v11 = vadd.f32 %v3120_v18, %v3020_v57 }
 0x8b4   : > { %v3203_v8 = vpop.f32.mrf.mxu0  ;;  %v3122_v56 = vpop.f32.mrf.mxu1 }
 0x8b5   : > { %v8214_v1 = vmax.f32 %v3244_v31, 0.0  ;;  %v3245_v39 = vadd.f32 %v3227_v2, %v3200_v32  ;;  %v3204_v20 = vadd.f32 %v3203_v8, %v3115_v43  ;;  %v3123_v17 = vadd.f32 %v3122_v56, %v3022_v9 }
 0x8b6   : > { %v3205_v16 = vpop.f32.mrf.mxu0 }
 0x8b7   : > { %10171 = vst [vmem:[#allocation167_spill] sm:$0xff] %v8214_v1  ;;  %v8216_v37 = vmax.f32 %v3245_v39, 0.0  ;;  %3356 = vrot.lane.b32.xlu1 %v8214_v1, %s9937_s27  ;;  %v3206_v41 = vadd.f32 %v3205_v16, %v3117_v26  ;;  %v3246_v19 = vadd.f32 %v3232_v28, %v3204_v20  ;;  %v3922_v16 = vld [vmem:[%s9533_s16 + $0x10] sm:$0xff]  ;;  %v3921_v20 = vld [vmem:[%s9533_s16 + $0x8] sm:$0xff] }
 0x8b8   : > { %v3209_v33 = vpop.f32.mrf.mxu0 }
 0x8b9   : > { %10172 = vst [vmem:[#allocation168_spill] sm:$0xff] %v8216_v37  ;;  %3364 = vrot.lane.b32.xlu0 %v8216_v37, %s9937_s27  ;;  %v3247_v49 = vadd.f32 %v3232_v28, %v3206_v41  ;;  %v8238_v45 = vmax.f32 %v3246_v19, 0.0  ;;  %v3210_v40 = vadd.f32 %v3209_v33, %v3121_v11  ;;  %v3920_v28 = vld [vmem:[%s9533_s16] sm:$0xff] }
 0x8ba   : > { %v3211_v35 = vpop.f32.mrf.mxu0 }
 0x8bb   : > { %3484 = vrot.lane.b32.xlu1 %v8214_v1, %s9864_s21  ;;  %10173 = vst [vmem:[#allocation170_spill] sm:$0xff] %v8238_v45  ;;  %v8242_v52 = vmax.f32 %v3247_v49, 0.0  ;;  %v3212_v53 = vadd.f32 %v3211_v35, %v3123_v17  ;;  %v3248_v36 = vadd.f32 %v8208_v12, %v3210_v40 }
 0x8bc   : > { %v3215_v47 = vpop.f32.mrf.mxu0 }
 0x8bd   : > { %3492 = vrot.lane.b32.xlu0 %v8216_v37, %s9864_s21  ;;  %10174 = vst [vmem:[#allocation169_spill] sm:$0xff] %v8242_v52  ;;  %v3249_v62 = vadd.f32 %v8208_v12, %v3212_v53  ;;  %v8269_v58 = vmax.f32 %v3248_v36, 0.0  ;;  %v3126_v12 = vpop.f32.mrf.mxu1 }
 0x8be   : > { %v3127_v6 = vadd.f32 %v3126_v12, %v8210_v27  ;;  %v3217_v46 = vpop.f32.mrf.mxu0 }
 0x8bf   : > { %3324 = vrot.lane.b32.xlu1 %v8214_v1, %s9938_s29  ;;  %10175 = vst [vmem:[#allocation171_spill] sm:$0xff] %v8269_v58  ;;  %v8273_v59 = vmax.f32 %v3249_v62, 0.0  ;;  %v3128_v7 = vpop.f32.mrf.mxu1 }
 0x8c0   : > { %v3129_v3 = vadd.f32 %v3128_v7, %v8212_v51  ;;  %v3216_v29 = vadd.f32 %v3215_v47, %v3127_v6 }
 0x8c1   : > { %3332 = vrot.lane.b32.xlu0 %v8216_v37, %s9938_s29  ;;  %10176 = vst [vmem:[#allocation172_spill] sm:$0xff] %v8273_v59 }
 0x8c2   : > { %v3218_v2 = vadd.f32 %v3217_v46, %v3129_v3  ;;  %v3250_v38 = vadd.f32 %v8226_v60, %v3216_v29 }
 0x8c3   : > { %3292 = vrot.lane.b32.xlu1 %v8214_v1, %s9939_s24 }
 0x8c4   : > { %v3251_v27 = vadd.f32 %v8226_v60, %v3218_v2  ;;  %v8301_v31 = vmax.f32 %v3250_v38, 0.0 }
 0x8c5   : > { %3300 = vrot.lane.b32.xlu0 %v8216_v37, %s9939_s24 }
 0x8c6   : > { %10177 = vst [vmem:[#allocation231_spill] sm:$0xff] %v8301_v31  ;;  %v8305_v51 = vmax.f32 %v3251_v27, 0.0 }
 0x8c7   : > { %3260 = vrot.lane.b32.xlu1 %v8214_v1, %s9854_s6 }
 0x8c8   : > { %10178 = vst [vmem:[#allocation232_spill] sm:$0xff] %v8305_v51 }
 0x8c9   : > { %3268 = vrot.lane.b32.xlu0 %v8216_v37, %s9854_s6 }
 0x8cb   : > { %3358 = vrot.lane.b32.xlu1 %v8238_v45, %s9937_s27 }
 0x8cd   : > { %3366 = vrot.lane.b32.xlu0 %v8242_v52, %s9937_s27 }
 0x8cf   : > { %3486 = vrot.lane.b32.xlu1 %v8238_v45, %s9864_s21 }
 0x8d1   : > { %3494 = vrot.lane.b32.xlu0 %v8242_v52, %s9864_s21 }
 0x8d3   : > { %3326 = vrot.lane.b32.xlu1 %v8238_v45, %s9938_s29 }
 0x8d5   : > { %3334 = vrot.lane.b32.xlu0 %v8242_v52, %s9938_s29 }
 0x8d7   : > { %3294 = vrot.lane.b32.xlu1 %v8238_v45, %s9939_s24 }
 0x8d9   : > { %3302 = vrot.lane.b32.xlu0 %v8242_v52, %s9939_s24 }
 0x8db   : > { %3262 = vrot.lane.b32.xlu1 %v8238_v45, %s9854_s6 }
 0x8dd   : > { %3270 = vrot.lane.b32.xlu0 %v8242_v52, %s9854_s6 }
 0x8df   : > { %3454 = vrot.lane.b32.xlu1 %v8238_v45, %s9855_s3 }
 0x8e1   : > { %3462 = vrot.lane.b32.xlu0 %v8242_v52, %s9855_s3 }
 0x8e3   : > { %3360 = vrot.lane.b32.xlu1 %v8269_v58, %s9937_s27 }
 0x8e5   : > { %3368 = vrot.lane.b32.xlu0 %v8273_v59, %s9937_s27 }
 0x8e7   : > { %3488 = vrot.lane.b32.xlu1 %v8269_v58, %s9864_s21 }
 0x8e9   : > { %3496 = vrot.lane.b32.xlu0 %v8273_v59, %s9864_s21 }
 0x8eb   : > { %3328 = vrot.lane.b32.xlu1 %v8269_v58, %s9938_s29 }
 0x8ed   : > { %3336 = vrot.lane.b32.xlu0 %v8273_v59, %s9938_s29 }
 0x8ef   : > { %3296 = vrot.lane.b32.xlu1 %v8269_v58, %s9939_s24 }
 0x8f1   : > { %3304 = vrot.lane.b32.xlu0 %v8273_v59, %s9939_s24 }
 0x8f3   : > { %3264 = vrot.lane.b32.xlu1 %v8269_v58, %s9854_s6 }
 0x8f5   : > { %3272 = vrot.lane.b32.xlu0 %v8273_v59, %s9854_s6 }
 0x8f7   : > { %3456 = vrot.lane.b32.xlu1 %v8269_v58, %s9855_s3 }
 0x8f9   : > { %3464 = vrot.lane.b32.xlu0 %v8273_v59, %s9855_s3 }
 0x8fb   : > { %3362 = vrot.lane.b32.xlu1 %v8301_v31, %s9937_s27 }
 0x8fd   : > { %3370 = vrot.lane.b32.xlu0 %v8305_v51, %s9937_s27 }
 0x8ff   : > { %3490 = vrot.lane.b32.xlu1 %v8301_v31, %s9864_s21 }
 0x901   : > { %3498 = vrot.lane.b32.xlu0 %v8305_v51, %s9864_s21 }
 0x903   : > { %3330 = vrot.lane.b32.xlu1 %v8301_v31, %s9938_s29 }
 0x905   : > { %3338 = vrot.lane.b32.xlu0 %v8305_v51, %s9938_s29 }
 0x907   : > { %3452 = vrot.lane.b32.xlu1 %v8214_v1, %s9855_s3 }
 0x909   : > { %3460 = vrot.lane.b32.xlu0 %v8216_v37, %s9855_s3 }
 0x90b   : > { %3298 = vrot.lane.b32.xlu1 %v8301_v31, %s9939_s24 }
 0x90d   : > { %3306 = vrot.lane.b32.xlu0 %v8305_v51, %s9939_s24 }
 0x90f   : > { %3266 = vrot.lane.b32.xlu1 %v8301_v31, %s9854_s6 }
 0x911   : > { %3432 = vrot.lane.b32.xlu0 %v8273_v59, %s9862_s26 }
 0x913   : > { %3458 = vrot.lane.b32.xlu1 %v8301_v31, %s9855_s3 }
 0x915   : > { %3274 = vrot.lane.b32.xlu0 %v8305_v51, %s9854_s6 }
 0x917   : > { %3426 = vrot.lane.b32.xlu1 %v8301_v31, %s9862_s26 }
 0x919   : > { %3430 = vrot.lane.b32.xlu0 %v8242_v52, %s9862_s26 }
 0x91b   : > { %3424 = vrot.lane.b32.xlu1 %v8269_v58, %s9862_s26 }
 0x91d   : > { %3466 = vrot.lane.b32.xlu0 %v8305_v51, %s9855_s3 }
 0x91f   : > { %3422 = vrot.lane.b32.xlu1 %v8238_v45, %s9862_s26 }
 0x921   : > { %3428 = vrot.lane.b32.xlu0 %v8216_v37, %s9862_s26 }
 0x923   : > { %3420 = vrot.lane.b32.xlu1 %v8214_v1, %s9862_s26 }
 0x925   : > { %3434 = vrot.lane.b32.xlu0 %v8305_v51, %s9862_s26 }
 0x927   : > { %3394 = vrot.lane.b32.xlu1 %v8301_v31, %s9863_s5 }
 0x929   : > { %3400 = vrot.lane.b32.xlu0 %v8273_v59, %s9863_s5  ;;  %v3357_v32 = vpop.permute.xlu1 %3356 }
 0x92b   : > { %v3365_v39 = vpop.permute.xlu0 %3364  ;;  %3392 = vrot.lane.b32.xlu1 %v8269_v58, %s9863_s5 }
 0x92c   : > { %v3372_v31 = vsel %vm845_vm4, %v3357_v32, %v3365_v39 }
 0x92d   : > { %3402 = vrot.lane.b32.xlu0 %v8305_v51, %s9863_s5  ;;  %v8359_v34 = vpop.permute.xlu1 %3484 }
 0x92f   : > { %v8361_v8 = vpop.permute.xlu0 %3492  ;;  %3390 = vrot.lane.b32.xlu1 %v8238_v45, %s9863_s5 }
 0x931   : > { %3398 = vrot.lane.b32.xlu0 %v8242_v52, %s9863_s5  ;;  %v8367_v48 = vpop.permute.xlu1 %3324 }
 0x933   : > { %v8369_v60 = vpop.permute.xlu0 %3332  ;;  %3388 = vrot.lane.b32.xlu1 %v8214_v1, %s9863_s5 }
 0x935   : > { %3396 = vrot.lane.b32.xlu0 %v8216_v37, %s9863_s5  ;;  %v8381_v43 = vpop.permute.xlu1 %3292 }
 0x937   : > { %v8386_v26 = vpop.permute.xlu0 %3300  ;;  %3941 = vperm.xlu1 %5068, %v3923_v13  }
 0x939   : > { %3936 = vperm.xlu0 %5067, %v3922_v16   ;;  %v8391_v41 = vpop.permute.xlu1 %3260  ;;  %v3376_v16 = vsel %vm845_vm4, %v3365_v39, %v3357_v32 }
 0x93a   : > { %v3380_v51 = vmul.f32 %v3376_v16, %v5442_v55 }
 0x93b   : > { %v8396_v19 = vpop.permute.xlu0 %3268  ;;  %3931 = vperm.xlu1 %5068, %v3921_v20  }
 0x93d   : > { %3926 = vperm.xlu0 %5067, %v3920_v28   ;;  %v3359_v49 = vpop.permute.xlu1 %3358 }
 0x93f   : > { %v3367_v18 = vpop.permute.xlu0 %3366 }
 0x940   : > { %v3373_v44 = vsel %vm845_vm4, %v3359_v49, %v3367_v18 }
 0x941   : > { %v3487_v33 = vpop.permute.xlu1 %3486 }
 0x943   : > { %v3495_v57 = vpop.permute.xlu0 %3494 }
 0x945   : > { %v8398_v56 = vpop.permute.xlu1 %3326 }
 0x947   : > { %v8400_v9 = vpop.permute.xlu0 %3334 }
 0x949   : > { %v8402_v11 = vpop.permute.xlu1 %3294 }
 0x94b   : > { %v8404_v35 = vpop.permute.xlu0 %3302 }
 0x94d   : > { %v8406_v17 = vpop.permute.xlu1 %3262 }
 0x94f   : > { %v8408_v40 = vpop.permute.xlu0 %3270 }
 0x951   : > { %v8410_v53 = vpop.permute.xlu1 %3454 }
 0x953   : > { %v8412_v36 = vpop.permute.xlu0 %3462 }
 0x955   : > { %v3361_v62 = vpop.permute.xlu1 %3360 }
 0x957   : > { %v3369_v12 = vpop.permute.xlu0 %3368 }
 0x958   : > { %v3374_v28 = vsel %vm845_vm4, %v3361_v62, %v3369_v12  ;;  %v3378_v1 = vsel %vm845_vm4, %v3369_v12, %v3361_v62  ;;  %v3377_v62 = vsel %vm845_vm4, %v3367_v18, %v3359_v49  ;;  %v3505_v12 = vsel %vm933_vm1, %v3495_v57, %v3487_v33 }
 0x959   : > { %v3489_v47 = vpop.permute.xlu1 %3488 }
 0x95b   : > { %v3497_v7 = vpop.permute.xlu0 %3496 }
 0x95c   : > { %v3502_v32 = vsel %vm933_vm1, %v3489_v47, %v3497_v7  ;;  %v3506_v39 = vsel %vm933_vm1, %v3497_v7, %v3489_v47  ;;  %v3500_v47 = vsel %vm933_vm1, %v8359_v34, %v8361_v8  ;;  %v3501_v7 = vsel %vm933_vm1, %v3487_v33, %v3495_v57 }
 0x95d   : > { %v3329_v6 = vpop.permute.xlu1 %3328 }
 0x95f   : > { %v3337_v46 = vpop.permute.xlu0 %3336 }
 0x960   : > { %v3346_v33 = vsel %vm823_vm5, %v3337_v46, %v3329_v6 }
 0x961   : > { %v8414_v3 = vpop.permute.xlu1 %3296 }
 0x963   : > { %v8416_v29 = vpop.permute.xlu0 %3304 }
 0x965   : > { %v8418_v2 = vpop.permute.xlu1 %3264 }
 0x967   : > { %v8420_v38 = vpop.permute.xlu0 %3272 }
 0x969   : > { %v8422_v27 = vpop.permute.xlu1 %3456 }
 0x96b   : > { %v8424_v13 = vpop.permute.xlu0 %3464 }
 0x96d   : > { %v3363_v5 = vpop.permute.xlu1 %3362 }
 0x96f   : > { %v3371_v20 = vpop.permute.xlu0 %3370 }
 0x970   : > { %v3375_v37 = vsel %vm845_vm4, %v3363_v5, %v3371_v20  ;;  %v3379_v45 = vsel %vm845_vm4, %v3371_v20, %v3363_v5  ;;  %v3384_v5 = vmul.f32 %v3378_v1, %v5442_v55  ;;  %v3383_v20 = vmul.f32 %v3373_v44, %v5439_v54 }
 0x971   : > { %v3386_v52 = vmul.f32 %v3379_v45, %v5442_v55  ;;  %v3491_v58 = vpop.permute.xlu1 %3490  ;;  %v3387_v59 = vmul.f32 %v3375_v37, %v5439_v54  ;;  %v3385_v37 = vmul.f32 %v3374_v28, %v5439_v54  ;;  %v3381_v28 = vmul.f32 %v3372_v31, %v5439_v54 }
 0x972   : > { %v3512_v44 = vmul.f32 %v3502_v32, %v5389_v23  ;;  %v3513_v31 = vmul.f32 %v3506_v39, %v5386_v22  ;;  %v3510_v32 = vmul.f32 %v3501_v7, %v5389_v23  ;;  %v3341_v39 = vsel %vm823_vm5, %v8398_v56, %v8400_v9 }
 0x973   : > { %v3499_v45 = vpop.permute.xlu0 %3498  ;;  %3552 = vmatprep.subr.mxu0 %v3387_v59 }
 0x974   : > { %v3503_v16 = vsel %vm933_vm1, %v3491_v58, %v3499_v45  ;;  %v3507_v49 = vsel %vm933_vm1, %v3499_v45, %v3491_v58  ;;  %3553 = vmatpush1.msra.mxu0 %v3386_v52  ;;  %v3504_v52 = vsel %vm933_vm1, %v8361_v8, %v8359_v34  ;;  %v3382_v58 = vmul.f32 %v3377_v62, %v5442_v55 }
 0x975   : > { %v3514_v18 = vmul.f32 %v3503_v16, %v5389_v23  ;;  %v3515_v1 = vmul.f32 %v3507_v49, %v5386_v22  ;;  %3554 = vmatprep.subr.mxu0 %v3385_v37  ;;  %v3331_v59 = vpop.permute.xlu1 %3330  ;;  %v3511_v37 = vmul.f32 %v3505_v12, %v5386_v22  ;;  %v3342_v16 = vsel %vm823_vm5, %v3329_v6, %v3337_v46 }
 0x976   : > { %3555 = vmatpush1.msra.mxu0 %v3384_v5  ;;  %v3508_v5 = vmul.f32 %v3500_v47, %v5389_v23  ;;  %v3345_v6 = vsel %vm823_vm5, %v8400_v9, %v8398_v56  ;;  %v3353_v49 = vmul.f32 %v3342_v16, %v5454_v63  ;;  %v3352_v56 = vmul.f32 %v3346_v33, %v5457_v0  ;;  %v10180_v16 = vld [vmem:[#allocation95_spill] sm:$0xff]  ;;  %v10181_v33 = vld [vmem:[#allocation97_spill] sm:$0xff] }
 0x977   : > { %v3339_v45 = vpop.permute.xlu0 %3338  ;;  %3556 = vmatprep.subr.mxu0 %v3383_v20  ;;  %3665 = vmatprep.subr.mxu1 %v3515_v1  ;;  %v3340_v1 = vsel %vm823_vm5, %v8367_v48, %v8369_v60  ;;  %v3530_v20 = vld [vmem:[%s9532_s15 + $0x10] sm:$0xff] }
 0x978   : > { %v3343_v34 = vsel %vm823_vm5, %v3331_v59, %v3339_v45  ;;  %v3347_v8 = vsel %vm823_vm5, %v3339_v45, %v3331_v59  ;;  %3557 = vmatpush1.msra.mxu0 %v3382_v58  ;;  %3666 = vmatpush1.msra.mxu1 %v3514_v18  ;;  %v3509_v18 = vmul.f32 %v3504_v52, %v5386_v22 }
 0x979   : > { %v3354_v57 = vmul.f32 %v3347_v8, %v5457_v0  ;;  %v3355_v62 = vmul.f32 %v3343_v34, %v5454_v63  ;;  %3558 = vmatprep.subr.mxu0 %v3381_v28  ;;  %3667 = vmatprep.subr.mxu1 %v3513_v31  ;;  %v8485_v12 = vpop.permute.xlu1 %3452  ;;  %v3351_v59 = vmul.f32 %v3341_v39, %v5454_v63 }
 0x97a   : > { %3559 = vmatpush1.msra.mxu0 %v3380_v51  ;;  %3668 = vmatpush1.msra.mxu1 %v3512_v44  ;;  %v3344_v51 = vsel %vm823_vm5, %v8369_v60, %v8367_v48  ;;  %v3350_v28 = vmul.f32 %v3345_v6, %v5457_v0  ;;  %v10179_v60 = vld [vmem:[#allocation96_spill] sm:$0xff]  ;;  %v3349_v52 = vmul.f32 %v3340_v1, %v5454_v63  ;;  %v10185_v1 = vld [vmem:[#allocation101_spill] sm:$0xff] }
 0x97b   : > { %v8497_v46 = vpop.permute.xlu0 %3460  ;;  %3560 = vmatprep.subr.mxu0 %v3355_v62  ;;  %3669 = vmatprep.subr.mxu1 %v3511_v37  ;;  %v3348_v47 = vmul.f32 %v3344_v51, %v5457_v0  ;;  %v3310_v58 = vsel %vm801_vm6, %v8414_v3, %v8416_v29  ;;  %v3314_v45 = vsel %vm801_vm6, %v8416_v29, %v8414_v3  ;;  %v10182_v29 = vld [vmem:[#allocation98_spill] sm:$0xff] }
 0x97c   : > { %3561 = vmatpush1.msra.mxu0 %v3354_v57  ;;  %3670 = vmatpush1.msra.mxu1 %v3510_v32  ;;  %v3309_v8 = vsel %vm801_vm6, %v8402_v11, %v8404_v35  ;;  %v3313_v3 = vsel %vm801_vm6, %v8404_v35, %v8402_v11  ;;  %v3321_v62 = vmul.f32 %v3310_v58, %v5469_v10  ;;  %v10183_v11 = vld [vmem:[#allocation99_spill] sm:$0xff]  ;;  %v10184_v35 = vld [vmem:[#allocation100_spill] sm:$0xff] }
 0x97d   : > { %3562 = vmatprep.subr.mxu0 %v3353_v49  ;;  %3671 = vmatprep.subr.mxu1 %v3509_v18  ;;  %v3299_v9 = vpop.permute.xlu1 %3298  ;;  %v3312_v32 = vsel %vm801_vm6, %v8386_v26, %v8381_v43  ;;  %v3320_v39 = vmul.f32 %v3314_v45, %v5472_v4  ;;  %v3319_v49 = vmul.f32 %v3309_v8, %v5469_v10 }
 0x97e   : > { %3563 = vmatpush1.msra.mxu0 %v3352_v56  ;;  %3672 = vmatpush1.msra.mxu1 %v3508_v5  ;;  %v3308_v5 = vsel %vm801_vm6, %v8381_v43, %v8386_v26  ;;  %v3318_v18 = vmul.f32 %v3313_v3, %v5472_v4  ;;  %v3316_v51 = vmul.f32 %v3312_v32, %v5472_v4  ;;  %v10186_v56 = vld [vmem:[#allocation102_spill] sm:$0xff] }
 0x97f   : > { %v3307_v48 = vpop.permute.xlu0 %3306  ;;  %3564 = vmatprep.subr.mxu0 %v3351_v59  ;;  %3742 = vmatprep.subr.mxu1 %v10179_v60  ;;  %v3317_v26 = vmul.f32 %v3308_v5, %v5469_v10  ;;  %v10194_v5 = vld [vmem:[#allocation110_spill] sm:$0xff]  ;;  %v3474_v32 = vsel %vm911_vm0, %v8424_v13, %v8422_v27 }
 0x980   : > { %v3311_v7 = vsel %vm801_vm6, %v3299_v9, %v3307_v48  ;;  %v3315_v44 = vsel %vm801_vm6, %v3307_v48, %v3299_v9  ;;  %3565 = vmatpush1.msra.mxu0 %v3350_v28  ;;  %5001 = vmatmul.mubr.msk.f32.vlgmr.msra.gmra.mxu1 %vm1381_vm9, %v3530_v20  ;;  %v3278_v9 = vsel %vm780_vm7, %v8418_v2, %v8420_v38  ;;  %v10187_v28 = vld [vmem:[#allocation104_spill] sm:$0xff] }
 0x981   : > { %v3322_v31 = vmul.f32 %v3315_v44, %v5472_v4  ;;  %v3323_v37 = vmul.f32 %v3311_v7, %v5469_v10  ;;  %3743 = vmatpush1.msra.mxu1 %v10180_v16  ;;  %3566 = vmatprep.subr.mxu0 %v3349_v52  ;;  %v3267_v34 = vpop.permute.xlu1 %3266  ;;  %v10188_v52 = vld [vmem:[#allocation103_spill] sm:$0xff]  ;;  %v3277_v7 = vsel %vm780_vm7, %v8406_v17, %v8408_v40  ;;  %v10189_v44 = vld [vmem:[#allocation105_spill] sm:$0xff] }
 0x982   : > { %3744 = vmatprep.subr.mxu1 %v10181_v33  ;;  %3567 = vmatpush1.msra.mxu0 %v3348_v47  ;;  %v3282_v47 = vsel %vm780_vm7, %v8420_v38, %v8418_v2  ;;  %v3281_v2 = vsel %vm780_vm7, %v8408_v40, %v8406_v17  ;;  %v10190_v38 = vld [vmem:[#allocation106_spill] sm:$0xff]  ;;  %v3280_v16 = vsel %vm780_vm7, %v8396_v19, %v8391_v41  ;;  %v10191_v17 = vld [vmem:[#allocation107_spill] sm:$0xff]  ;;  %v10192_v40 = vld [vmem:[#allocation108_spill] sm:$0xff] }
 0x983   : > { %3745 = vmatpush1.msra.mxu1 %v10182_v29  ;;  %v8544_v57 = vpop.permute.xlu0 %3432  ;;  %3568 = vmatprep.subr.mxu0 %v3323_v37  ;;  %v3276_v37 = vsel %vm780_vm7, %v8391_v41, %v8396_v19  ;;  %v3287_v33 = vmul.f32 %v3277_v7, %v5483_v21  ;;  %v3286_v3 = vmul.f32 %v3281_v2, %v5486_v24  ;;  %v10193_v29 = vld [vmem:[#allocation109_spill] sm:$0xff]  ;;  %v10202_v2 = vld [vmem:[#allocation118_spill] sm:$0xff] }
 0x984   : > { %3746 = vmatprep.subr.mxu1 %v10183_v11  ;;  %3569 = vmatpush1.msra.mxu0 %v3322_v31  ;;  %v3289_v31 = vmul.f32 %v3278_v9, %v5483_v21  ;;  %v3285_v19 = vmul.f32 %v3276_v37, %v5483_v21  ;;  %v3481_v9 = vmul.f32 %v3474_v32, %v10101_v15  ;;  %v10203_v37 = vld [vmem:[#allocation120_spill] sm:$0xff]  ;;  %v10207_v32 = vld [vmem:[#allocation123_spill] sm:$0xff] }
 0x985   : > { %3747 = vmatpush1.msra.mxu1 %v10184_v35  ;;  %3570 = vmatprep.subr.mxu0 %v3321_v62  ;;  %v3459_v6 = vpop.permute.xlu1 %3458  ;;  %v3284_v62 = vmul.f32 %v3280_v16, %v5486_v24  ;;  %v10195_v35 = vld [vmem:[#allocation112_spill] sm:$0xff] }
 0x986   : > { %3748 = vmatprep.subr.mxu1 %v10185_v1  ;;  %3571 = vmatpush1.msra.mxu0 %v3320_v39 }
 0x987   : > { %3749 = vmatpush1.msra.mxu1 %v10186_v56  ;;  %v3275_v43 = vpop.permute.xlu0 %3274  ;;  %3572 = vmatprep.subr.mxu0 %v3319_v49  ;;  %v3470_v49 = vsel %vm911_vm0, %v8422_v27, %v8424_v13  ;;  %v3469_v27 = vsel %vm911_vm0, %v8410_v53, %v8412_v36  ;;  %v10198_v13 = vld [vmem:[#allocation114_spill] sm:$0xff] }
 0x988   : > { %v3279_v59 = vsel %vm780_vm7, %v3267_v34, %v3275_v43  ;;  %v3283_v20 = vsel %vm780_vm7, %v3275_v43, %v3267_v34  ;;  %3750 = vmatprep.subr.mxu1 %v10187_v28  ;;  %3573 = vmatpush1.msra.mxu0 %v3318_v18  ;;  %v3288_v34 = vmul.f32 %v3282_v47, %v5486_v24  ;;  %v10197_v43 = vld [vmem:[#allocation113_spill] sm:$0xff]  ;;  %v10199_v47 = vld [vmem:[#allocation115_spill] sm:$0xff] }
 0x989   : > { %v3290_v48 = vmul.f32 %v3283_v20, %v5486_v24  ;;  %v3291_v60 = vmul.f32 %v3279_v59, %v5483_v21  ;;  %3751 = vmatpush1.msra.mxu1 %v10188_v52  ;;  %3574 = vmatprep.subr.mxu0 %v3317_v26  ;;  %v8580_v58 = vpop.permute.xlu1 %3426  ;;  %v3480_v59 = vmul.f32 %v3470_v49, %v10099_v25  ;;  %v10201_v52 = vld [vmem:[#allocation117_spill] sm:$0xff] }
 0x98a   : > { %3752 = vmatprep.subr.mxu1 %v10189_v44  ;;  %3575 = vmatpush1.msra.mxu0 %v3316_v51  ;;  %v10196_v51 = vld [vmem:[#allocation111_spill] sm:$0xff]  ;;  %v3468_v20 = vsel %vm911_vm0, %v8485_v12, %v8497_v46  ;;  %v3472_v28 = vsel %vm911_vm0, %v8497_v46, %v8485_v12  ;;  %v10209_v49 = vld [vmem:[#allocation125_spill] sm:$0xff] }
 0x98b   : > { %3753 = vmatpush1.msra.mxu1 %v10190_v38  ;;  %v8592_v45 = vpop.permute.xlu0 %3430  ;;  %3576 = vmatprep.subr.mxu0 %v3291_v60  ;;  %v3478_v60 = vmul.f32 %v3469_v27, %v10099_v25  ;;  %v3476_v7 = vmul.f32 %v3468_v20, %v10099_v25  ;;  %v3477_v44 = vmul.f32 %v3472_v28, %v10101_v15  ;;  %v10212_v20 = vld [vmem:[#allocation127_spill] sm:$0xff] }
 0x98c   : > { %3754 = vmatprep.subr.mxu1 %v10191_v17  ;;  %3577 = vmatpush1.msra.mxu0 %v3290_v48 }
 0x98d   : > { %3755 = vmatpush1.msra.mxu1 %v10192_v40  ;;  %3578 = vmatprep.subr.mxu0 %v3289_v31  ;;  %v3425_v8 = vpop.permute.xlu1 %3424  ;;  %v10204_v40 = vld [vmem:[#allocation119_spill] sm:$0xff] }
 0x98e   : > { %3756 = vmatprep.subr.mxu1 %v10193_v29  ;;  %3579 = vmatpush1.msra.mxu0 %v3288_v34  ;;  %v3442_v46 = vsel %vm889_vm2, %v8544_v57, %v3425_v8  ;;  %v3438_v16 = vsel %vm889_vm2, %v3425_v8, %v8544_v57  ;;  %v10206_v8 = vld [vmem:[#allocation122_spill] sm:$0xff] }
 0x98f   : > { %3757 = vmatpush1.msra.mxu1 %v10194_v5  ;;  %v3467_v41 = vpop.permute.xlu0 %3466  ;;  %3580 = vmatprep.subr.mxu0 %v3287_v33  ;;  %v3449_v29 = vmul.f32 %v3442_v46, %v10113_v61  ;;  %v3448_v5 = vmul.f32 %v3438_v16, %v10111_v30  ;;  %v10216_v46 = vld [vmem:[#allocation132_spill] sm:$0xff] }
 0x990   : > { %v3471_v39 = vsel %vm911_vm0, %v3459_v6, %v3467_v41  ;;  %v3475_v11 = vsel %vm911_vm0, %v3467_v41, %v3459_v6  ;;  %3758 = vmatprep.subr.mxu1 %v10195_v35  ;;  %3581 = vmatpush1.msra.mxu0 %v3286_v3  ;;  %v3473_v6 = vsel %vm911_vm0, %v8412_v36, %v8410_v53  ;;  %v10200_v53 = vld [vmem:[#allocation116_spill] sm:$0xff] }
 0x991   : > { %v3482_v18 = vmul.f32 %v3471_v39, %v10099_v25  ;;  %v3483_v1 = vmul.f32 %v3475_v11, %v10101_v15  ;;  %3759 = vmatpush1.msra.mxu1 %v10196_v51  ;;  %3582 = vmatprep.subr.mxu0 %v3285_v19  ;;  %v3423_v56 = vpop.permute.xlu1 %3422  ;;  %v3479_v48 = vmul.f32 %v3473_v6, %v10101_v15  ;;  %v10208_v11 = vld [vmem:[#allocation124_spill] sm:$0xff]  ;;  %v10210_v51 = vld [vmem:[#allocation126_spill] sm:$0xff] }
 0x992   : > { %3760 = vmatprep.subr.mxu1 %v10197_v43  ;;  %3583 = vmatpush1.msra.mxu0 %v3284_v62  ;;  %v3441_v3 = vsel %vm889_vm2, %v8592_v45, %v3423_v56  ;;  %v3437_v57 = vsel %vm889_vm2, %v3423_v56, %v8592_v45 }
 0x993   : > { %3761 = vmatpush1.msra.mxu1 %v10198_v13  ;;  %v3429_v26 = vpop.permute.xlu0 %3428  ;;  %3584 = vmatprep.subr.mxu0 %v3483_v1  ;;  %v3447_v39 = vmul.f32 %v3441_v3, %v10113_v61  ;;  %v3446_v35 = vmul.f32 %v3437_v57, %v10111_v30  ;;  %v10211_v13 = vld [vmem:[#allocation128_spill] sm:$0xff]  ;;  %v10221_v57 = vmov 0.0  }
 0x994   : > { %3762 = vmatprep.subr.mxu1 %v10199_v47  ;;  %3585 = vmatpush2.msra.mxu0 %v3482_v18  ;;  %v10213_v47 = vld [vmem:[#allocation129_spill] sm:$0xff] }
 0x995   : > { %3763 = vmatpush1.msra.mxu1 %v10200_v53  ;;  %3586 = vmatprep.subr.mxu0 %v3481_v9  ;;  %v3421_v36 = vpop.permute.xlu1 %3420 }
 0x996   : > { %3764 = vmatprep.subr.mxu1 %v10201_v52  ;;  %3587 = vmatpush2.msra.mxu0 %v3480_v59  ;;  %v3436_v41 = vsel %vm889_vm2, %v3421_v36, %v3429_v26  ;;  %v3440_v19 = vsel %vm889_vm2, %v3429_v26, %v3421_v36  ;;  %v10214_v36 = vld [vmem:[#allocation130_spill] sm:$0xff] }
 0x997   : > { %3765 = vmatpush1.msra.mxu1 %v10202_v2  ;;  %v3435_v12 = vpop.permute.xlu0 %3434  ;;  %3588 = vmatprep.subr.mxu0 %v3479_v48  ;;  %v3444_v18 = vmul.f32 %v3436_v41, %v10111_v30  ;;  %v3445_v1 = vmul.f32 %v3440_v19, %v10113_v61  ;;  %v10225_v41 = vld [vmem:[#allocation140_spill] sm:$0xff] }
 0x998   : > { %v3439_v38 = vsel %vm889_vm2, %v8580_v58, %v3435_v12  ;;  %v3443_v31 = vsel %vm889_vm2, %v3435_v12, %v8580_v58  ;;  %3766 = vmatprep.subr.mxu1 %v10203_v37  ;;  %3589 = vmatpush2.msra.mxu0 %v3478_v60  ;;  %v10205_v58 = vld [vmem:[#allocation121_spill] sm:$0xff]  ;;  %v10218_v37 = vld [vmem:[#allocation134_spill] sm:$0xff]  ;;  %v10226_v19 = vld [vmem:[#allocation232_spill] sm:$0xff] }
 0x999   : > { %v3450_v34 = vmul.f32 %v3439_v38, %v10111_v30  ;;  %v3451_v17 = vmul.f32 %v3443_v31, %v10113_v61  ;;  %3767 = vmatpush1.msra.mxu1 %v10204_v40  ;;  %3590 = vmatprep.subr.mxu0 %v3477_v44  ;;  %v3395_v33 = vpop.permute.xlu1 %3394  ;;  %v10215_v44 = vld [vmem:[#allocation131_spill] sm:$0xff]  ;;  %v10217_v38 = vld [vmem:[#allocation133_spill] sm:$0xff] }
 0x99a   : > { %3768 = vmatprep.subr.mxu1 %v10205_v58  ;;  %3591 = vmatpush2.msra.mxu0 %v3476_v7 }
 0x99b   : > { %3769 = vmatpush1.msra.mxu1 %v10206_v8  ;;  %v3401_v62 = vpop.permute.xlu0 %3400  ;;  %3592 = vmatprep.subr.mxu0 %v3451_v17  ;;  %v10222_v8 = vld [vmem:[#allocation137_spill] sm:$0xff] }
 0x99c   : > { %3770 = vmatprep.subr.mxu1 %v10207_v32  ;;  %3593 = vmatpush2.msra.mxu0 %v3450_v34  ;;  %v3533_v34 = vld [vmem:[%s9532_s15 + $0x28] sm:$0xff]  ;;  %v10227_v32 = vld [vmem:[#allocation141_spill] sm:$0xff] }
 0x99d   : > { %3771 = vmatpush1.msra.mxu1 %v10208_v11  ;;  %3594 = vmatprep.subr.mxu0 %v3449_v29  ;;  %v3393_v45 = vpop.permute.xlu1 %3392  ;;  %v10220_v29 = vld [vmem:[#allocation135_spill] sm:$0xff]  ;;  %v10229_v11 = vld [vmem:[#allocation142_spill] sm:$0xff] }
 0x99e   : > { %3772 = vmatprep.subr.mxu1 %v10209_v49  ;;  %3595 = vmatpush2.msra.mxu0 %v3448_v5  ;;  %v3410_v6 = vsel %vm867_vm3, %v3401_v62, %v3393_v45  ;;  %v3406_v26 = vsel %vm867_vm3, %v3393_v45, %v3401_v62  ;;  %v10223_v62 = vld [vmem:[#allocation138_spill] sm:$0xff]  ;;  %v10224_v5 = vld [vmem:[#allocation139_spill] sm:$0xff]  ;;  %v10230_v45 = vld [vmem:[#allocation172_spill] sm:$0xff] }
 0x99f   : > { %3773 = vmatpush1.msra.mxu1 %v10210_v51  ;;  %v3403_v56 = vpop.permute.xlu0 %3402  ;;  %3596 = vmatprep.subr.mxu0 %v3447_v39  ;;  %v3417_v53 = vmul.f32 %v3410_v6, %v10123_v50  ;;  %v3416_v60 = vmul.f32 %v3406_v26, %v10121_v42  ;;  %v10228_v39 = vld [vmem:[#allocation231_spill] sm:$0xff]  ;;  %v10235_v51 = vld [vmem:[#allocation145_spill] sm:$0xff] }
 0x9a0   : > { %v3407_v43 = vsel %vm867_vm3, %v3395_v33, %v3403_v56  ;;  %v3411_v27 = vsel %vm867_vm3, %v3403_v56, %v3395_v33  ;;  %3774 = vmatprep.subr.mxu1 %v10211_v13  ;;  %3597 = vmatpush2.msra.mxu0 %v3446_v35  ;;  %v10219_v33 = vld [vmem:[#allocation136_spill] sm:$0xff]  ;;  %v10232_v49 = vld [vmem:[#allocation171_spill] sm:$0xff]  ;;  %v10236_v56 = vld [vmem:[#allocation170_spill] sm:$0xff] }
 0x9a1   : > { %v3418_v9 = vmul.f32 %v3407_v43, %v10121_v42  ;;  %v3419_v59 = vmul.f32 %v3411_v27, %v10123_v50  ;;  %3775 = vmatpush2.msra.mxu1 %v10212_v20  ;;  %3598 = vmatprep.subr.mxu0 %v3445_v1  ;;  %v3391_v28 = vpop.permute.xlu1 %3390  ;;  %v10231_v35 = vld [vmem:[#allocation144_spill] sm:$0xff]  ;;  %v10234_v1 = vld [vmem:[#allocation169_spill] sm:$0xff]  ;;  %v10237_v43 = vld [vmem:[#allocation146_spill] sm:$0xff] }
 0x9a2   : > { %3776 = vmatprep.subr.mxu1 %v10213_v47  ;;  %3599 = vmatpush2.msra.mxu0 %v3444_v18  ;;  %v10233_v18 = vld [vmem:[#allocation143_spill] sm:$0xff]  ;;  %v3528_v6 = vld [vmem:[%s9532_s15] sm:$0xff]  ;;  %v10238_v27 = vld [vmem:[#allocation168_spill] sm:$0xff] }
 0x9a3   : > { %3777 = vmatpush2.msra.mxu1 %v10214_v36  ;;  %v3399_v48 = vpop.permute.xlu0 %3398  ;;  %3600 = vmatprep.subr.mxu0 %v3419_v59  ;;  %v10239_v13 = vld [vmem:[#allocation148_spill] sm:$0xff]  ;;  %v10240_v26 = vld [vmem:[#allocation167_spill] sm:$0xff]  ;;  %v3536_v59 = vld [vmem:[%s9532_s15 + $0x40] sm:$0xff] }
 0x9a4   : > { %v3405_v52 = vsel %vm867_vm3, %v3391_v28, %v3399_v48  ;;  %v3409_v7 = vsel %vm867_vm3, %v3399_v48, %v3391_v28  ;;  %3778 = vmatprep.subr.mxu1 %v10215_v44  ;;  %3601 = vmatpush2.msra.mxu0 %v3418_v9  ;;  %v10241_v9 = vld [vmem:[#allocation147_spill] sm:$0xff]  ;;  %v10242_v20 = vld [vmem:[#allocation150_spill] sm:$0xff]  ;;  %v10244_v47 = vld [vmem:[#allocation149_spill] sm:$0xff] }
 0x9a5   : > { %v3414_v2 = vmul.f32 %v3405_v52, %v10121_v42  ;;  %v3415_v12 = vmul.f32 %v3409_v7, %v10123_v50  ;;  %3779 = vmatpush2.msra.mxu1 %v10216_v46  ;;  %3602 = vmatprep.subr.mxu0 %v3417_v53  ;;  %v3389_v31 = vpop.permute.xlu1 %3388  ;;  %v10243_v28 = vld [vmem:[#allocation151_spill] sm:$0xff]  ;;  %v3532_v53 = vld [vmem:[%s9532_s15 + $0x20] sm:$0xff]  ;;  %v10245_v36 = vld [vmem:[#allocation152_spill] sm:$0xff] }
 0x9a6   : > { %3780 = vmatprep.subr.mxu1 %v10217_v38  ;;  %3603 = vmatpush2.msra.mxu0 %v3416_v60  ;;  %v10246_v48 = vld [vmem:[#allocation94_spill] sm:$0xff]  ;;  %v10247_v60 = vld [vmem:[#allocation153_spill] sm:$0xff]  ;;  %v3531_v52 = vld [vmem:[%s9532_s15 + $0x18] sm:$0xff] }
 0x9a7   : > { %3781 = vmatpush2.msra.mxu1 %v10218_v37  ;;  %v3397_v16 = vpop.permute.xlu0 %3396  ;;  %3604 = vmatprep.subr.mxu0 %v3415_v12  ;;  %v10248_v7 = vld [vmem:[#allocation93_spill] sm:$0xff]  ;;  %v10249_v44 = vld [vmem:[#allocation154_spill] sm:$0xff]  ;;  %v3539_v12 = vld [vmem:[%s9532_s15 + $0x58] sm:$0xff] }
 0x9a8   : > { %v3404_v17 = vsel %vm867_vm3, %v3389_v31, %v3397_v16  ;;  %v3408_v40 = vsel %vm867_vm3, %v3397_v16, %v3389_v31  ;;  %3782 = vmatprep.subr.mxu1 %v10219_v33  ;;  %3605 = vmatpush2.msra.mxu0 %v3414_v2  ;;  %v10250_v2 = vld [vmem:[#allocation92_spill] sm:$0xff]  ;;  %v10251_v46 = vld [vmem:[#allocation155_spill] sm:$0xff]  ;;  %v10254_v16 = vld [vmem:[#allocation90_spill] sm:$0xff] }
 0x9a9   : > { %v3412_v3 = vmul.f32 %v3404_v17, %v10121_v42  ;;  %v3413_v58 = vmul.f32 %v3408_v40, %v10123_v50  ;;  %3783 = vmatpush2.msra.mxu1 %v10220_v29  ;;  %3711 = vmatprep.mubr.f32.mxu1 %v10221_v57  ;;  %v10252_v38 = vld [vmem:[#allocation91_spill] sm:$0xff]  ;;  %v3535_v31 = vld [vmem:[%s9532_s15 + $0x38] sm:$0xff]  ;;  %v10256_v40 = vld [vmem:[#allocation89_spill] sm:$0xff] }
 0x9aa   : > { %3784 = vmatprep.subr.mxu1 %v10222_v8  ;;  %5002 = vmatmul.mubr.msk.f32.gmra.mxu1 %vm1381_vm9, %v3533_v34  ;;  %v10253_v37 = vld [vmem:[#allocation156_spill] sm:$0xff]  ;;  %v10255_v34 = vld [vmem:[#allocation158_spill] sm:$0xff]  ;;  %v3534_v17 = vld [vmem:[%s9532_s15 + $0x30] sm:$0xff] }
 0x9ab   : > { %3785 = vmatpush2.msra.mxu1 %v10223_v62  ;;  %3606 = vmatprep.subr.mxu0 %v3413_v58  ;;  %v3517_v33 = vld [vmem:[%s9531_s14 + $0x8] sm:$0xff]  ;;  %v10257_v58 = vld [vmem:[#allocation157_spill] sm:$0xff]  ;;  %v10258_v29 = vld [vmem:[#allocation88_spill] sm:$0xff] }
 0x9ac   : > { %3786 = vmatprep.subr.mxu1 %v10224_v5  ;;  %3607 = vmatpush2.msra.mxu0 %v3412_v3  ;;  %v3538_v3 = vld [vmem:[%s9532_s15 + $0x50] sm:$0xff]  ;;  %v3516_v8 = vld [vmem:[%s9531_s14] sm:$0xff] }
 0x9ad   : > { %3787 = vmatpush2.msra.mxu1 %v10225_v41  ;;  %3608 = vmatprep.subr.mxu0 %v10226_v19  ;;  %v10259_v62 = vld [vmem:[#allocation87_spill] sm:$0xff]  ;;  %v3520_v5 = vld [vmem:[%s9531_s14 + $0x20] sm:$0xff]  ;;  %v3537_v41 = vld [vmem:[%s9532_s15 + $0x48] sm:$0xff] }
 0x9ae   : > { %3788 = vmatprep.subr.mxu1 %v10227_v32  ;;  %3609 = vmatpush2.msra.mxu0 %v10228_v39  ;;  %v3519_v19 = vld [vmem:[%s9531_s14 + $0x18] sm:$0xff]  ;;  %v3518_v39 = vld [vmem:[%s9531_s14 + $0x10] sm:$0xff] }
 0x9af   : > { %3789 = vmatpush2.msra.mxu1 %v10229_v11  ;;  %3610 = vmatprep.subr.mxu0 %v10230_v45  ;;  %v3523_v32 = vld [vmem:[%s9531_s14 + $0x38] sm:$0xff]  ;;  %v3522_v11 = vld [vmem:[%s9531_s14 + $0x30] sm:$0xff] }
 0x9b0   : > { %3790 = vmatprep.subr.mxu1 %v10231_v35  ;;  %3611 = vmatpush2.msra.mxu0 %v10232_v49  ;;  %v3526_v45 = vld [vmem:[%s9531_s14 + $0x50] sm:$0xff]  ;;  %v3521_v35 = vld [vmem:[%s9531_s14 + $0x28] sm:$0xff] }
 0x9b1   : > { %3791 = vmatpush2.msra.mxu1 %v10233_v18  ;;  %3612 = vmatprep.subr.mxu0 %v10234_v1  ;;  %v3525_v49 = vld [vmem:[%s9531_s14 + $0x48] sm:$0xff]  ;;  %v3524_v18 = vld [vmem:[%s9531_s14 + $0x40] sm:$0xff]  ;;  %v3527_v1 = vld [vmem:[%s9531_s14 + $0x58] sm:$0xff] }
 0x9b2   : > { %3792 = vmatprep.subr.mxu1 %v10235_v51  ;;  %3613 = vmatpush2.msra.mxu0 %v10236_v56 }
 0x9b3   : > { %3793 = vmatpush2.msra.mxu1 %v10237_v43  ;;  %3614 = vmatprep.subr.mxu0 %v10238_v27 }
 0x9b4   : > { %3794 = vmatprep.subr.mxu1 %v10239_v13  ;;  %3615 = vmatpush2.msra.mxu0 %v10240_v26 }
 0x9b5   : > { %3795 = vmatpush2.msra.mxu1 %v10241_v9  ;;  %3617 = vmatmul.mubr.f32.vlgmr.msra.gmra.mxu0 %v3528_v6 }
 0x9b6   : > { %3796 = vmatprep.subr.mxu1 %v10242_v20  ;;  %3855 = vmatprep.subr.mxu0 %v10243_v28 }
 0x9b7   : > { %3717 = vmatprep.mubr.f32.mxu1 %v10221_v57  ;;  %3797 = vmatpush2.msra.mxu1 %v10244_v47 }
 0x9b8   : > { %3856 = vmatpush1.msra.mxu0 %v10245_v36  ;;  %5003 = vmatmul.mubr.msk.f32.gmra.mxu1 %vm1381_vm9, %v3536_v59 }
 0x9b9   : > { %3798 = vmatprep.subr.mxu1 %v10246_v48  ;;  %3857 = vmatprep.subr.mxu0 %v10247_v60  ;;  %v8849_v60 = vpop.permute.xlu0 %3936 }
 0x9ba   : > { %3622 = vmatprep.mubr.f32.mxu0 %v3532_v53  ;;  %3799 = vmatpush2.msra.mxu1 %v10248_v7 }
 0x9bb   : > { %3858 = vmatpush1.msra.mxu0 %v10249_v44  ;;  %3800 = vmatprep.subr.mxu1 %v10250_v2 }
 0x9bc   : > { %3623 = vmatmul.mubr.f32.gmra.mxu0 %v3531_v52  ;;  %3859 = vmatprep.subr.mxu0 %v10251_v46 }
 0x9bd   : > { %3723 = vmatprep.mubr.f32.mxu1 %v10221_v57  ;;  %3801 = vmatpush2.msra.mxu1 %v10252_v38 }
 0x9be   : > { %3860 = vmatpush1.msra.mxu0 %v10253_v37  ;;  %5004 = vmatmul.mubr.msk.f32.gmra.mxu1 %vm1381_vm9, %v3539_v12 }
 0x9bf   : > { %3802 = vmatprep.subr.mxu1 %v10254_v16  ;;  %3861 = vmatprep.subr.mxu0 %v10255_v34 }
 0x9c0   : > { %3628 = vmatprep.mubr.f32.mxu0 %v3535_v31  ;;  %3803 = vmatpush2.msra.mxu1 %v10256_v40 }
 0x9c1   : > { %3862 = vmatpush1.msra.mxu0 %v10257_v58  ;;  %3804 = vmatprep.subr.mxu1 %v10258_v29 }
 0x9c2   : > { %3629 = vmatmul.mubr.f32.gmra.mxu0 %v3534_v17  ;;  %3805 = vmatpush2.msra.mxu1 %v10259_v62  ;;  %v3927_v17 = vpop.permute.xlu0 %3926 }
 0x9c3   : > { %3806 = vmatprep.mubr.f32.mxu1 %v3517_v33  ;;  %3634 = vmatprep.mubr.f32.mxu0 %v3538_v3 }
 0x9c4   : > { %3807 = vmatmul.mubr.f32.vlgmr.msra.gmra.mxu1 %v3516_v8 }
 0x9c5   : > { %3812 = vmatprep.mubr.f32.mxu1 %v3520_v5 }
 0x9c6   : > { %3635 = vmatmul.mubr.f32.gmra.mxu0 %v3537_v41 }
 0x9c7   : > { %3895 = vmatprep.mubr.f32.mxu0 %v10221_v57 }
 0x9c8   : > { %3813 = vmatmul.mubr.f32.gmra.mxu1 %v3519_v19  ;;  %v8867_v19 = vpop.permute.xlu1 %3941 }
 0x9c9   : > { %3818 = vmatprep.mubr.f32.mxu1 %v3523_v32 }
 0x9ca   : > { %5005 = vmatmul.mubr.msk.f32.vlgmr.msra.gmra.mxu0 %vm1381_vm9, %v3518_v39 }
 0x9cb   : > { %3901 = vmatprep.mubr.f32.mxu0 %v10221_v57 }
 0x9cc   : > { %3819 = vmatmul.mubr.f32.gmra.mxu1 %v3522_v11 }
 0x9cd   : > { %3824 = vmatprep.mubr.f32.mxu1 %v3526_v45 }
 0x9ce   : > { %5006 = vmatmul.mubr.msk.f32.gmra.mxu0 %vm1381_vm9, %v3521_v35 }
 0x9cf   : > { %3907 = vmatprep.mubr.f32.mxu0 %v10221_v57 }
 0x9d0   : > { %3825 = vmatmul.mubr.f32.gmra.mxu1 %v3525_v49 }
 0x9d1   : > { %4390 = vmatprep.mubr.f32.mxu1 %v10221_v57 }
 0x9d2   : > { %5007 = vmatmul.mubr.msk.f32.gmra.mxu0 %vm1381_vm9, %v3524_v18 }
 0x9d3   : > { %3913 = vmatprep.mubr.f32.mxu0 %v10221_v57 }
 0x9d6   : > { %5008 = vmatmul.mubr.msk.f32.gmra.mxu0 %vm1381_vm9, %v3527_v1  ;;  %v3932_v1 = vpop.permute.xlu1 %3931 }
 0xa40   : > { %v3707_v51 = vpop.f32.mrf.mxu1 }
 0xa42   : > { %v3709_v56 = vpop.f32.mrf.mxu1 }
 0xa6a   : > { %v3713_v6 = vpop.f32.mrf.mxu1 }
 0xa6c   : > { %v3715_v43 = vpop.f32.mrf.mxu1 }
 0xa75   : > { %v3618_v27 = vpop.f32.mrf.mxu0 }
 0xa76   : > { %v3708_v7 = vadd.f32 %v3707_v51, %v3618_v27 }
 0xa77   : > { %v3620_v13 = vpop.f32.mrf.mxu0 }
 0xa78   : > { %v3719_v26 = vpop.f32.mrf.mxu1  ;;  %v3710_v46 = vadd.f32 %v3709_v56, %v3620_v13 }
 0xa7a   : > { %v8847_v9 = vpop.f32.mrf.mxu1 }
 0xa7c   : > { %v3624_v59 = vpop.f32.mrf.mxu0 }
 0xa7d   : > { %v3714_v41 = vadd.f32 %v3713_v6, %v3624_v59 }
 0xa7e   : > { %v3626_v20 = vpop.f32.mrf.mxu0  ;;  %v3725_v28 = vpop.f32.mrf.mxu1 }
 0xa7f   : > { %v3716_v39 = vadd.f32 %v3715_v43, %v3626_v20 }
 0xa80   : > { %v3727_v47 = vpop.f32.mrf.mxu1 }
 0xa82   : > { %v3630_v53 = vpop.f32.mrf.mxu0 }
 0xa83   : > { %v3720_v59 = vadd.f32 %v3719_v26, %v3630_v53 }
 0xa84   : > { %v3632_v36 = vpop.f32.mrf.mxu0  ;;  %v3808_v48 = vpop.f32.mrf.mxu1 }
 0xa85   : > { %v3809_v38 = vadd.f32 %v3808_v48, %v3708_v7 }
 0xa86   : > { %v3636_v52 = vpop.f32.mrf.mxu0  ;;  %v3810_v2 = vpop.f32.mrf.mxu1 }
 0xa87   : > { %v8851_v44 = vadd.f32 %v3725_v28, %v3636_v52  ;;  %v3811_v16 = vadd.f32 %v3810_v2, %v3710_v46  ;;  %v3722_v28 = vadd.f32 %v8847_v9, %v3632_v36 }
 0xa88   : > { %v3638_v12 = vpop.f32.mrf.mxu0  ;;  %v3814_v62 = vpop.f32.mrf.mxu1 }
 0xa89   : > { %v8853_v31 = vadd.f32 %v3727_v47, %v3638_v12  ;;  %v3815_v11 = vadd.f32 %v3814_v62, %v3714_v41 }
 0xa8a   : > { %v3897_v37 = vpop.f32.mrf.mxu0  ;;  %v3816_v32 = vpop.f32.mrf.mxu1 }
 0xa8b   : > { %v3898_v34 = vadd.f32 %v3897_v37, %v3809_v38  ;;  %v3817_v35 = vadd.f32 %v3816_v32, %v3716_v39 }
 0xa8c   : > { %v3899_v40 = vpop.f32.mrf.mxu0  ;;  %v3820_v27 = vpop.f32.mrf.mxu1 }
 0xa8d   : > { %v3944_v33 = vadd.f32 %v3927_v17, %v3898_v34  ;;  %v3900_v3 = vadd.f32 %v3899_v40, %v3811_v16  ;;  %v3821_v47 = vadd.f32 %v3820_v27, %v3720_v59 }
 0xa8e   : > { %v3903_v5 = vpop.f32.mrf.mxu0  ;;  %v3822_v20 = vpop.f32.mrf.mxu1 }
 0xa8f   : > { %v8855_v58 = vmax.f32 %v3944_v33, 0.0  ;;  %v3945_v29 = vadd.f32 %v3927_v17, %v3900_v3  ;;  %v3904_v49 = vadd.f32 %v3903_v5, %v3815_v11  ;;  %v3823_v52 = vadd.f32 %v3822_v20, %v3722_v28  ;;  %v4586_v20 = vld [vmem:[%s9536_s19 + $0x10] sm:$0xff] }
 0xa90   : > { %v3905_v45 = vpop.f32.mrf.mxu0 }
 0xa91   : > { %10260 = vst [vmem:[#allocation174_spill] sm:$0xff] %v8855_v58  ;;  %v8857_v8 = vmax.f32 %v3945_v29, 0.0  ;;  %4056 = vrot.lane.b32.xlu1 %v8855_v58, %s9937_s27  ;;  %v3906_v18 = vadd.f32 %v3905_v45, %v3817_v35  ;;  %v3946_v51 = vadd.f32 %v3932_v1, %v3904_v49 }
 0xa92   : > { %v3909_v13 = vpop.f32.mrf.mxu0 }
 0xa93   : > { %10261 = vst [vmem:[#allocation11_spill] sm:$0xff] %v8857_v8  ;;  %4064 = vrot.lane.b32.xlu0 %v8857_v8, %s9937_s27  ;;  %v3947_v56 = vadd.f32 %v3932_v1, %v3906_v18  ;;  %v8879_v6 = vmax.f32 %v3946_v51, 0.0  ;;  %v3910_v7 = vadd.f32 %v3909_v13, %v3821_v47  ;;  %v4584_v18 = vld [vmem:[%s9536_s19] sm:$0xff]  ;;  %v4226_v1 = vld [vmem:[%s9535_s18 + $0x8] sm:$0xff] }
 0xa94   : > { %v3911_v48 = vpop.f32.mrf.mxu0  ;;  %4307 = vmatprep.mubr.f32.mxu0 %v4226_v1 }
 0xa95   : > { %4184 = vrot.lane.b32.xlu1 %v8855_v58, %s9864_s21  ;;  %10262 = vst [vmem:[#allocation173_spill] sm:$0xff] %v8879_v6  ;;  %v8883_v43 = vmax.f32 %v3947_v56, 0.0  ;;  %v3912_v2 = vadd.f32 %v3911_v48, %v3823_v52  ;;  %v3948_v26 = vadd.f32 %v8849_v60, %v3910_v7  ;;  %v4585_v56 = vld [vmem:[%s9536_s19 + $0x8] sm:$0xff] }
 0xa96   : > { %v3915_v12 = vpop.f32.mrf.mxu0 }
 0xa97   : > { %4192 = vrot.lane.b32.xlu0 %v8857_v8, %s9864_s21  ;;  %10263 = vst [vmem:[#allocation9_spill] sm:$0xff] %v8883_v43  ;;  %v3949_v9 = vadd.f32 %v8849_v60, %v3912_v2  ;;  %v8910_v53 = vmax.f32 %v3948_v26, 0.0  ;;  %v3826_v60 = vpop.f32.mrf.mxu1 }
 0xa98   : > { %v3827_v38 = vadd.f32 %v3826_v60, %v8851_v44  ;;  %v3917_v37 = vpop.f32.mrf.mxu0 }
 0xa99   : > { %4024 = vrot.lane.b32.xlu1 %v8855_v58, %s9938_s29  ;;  %10264 = vst [vmem:[#allocation229_spill] sm:$0xff] %v8910_v53  ;;  %v8914_v36 = vmax.f32 %v3949_v9, 0.0  ;;  %v3828_v46 = vpop.f32.mrf.mxu1 }
 0xa9a   : > { %v3829_v16 = vadd.f32 %v3828_v46, %v8853_v31  ;;  %v3916_v34 = vadd.f32 %v3915_v12, %v3827_v38 }
 0xa9b   : > { %4032 = vrot.lane.b32.xlu0 %v8857_v8, %s9938_s29  ;;  %10265 = vst [vmem:[#allocation230_spill] sm:$0xff] %v8914_v36 }
 0xa9c   : > { %v3918_v17 = vadd.f32 %v3917_v37, %v3829_v16  ;;  %v3950_v40 = vadd.f32 %v8867_v19, %v3916_v34 }
 0xa9d   : > { %3992 = vrot.lane.b32.xlu1 %v8855_v58, %s9939_s24 }
 0xa9e   : > { %v3951_v44 = vadd.f32 %v8867_v19, %v3918_v17  ;;  %v8942_v33 = vmax.f32 %v3950_v40, 0.0 }
 0xa9f   : > { %4000 = vrot.lane.b32.xlu0 %v8857_v8, %s9939_s24 }
 0xaa0   : > { %10266 = vst [vmem:[#allocation175_spill] sm:$0xff] %v8942_v33  ;;  %v8946_v31 = vmax.f32 %v3951_v44, 0.0 }
 0xaa1   : > { %3960 = vrot.lane.b32.xlu1 %v8855_v58, %s9854_s6 }
 0xaa2   : > { %10267 = vst [vmem:[#allocation176_spill] sm:$0xff] %v8946_v31 }
 0xaa3   : > { %3968 = vrot.lane.b32.xlu0 %v8857_v8, %s9854_s6 }
 0xaa5   : > { %4058 = vrot.lane.b32.xlu1 %v8879_v6, %s9937_s27 }
 0xaa7   : > { %4066 = vrot.lane.b32.xlu0 %v8883_v43, %s9937_s27 }
 0xaa9   : > { %4186 = vrot.lane.b32.xlu1 %v8879_v6, %s9864_s21 }
 0xaab   : > { %4194 = vrot.lane.b32.xlu0 %v8883_v43, %s9864_s21 }
 0xaad   : > { %4026 = vrot.lane.b32.xlu1 %v8879_v6, %s9938_s29 }
 0xaaf   : > { %4034 = vrot.lane.b32.xlu0 %v8883_v43, %s9938_s29 }
 0xab1   : > { %3994 = vrot.lane.b32.xlu1 %v8879_v6, %s9939_s24 }
 0xab3   : > { %4002 = vrot.lane.b32.xlu0 %v8883_v43, %s9939_s24 }
 0xab5   : > { %3962 = vrot.lane.b32.xlu1 %v8879_v6, %s9854_s6 }
 0xab7   : > { %3970 = vrot.lane.b32.xlu0 %v8883_v43, %s9854_s6 }
 0xab9   : > { %4154 = vrot.lane.b32.xlu1 %v8879_v6, %s9855_s3 }
 0xabb   : > { %4162 = vrot.lane.b32.xlu0 %v8883_v43, %s9855_s3 }
 0xabd   : > { %4060 = vrot.lane.b32.xlu1 %v8910_v53, %s9937_s27 }
 0xabf   : > { %4068 = vrot.lane.b32.xlu0 %v8914_v36, %s9937_s27 }
 0xac1   : > { %4188 = vrot.lane.b32.xlu1 %v8910_v53, %s9864_s21 }
 0xac3   : > { %4196 = vrot.lane.b32.xlu0 %v8914_v36, %s9864_s21 }
 0xac5   : > { %4028 = vrot.lane.b32.xlu1 %v8910_v53, %s9938_s29 }
 0xac7   : > { %4036 = vrot.lane.b32.xlu0 %v8914_v36, %s9938_s29 }
 0xac9   : > { %3996 = vrot.lane.b32.xlu1 %v8910_v53, %s9939_s24 }
 0xacb   : > { %4004 = vrot.lane.b32.xlu0 %v8914_v36, %s9939_s24 }
 0xacd   : > { %3964 = vrot.lane.b32.xlu1 %v8910_v53, %s9854_s6 }
 0xacf   : > { %3972 = vrot.lane.b32.xlu0 %v8914_v36, %s9854_s6 }
 0xad1   : > { %4156 = vrot.lane.b32.xlu1 %v8910_v53, %s9855_s3 }
 0xad3   : > { %4164 = vrot.lane.b32.xlu0 %v8914_v36, %s9855_s3 }
 0xad5   : > { %4062 = vrot.lane.b32.xlu1 %v8942_v33, %s9937_s27 }
 0xad7   : > { %4070 = vrot.lane.b32.xlu0 %v8946_v31, %s9937_s27 }
 0xad9   : > { %4190 = vrot.lane.b32.xlu1 %v8942_v33, %s9864_s21 }
 0xadb   : > { %4198 = vrot.lane.b32.xlu0 %v8946_v31, %s9864_s21 }
 0xadd   : > { %4030 = vrot.lane.b32.xlu1 %v8942_v33, %s9938_s29 }
 0xadf   : > { %4038 = vrot.lane.b32.xlu0 %v8946_v31, %s9938_s29  ;;  %s10349_s29 = sld [smem:[#allocation242_spill]] }
 0xae1   : > { %4152 = vrot.lane.b32.xlu1 %v8855_v58, %s9855_s3 }
 0xae3   : > { %4160 = vrot.lane.b32.xlu0 %v8857_v8, %s9855_s3 }
 0xae5   : > { %3998 = vrot.lane.b32.xlu1 %v8942_v33, %s9939_s24 }
 0xae7   : > { %4006 = vrot.lane.b32.xlu0 %v8946_v31, %s9939_s24  ;;  %s766_s24 = scalar_lea.vmem %s10349_s29, %s5019_s2 }
 0xae9   : > { %3966 = vrot.lane.b32.xlu1 %v8942_v33, %s9854_s6 }
 0xaeb   : > { %4132 = vrot.lane.b32.xlu0 %v8914_v36, %s9862_s26 }
 0xaed   : > { %4158 = vrot.lane.b32.xlu1 %v8942_v33, %s9855_s3 }
 0xaef   : > { %3974 = vrot.lane.b32.xlu0 %v8946_v31, %s9854_s6 }
 0xaf1   : > { %4126 = vrot.lane.b32.xlu1 %v8942_v33, %s9862_s26 }
 0xaf3   : > { %4130 = vrot.lane.b32.xlu0 %v8883_v43, %s9862_s26 }
 0xaf5   : > { %4124 = vrot.lane.b32.xlu1 %v8910_v53, %s9862_s26 }
 0xaf7   : > { %4166 = vrot.lane.b32.xlu0 %v8946_v31, %s9855_s3 }
 0xaf9   : > { %4122 = vrot.lane.b32.xlu1 %v8879_v6, %s9862_s26 }
 0xafb   : > { %4128 = vrot.lane.b32.xlu0 %v8857_v8, %s9862_s26 }
 0xafd   : > { %4120 = vrot.lane.b32.xlu1 %v8855_v58, %s9862_s26 }
 0xaff   : > { %4134 = vrot.lane.b32.xlu0 %v8946_v31, %s9862_s26  ;;  %s761_s26 = scalar_lea.vmem %s9537_s20, %s5019_s2 }
 0xb01   : > { %4094 = vrot.lane.b32.xlu1 %v8942_v33, %s9863_s5 }
 0xb03   : > { %4100 = vrot.lane.b32.xlu0 %v8914_v36, %s9863_s5  ;;  %v4057_v3 = vpop.permute.xlu1 %4056 }
 0xb05   : > { %v4065_v29 = vpop.permute.xlu0 %4064  ;;  %4092 = vrot.lane.b32.xlu1 %v8910_v53, %s9863_s5 }
 0xb06   : > { %v9000_v62 = vsel %vm845_vm4, %v4057_v3, %v4065_v29  ;;  %v9004_v5 = vsel %vm845_vm4, %v4065_v29, %v4057_v3 }
 0xb07   : > { %4102 = vrot.lane.b32.xlu0 %v8946_v31, %s9863_s5  ;;  %v4185_v41 = vpop.permute.xlu1 %4184 }
 0xb09   : > { %v4193_v19 = vpop.permute.xlu0 %4192  ;;  %4090 = vrot.lane.b32.xlu1 %v8879_v6, %s9863_s5 }
 0xb0a   : > { %v9012_v32 = vsel %vm933_vm1, %v4185_v41, %v4193_v19  ;;  %v9016_v39 = vsel %vm933_vm1, %v4193_v19, %v4185_v41 }
 0xb0b   : > { %4098 = vrot.lane.b32.xlu0 %v8883_v43, %s9863_s5  ;;  %v4025_v11 = vpop.permute.xlu1 %4024 }
 0xb0d   : > { %v4033_v45 = vpop.permute.xlu0 %4032  ;;  %4088 = vrot.lane.b32.xlu1 %v8855_v58, %s9863_s5 }
 0xb0e   : > { %v9024_v35 = vsel %vm823_vm5, %v4025_v11, %v4033_v45  ;;  %v9028_v49 = vsel %vm823_vm5, %v4033_v45, %v4025_v11 }
 0xb0f   : > { %4096 = vrot.lane.b32.xlu0 %v8857_v8, %s9863_s5  ;;  %v3993_v51 = vpop.permute.xlu1 %3992 }
 0xb11   : > { %v4001_v27 = vpop.permute.xlu0 %4000  ;;  %4589 = vperm.xlu1 %5068, %v4584_v18  }
 0xb12   : > { %v9043_v13 = vsel %vm801_vm6, %v3993_v51, %v4001_v27  ;;  %v9047_v59 = vsel %vm801_vm6, %v4001_v27, %v3993_v51 }
 0xb13   : > { %4594 = vperm.xlu0 %5067, %v4585_v56   ;;  %v3961_v28 = vpop.permute.xlu1 %3960 }
 0xb15   : > { %v3969_v47 = vpop.permute.xlu0 %3968  ;;  %4599 = vperm.xlu1 %5068, %v4586_v20  }
 0xb16   : > { %v9054_v48 = vsel %vm780_vm7, %v3961_v28, %v3969_v47  ;;  %v9058_v52 = vsel %vm780_vm7, %v3969_v47, %v3961_v28 }
 0xb17   : > { %v4059_v7 = vpop.permute.xlu1 %4058 }
 0xb19   : > { %v4067_v2 = vpop.permute.xlu0 %4066 }
 0xb1a   : > { %v4073_v36 = vsel %vm845_vm4, %v4059_v7, %v4067_v2  ;;  %v4077_v33 = vsel %vm845_vm4, %v4067_v2, %v4059_v7 }
 0xb1b   : > { %v4187_v26 = vpop.permute.xlu1 %4186  ;;  %v4083_v2 = vmul.f32 %v4073_v36, %v5439_v54 }
 0xb1d   : > { %v4195_v9 = vpop.permute.xlu0 %4194 }
 0xb1f   : > { %v9060_v60 = vpop.permute.xlu1 %4026 }
 0xb21   : > { %v9062_v12 = vpop.permute.xlu0 %4034 }
 0xb23   : > { %v9064_v46 = vpop.permute.xlu1 %3994 }
 0xb25   : > { %v9066_v38 = vpop.permute.xlu0 %4002 }
 0xb27   : > { %v9068_v37 = vpop.permute.xlu1 %3962 }
 0xb29   : > { %v9070_v16 = vpop.permute.xlu0 %3970 }
 0xb2b   : > { %v4155_v34 = vpop.permute.xlu1 %4154 }
 0xb2d   : > { %v4163_v17 = vpop.permute.xlu0 %4162 }
 0xb2e   : > { %v9074_v40 = vsel %vm911_vm0, %v4155_v34, %v4163_v17  ;;  %v9078_v44 = vsel %vm911_vm0, %v4163_v17, %v4155_v34 }
 0xb2f   : > { %v4061_v3 = vpop.permute.xlu1 %4060 }
 0xb31   : > { %v4069_v29 = vpop.permute.xlu0 %4068 }
 0xb32   : > { %v4074_v34 = vsel %vm845_vm4, %v4061_v3, %v4069_v29  ;;  %v4078_v17 = vsel %vm845_vm4, %v4069_v29, %v4061_v3  ;;  %v4205_v3 = vsel %vm933_vm1, %v4195_v9, %v4187_v26 }
 0xb33   : > { %v4189_v41 = vpop.permute.xlu1 %4188  ;;  %v4084_v29 = vmul.f32 %v4078_v17, %v5442_v55  ;;  %v4085_v31 = vmul.f32 %v4074_v34, %v5439_v54  ;;  %v4080_v17 = vmul.f32 %v9004_v5, %v5442_v55 }
 0xb35   : > { %v4197_v19 = vpop.permute.xlu0 %4196 }
 0xb37   : > { %v4029_v11 = vpop.permute.xlu1 %4028 }
 0xb39   : > { %v4037_v45 = vpop.permute.xlu0 %4036 }
 0xb3a   : > { %v4042_v5 = vsel %vm823_vm5, %v4029_v11, %v4037_v45 }
 0xb3b   : > { %v9080_v18 = vpop.permute.xlu1 %3996 }
 0xb3d   : > { %v9082_v1 = vpop.permute.xlu0 %4004 }
 0xb3f   : > { %v9084_v51 = vpop.permute.xlu1 %3964 }
 0xb41   : > { %v9086_v56 = vpop.permute.xlu0 %3972 }
 0xb43   : > { %v9088_v27 = vpop.permute.xlu1 %4156 }
 0xb45   : > { %v9090_v20 = vpop.permute.xlu0 %4164 }
 0xb47   : > { %v4063_v28 = vpop.permute.xlu1 %4062 }
 0xb49   : > { %v4071_v47 = vpop.permute.xlu0 %4070 }
 0xb4a   : > { %v4075_v58 = vsel %vm845_vm4, %v4063_v28, %v4071_v47  ;;  %v4079_v8 = vsel %vm845_vm4, %v4071_v47, %v4063_v28 }
 0xb4b   : > { %v4086_v6 = vmul.f32 %v4079_v8, %v5442_v55  ;;  %v4087_v43 = vmul.f32 %v4075_v58, %v5439_v54  ;;  %v4191_v53 = vpop.permute.xlu1 %4190  ;;  %v4202_v8 = vsel %vm933_vm1, %v4189_v41, %v4197_v19  ;;  %v4206_v58 = vsel %vm933_vm1, %v4197_v19, %v4189_v41 }
 0xb4c   : > { %v4081_v41 = vmul.f32 %v9000_v62, %v5439_v54  ;;  %v4082_v19 = vmul.f32 %v4077_v33, %v5442_v55  ;;  %v4213_v36 = vmul.f32 %v4206_v58, %v5386_v22  ;;  %v4046_v33 = vsel %vm823_vm5, %v4037_v45, %v4029_v11 }
 0xb4d   : > { %v4199_v57 = vpop.permute.xlu0 %4198  ;;  %4243 = vmatprep.subr.mxu0 %v4087_v43  ;;  %v4209_v11 = vmul.f32 %v9016_v39, %v5386_v22  ;;  %v4045_v45 = vsel %vm823_vm5, %v9062_v12, %v9060_v60 }
 0xb4e   : > { %v4203_v28 = vsel %vm933_vm1, %v4191_v53, %v4199_v57  ;;  %v4207_v7 = vsel %vm933_vm1, %v4199_v57, %v4191_v53  ;;  %4244 = vmatpush1.msra.mxu0 %v4086_v6  ;;  %v4201_v57 = vsel %vm933_vm1, %v4187_v26, %v4195_v9  ;;  %v4211_v6 = vmul.f32 %v4205_v3, %v5386_v22 }
 0xb4f   : > { %v4214_v47 = vmul.f32 %v4203_v28, %v5389_v23  ;;  %v4215_v34 = vmul.f32 %v4207_v7, %v5386_v22  ;;  %4245 = vmatprep.subr.mxu0 %v4085_v31  ;;  %v4031_v43 = vpop.permute.xlu1 %4030  ;;  %v4212_v53 = vmul.f32 %v4202_v8, %v5389_v23  ;;  %v4210_v3 = vmul.f32 %v4201_v57, %v5389_v23  ;;  %v10270_v57 = vld [vmem:[#allocation25_spill] sm:$0xff] }
 0xb50   : > { %4246 = vmatpush1.msra.mxu0 %v4084_v29  ;;  %v4041_v29 = vsel %vm823_vm5, %v9060_v60, %v9062_v12  ;;  %v4053_v8 = vmul.f32 %v4042_v5, %v5454_v63  ;;  %v4208_v28 = vmul.f32 %v9012_v32, %v5389_v23  ;;  %v4052_v7 = vmul.f32 %v4046_v33, %v5457_v0  ;;  %v4227_v60 = vld [vmem:[%s9535_s18 + $0x10] sm:$0xff] }
 0xb51   : > { %v4039_v31 = vpop.permute.xlu0 %4038  ;;  %4247 = vmatprep.subr.mxu0 %v4083_v2  ;;  %4350 = vmatprep.subr.mxu1 %v4215_v34  ;;  %v4051_v22 = vmul.f32 %v4041_v29, %v5454_v63  ;;  %v4050_v12 = vmul.f32 %v4045_v45, %v5457_v0  ;;  %v4048_v23 = vmul.f32 %v9028_v49, %v5457_v0  ;;  %v10269_v49 = vld [vmem:[#allocation24_spill] sm:$0xff] }
 0xb52   : > { %v4043_v54 = vsel %vm823_vm5, %v4031_v43, %v4039_v31  ;;  %v4047_v55 = vsel %vm823_vm5, %v4039_v31, %v4031_v43  ;;  %4248 = vmatpush1.msra.mxu0 %v4082_v19  ;;  %4351 = vmatpush1.msra.mxu1 %v4214_v47  ;;  %v4049_v32 = vmul.f32 %v9024_v35, %v5454_v63  ;;  %v10268_v47 = vld [vmem:[#allocation23_spill] sm:$0xff] }
 0xb53   : > { %v4054_v62 = vmul.f32 %v4047_v55, %v5457_v0  ;;  %v4055_v26 = vmul.f32 %v4043_v54, %v5454_v63  ;;  %4249 = vmatprep.subr.mxu0 %v4081_v41  ;;  %4352 = vmatprep.subr.mxu1 %v4213_v36  ;;  %v9141_v9 = vpop.permute.xlu1 %4152  ;;  %v4010_v34 = vsel %vm801_vm6, %v9080_v18, %v9082_v1  ;;  %v10272_v31 = vld [vmem:[#allocation27_spill] sm:$0xff]  ;;  %v10273_v54 = vld [vmem:[#allocation28_spill] sm:$0xff] }
 0xb54   : > { %4250 = vmatpush1.msra.mxu0 %v4080_v17  ;;  %4353 = vmatpush1.msra.mxu1 %v4212_v53  ;;  %v4014_v63 = vsel %vm801_vm6, %v9082_v1, %v9080_v18  ;;  %v4009_v19 = vsel %vm801_vm6, %v9064_v46, %v9066_v38  ;;  %v4013_v18 = vsel %vm801_vm6, %v9066_v38, %v9064_v46  ;;  %v10274_v38 = vld [vmem:[#allocation29_spill] sm:$0xff] }
 0xb55   : > { %v9155_v58 = vpop.permute.xlu0 %4160  ;;  %4251 = vmatprep.subr.mxu0 %v4055_v26  ;;  %4354 = vmatprep.subr.mxu1 %v4211_v6  ;;  %v4021_v1 = vmul.f32 %v4010_v34, %v5469_v10  ;;  %v10271_v6 = vld [vmem:[#allocation26_spill] sm:$0xff]  ;;  %v4020_v36 = vmul.f32 %v4014_v63, %v5472_v4  ;;  %v4019_v5 = vmul.f32 %v4009_v19, %v5469_v10 }
 0xb56   : > { %4252 = vmatpush1.msra.mxu0 %v4054_v62  ;;  %4355 = vmatpush1.msra.mxu1 %v4210_v3  ;;  %v4018_v46 = vmul.f32 %v4013_v18, %v5472_v4  ;;  %v4016_v33 = vmul.f32 %v9047_v59, %v5472_v4  ;;  %v4017_v62 = vmul.f32 %v9043_v13, %v5469_v10  ;;  %v10275_v26 = vld [vmem:[#allocation30_spill] sm:$0xff]  ;;  %v10277_v59 = vld [vmem:[#allocation32_spill] sm:$0xff] }
 0xb57   : > { %4253 = vmatprep.subr.mxu0 %v4053_v8  ;;  %4356 = vmatprep.subr.mxu1 %v4209_v11  ;;  %v3999_v39 = vpop.permute.xlu1 %3998  ;;  %v3978_v29 = vsel %vm780_vm7, %v9084_v51, %v9086_v56  ;;  %v10276_v8 = vld [vmem:[#allocation31_spill] sm:$0xff]  ;;  %v3984_v34 = vmul.f32 %v9058_v52, %v5486_v24  ;;  %v10285_v52 = vld [vmem:[#allocation40_spill] sm:$0xff] }
 0xb58   : > { %4254 = vmatpush1.msra.mxu0 %v4052_v7  ;;  %4357 = vmatpush1.msra.mxu1 %v4208_v28  ;;  %v3977_v7 = vsel %vm780_vm7, %v9068_v37, %v9070_v16 }
 0xb59   : > { %v4007_v2 = vpop.permute.xlu0 %4006  ;;  %4255 = vmatprep.subr.mxu0 %v4051_v22  ;;  %4418 = vmatprep.subr.mxu1 %v10268_v47  ;;  %v10278_v22 = vld [vmem:[#allocation33_spill] sm:$0xff] }
 0xb5a   : > { %v4011_v43 = vsel %vm801_vm6, %v3999_v39, %v4007_v2  ;;  %v4015_v17 = vsel %vm801_vm6, %v4007_v2, %v3999_v39  ;;  %4256 = vmatpush1.msra.mxu0 %v4050_v12  ;;  %5009 = vmatmul.mubr.msk.f32.vlgmr.msra.gmra.mxu1 %vm1381_vm9, %v4227_v60  ;;  %v10279_v39 = vld [vmem:[#allocation34_spill] sm:$0xff]  ;;  %v10281_v2 = vld [vmem:[#allocation36_spill] sm:$0xff] }
 0xb5b   : > { %v4022_v0 = vmul.f32 %v4015_v17, %v5472_v4  ;;  %v4023_v35 = vmul.f32 %v4011_v43, %v5469_v10  ;;  %4419 = vmatpush1.msra.mxu1 %v10269_v49  ;;  %4257 = vmatprep.subr.mxu0 %v4049_v32  ;;  %v3967_v41 = vpop.permute.xlu1 %3966  ;;  %v3982_v10 = vsel %vm780_vm7, %v9086_v56, %v9084_v51  ;;  %v10283_v17 = vld [vmem:[#allocation38_spill] sm:$0xff] }
 0xb5c   : > { %4420 = vmatprep.subr.mxu1 %v10270_v57  ;;  %4258 = vmatpush1.msra.mxu0 %v4048_v23  ;;  %v3981_v51 = vsel %vm780_vm7, %v9070_v16, %v9068_v37  ;;  %v3989_v56 = vmul.f32 %v3978_v29, %v5483_v21  ;;  %v3988_v12 = vmul.f32 %v3982_v10, %v5486_v24  ;;  %v10280_v23 = vld [vmem:[#allocation35_spill] sm:$0xff]  ;;  %v10282_v16 = vld [vmem:[#allocation37_spill] sm:$0xff] }
 0xb5d   : > { %4421 = vmatpush1.msra.mxu1 %v10271_v6  ;;  %v9197_v53 = vpop.permute.xlu0 %4132  ;;  %4259 = vmatprep.subr.mxu0 %v4023_v35  ;;  %v3987_v32 = vmul.f32 %v3977_v7, %v5483_v21  ;;  %v3986_v37 = vmul.f32 %v3981_v51, %v5486_v24  ;;  %v3985_v43 = vmul.f32 %v9054_v48, %v5483_v21  ;;  %v10286_v57 = vld [vmem:[#allocation41_spill] sm:$0xff]  ;;  %v10296_v51 = vld [vmem:[#allocation51_spill] sm:$0xff] }
 0xb5e   : > { %4422 = vmatprep.subr.mxu1 %v10272_v31  ;;  %4260 = vmatpush1.msra.mxu0 %v4022_v0  ;;  %v4174_v0 = vsel %vm911_vm0, %v9090_v20, %v9088_v27  ;;  %v10288_v31 = vld [vmem:[#allocation43_spill] sm:$0xff]  ;;  %v10294_v10 = vld [vmem:[#allocation49_spill] sm:$0xff] }
 0xb5f   : > { %4423 = vmatpush1.msra.mxu1 %v10273_v54  ;;  %4261 = vmatprep.subr.mxu0 %v4021_v1  ;;  %v4159_v55 = vpop.permute.xlu1 %4158  ;;  %v4181_v18 = vmul.f32 %v4174_v0, %v10101_v15  ;;  %v10287_v1 = vld [vmem:[#allocation42_spill] sm:$0xff]  ;;  %v10289_v54 = vld [vmem:[#allocation44_spill] sm:$0xff] }
 0xb60   : > { %4424 = vmatprep.subr.mxu1 %v10274_v38  ;;  %4262 = vmatpush1.msra.mxu0 %v4020_v36  ;;  %v10290_v38 = vld [vmem:[#allocation45_spill] sm:$0xff]  ;;  %v10301_v0 = vld [vmem:[#allocation56_spill] sm:$0xff] }
 0xb61   : > { %4425 = vmatpush1.msra.mxu1 %v10275_v26  ;;  %v3975_v3 = vpop.permute.xlu0 %3974  ;;  %4263 = vmatprep.subr.mxu0 %v4019_v5  ;;  %v4179_v5 = vmul.f32 %v9078_v44, %v10101_v15 }
 0xb62   : > { %v3979_v11 = vsel %vm780_vm7, %v3967_v41, %v3975_v3  ;;  %v3983_v45 = vsel %vm780_vm7, %v3975_v3, %v3967_v41  ;;  %4426 = vmatprep.subr.mxu1 %v10276_v8  ;;  %4264 = vmatpush1.msra.mxu0 %v4018_v46  ;;  %v10284_v41 = vld [vmem:[#allocation39_spill] sm:$0xff]  ;;  %v4178_v46 = vmul.f32 %v9074_v40, %v10099_v25 }
 0xb63   : > { %v3990_v4 = vmul.f32 %v3983_v45, %v5486_v24  ;;  %v3991_v13 = vmul.f32 %v3979_v11, %v5483_v21  ;;  %4427 = vmatpush1.msra.mxu1 %v10277_v59  ;;  %4265 = vmatprep.subr.mxu0 %v4017_v62  ;;  %v4127_v28 = vpop.permute.xlu1 %4126  ;;  %v4170_v21 = vsel %vm911_vm0, %v9088_v27, %v9090_v20  ;;  %v10292_v3 = vld [vmem:[#allocation47_spill] sm:$0xff]  ;;  %v10293_v11 = vld [vmem:[#allocation48_spill] sm:$0xff] }
 0xb64   : > { %4428 = vmatprep.subr.mxu1 %v10278_v22  ;;  %4266 = vmatpush1.msra.mxu0 %v4016_v33  ;;  %v4180_v36 = vmul.f32 %v4170_v21, %v10099_v25  ;;  %v4168_v27 = vsel %vm911_vm0, %v9141_v9, %v9155_v58  ;;  %v4172_v20 = vsel %vm911_vm0, %v9155_v58, %v9141_v9  ;;  %v10291_v58 = vld [vmem:[#allocation46_spill] sm:$0xff] }
 0xb65   : > { %4429 = vmatpush1.msra.mxu1 %v10279_v39  ;;  %v9237_v60 = vpop.permute.xlu0 %4130  ;;  %4267 = vmatprep.subr.mxu0 %v3991_v13  ;;  %v4176_v33 = vmul.f32 %v4168_v27, %v10099_v25  ;;  %v4177_v9 = vmul.f32 %v4172_v20, %v10101_v15  ;;  %v10295_v13 = vld [vmem:[#allocation50_spill] sm:$0xff]  ;;  %v10297_v39 = vld [vmem:[#allocation52_spill] sm:$0xff] }
 0xb66   : > { %4430 = vmatprep.subr.mxu1 %v10280_v23  ;;  %4268 = vmatpush1.msra.mxu0 %v3990_v4  ;;  %v10298_v23 = vld [vmem:[#allocation53_spill] sm:$0xff]  ;;  %v10303_v21 = vld [vmem:[#allocation58_spill] sm:$0xff] }
 0xb67   : > { %4431 = vmatpush1.msra.mxu1 %v10281_v2  ;;  %4269 = vmatprep.subr.mxu0 %v3989_v56  ;;  %v4125_v47 = vpop.permute.xlu1 %4124  ;;  %v10307_v20 = vld [vmem:[#allocation62_spill] sm:$0xff] }
 0xb68   : > { %4432 = vmatprep.subr.mxu1 %v10282_v16  ;;  %4270 = vmatpush1.msra.mxu0 %v3988_v12  ;;  %v4142_v44 = vsel %vm889_vm2, %v9197_v53, %v4125_v47 }
 0xb69   : > { %4433 = vmatpush1.msra.mxu1 %v10283_v17  ;;  %v4167_v63 = vpop.permute.xlu0 %4166  ;;  %4271 = vmatprep.subr.mxu0 %v3987_v32  ;;  %v4149_v4 = vmul.f32 %v4142_v44, %v10113_v61  ;;  %v10300_v17 = vld [vmem:[#allocation55_spill] sm:$0xff]  ;;  %v10312_v44 = vld [vmem:[#allocation66_spill] sm:$0xff] }
 0xb6a   : > { %v4171_v35 = vsel %vm911_vm0, %v4159_v55, %v4167_v63  ;;  %v4175_v49 = vsel %vm911_vm0, %v4167_v63, %v4159_v55  ;;  %4434 = vmatprep.subr.mxu1 %v10284_v41  ;;  %4272 = vmatpush1.msra.mxu0 %v3986_v37 }
 0xb6b   : > { %v4182_v24 = vmul.f32 %v4171_v35, %v10099_v25  ;;  %v4183_v48 = vmul.f32 %v4175_v49, %v10101_v15  ;;  %4435 = vmatpush1.msra.mxu1 %v10285_v52  ;;  %4273 = vmatprep.subr.mxu0 %v3985_v43  ;;  %v4123_v19 = vpop.permute.xlu1 %4122  ;;  %v4138_v25 = vsel %vm889_vm2, %v4125_v47, %v9197_v53  ;;  %v10299_v47 = vld [vmem:[#allocation54_spill] sm:$0xff]  ;;  %v10302_v49 = vld [vmem:[#allocation57_spill] sm:$0xff] }
 0xb6c   : > { %4436 = vmatprep.subr.mxu1 %v10286_v57  ;;  %4274 = vmatpush1.msra.mxu0 %v3984_v34  ;;  %v4141_v8 = vsel %vm889_vm2, %v9237_v60, %v4123_v19  ;;  %v4137_v53 = vsel %vm889_vm2, %v4123_v19, %v9237_v60  ;;  %v10304_v57 = vld [vmem:[#allocation59_spill] sm:$0xff] }
 0xb6d   : > { %4437 = vmatpush1.msra.mxu1 %v10287_v1  ;;  %v4129_v6 = vpop.permute.xlu0 %4128  ;;  %4275 = vmatprep.subr.mxu0 %v4183_v48  ;;  %v4147_v56 = vmul.f32 %v4141_v8, %v10113_v61  ;;  %v4146_v12 = vmul.f32 %v4137_v53, %v10111_v30  ;;  %v10324_v8 = vld [vmem:[#allocation73_spill] sm:$0xff]  ;;  %v10326_v53 = vld [vmem:[#allocation74_spill] sm:$0xff] }
 0xb6e   : > { %4438 = vmatprep.subr.mxu1 %v10288_v31  ;;  %4276 = vmatpush2.msra.mxu0 %v4182_v24 }
 0xb6f   : > { %4439 = vmatpush1.msra.mxu1 %v10289_v54  ;;  %4277 = vmatprep.subr.mxu0 %v4181_v18  ;;  %v4121_v55 = vpop.permute.xlu1 %4120 }
 0xb70   : > { %4440 = vmatprep.subr.mxu1 %v10290_v38  ;;  %4278 = vmatpush2.msra.mxu0 %v4180_v36  ;;  %v4136_v7 = vsel %vm889_vm2, %v4121_v55, %v4129_v6  ;;  %v4140_v22 = vsel %vm889_vm2, %v4129_v6, %v4121_v55  ;;  %v10305_v6 = vld [vmem:[#allocation60_spill] sm:$0xff]  ;;  %v10306_v36 = vld [vmem:[#allocation61_spill] sm:$0xff] }
 0xb71   : > { %4441 = vmatpush1.msra.mxu1 %v10291_v58  ;;  %v4135_v62 = vpop.permute.xlu0 %4134  ;;  %4279 = vmatprep.subr.mxu0 %v4179_v5  ;;  %v4144_v32 = vmul.f32 %v4136_v7, %v10111_v30  ;;  %v4145_v2 = vmul.f32 %v4140_v22, %v10113_v61  ;;  %v4230_v5 = vld [vmem:[%s9535_s18 + $0x28] sm:$0xff]  ;;  %v10310_v58 = vmov 0.0   ;;  %v10330_v7 = vld [vmem:[#allocation76_spill] sm:$0xff]  ;;  %v10331_v22 = vld [vmem:[#allocation77_spill] sm:$0xff] }
 0xb72   : > { %v4139_v26 = vsel %vm889_vm2, %v4127_v28, %v4135_v62  ;;  %v4143_v40 = vsel %vm889_vm2, %v4135_v62, %v4127_v28  ;;  %4442 = vmatprep.subr.mxu1 %v10292_v3  ;;  %4280 = vmatpush2.msra.mxu0 %v4178_v46  ;;  %v4148_v28 = vmul.f32 %v4138_v25, %v10111_v30  ;;  %v10308_v46 = vld [vmem:[#allocation63_spill] sm:$0xff]  ;;  %v10311_v62 = vld [vmem:[#allocation65_spill] sm:$0xff]  ;;  %v10318_v3 = vld [vmem:[#allocation70_spill] sm:$0xff] }
 0xb73   : > { %v4150_v15 = vmul.f32 %v4139_v26, %v10111_v30  ;;  %v4151_v29 = vmul.f32 %v4143_v40, %v10113_v61  ;;  %4443 = vmatpush1.msra.mxu1 %v10293_v11  ;;  %4281 = vmatprep.subr.mxu0 %v4177_v9  ;;  %v4095_v45 = vpop.permute.xlu1 %4094  ;;  %v10309_v9 = vld [vmem:[#allocation64_spill] sm:$0xff]  ;;  %v10319_v25 = vld [vmem:[#allocation230_spill] sm:$0xff] }
 0xb74   : > { %4444 = vmatprep.subr.mxu1 %v10294_v10  ;;  %4282 = vmatpush2.msra.mxu0 %v4176_v33  ;;  %v10314_v26 = vld [vmem:[#allocation68_spill] sm:$0xff]  ;;  %v10325_v10 = vld [vmem:[#allocation173_spill] sm:$0xff] }
 0xb75   : > { %4445 = vmatpush1.msra.mxu1 %v10295_v13  ;;  %v4101_v59 = vpop.permute.xlu0 %4100  ;;  %4283 = vmatprep.subr.mxu0 %v4151_v29  ;;  %v10315_v40 = vld [vmem:[#allocation176_spill] sm:$0xff]  ;;  %v10321_v29 = vld [vmem:[#allocation229_spill] sm:$0xff]  ;;  %v10327_v13 = vld [vmem:[#allocation11_spill] sm:$0xff] }
 0xb76   : > { %4446 = vmatprep.subr.mxu1 %v10296_v51  ;;  %4284 = vmatpush2.msra.mxu0 %v4150_v15  ;;  %v10320_v15 = vld [vmem:[#allocation71_spill] sm:$0xff]  ;;  %v10322_v11 = vld [vmem:[#allocation72_spill] sm:$0xff] }
 0xb77   : > { %4447 = vmatpush1.msra.mxu1 %v10297_v39  ;;  %4285 = vmatprep.subr.mxu0 %v4149_v4  ;;  %v4093_v60 = vpop.permute.xlu1 %4092  ;;  %v4225_v4 = vld [vmem:[%s9535_s18] sm:$0xff]  ;;  %v10332_v51 = vld [vmem:[#allocation80_spill] sm:$0xff]  ;;  %v10333_v39 = vld [vmem:[#allocation78_spill] sm:$0xff] }
 0xb78   : > { %4448 = vmatprep.subr.mxu1 %v10298_v23  ;;  %4286 = vmatpush2.msra.mxu0 %v4148_v28  ;;  %v4110_v16 = vsel %vm867_vm3, %v4101_v59, %v4093_v60  ;;  %v4106_v30 = vsel %vm867_vm3, %v4093_v60, %v4101_v59  ;;  %v10328_v59 = vld [vmem:[#allocation75_spill] sm:$0xff]  ;;  %v10329_v28 = vld [vmem:[#allocation174_spill] sm:$0xff]  ;;  %v10336_v23 = vld [vmem:[#allocation81_spill] sm:$0xff] }
 0xb79   : > { %4449 = vmatpush1.msra.mxu1 %v10299_v47  ;;  %v4103_v37 = vpop.permute.xlu0 %4102  ;;  %4287 = vmatprep.subr.mxu0 %v4147_v56  ;;  %v4117_v41 = vmul.f32 %v4110_v16, %v10123_v50  ;;  %v4116_v48 = vmul.f32 %v4106_v30, %v10121_v42  ;;  %v4229_v56 = vld [vmem:[%s9535_s18 + $0x20] sm:$0xff]  ;;  %v10334_v60 = vld [vmem:[#allocation79_spill] sm:$0xff]  ;;  %v10338_v47 = vld [vmem:[#allocation82_spill] sm:$0xff] }
 0xb7a   : > { %v4107_v34 = vsel %vm867_vm3, %v4095_v45, %v4103_v37  ;;  %v4111_v43 = vsel %vm867_vm3, %v4103_v37, %v4095_v45  ;;  %4450 = vmatprep.subr.mxu1 %v10300_v17  ;;  %4288 = vmatpush2.msra.mxu0 %v4146_v12  ;;  %v10323_v45 = vld [vmem:[#allocation9_spill] sm:$0xff]  ;;  %v10335_v12 = vld [vmem:[#allocation22_spill] sm:$0xff]  ;;  %v10339_v37 = vld [vmem:[#allocation20_spill] sm:$0xff] }
 0xb7b   : > { %v4118_v61 = vmul.f32 %v4107_v34, %v10121_v42  ;;  %v4119_v63 = vmul.f32 %v4111_v43, %v10123_v50  ;;  %4451 = vmatpush2.msra.mxu1 %v10301_v0  ;;  %4289 = vmatprep.subr.mxu0 %v4145_v2  ;;  %v4091_v35 = vpop.permute.xlu1 %4090  ;;  %v10337_v2 = vld [vmem:[#allocation21_spill] sm:$0xff]  ;;  %v10340_v34 = vld [vmem:[#allocation84_spill] sm:$0xff]  ;;  %v10341_v43 = vld [vmem:[#allocation19_spill] sm:$0xff] }
 0xb7c   : > { %4452 = vmatprep.subr.mxu1 %v10302_v49  ;;  %4290 = vmatpush2.msra.mxu0 %v4144_v32  ;;  %v4228_v32 = vld [vmem:[%s9535_s18 + $0x18] sm:$0xff]  ;;  %v4233_v16 = vld [vmem:[%s9535_s18 + $0x40] sm:$0xff]  ;;  %v10342_v30 = vld [vmem:[#allocation83_spill] sm:$0xff] }
 0xb7d   : > { %4453 = vmatpush2.msra.mxu1 %v10303_v21  ;;  %v4099_v24 = vpop.permute.xlu0 %4098  ;;  %4291 = vmatprep.subr.mxu0 %v4119_v63  ;;  %v4232_v17 = vld [vmem:[%s9535_s18 + $0x38] sm:$0xff]  ;;  %v10344_v63 = vld [vmem:[#allocation86_spill] sm:$0xff]  ;;  %v4231_v0 = vld [vmem:[%s9535_s18 + $0x30] sm:$0xff] }
 0xb7e   : > { %v4105_v52 = vsel %vm867_vm3, %v4091_v35, %v4099_v24  ;;  %v4109_v19 = vsel %vm867_vm3, %v4099_v24, %v4091_v35  ;;  %4454 = vmatprep.subr.mxu1 %v10304_v57  ;;  %4292 = vmatpush2.msra.mxu0 %v4118_v61  ;;  %v10343_v61 = vld [vmem:[#allocation18_spill] sm:$0xff]  ;;  %v10345_v35 = vld [vmem:[#allocation17_spill] sm:$0xff]  ;;  %v10347_v21 = vld [vmem:[#allocation16_spill] sm:$0xff] }
 0xb7f   : > { %v4114_v18 = vmul.f32 %v4105_v52, %v10121_v42  ;;  %v4115_v1 = vmul.f32 %v4109_v19, %v10123_v50  ;;  %4455 = vmatpush2.msra.mxu1 %v10305_v6  ;;  %4293 = vmatprep.subr.mxu0 %v4117_v41  ;;  %v4089_v27 = vpop.permute.xlu1 %4088  ;;  %v4217_v49 = vld [vmem:[%s9534_s17 + $0x8] sm:$0xff]  ;;  %v10346_v41 = vld [vmem:[#allocation85_spill] sm:$0xff]  ;;  %v4218_v19 = vld [vmem:[%s9534_s17 + $0x10] sm:$0xff] }
 0xb80   : > { %4456 = vmatprep.subr.mxu1 %v10306_v36  ;;  %4294 = vmatpush2.msra.mxu0 %v4116_v48  ;;  %v4216_v24 = vld [vmem:[%s9534_s17] sm:$0xff]  ;;  %v10348_v48 = vld [vmem:[#allocation15_spill] sm:$0xff]  ;;  %v4219_v57 = vld [vmem:[%s9534_s17 + $0x18] sm:$0xff] }
 0xb81   : > { %4457 = vmatpush2.msra.mxu1 %v10307_v20  ;;  %v4097_v31 = vpop.permute.xlu0 %4096  ;;  %4295 = vmatprep.subr.mxu0 %v4115_v1  ;;  %v4220_v52 = vld [vmem:[%s9534_s17 + $0x20] sm:$0xff]  ;;  %v4221_v1 = vld [vmem:[%s9534_s17 + $0x28] sm:$0xff]  ;;  %v4222_v6 = vld [vmem:[%s9534_s17 + $0x30] sm:$0xff] }
 0xb82   : > { %v4104_v54 = vsel %vm867_vm3, %v4089_v27, %v4097_v31  ;;  %v4108_v55 = vsel %vm867_vm3, %v4097_v31, %v4089_v27  ;;  %4458 = vmatprep.subr.mxu1 %v10308_v46  ;;  %4296 = vmatpush2.msra.mxu0 %v4114_v18  ;;  %v4223_v18 = vld [vmem:[%s9534_s17 + $0x38] sm:$0xff]  ;;  %v4224_v36 = vld [vmem:[%s9534_s17 + $0x40] sm:$0xff] }
 0xb83   : > { %v4112_v38 = vmul.f32 %v4104_v54, %v10121_v42  ;;  %v4113_v33 = vmul.f32 %v4108_v55, %v10123_v50  ;;  %4459 = vmatpush2.msra.mxu1 %v10309_v9  ;;  %4396 = vmatprep.mubr.f32.mxu1 %v10310_v58  ;;  %v10316_v42 = vld [vmem:[#allocation69_spill] sm:$0xff]  ;;  %v10317_v50 = vld [vmem:[#allocation175_spill] sm:$0xff] }
 0xb84   : > { %4460 = vmatprep.subr.mxu1 %v10311_v62  ;;  %5010 = vmatmul.mubr.msk.f32.gmra.mxu1 %vm1381_vm9, %v4230_v5 }
 0xb85   : > { %4461 = vmatpush2.msra.mxu1 %v10312_v44  ;;  %4297 = vmatprep.subr.mxu0 %v4113_v33 }
 0xb86   : > { %4462 = vmatprep.subr.mxu1 %v10313_v14  ;;  %4298 = vmatpush2.msra.mxu0 %v4112_v38 }
 0xb87   : > { %4463 = vmatpush2.msra.mxu1 %v10314_v26  ;;  %4299 = vmatprep.subr.mxu0 %v10315_v40 }
 0xb88   : > { %4464 = vmatprep.subr.mxu1 %v10316_v42  ;;  %4300 = vmatpush2.msra.mxu0 %v10317_v50 }
 0xb89   : > { %4465 = vmatpush2.msra.mxu1 %v10318_v3  ;;  %4301 = vmatprep.subr.mxu0 %v10319_v25 }
 0xb8a   : > { %4466 = vmatprep.subr.mxu1 %v10320_v15  ;;  %4302 = vmatpush2.msra.mxu0 %v10321_v29 }
 0xb8b   : > { %4467 = vmatpush2.msra.mxu1 %v10322_v11  ;;  %4303 = vmatprep.subr.mxu0 %v10323_v45  ;;  %v4616_v11 = vstv %s9455_s8 }
 0xb8c   : > { %4468 = vmatprep.subr.mxu1 %v10324_v8  ;;  %4304 = vmatpush2.msra.mxu0 %v10325_v10  ;;  %v4590_v3 = vpop.permute.xlu1 %4589 }
 0xb8d   : > { %4469 = vmatpush2.msra.mxu1 %v10326_v53  ;;  %4305 = vmatprep.subr.mxu0 %v10327_v13 }
 0xb8e   : > { %4470 = vmatprep.subr.mxu1 %v10328_v59  ;;  %4306 = vmatpush2.msra.mxu0 %v10329_v28 }
 0xb8f   : > { %4471 = vmatpush2.msra.mxu1 %v10330_v7  ;;  %4308 = vmatmul.mubr.f32.vlgmr.msra.gmra.mxu0 %v4225_v4 }
 0xb90   : > { %4472 = vmatprep.subr.mxu1 %v10331_v22  ;;  %4525 = vmatprep.subr.mxu0 %v10332_v51  ;;  %v4595_v22 = vpop.permute.xlu0 %4594 }
 0xb91   : > { %4473 = vmatpush2.msra.mxu1 %v10333_v39  ;;  %4526 = vmatpush1.msra.mxu0 %v10334_v60  ;;  %v5081_v60 = vld [vmem:[%s5321_s23] sm:$0xff] }
 0xb92   : > { %4474 = vmatprep.subr.mxu1 %v10335_v12  ;;  %4527 = vmatprep.subr.mxu0 %v10336_v23  ;;  %v4617_v12 = vmul.f32 %v5081_v60, %v4616_v11 }
 0xb93   : > { %4313 = vmatprep.mubr.f32.mxu0 %v4229_v56  ;;  %4475 = vmatpush2.msra.mxu1 %v10337_v2 }
 0xb94   : > { %4528 = vmatpush1.msra.mxu0 %v10338_v47  ;;  %4476 = vmatprep.subr.mxu1 %v10339_v37 }
 0xb95   : > { %4314 = vmatmul.mubr.f32.gmra.mxu0 %v4228_v32  ;;  %4529 = vmatprep.subr.mxu0 %v10340_v34  ;;  %v5082_v34 = vld [vmem:[%s5321_s23 + $0x8] sm:$0xff] }
 0xb96   : > { %4402 = vmatprep.mubr.f32.mxu1 %v10310_v58  ;;  %4477 = vmatpush2.msra.mxu1 %v10341_v43  ;;  %v4618_v43 = vmul.f32 %v5082_v34, %v4616_v11 }
 0xb97   : > { %4530 = vmatpush1.msra.mxu0 %v10342_v30  ;;  %5011 = vmatmul.mubr.msk.f32.gmra.mxu1 %vm1381_vm9, %v4233_v16 }
 0xb98   : > { %4478 = vmatprep.subr.mxu1 %v10343_v61  ;;  %4531 = vmatprep.subr.mxu0 %v10344_v63 }
 0xb99   : > { %4319 = vmatprep.mubr.f32.mxu0 %v4232_v17  ;;  %4479 = vmatpush2.msra.mxu1 %v10345_v35  ;;  %v4600_v35 = vpop.permute.xlu1 %4599 }
 0xb9a   : > { %4532 = vmatpush1.msra.mxu0 %v10346_v41  ;;  %4480 = vmatprep.subr.mxu1 %v10347_v21  ;;  %v4619_v41 = vmul.f32 %v4617_v12, %v4617_v12 }
 0xb9b   : > { %4320 = vmatmul.mubr.f32.gmra.mxu0 %v4231_v0  ;;  %4481 = vmatpush2.msra.mxu1 %v10348_v48  ;;  %v4620_v48 = vmul.f32 %v4618_v43, %v4618_v43 }
 0xb9c   : > { %4482 = vmatprep.mubr.f32.mxu1 %v4217_v49  ;;  %4565 = vmatprep.mubr.f32.mxu0 %v10310_v58 }
 0xb9d   : > { %4483 = vmatmul.mubr.f32.vlgmr.msra.gmra.mxu1 %v4216_v24 }
 0xb9e   : > { %4488 = vmatprep.mubr.f32.mxu1 %v4220_v52 }
 0xb9f   : > { %5012 = vmatmul.mubr.msk.f32.vlgmr.msra.gmra.mxu0 %vm1381_vm9, %v4218_v19  ;;  %v4621_v19 = vsub.f32 %v4619_v41, %v4617_v12 }
 0xba0   : > { %4571 = vmatprep.mubr.f32.mxu0 %v10310_v58 }
 0xba1   : > { %4489 = vmatmul.mubr.f32.gmra.mxu1 %v4219_v57  ;;  %v4622_v57 = vsub.f32 %v4620_v48, %v4618_v43 }
 0xba2   : > { %4494 = vmatprep.mubr.f32.mxu1 %v4223_v18 }
 0xba3   : > { %5013 = vmatmul.mubr.msk.f32.gmra.mxu0 %vm1381_vm9, %v4221_v1 }
 0xba4   : > { %4577 = vmatprep.mubr.f32.mxu0 %v10310_v58 }
 0xba5   : > { %4495 = vmatmul.mubr.f32.gmra.mxu1 %v4222_v6 }
 0xba7   : > { %5014 = vmatmul.mubr.msk.f32.gmra.mxu0 %vm1381_vm9, %v4224_v36 }
 0xc1a   : > { %v4392_v27 = vpop.f32.mrf.mxu1 }
 0xc1c   : > { %v4394_v20 = vpop.f32.mrf.mxu1 }
 0xc44   : > { %v4398_v5 = vpop.f32.mrf.mxu1 }
 0xc46   : > { %v4400_v55 = vpop.f32.mrf.mxu1 }
 0xc4f   : > { %v4309_v31 = vpop.f32.mrf.mxu0 }
 0xc50   : > { %v4393_v62 = vadd.f32 %v4392_v27, %v4309_v31 }
 0xc51   : > { %v4311_v54 = vpop.f32.mrf.mxu0 }
 0xc52   : > { %v4395_v26 = vadd.f32 %v4394_v20, %v4311_v54 }
 0xc55   : > { %v4315_v46 = vpop.f32.mrf.mxu0 }
 0xc56   : > { %v4399_v25 = vadd.f32 %v4398_v5, %v4315_v46 }
 0xc57   : > { %v4317_v38 = vpop.f32.mrf.mxu0  ;;  %v4404_v33 = vpop.f32.mrf.mxu1 }
 0xc58   : > { %v4401_v10 = vadd.f32 %v4400_v55, %v4317_v38 }
 0xc59   : > { %v4406_v58 = vpop.f32.mrf.mxu1 }
 0xc5b   : > { %v4321_v9 = vpop.f32.mrf.mxu0 }
 0xc5c   : > { %v4405_v59 = vadd.f32 %v4404_v33, %v4321_v9 }
 0xc5d   : > { %v4323_v44 = vpop.f32.mrf.mxu0  ;;  %v4484_v14 = vpop.f32.mrf.mxu1 }
 0xc5e   : > { %v4485_v40 = vadd.f32 %v4484_v14, %v4393_v62  ;;  %v4407_v23 = vadd.f32 %v4406_v58, %v4323_v44 }
 0xc5f   : > { %v4486_v42 = vpop.f32.mrf.mxu1  ;;  %v4567_v50 = vpop.f32.mrf.mxu0 }
 0xc60   : > { %v4487_v15 = vadd.f32 %v4486_v42, %v4395_v26  ;;  %v4568_v29 = vadd.f32 %v4567_v50, %v4485_v40 }
 0xc61   : > { %v4490_v45 = vpop.f32.mrf.mxu1  ;;  %v4569_v8 = vpop.f32.mrf.mxu0 }
 0xc62   : > { %v4602_v4 = vadd.f32 %v4590_v3, %v4568_v29  ;;  %v4491_v53 = vadd.f32 %v4490_v45, %v4399_v25  ;;  %v4570_v13 = vadd.f32 %v4569_v8, %v4487_v15 }
 0xc63   : > { %v4492_v28 = vpop.f32.mrf.mxu1  ;;  %v4573_v7 = vpop.f32.mrf.mxu0 }
 0xc64   : > { %5069 = vtanh.f32 %v4602_v4  ;;  %v4603_v51 = vadd.f32 %v4590_v3, %v4570_v13  ;;  %v4493_v56 = vadd.f32 %v4492_v28, %v4401_v10  ;;  %v4574_v39 = vadd.f32 %v4573_v7, %v4491_v53 }
 0xc65   : > { %v4496_v32 = vpop.f32.mrf.mxu1  ;;  %v4575_v2 = vpop.f32.mrf.mxu0 }
 0xc66   : > { %5071 = vtanh.f32 %v4603_v51  ;;  %v4604_v47 = vadd.f32 %v4595_v22, %v4574_v39  ;;  %v4497_v37 = vadd.f32 %v4496_v32, %v4405_v59  ;;  %v4576_v16 = vadd.f32 %v4575_v2, %v4493_v56 }
 0xc67   : > { %v4498_v17 = vpop.f32.mrf.mxu1  ;;  %v4579_v30 = vpop.f32.mrf.mxu0 }
 0xc68   : > { %5073 = vtanh.f32 %v4604_v47  ;;  %v4605_v61 = vadd.f32 %v4595_v22, %v4576_v16  ;;  %v4499_v63 = vadd.f32 %v4498_v17, %v4407_v23  ;;  %v4580_v0 = vadd.f32 %v4579_v30, %v4497_v37 }
 0xc69   : > { %v4581_v49 = vpop.f32.mrf.mxu0 }
 0xc6a   : > { %5075 = vtanh.f32 %v4605_v61  ;;  %v4606_v21 = vadd.f32 %v4600_v35, %v4580_v0  ;;  %v4582_v24 = vadd.f32 %v4581_v49, %v4499_v63 }
 0xc6c   : > { %5077 = vtanh.f32 %v4606_v21  ;;  %v4607_v52 = vadd.f32 %v4600_v35, %v4582_v24 }
 0xc6e   : > { %5079 = vtanh.f32 %v4607_v52 }
 0xc71   : > { %v5070_v18 = vpop.eup %5069 }
 0xc72   : > { %v4623_v1 = vmul.f32 %v5070_v18, %v4621_v19  ;;  %4795 = vst [vmem:[%s771_s7] sm:$0xff] %v5070_v18 }
 0xc73   : > { %v5072_v6 = vpop.eup %5071 }
 0xc74   : > { %v4625_v36 = vadd.f32 %v4623_v1, %v4617_v12  ;;  %v4624_v27 = vmul.f32 %v5072_v6, %v4622_v57  ;;  %4796 = vst [vmem:[%s771_s7 + $0x8] sm:$0xff] %v5072_v6 }
 0xc75   : > { %v9470_v20 = vpop.eup %5073 }
 0xc76   : > { %v4627_v31 = vmul.f32 %v4625_v36, %v4625_v36  ;;  %v4626_v5 = vadd.f32 %v4624_v27, %v4618_v43  ;;  %4797 = vst [vmem:[%s771_s7 + $0x10] sm:$0xff] %v9470_v20 }
 0xc77   : > { %v9473_v54 = vpop.eup %5075 }
 0xc78   : > { %v4629_v55 = vsub.f32 %v4627_v31, %v4625_v36  ;;  %v4628_v46 = vmul.f32 %v4626_v5, %v4626_v5  ;;  %4798 = vst [vmem:[%s771_s7 + $0x18] sm:$0xff] %v9473_v54 }
 0xc79   : > { %v9476_v38 = vpop.eup %5077 }
 0xc7a   : > { %v4633_v33 = vrot.slane %v4629_v55, 5  ;;  %v4630_v9 = vsub.f32 %v4628_v46, %v4626_v5  ;;  %4799 = vst [vmem:[%s771_s7 + $0x20] sm:$0xff] %v9476_v38 }
 0xc7b   : > { %v9479_v58 = vpop.eup %5079 }
 0xc7c   : > { %v4637_v62 = vmul.f32 %v5070_v18, %v4633_v33  ;;  %v4634_v44 = vrot.slane %v4630_v9, 5  ;;  %4800 = vst [vmem:[%s771_s7 + $0x28] sm:$0xff] %v9479_v58 }
 0xc7e   : > { %v4641_v14 = vrot.slane %v4637_v62, 3  ;;  %v4638_v26 = vmul.f32 %v5072_v6, %v4634_v44 }
 0xc80   : > { %v4645_v40 = vadd.f32 %v4641_v14, %v4625_v36  ;;  %v4642_v42 = vrot.slane %v4638_v26, 3 }
 0xc82   : > { %v4647_v50 = vmul.f32 %v4645_v40, %v4645_v40  ;;  %v4646_v3 = vadd.f32 %v4642_v42, %v4626_v5 }
 0xc84   : > { %v4649_v25 = vsub.f32 %v4647_v50, %v4645_v40  ;;  %v4648_v15 = vmul.f32 %v4646_v3, %v4646_v3 }
 0xc86   : > { %v4653_v29 = vrot.slane %v4649_v25, 2  ;;  %v4650_v11 = vsub.f32 %v4648_v15, %v4646_v3 }
 0xc88   : > { %v4657_v45 = vmul.f32 %v5070_v18, %v4653_v29  ;;  %v4654_v8 = vrot.slane %v4650_v11, 2  ;;  %v4659_v10 = vmul.f32 %v9470_v20, %v4653_v29 }
 0xc8a   : > { %v4666_v4 = vrot.slane %v4657_v45, 6  ;;  %v4658_v53 = vmul.f32 %v5072_v6, %v4654_v8  ;;  %v4667_v13 = vrot.slane %v4659_v10, 6  ;;  %v4660_v59 = vmul.f32 %v9473_v54, %v4654_v8 }
 0xc8c   : > { %v4669_v28 = vrot.slane %v4658_v53, 6  ;;  %v4668_v7 = vsel %vm4665_vm10, %v4666_v4, %v4667_v13  ;;  %v4670_v22 = vrot.slane %v4660_v59, 6 }
 0xc8d   : > { %v4674_v51 = vadd.f32 %v4668_v7, %v4645_v40 }
 0xc8e   : > { %v4671_v56 = vsel %vm4665_vm10, %v4669_v28, %v4670_v22 }
 0xc8f   : > { %v4676_v39 = vmul.f32 %v4674_v51, %v4674_v51  ;;  %v4675_v60 = vadd.f32 %v4671_v56, %v4646_v3 }
 0xc91   : > { %v4678_v12 = vsub.f32 %v4676_v39, %v4674_v51  ;;  %v4677_v23 = vmul.f32 %v4675_v60, %v4675_v60 }
 0xc93   : > { %v4682_v32 = vrot.slane %v4678_v12, 7  ;;  %v4679_v2 = vsub.f32 %v4677_v23, %v4675_v60 }
 0xc95   : > { %v4686_v47 = vmul.f32 %v9470_v20, %v4682_v32  ;;  %v4683_v37 = vrot.slane %v4679_v2, 7 }
 0xc97   : > { %v4690_v16 = vrot.slane %v4686_v47, 1  ;;  %v4687_v34 = vmul.f32 %v9473_v54, %v4683_v37 }
 0xc99   : > { %v4694_v43 = vadd.f32 %v4690_v16, %v4674_v51  ;;  %v4691_v17 = vrot.slane %v4687_v34, 1 }
 0xc9b   : > { %v4696_v30 = vmul.f32 %v4694_v43, %v4694_v43  ;;  %v4695_v61 = vadd.f32 %v4691_v17, %v4675_v60 }
 0xc9d   : > { %v4698_v63 = vsub.f32 %v4696_v30, %v4694_v43  ;;  %v4697_v0 = vmul.f32 %v4695_v61, %v4695_v61  ;;  %v4787_v35 = vcombine.low %v4694_v43, %v4695_v61 }
 0xc9f   : > { %v4702_v49 = vrot.slane %v4698_v63, 4  ;;  %v4699_v41 = vsub.f32 %v4697_v0, %v4695_v61  ;;  %4789 = vst [vmem:[%s761_s26] sm:$0x77] %v4787_v35 }
 0xca1   : > { %v4706_v21 = vmul.f32 %v9470_v20, %v4702_v49  ;;  %v4703_v24 = vrot.slane %v4699_v41, 4 }
 0xca3   : > { %v4710_v48 = vrot.slane %v4706_v21, 4  ;;  %v4707_v52 = vmul.f32 %v9473_v54, %v4703_v24 }
 0xca5   : > { %v4714_v19 = vadd.f32 %v4710_v48, %v4694_v43  ;;  %v4711_v57 = vrot.slane %v4707_v52, 4 }
 0xca7   : > { %v4716_v18 = vmul.f32 %v4714_v19, %v4714_v19  ;;  %v4715_v1 = vadd.f32 %v4711_v57, %v4695_v61 }
 0xca9   : > { %v4718_v6 = vsub.f32 %v4716_v18, %v4714_v19  ;;  %v4717_v36 = vmul.f32 %v4715_v1, %v4715_v1 }
 0xcab   : > { %v4722_v27 = vrot.slane %v4718_v6, 1  ;;  %v4719_v31 = vsub.f32 %v4717_v36, %v4715_v1 }
 0xcad   : > { %v4726_v5 = vmul.f32 %v9470_v20, %v4722_v27  ;;  %v4728_v55 = vmul.f32 %v9476_v38, %v4722_v27  ;;  %v4723_v46 = vrot.slane %v4719_v31, 1 }
 0xcaf   : > { %v4735_v33 = vrot.slane %v4726_v5, 7  ;;  %v4736_v9 = vrot.slane %v4728_v55, 7  ;;  %v4727_v62 = vmul.f32 %v9473_v54, %v4723_v46  ;;  %v4729_v44 = vmul.f32 %v9479_v58, %v4723_v46 }
 0xcb1   : > { %v4737_v14 = vsel %vm4734_vm11, %v4735_v33, %v4736_v9  ;;  %v4738_v26 = vrot.slane %v4727_v62, 7  ;;  %v4739_v40 = vrot.slane %v4729_v44, 7 }
 0xcb2   : > { %v4743_v42 = vadd.f32 %v4737_v14, %v4714_v19 }
 0xcb3   : > { %v4740_v50 = vsel %vm4734_vm11, %v4738_v26, %v4739_v40 }
 0xcb4   : > { %v4745_v3 = vmul.f32 %v4743_v42, %v4743_v42  ;;  %v4744_v25 = vadd.f32 %v4740_v50, %v4715_v1 }
 0xcb6   : > { %v4747_v15 = vsub.f32 %v4745_v3, %v4743_v42  ;;  %v4746_v29 = vmul.f32 %v4744_v25, %v4744_v25 }
 0xcb8   : > { %v4751_v20 = vrot.slane %v4747_v15, 6  ;;  %v4748_v11 = vsub.f32 %v4746_v29, %v4744_v25 }
 0xcba   : > { %v4755_v45 = vmul.f32 %v9476_v38, %v4751_v20  ;;  %v4752_v8 = vrot.slane %v4748_v11, 6 }
 0xcbc   : > { %v4759_v10 = vrot.slane %v4755_v45, 2  ;;  %v4756_v4 = vmul.f32 %v9479_v58, %v4752_v8 }
 0xcbe   : > { %v4763_v54 = vadd.f32 %v4759_v10, %v4743_v42  ;;  %v4760_v53 = vrot.slane %v4756_v4, 2 }
 0xcc0   : > { %v4765_v13 = vmul.f32 %v4763_v54, %v4763_v54  ;;  %v4764_v59 = vadd.f32 %v4760_v53, %v4744_v25 }
 0xcc2   : > { %v4767_v28 = vsub.f32 %v4765_v13, %v4763_v54  ;;  %v4766_v7 = vmul.f32 %v4764_v59, %v4764_v59 }
 0xcc4   : > { %v4771_v22 = vrot.slane %v4767_v28, 3  ;;  %v4768_v51 = vsub.f32 %v4766_v7, %v4764_v59 }
 0xcc6   : > { %v4775_v56 = vmul.f32 %v9476_v38, %v4771_v22  ;;  %v4772_v39 = vrot.slane %v4768_v51, 3 }
 0xcc8   : > { %v4779_v60 = vrot.slane %v4775_v56, 5  ;;  %v4776_v12 = vmul.f32 %v9479_v58, %v4772_v39 }
 0xcca   : > { %v4780_v23 = vrot.slane %v4776_v12, 5  ;;  %v4783_v32 = vadd.f32 %v4779_v60, %v4763_v54 }
 0xccc   : > { %v4784_v2 = vadd.f32 %v4780_v23, %v4764_v59 }
 0xcce   : > { %v4792_v47 = vcombine.low %v4783_v32, %v4784_v2 }
 0xcd0   : > { %4794 = vst [vmem:[%s766_s24] sm:$0x77] %v4792_v47 }
 0xcd1 PF: > { %s10350_s29 = sld [smem:[#allocation7_spill]] }
 0xcd2   : > { %s10351_s3 = sld [smem:[#allocation6_spill]] }
 0xcd3   : > { %s10352_s28 = sld [smem:[#allocation8_spill]] }
 0xcd7   : > { %p31_p7 = scmp.ge.s32.totalorder %s10350_s29, 4  }
 0xcd9   :  { %33 = sbr.rel (!%p31_p7) target bundleno = 13 (0xd), region = 197 }
 0xcde   :  { %4854 = vsyncpa [#allocation3], 1 }
 0xcdf   :  { %4856 = vsyncpa [#allocation3 + $0x1], 1 }

</bundles_post_ra>
